<compile_context>
chip_gen: v7x
topology: tpu7x:2x2x1
jax: 0.10.0
libtpu: 0.0.40
codegen_flags: <defaults>
</compile_context>

<pallas_src>
import functools

import jax
import jax.numpy as jnp
from jax.experimental import pallas as pl
from jax.experimental.pallas import tpu as pltpu

_EPS = 1e-5
_VMEM_LIMIT = 32 * 1024 * 1024  # safe on v5e/v6e/v7x; all tiles here are << this


def _round_up(x, m):
    return (x + m - 1) // m * m


# --------------------------------------------------------------------------- kernels
def _apply_act(x, act):
    if act == "none":
        return x
    if act == "lrelu":
        return jnp.where(x >= 0, x, 0.2 * x)
    if act == "relu":
        return jnp.maximum(x, 0.0)
    if act == "sigmoid":
        s = pl.reciprocal(1.0 + jnp.exp(-x), approx=True)   # EUP slot, ~free
        return jnp.clip(s, 0.0, 1.0)                          # clamp approx error
    raise ValueError(act)


def _gemm_bias_act_t_kernel(w_ref, a_ref, bias_ref, o_ref, *, act):
    # Transposed (lane-dense) conv layer without BN (c1, c5):
    #   w: (Cout, K), a: (K, Mp) patches^T, o: (Cout, Mp)  -- positions on lanes.
    raw = jnp.dot(w_ref[...], a_ref[...], preferred_element_type=jnp.float32)
    o_ref[...] = _apply_act(raw + bias_ref[...], act)


def _conv_bn_act_kernel(a_ref, b_ref, gamma_ref, beta_ref, o_ref, *, m_true, act):
    # Standard-layout fused conv layer (c2/c3/c4): raw = A @ B ; BN batch stats over
    # the m_true valid rows (centred variance) ; affine ; activation.
    raw = jnp.dot(a_ref[...], b_ref[...], preferred_element_type=jnp.float32)
    rows = jax.lax.broadcasted_iota(jnp.int32, raw.shape, 0)
    mask = rows < m_true                                   # exclude padded GEMM rows
    mean = jnp.sum(jnp.where(mask, raw, 0.0), axis=0, keepdims=True) / m_true
    d = jnp.where(mask, raw - mean, 0.0)
    var = jnp.sum(d * d, axis=0, keepdims=True) / m_true   # biased (training-mode) var
    scale = gamma_ref[...] * jax.lax.rsqrt(var + _EPS)
    shift = beta_ref[...] - mean * scale
    o_ref[...] = _apply_act(raw * scale + shift, act)


def _deconv_bn_act_t_kernel(w_ref, a_ref, bias_ref, gamma_ref, beta_ref, o_ref,
                            *, phases, cout, m_true, act):
    # Fused sub-pixel ConvTranspose2d(k=4, s=2, p=0) + bias + BN + act, transposed layout.
    #   w: (phases*Cout, K) per-phase weights stacked on the output-row axis
    #   a: (K, Mp)          shared 2x2-window patches^T of the pad-1 input
    #   o: (phases*Cout, Mp) per-phase outputs, positions lane-dense.
    # ONE MXU matmul covers all phases (4x larger M-dim than per-phase dots).
    raw = jnp.dot(w_ref[...], a_ref[...], preferred_element_type=jnp.float32) + bias_ref[...]
    cols = jax.lax.broadcasted_iota(jnp.int32, raw.shape, 1)
    mask = cols < m_true                                    # exclude padded lane columns
    cnt = float(phases * m_true)                            # BN counts all phases/channel
    s = jnp.sum(jnp.where(mask, raw, 0.0), axis=1, keepdims=True)        # (P*Cout, 1)
    mean_c = sum(s[p * cout:(p + 1) * cout] for p in range(phases)) / cnt  # (Cout, 1)
    mean = jnp.concatenate([mean_c] * phases, axis=0)                      # (P*Cout, 1)
    d = jnp.where(mask, raw - mean, 0.0)
    v = jnp.sum(d * d, axis=1, keepdims=True)
    var_c = sum(v[p * cout:(p + 1) * cout] for p in range(phases)) / cnt
    scale_c = gamma_ref[...] * jax.lax.rsqrt(var_c + _EPS)
    shift_c = beta_ref[...] - mean_c * scale_c
    scale = jnp.concatenate([scale_c] * phases, axis=0)
    shift = jnp.concatenate([shift_c] * phases, axis=0)
    o_ref[...] = _apply_act(raw * scale + shift, act)


# --------------------------------------------------------------------------- wrappers
def pallas_gemm_bias_act_t(wmat, a_t, bias, act):
    cout, k = wmat.shape
    mp = a_t.shape[1]
    return pl.pallas_call(
        functools.partial(_gemm_bias_act_t_kernel, act=act),
        out_shape=jax.ShapeDtypeStruct((cout, mp), jnp.float32),
        grid=(1,),
        in_specs=[
            pl.BlockSpec((cout, k), lambda i: (0, 0)),
            pl.BlockSpec((k, mp), lambda i: (0, 0)),
            pl.BlockSpec((cout, 1), lambda i: (0, 0)),
        ],
        out_specs=pl.BlockSpec((cout, mp), lambda i: (0, 0)),
        compiler_params=pltpu.CompilerParams(
            dimension_semantics=("arbitrary",), vmem_limit_bytes=_VMEM_LIMIT),
    )(wmat, a_t, bias)


def pallas_conv_bn_act(a_pad, bmat, gamma, beta, act, m_true):
    m_pad, k = a_pad.shape
    c = bmat.shape[1]
    return pl.pallas_call(
        functools.partial(_conv_bn_act_kernel, m_true=m_true, act=act),
        out_shape=jax.ShapeDtypeStruct((m_pad, c), jnp.float32),
        grid=(1,),
        in_specs=[
            pl.BlockSpec((m_pad, k), lambda i: (0, 0)),
            pl.BlockSpec((k, c), lambda i: (0, 0)),
            pl.BlockSpec((1, c), lambda i: (0, 0)),
            pl.BlockSpec((1, c), lambda i: (0, 0)),
        ],
        out_specs=pl.BlockSpec((m_pad, c), lambda i: (0, 0)),
        compiler_params=pltpu.CompilerParams(
            dimension_semantics=("arbitrary",), vmem_limit_bytes=_VMEM_LIMIT),
    )(a_pad, bmat, gamma, beta)


def pallas_deconv_bn_act_t(wstk, a_t, bstk, gamma, beta, act, m_true):
    pc, k = wstk.shape
    mp = a_t.shape[1]
    cout = gamma.shape[0]
    phases = pc // cout
    return pl.pallas_call(
        functools.partial(_deconv_bn_act_t_kernel, phases=phases, cout=cout,
                          m_true=m_true, act=act),
        out_shape=jax.ShapeDtypeStruct((pc, mp), jnp.float32),
        grid=(1,),
        in_specs=[
            pl.BlockSpec((pc, k), lambda i: (0, 0)),
            pl.BlockSpec((k, mp), lambda i: (0, 0)),
            pl.BlockSpec((pc, 1), lambda i: (0, 0)),
            pl.BlockSpec((cout, 1), lambda i: (0, 0)),
            pl.BlockSpec((cout, 1), lambda i: (0, 0)),
        ],
        out_specs=pl.BlockSpec((pc, mp), lambda i: (0, 0)),
        compiler_params=pltpu.CompilerParams(
            dimension_semantics=("arbitrary",), vmem_limit_bytes=_VMEM_LIMIT),
    )(wstk, a_t, bstk, gamma, beta)


# --------------------------------------------------------------------------- layers (glue)
def _im2col(x, k, stride, pad):
    # Standard layout: (N*OH*OW, C*k*k), K index = c*k*k + i*k + j.
    n, c, h, w = x.shape
    xp = jnp.pad(x, ((0, 0), (0, 0), (pad, pad), (pad, pad)))
    hp, wp = h + 2 * pad, w + 2 * pad
    oh = (hp - k) // stride + 1
    ow = (wp - k) // stride + 1
    cols = []
    for i in range(k):
        for j in range(k):
            cols.append(xp[:, :, i:i + stride * oh:stride, j:j + stride * ow:stride])
    patches = jnp.stack(cols, axis=-1)            # (N, C, OH, OW, k*k)
    patches = patches.transpose(0, 2, 3, 1, 4)    # (N, OH, OW, C, k*k)
    return patches.reshape(n * oh * ow, c * k * k), oh, ow


def _im2col_t(x, k, stride, pad):
    # Transposed layout: (C*k*k, N*OH*OW), same K ordering as _im2col.
    n, c, h, w = x.shape
    xp = jnp.pad(x, ((0, 0), (0, 0), (pad, pad), (pad, pad)))
    hp, wp = h + 2 * pad, w + 2 * pad
    oh = (hp - k) // stride + 1
    ow = (wp - k) // stride + 1
    cols = []
    for i in range(k):
        for j in range(k):
            cols.append(xp[:, :, i:i + stride * oh:stride, j:j + stride * ow:stride])
    p = jnp.stack(cols, axis=2)                   # (N, C, k*k, OH, OW)
    p = p.transpose(1, 2, 0, 3, 4)                # (C, k*k, N, OH, OW)
    return p.reshape(c * k * k, n * oh * ow), oh, ow


def _conv_layer(x, w, bias, stride, pad, act):
    # Conv2d without BatchNorm (c1, c5): transposed lane-dense GEMM + bias + activation.
    n = x.shape[0]
    cout, cin, k, _ = w.shape
    a_t, oh, ow = _im2col_t(x, k, stride, pad)
    m = a_t.shape[1]
    m_pad = _round_up(m, 128)                     # lane-dense output columns
    a_t = jnp.pad(a_t, ((0, 0), (0, m_pad - m)))
    wmat = w.reshape(cout, cin * k * k)           # W^T already matches patch K-order
    b2 = (bias if bias is not None else jnp.zeros((cout,), jnp.float32)).reshape(cout, 1)
    out = pallas_gemm_bias_act_t(wmat, a_t, b2, act)          # (Cout, Mp)
    return out[:, :m].reshape(cout, n, oh, ow).transpose(1, 0, 2, 3)


def _conv_bn_layer(x, w, gamma, beta, stride, pad, act):
    # Conv2d + BatchNorm2d + activation (c2/c3/c4), standard layout (Cout already
    # lane-dense), fully fused in one pallas_call.
    n = x.shape[0]
    cout, cin, k, _ = w.shape
    patches, oh, ow = _im2col(x, k, stride, pad)
    m = patches.shape[0]
    m_pad = _round_up(m, 8)
    patches = jnp.pad(patches, ((0, m_pad - m), (0, 0)))
    bmat = w.transpose(1, 2, 3, 0).reshape(cin * k * k, cout)
    out = pallas_conv_bn_act(patches, bmat, gamma.reshape(1, cout),
                             beta.reshape(1, cout), act, m)
    return out[:m].reshape(n, oh, ow, cout).transpose(0, 3, 1, 2)


def _deconv_bn_layer(x, wt, bias, gamma, beta, act):
    # ConvTranspose2d(cin->cout, 4, 2, 0) + BatchNorm2d + act via 4 sub-pixel phases.
    # All phases share one im2col of the pad-1 input with 2x2 windows; the 4 per-phase
    # weight matrices are stacked so the whole layer is ONE GEMM + BN + act pallas_call.
    n, cin, h, w = x.shape
    cout = wt.shape[1]
    a_t, oh2, ow2 = _im2col_t(x, 2, 1, 1)         # (cin*4, n*(h+1)*(w+1))
    m = a_t.shape[1]
    m_pad = _round_up(m, 128)
    a_t = jnp.pad(a_t, ((0, 0), (0, m_pad - m)))
    phase_w = []
    for ph in range(2):
        for pw in range(2):
            # taps kh in {ph, ph+2}, kw in {pw, pw+2}; window offset i=0 pairs with kh=ph+2
            sub = jnp.flip(wt[:, :, ph::2, pw::2], axis=(2, 3))        # (cin, cout, 2, 2)
            phase_w.append(sub.transpose(1, 0, 2, 3).reshape(cout, cin * 4))
    wstk = jnp.concatenate(phase_w, axis=0)       # (4*cout, cin*4), phase = ph*2 + pw
    bstk = jnp.tile(bias, 4).reshape(4 * cout, 1)
    out = pallas_deconv_bn_act_t(wstk, a_t, bstk, gamma.reshape(cout, 1),
                                 beta.reshape(cout, 1), act, m)        # (4*cout, Mp)
    # interleave phases back to NCHW: out[(ph*2+pw)*cout + c, n*oh2*ow2 + r*ow2 + q]
    #   -> y[n, c, 2r+ph, 2q+pw]
    o = out[:, :m].reshape(2, 2, cout, n, oh2, ow2)                    # (ph, pw, c, n, r, q)
    return o.transpose(3, 2, 4, 0, 5, 1).reshape(n, cout, 2 * oh2, 2 * ow2)


# --------------------------------------------------------------------------- model
def encoder_decoder_forward(x, p):
    x = _conv_layer(x, p["c1_w"], None, 2, 1, "lrelu")
    x = _conv_bn_layer(x, p["c2_w"], p["bn2_g"], p["bn2_b"], 2, 1, "lrelu")
    x = _conv_bn_layer(x, p["c3_w"], p["bn3_g"], p["bn3_b"], 2, 1, "lrelu")
    x = _conv_bn_layer(x, p["c4_w"], p["bn4_g"], p["bn4_b"], 1, 1, "lrelu")
    x = _deconv_bn_layer(x, p["t1_w"], p["t1_b"], p["bn5_g"], p["bn5_b"], "relu")
    x = _deconv_bn_layer(x, p["t2_w"], p["t2_b"], p["bn6_g"], p["bn6_b"], "relu")
    x = _deconv_bn_layer(x, p["t3_w"], p["t3_b"], p["bn7_g"], p["bn7_b"], "relu")
    x = _conv_layer(x, p["c5_w"], p["c5_b"], 1, 0, "sigmoid")
    return x


def init_params(key):
    ks = jax.random.split(key, 12)

    def w(k, shape):
        return jax.random.normal(k, shape, jnp.float32) * 0.05

    p = {}
    p["c1_w"] = w(ks[0], (32, 2, 4, 4))
    p["c2_w"] = w(ks[1], (64, 32, 4, 4)); p["bn2_g"] = jnp.ones((64,), jnp.float32); p["bn2_b"] = jnp.zeros((64,), jnp.float32)
    p["c3_w"] = w(ks[2], (128, 64, 4, 4)); p["bn3_g"] = jnp.ones((128,), jnp.float32); p["bn3_b"] = jnp.zeros((128,), jnp.float32)
    p["c4_w"] = w(ks[3], (128, 128, 4, 4)); p["bn4_g"] = jnp.ones((128,), jnp.float32); p["bn4_b"] = jnp.zeros((128,), jnp.float32)
    p["t1_w"] = w(ks[4], (128, 64, 4, 4)); p["t1_b"] = w(ks[5], (64,)); p["bn5_g"] = jnp.ones((64,), jnp.float32); p["bn5_b"] = jnp.zeros((64,), jnp.float32)
    p["t2_w"] = w(ks[6], (64, 32, 4, 4)); p["t2_b"] = w(ks[7], (32,)); p["bn6_g"] = jnp.ones((32,), jnp.float32); p["bn6_b"] = jnp.zeros((32,), jnp.float32)
    p["t3_w"] = w(ks[8], (32, 2, 4, 4)); p["t3_b"] = w(ks[9], (2,)); p["bn7_g"] = jnp.ones((2,), jnp.float32); p["bn7_b"] = jnp.zeros((2,), jnp.float32)
    p["c5_w"] = w(ks[10], (1, 2, 4, 4)); p["c5_b"] = w(ks[11], (1,))
    return p


if __name__ == "__main__":
    key = jax.random.PRNGKey(0)
    pk, xk = jax.random.split(key)
    params = init_params(pk)
    # input: (N=2, nc=2, 32, 32) -> output: (2, 1, 35, 35)
    x = jax.random.normal(xk, (2, 2, 32, 32), jnp.float32)

    fwd = jax.jit(encoder_decoder_forward)
    out = jax.block_until_ready(fwd(x, params))

    assert out.shape == (2, 1, 35, 35), out.shape
    assert bool(jnp.all(jnp.isfinite(out)))
    assert bool(jnp.all((out >= 0.0) & (out <= 1.0)))  # sigmoid output range
    print("KERNEL_OK")
</pallas_src>

<mosaic_0001>
module attributes {stable_mosaic.version = 11 : i64} {
  func.func @_gemm_bias_act_t_kernel(%arg0: i32, %arg1: memref<32x32xf32, #tpu.memory_space<vmem>>, %arg2: memref<32x512xf32, #tpu.memory_space<vmem>>, %arg3: memref<32x1xf32, #tpu.memory_space<vmem>>, %arg4: memref<32x512xf32, #tpu.memory_space<vmem>>) attributes {dimension_semantics = [#tpu.dimension_semantics<arbitrary>], iteration_bounds = array<i64: 1>, scalar_prefetch = 0 : i64, scratch_operands = 0 : i64, tpu.core_type = #tpu.core_type<tc>, window_params = [{pipeline_mode = #tpu.pipeline_mode<synchronous>, transform_indices = @transform_0, window_bounds = array<i64: 32, 32>}, {pipeline_mode = #tpu.pipeline_mode<synchronous>, transform_indices = @transform_1, window_bounds = array<i64: 32, 512>}, {pipeline_mode = #tpu.pipeline_mode<synchronous>, transform_indices = @transform_2, window_bounds = array<i64: 32, 1>}, {pipeline_mode = #tpu.pipeline_mode<synchronous>, transform_indices = @transform_3, window_bounds = array<i64: 32, 512>}]} {
    %c0 = arith.constant 0 : index
    %c0_0 = arith.constant 0 : index
    %0 = vector.load %arg1[%c0, %c0_0] : memref<32x32xf32, #tpu.memory_space<vmem>>, vector<32x32xf32>
    %c0_1 = arith.constant 0 : index
    %c0_2 = arith.constant 0 : index
    %1 = vector.load %arg2[%c0_1, %c0_2] : memref<32x512xf32, #tpu.memory_space<vmem>>, vector<32x512xf32>
    %cst = arith.constant dense<0.000000e+00> : vector<32x512xf32>
    %2 = tpu.matmul %0, %1, %cst {dimension_numbers = #tpu.dot_dimension_numbers<[1], [0], [0], [1], [0, 0, 1, 1], [], []>} : vector<32x32xf32>, vector<32x512xf32>, vector<32x512xf32> -> vector<32x512xf32>
    %c0_3 = arith.constant 0 : index
    %c0_4 = arith.constant 0 : index
    %3 = vector.load %arg3[%c0_3, %c0_4] : memref<32x1xf32, #tpu.memory_space<vmem>>, vector<32x1xf32>
    %4 = vector.broadcast %3 : vector<32x1xf32> to vector<32x512xf32>
    %5 = arith.addf %2, %4 : vector<32x512xf32>
    %cst_5 = arith.constant 0.000000e+00 : f32
    %6 = vector.broadcast %cst_5 : f32 to vector<32x512xf32>
    %7 = arith.cmpf oge, %5, %6 : vector<32x512xf32>
    %cst_6 = arith.constant 2.000000e-01 : f32
    %8 = vector.broadcast %cst_6 : f32 to vector<32x512xf32>
    %9 = arith.mulf %8, %5 : vector<32x512xf32>
    %10 = arith.select %7, %5, %9 : vector<32x512xi1>, vector<32x512xf32>
    %c0_7 = arith.constant 0 : index
    %c0_8 = arith.constant 0 : index
    %11 = vector.load %arg4[%c0_7, %c0_8] : memref<32x512xf32, #tpu.memory_space<vmem>>, vector<32x512xf32>
    tpu.vector_store %arg4[%c0_7, %c0_8], %10 {strides = array<i32>} : memref<32x512xf32, #tpu.memory_space<vmem>>, vector<32x512xf32>,
    return
  }
  func.func @transform_0(%arg0: i32) -> (i32, i32) {
    %c0_i32 = arith.constant 0 : i32
    %c0_i32_0 = arith.constant 0 : i32
    %c0_i32_1 = arith.constant 0 : i32
    return %c0_i32, %c0_i32_0 : i32, i32
  }
  func.func @transform_1(%arg0: i32) -> (i32, i32) {
    %c0_i32 = arith.constant 0 : i32
    %c0_i32_0 = arith.constant 0 : i32
    %c0_i32_1 = arith.constant 0 : i32
    return %c0_i32, %c0_i32_0 : i32, i32
  }
  func.func @transform_2(%arg0: i32) -> (i32, i32) {
    %c0_i32 = arith.constant 0 : i32
    %c0_i32_0 = arith.constant 0 : i32
    %c0_i32_1 = arith.constant 0 : i32
    return %c0_i32, %c0_i32_0 : i32, i32
  }
  func.func @transform_3(%arg0: i32) -> (i32, i32) {
    %c0_i32 = arith.constant 0 : i32
    %c0_i32_0 = arith.constant 0 : i32
    %c0_i32_1 = arith.constant 0 : i32
    return %c0_i32, %c0_i32_0 : i32, i32
  }
}

module attributes {stable_mosaic.version = 11 : i64} {
  func.func @_conv_bn_act_kernel(%arg0: i32, %arg1: memref<128x512xf32, #tpu.memory_space<vmem>>, %arg2: memref<512x64xf32, #tpu.memory_space<vmem>>, %arg3: memref<1x64xf32, #tpu.memory_space<vmem>>, %arg4: memref<1x64xf32, #tpu.memory_space<vmem>>, %arg5: memref<128x64xf32, #tpu.memory_space<vmem>>) attributes {dimension_semantics = [#tpu.dimension_semantics<arbitrary>], iteration_bounds = array<i64: 1>, scalar_prefetch = 0 : i64, scratch_operands = 0 : i64, tpu.core_type = #tpu.core_type<tc>, window_params = [{pipeline_mode = #tpu.pipeline_mode<synchronous>, transform_indices = @transform_0, window_bounds = array<i64: 128, 512>}, {pipeline_mode = #tpu.pipeline_mode<synchronous>, transform_indices = @transform_1, window_bounds = array<i64: 512, 64>}, {pipeline_mode = #tpu.pipeline_mode<synchronous>, transform_indices = @transform_2, window_bounds = array<i64: 1, 64>}, {pipeline_mode = #tpu.pipeline_mode<synchronous>, transform_indices = @transform_3, window_bounds = array<i64: 1, 64>}, {pipeline_mode = #tpu.pipeline_mode<synchronous>, transform_indices = @transform_4, window_bounds = array<i64: 128, 64>}]} {
    %c0 = arith.constant 0 : index
    %c0_0 = arith.constant 0 : index
    %0 = vector.load %arg1[%c0, %c0_0] : memref<128x512xf32, #tpu.memory_space<vmem>>, vector<128x512xf32>
    %c0_1 = arith.constant 0 : index
    %c0_2 = arith.constant 0 : index
    %1 = vector.load %arg2[%c0_1, %c0_2] : memref<512x64xf32, #tpu.memory_space<vmem>>, vector<512x64xf32>
    %cst = arith.constant dense<0.000000e+00> : vector<128x64xf32>
    %2 = tpu.matmul %0, %1, %cst {dimension_numbers = #tpu.dot_dimension_numbers<[1], [0], [0], [1], [0, 0, 1, 1], [], []>} : vector<128x512xf32>, vector<512x64xf32>, vector<128x64xf32> -> vector<128x64xf32>
    %3 = tpu.iota {dimensions = array<i32: 0>} : vector<128x64xi32>
    %c128_i32 = arith.constant 128 : i32
    %4 = vector.broadcast %c128_i32 : i32 to vector<128x64xi32>
    %5 = arith.cmpi slt, %3, %4 : vector<128x64xi32>
    %cst_3 = arith.constant 0.000000e+00 : f32
    %6 = vector.broadcast %cst_3 : f32 to vector<128x64xf32>
    %7 = arith.select %5, %2, %6 : vector<128x64xi1>, vector<128x64xf32>
    %cst_4 = arith.constant dense<0.000000e+00> : vector<64xf32>
    %8 = vector.multi_reduction <add>, %7, %cst_4 [0] : vector<128x64xf32> to vector<64xf32>
    %9 = vector.shape_cast %8 : vector<64xf32> to vector<1x64xf32>
    %cst_5 = arith.constant 1.280000e+02 : f32
    %10 = vector.broadcast %cst_5 : f32 to vector<1x64xf32>
    %11 = arith.divf %9, %10 : vector<1x64xf32>
    %12 = vector.broadcast %11 : vector<1x64xf32> to vector<128x64xf32>
    %13 = arith.subf %2, %12 : vector<128x64xf32>
    %cst_6 = arith.constant 0.000000e+00 : f32
    %14 = vector.broadcast %cst_6 : f32 to vector<128x64xf32>
    %15 = arith.select %5, %13, %14 : vector<128x64xi1>, vector<128x64xf32>
    %16 = arith.mulf %15, %15 : vector<128x64xf32>
    %cst_7 = arith.constant dense<0.000000e+00> : vector<64xf32>
    %17 = vector.multi_reduction <add>, %16, %cst_7 [0] : vector<128x64xf32> to vector<64xf32>
    %18 = vector.shape_cast %17 : vector<64xf32> to vector<1x64xf32>
    %cst_8 = arith.constant 1.280000e+02 : f32
    %19 = vector.broadcast %cst_8 : f32 to vector<1x64xf32>
    %20 = arith.divf %18, %19 : vector<1x64xf32>
    %c0_9 = arith.constant 0 : index
    %c0_10 = arith.constant 0 : index
    %21 = vector.load %arg3[%c0_9, %c0_10] : memref<1x64xf32, #tpu.memory_space<vmem>>, vector<1x64xf32>
    %cst_11 = arith.constant 9.99999974E-6 : f32
    %22 = vector.broadcast %cst_11 : f32 to vector<1x64xf32>
    %23 = arith.addf %20, %22 : vector<1x64xf32>
    %24 = math.rsqrt %23 : vector<1x64xf32>
    %25 = arith.mulf %21, %24 : vector<1x64xf32>
    %c0_12 = arith.constant 0 : index
    %c0_13 = arith.constant 0 : index
    %26 = vector.load %arg4[%c0_12, %c0_13] : memref<1x64xf32, #tpu.memory_space<vmem>>, vector<1x64xf32>
    %27 = arith.mulf %11, %25 : vector<1x64xf32>
    %28 = arith.subf %26, %27 : vector<1x64xf32>
    %29 = vector.broadcast %25 : vector<1x64xf32> to vector<128x64xf32>
    %30 = arith.mulf %2, %29 : vector<128x64xf32>
    %31 = vector.broadcast %28 : vector<1x64xf32> to vector<128x64xf32>
    %32 = arith.addf %30, %31 : vector<128x64xf32>
    %cst_14 = arith.constant 0.000000e+00 : f32
    %33 = vector.broadcast %cst_14 : f32 to vector<128x64xf32>
    %34 = arith.cmpf oge, %32, %33 : vector<128x64xf32>
    %cst_15 = arith.constant 2.000000e-01 : f32
    %35 = vector.broadcast %cst_15 : f32 to vector<128x64xf32>
    %36 = arith.mulf %35, %32 : vector<128x64xf32>
    %37 = arith.select %34, %32, %36 : vector<128x64xi1>, vector<128x64xf32>
    %c0_16 = arith.constant 0 : index
    %c0_17 = arith.constant 0 : index
    %38 = vector.load %arg5[%c0_16, %c0_17] : memref<128x64xf32, #tpu.memory_space<vmem>>, vector<128x64xf32>
    tpu.vector_store %arg5[%c0_16, %c0_17], %37 {strides = array<i32>} : memref<128x64xf32, #tpu.memory_space<vmem>>, vector<128x64xf32>,
    return
  }
  func.func @transform_0(%arg0: i32) -> (i32, i32) {
    %c0_i32 = arith.constant 0 : i32
    %c0_i32_0 = arith.constant 0 : i32
    %c0_i32_1 = arith.constant 0 : i32
    return %c0_i32, %c0_i32_0 : i32, i32
  }
  func.func @transform_1(%arg0: i32) -> (i32, i32) {
    %c0_i32 = arith.constant 0 : i32
    %c0_i32_0 = arith.constant 0 : i32
    %c0_i32_1 = arith.constant 0 : i32
    return %c0_i32, %c0_i32_0 : i32, i32
  }
  func.func @transform_2(%arg0: i32) -> (i32, i32) {
    %c0_i32 = arith.constant 0 : i32
    %c0_i32_0 = arith.constant 0 : i32
    %c0_i32_1 = arith.constant 0 : i32
    return %c0_i32, %c0_i32_0 : i32, i32
  }
  func.func @transform_3(%arg0: i32) -> (i32, i32) {
    %c0_i32 = arith.constant 0 : i32
    %c0_i32_0 = arith.constant 0 : i32
    %c0_i32_1 = arith.constant 0 : i32
    return %c0_i32, %c0_i32_0 : i32, i32
  }
  func.func @transform_4(%arg0: i32) -> (i32, i32) {
    %c0_i32 = arith.constant 0 : i32
    %c0_i32_0 = arith.constant 0 : i32
    %c0_i32_1 = arith.constant 0 : i32
    return %c0_i32, %c0_i32_0 : i32, i32
  }
}

module attributes {stable_mosaic.version = 11 : i64} {
  func.func @_conv_bn_act_kernel(%arg0: i32, %arg1: memref<32x1024xf32, #tpu.memory_space<vmem>>, %arg2: memref<1024x128xf32, #tpu.memory_space<vmem>>, %arg3: memref<1x128xf32, #tpu.memory_space<vmem>>, %arg4: memref<1x128xf32, #tpu.memory_space<vmem>>, %arg5: memref<32x128xf32, #tpu.memory_space<vmem>>) attributes {dimension_semantics = [#tpu.dimension_semantics<arbitrary>], iteration_bounds = array<i64: 1>, scalar_prefetch = 0 : i64, scratch_operands = 0 : i64, tpu.core_type = #tpu.core_type<tc>, window_params = [{pipeline_mode = #tpu.pipeline_mode<synchronous>, transform_indices = @transform_0, window_bounds = array<i64: 32, 1024>}, {pipeline_mode = #tpu.pipeline_mode<synchronous>, transform_indices = @transform_1, window_bounds = array<i64: 1024, 128>}, {pipeline_mode = #tpu.pipeline_mode<synchronous>, transform_indices = @transform_2, window_bounds = array<i64: 1, 128>}, {pipeline_mode = #tpu.pipeline_mode<synchronous>, transform_indices = @transform_3, window_bounds = array<i64: 1, 128>}, {pipeline_mode = #tpu.pipeline_mode<synchronous>, transform_indices = @transform_4, window_bounds = array<i64: 32, 128>}]} {
    %c0 = arith.constant 0 : index
    %c0_0 = arith.constant 0 : index
    %0 = vector.load %arg1[%c0, %c0_0] : memref<32x1024xf32, #tpu.memory_space<vmem>>, vector<32x1024xf32>
    %c0_1 = arith.constant 0 : index
    %c0_2 = arith.constant 0 : index
    %1 = vector.load %arg2[%c0_1, %c0_2] : memref<1024x128xf32, #tpu.memory_space<vmem>>, vector<1024x128xf32>
    %cst = arith.constant dense<0.000000e+00> : vector<32x128xf32>
    %2 = tpu.matmul %0, %1, %cst {dimension_numbers = #tpu.dot_dimension_numbers<[1], [0], [0], [1], [0, 0, 1, 1], [], []>} : vector<32x1024xf32>, vector<1024x128xf32>, vector<32x128xf32> -> vector<32x128xf32>
    %3 = tpu.iota {dimensions = array<i32: 0>} : vector<32x128xi32>
    %c32_i32 = arith.constant 32 : i32
    %4 = vector.broadcast %c32_i32 : i32 to vector<32x128xi32>
    %5 = arith.cmpi slt, %3, %4 : vector<32x128xi32>
    %cst_3 = arith.constant 0.000000e+00 : f32
    %6 = vector.broadcast %cst_3 : f32 to vector<32x128xf32>
    %7 = arith.select %5, %2, %6 : vector<32x128xi1>, vector<32x128xf32>
    %cst_4 = arith.constant dense<0.000000e+00> : vector<128xf32>
    %8 = vector.multi_reduction <add>, %7, %cst_4 [0] : vector<32x128xf32> to vector<128xf32>
    %9 = vector.shape_cast %8 : vector<128xf32> to vector<1x128xf32>
    %cst_5 = arith.constant 3.200000e+01 : f32
    %10 = vector.broadcast %cst_5 : f32 to vector<1x128xf32>
    %11 = arith.divf %9, %10 : vector<1x128xf32>
    %12 = vector.broadcast %11 : vector<1x128xf32> to vector<32x128xf32>
    %13 = arith.subf %2, %12 : vector<32x128xf32>
    %cst_6 = arith.constant 0.000000e+00 : f32
    %14 = vector.broadcast %cst_6 : f32 to vector<32x128xf32>
    %15 = arith.select %5, %13, %14 : vector<32x128xi1>, vector<32x128xf32>
    %16 = arith.mulf %15, %15 : vector<32x128xf32>
    %cst_7 = arith.constant dense<0.000000e+00> : vector<128xf32>
    %17 = vector.multi_reduction <add>, %16, %cst_7 [0] : vector<32x128xf32> to vector<128xf32>
    %18 = vector.shape_cast %17 : vector<128xf32> to vector<1x128xf32>
    %cst_8 = arith.constant 3.200000e+01 : f32
    %19 = vector.broadcast %cst_8 : f32 to vector<1x128xf32>
    %20 = arith.divf %18, %19 : vector<1x128xf32>
    %c0_9 = arith.constant 0 : index
    %c0_10 = arith.constant 0 : index
    %21 = vector.load %arg3[%c0_9, %c0_10] : memref<1x128xf32, #tpu.memory_space<vmem>>, vector<1x128xf32>
    %cst_11 = arith.constant 9.99999974E-6 : f32
    %22 = vector.broadcast %cst_11 : f32 to vector<1x128xf32>
    %23 = arith.addf %20, %22 : vector<1x128xf32>
    %24 = math.rsqrt %23 : vector<1x128xf32>
    %25 = arith.mulf %21, %24 : vector<1x128xf32>
    %c0_12 = arith.constant 0 : index
    %c0_13 = arith.constant 0 : index
    %26 = vector.load %arg4[%c0_12, %c0_13] : memref<1x128xf32, #tpu.memory_space<vmem>>, vector<1x128xf32>
    %27 = arith.mulf %11, %25 : vector<1x128xf32>
    %28 = arith.subf %26, %27 : vector<1x128xf32>
    %29 = vector.broadcast %25 : vector<1x128xf32> to vector<32x128xf32>
    %30 = arith.mulf %2, %29 : vector<32x128xf32>
    %31 = vector.broadcast %28 : vector<1x128xf32> to vector<32x128xf32>
    %32 = arith.addf %30, %31 : vector<32x128xf32>
    %cst_14 = arith.constant 0.000000e+00 : f32
    %33 = vector.broadcast %cst_14 : f32 to vector<32x128xf32>
    %34 = arith.cmpf oge, %32, %33 : vector<32x128xf32>
    %cst_15 = arith.constant 2.000000e-01 : f32
    %35 = vector.broadcast %cst_15 : f32 to vector<32x128xf32>
    %36 = arith.mulf %35, %32 : vector<32x128xf32>
    %37 = arith.select %34, %32, %36 : vector<32x128xi1>, vector<32x128xf32>
    %c0_16 = arith.constant 0 : index
    %c0_17 = arith.constant 0 : index
    %38 = vector.load %arg5[%c0_16, %c0_17] : memref<32x128xf32, #tpu.memory_space<vmem>>, vector<32x128xf32>
    tpu.vector_store %arg5[%c0_16, %c0_17], %37 {strides = array<i32>} : memref<32x128xf32, #tpu.memory_space<vmem>>, vector<32x128xf32>,
    return
  }
  func.func @transform_0(%arg0: i32) -> (i32, i32) {
    %c0_i32 = arith.constant 0 : i32
    %c0_i32_0 = arith.constant 0 : i32
    %c0_i32_1 = arith.constant 0 : i32
    return %c0_i32, %c0_i32_0 : i32, i32
  }
  func.func @transform_1(%arg0: i32) -> (i32, i32) {
    %c0_i32 = arith.constant 0 : i32
    %c0_i32_0 = arith.constant 0 : i32
    %c0_i32_1 = arith.constant 0 : i32
    return %c0_i32, %c0_i32_0 : i32, i32
  }
  func.func @transform_2(%arg0: i32) -> (i32, i32) {
    %c0_i32 = arith.constant 0 : i32
    %c0_i32_0 = arith.constant 0 : i32
    %c0_i32_1 = arith.constant 0 : i32
    return %c0_i32, %c0_i32_0 : i32, i32
  }
  func.func @transform_3(%arg0: i32) -> (i32, i32) {
    %c0_i32 = arith.constant 0 : i32
    %c0_i32_0 = arith.constant 0 : i32
    %c0_i32_1 = arith.constant 0 : i32
    return %c0_i32, %c0_i32_0 : i32, i32
  }
  func.func @transform_4(%arg0: i32) -> (i32, i32) {
    %c0_i32 = arith.constant 0 : i32
    %c0_i32_0 = arith.constant 0 : i32
    %c0_i32_1 = arith.constant 0 : i32
    return %c0_i32, %c0_i32_0 : i32, i32
  }
}

module attributes {stable_mosaic.version = 11 : i64} {
  func.func @_conv_bn_act_kernel(%arg0: i32, %arg1: memref<24x2048xf32, #tpu.memory_space<vmem>>, %arg2: memref<2048x128xf32, #tpu.memory_space<vmem>>, %arg3: memref<1x128xf32, #tpu.memory_space<vmem>>, %arg4: memref<1x128xf32, #tpu.memory_space<vmem>>, %arg5: memref<24x128xf32, #tpu.memory_space<vmem>>) attributes {dimension_semantics = [#tpu.dimension_semantics<arbitrary>], iteration_bounds = array<i64: 1>, scalar_prefetch = 0 : i64, scratch_operands = 0 : i64, tpu.core_type = #tpu.core_type<tc>, window_params = [{pipeline_mode = #tpu.pipeline_mode<synchronous>, transform_indices = @transform_0, window_bounds = array<i64: 24, 2048>}, {pipeline_mode = #tpu.pipeline_mode<synchronous>, transform_indices = @transform_1, window_bounds = array<i64: 2048, 128>}, {pipeline_mode = #tpu.pipeline_mode<synchronous>, transform_indices = @transform_2, window_bounds = array<i64: 1, 128>}, {pipeline_mode = #tpu.pipeline_mode<synchronous>, transform_indices = @transform_3, window_bounds = array<i64: 1, 128>}, {pipeline_mode = #tpu.pipeline_mode<synchronous>, transform_indices = @transform_4, window_bounds = array<i64: 24, 128>}]} {
    %c0 = arith.constant 0 : index
    %c0_0 = arith.constant 0 : index
    %0 = vector.load %arg1[%c0, %c0_0] : memref<24x2048xf32, #tpu.memory_space<vmem>>, vector<24x2048xf32>
    %c0_1 = arith.constant 0 : index
    %c0_2 = arith.constant 0 : index
    %1 = vector.load %arg2[%c0_1, %c0_2] : memref<2048x128xf32, #tpu.memory_space<vmem>>, vector<2048x128xf32>
    %cst = arith.constant dense<0.000000e+00> : vector<24x128xf32>
    %2 = tpu.matmul %0, %1, %cst {dimension_numbers = #tpu.dot_dimension_numbers<[1], [0], [0], [1], [0, 0, 1, 1], [], []>} : vector<24x2048xf32>, vector<2048x128xf32>, vector<24x128xf32> -> vector<24x128xf32>
    %3 = tpu.iota {dimensions = array<i32: 0>} : vector<24x128xi32>
    %c18_i32 = arith.constant 18 : i32
    %4 = vector.broadcast %c18_i32 : i32 to vector<24x128xi32>
    %5 = arith.cmpi slt, %3, %4 : vector<24x128xi32>
    %cst_3 = arith.constant 0.000000e+00 : f32
    %6 = vector.broadcast %cst_3 : f32 to vector<24x128xf32>
    %7 = arith.select %5, %2, %6 : vector<24x128xi1>, vector<24x128xf32>
    %cst_4 = arith.constant dense<0.000000e+00> : vector<128xf32>
    %8 = vector.multi_reduction <add>, %7, %cst_4 [0] : vector<24x128xf32> to vector<128xf32>
    %9 = vector.shape_cast %8 : vector<128xf32> to vector<1x128xf32>
    %cst_5 = arith.constant 1.800000e+01 : f32
    %10 = vector.broadcast %cst_5 : f32 to vector<1x128xf32>
    %11 = arith.divf %9, %10 : vector<1x128xf32>
    %12 = vector.broadcast %11 : vector<1x128xf32> to vector<24x128xf32>
    %13 = arith.subf %2, %12 : vector<24x128xf32>
    %cst_6 = arith.constant 0.000000e+00 : f32
    %14 = vector.broadcast %cst_6 : f32 to vector<24x128xf32>
    %15 = arith.select %5, %13, %14 : vector<24x128xi1>, vector<24x128xf32>
    %16 = arith.mulf %15, %15 : vector<24x128xf32>
    %cst_7 = arith.constant dense<0.000000e+00> : vector<128xf32>
    %17 = vector.multi_reduction <add>, %16, %cst_7 [0] : vector<24x128xf32> to vector<128xf32>
    %18 = vector.shape_cast %17 : vector<128xf32> to vector<1x128xf32>
    %cst_8 = arith.constant 1.800000e+01 : f32
    %19 = vector.broadcast %cst_8 : f32 to vector<1x128xf32>
    %20 = arith.divf %18, %19 : vector<1x128xf32>
    %c0_9 = arith.constant 0 : index
    %c0_10 = arith.constant 0 : index
    %21 = vector.load %arg3[%c0_9, %c0_10] : memref<1x128xf32, #tpu.memory_space<vmem>>, vector<1x128xf32>
    %cst_11 = arith.constant 9.99999974E-6 : f32
    %22 = vector.broadcast %cst_11 : f32 to vector<1x128xf32>
    %23 = arith.addf %20, %22 : vector<1x128xf32>
    %24 = math.rsqrt %23 : vector<1x128xf32>
    %25 = arith.mulf %21, %24 : vector<1x128xf32>
    %c0_12 = arith.constant 0 : index
    %c0_13 = arith.constant 0 : index
    %26 = vector.load %arg4[%c0_12, %c0_13] : memref<1x128xf32, #tpu.memory_space<vmem>>, vector<1x128xf32>
    %27 = arith.mulf %11, %25 : vector<1x128xf32>
    %28 = arith.subf %26, %27 : vector<1x128xf32>
    %29 = vector.broadcast %25 : vector<1x128xf32> to vector<24x128xf32>
    %30 = arith.mulf %2, %29 : vector<24x128xf32>
    %31 = vector.broadcast %28 : vector<1x128xf32> to vector<24x128xf32>
    %32 = arith.addf %30, %31 : vector<24x128xf32>
    %cst_14 = arith.constant 0.000000e+00 : f32
    %33 = vector.broadcast %cst_14 : f32 to vector<24x128xf32>
    %34 = arith.cmpf oge, %32, %33 : vector<24x128xf32>
    %cst_15 = arith.constant 2.000000e-01 : f32
    %35 = vector.broadcast %cst_15 : f32 to vector<24x128xf32>
    %36 = arith.mulf %35, %32 : vector<24x128xf32>
    %37 = arith.select %34, %32, %36 : vector<24x128xi1>, vector<24x128xf32>
    %c0_16 = arith.constant 0 : index
    %c0_17 = arith.constant 0 : index
    %38 = vector.load %arg5[%c0_16, %c0_17] : memref<24x128xf32, #tpu.memory_space<vmem>>, vector<24x128xf32>
    tpu.vector_store %arg5[%c0_16, %c0_17], %37 {strides = array<i32>} : memref<24x128xf32, #tpu.memory_space<vmem>>, vector<24x128xf32>,
    return
  }
  func.func @transform_0(%arg0: i32) -> (i32, i32) {
    %c0_i32 = arith.constant 0 : i32
    %c0_i32_0 = arith.constant 0 : i32
    %c0_i32_1 = arith.constant 0 : i32
    return %c0_i32, %c0_i32_0 : i32, i32
  }
  func.func @transform_1(%arg0: i32) -> (i32, i32) {
    %c0_i32 = arith.constant 0 : i32
    %c0_i32_0 = arith.constant 0 : i32
    %c0_i32_1 = arith.constant 0 : i32
    return %c0_i32, %c0_i32_0 : i32, i32
  }
  func.func @transform_2(%arg0: i32) -> (i32, i32) {
    %c0_i32 = arith.constant 0 : i32
    %c0_i32_0 = arith.constant 0 : i32
    %c0_i32_1 = arith.constant 0 : i32
    return %c0_i32, %c0_i32_0 : i32, i32
  }
  func.func @transform_3(%arg0: i32) -> (i32, i32) {
    %c0_i32 = arith.constant 0 : i32
    %c0_i32_0 = arith.constant 0 : i32
    %c0_i32_1 = arith.constant 0 : i32
    return %c0_i32, %c0_i32_0 : i32, i32
  }
  func.func @transform_4(%arg0: i32) -> (i32, i32) {
    %c0_i32 = arith.constant 0 : i32
    %c0_i32_0 = arith.constant 0 : i32
    %c0_i32_1 = arith.constant 0 : i32
    return %c0_i32, %c0_i32_0 : i32, i32
  }
}

module attributes {stable_mosaic.version = 11 : i64} {
  func.func @_deconv_bn_act_t_kernel(%arg0: i32, %arg1: memref<256x512xf32, #tpu.memory_space<vmem>>, %arg2: memref<512x128xf32, #tpu.memory_space<vmem>>, %arg3: memref<256x1xf32, #tpu.memory_space<vmem>>, %arg4: memref<64x1xf32, #tpu.memory_space<vmem>>, %arg5: memref<64x1xf32, #tpu.memory_space<vmem>>, %arg6: memref<256x128xf32, #tpu.memory_space<vmem>>) attributes {dimension_semantics = [#tpu.dimension_semantics<arbitrary>], iteration_bounds = array<i64: 1>, scalar_prefetch = 0 : i64, scratch_operands = 0 : i64, tpu.core_type = #tpu.core_type<tc>, window_params = [{pipeline_mode = #tpu.pipeline_mode<synchronous>, transform_indices = @transform_0, window_bounds = array<i64: 256, 512>}, {pipeline_mode = #tpu.pipeline_mode<synchronous>, transform_indices = @transform_1, window_bounds = array<i64: 512, 128>}, {pipeline_mode = #tpu.pipeline_mode<synchronous>, transform_indices = @transform_2, window_bounds = array<i64: 256, 1>}, {pipeline_mode = #tpu.pipeline_mode<synchronous>, transform_indices = @transform_3, window_bounds = array<i64: 64, 1>}, {pipeline_mode = #tpu.pipeline_mode<synchronous>, transform_indices = @transform_4, window_bounds = array<i64: 64, 1>}, {pipeline_mode = #tpu.pipeline_mode<synchronous>, transform_indices = @transform_5, window_bounds = array<i64: 256, 128>}]} {
    %c0 = arith.constant 0 : index
    %c0_0 = arith.constant 0 : index
    %0 = vector.load %arg1[%c0, %c0_0] : memref<256x512xf32, #tpu.memory_space<vmem>>, vector<256x512xf32>
    %c0_1 = arith.constant 0 : index
    %c0_2 = arith.constant 0 : index
    %1 = vector.load %arg2[%c0_1, %c0_2] : memref<512x128xf32, #tpu.memory_space<vmem>>, vector<512x128xf32>
    %cst = arith.constant dense<0.000000e+00> : vector<256x128xf32>
    %2 = tpu.matmul %0, %1, %cst {dimension_numbers = #tpu.dot_dimension_numbers<[1], [0], [0], [1], [0, 0, 1, 1], [], []>} : vector<256x512xf32>, vector<512x128xf32>, vector<256x128xf32> -> vector<256x128xf32>
    %c0_3 = arith.constant 0 : index
    %c0_4 = arith.constant 0 : index
    %3 = vector.load %arg3[%c0_3, %c0_4] : memref<256x1xf32, #tpu.memory_space<vmem>>, vector<256x1xf32>
    %4 = vector.broadcast %3 : vector<256x1xf32> to vector<256x128xf32>
    %5 = arith.addf %2, %4 : vector<256x128xf32>
    %6 = tpu.iota {dimensions = array<i32: 1>} : vector<256x128xi32>
    %c32_i32 = arith.constant 32 : i32
    %7 = vector.broadcast %c32_i32 : i32 to vector<256x128xi32>
    %8 = arith.cmpi slt, %6, %7 : vector<256x128xi32>
    %cst_5 = arith.constant 0.000000e+00 : f32
    %9 = vector.broadcast %cst_5 : f32 to vector<256x128xf32>
    %10 = arith.select %8, %5, %9 : vector<256x128xi1>, vector<256x128xf32>
    %cst_6 = arith.constant dense<0.000000e+00> : vector<256xf32>
    %11 = vector.multi_reduction <add>, %10, %cst_6 [1] : vector<256x128xf32> to vector<256xf32>
    %12 = vector.shape_cast %11 : vector<256xf32> to vector<256x1xf32>
    %13 = vector.extract_strided_slice %12 {offsets = [0, 0], sizes = [64, 1], strides = [1, 1]} : vector<256x1xf32> to vector<64x1xf32>
    %cst_7 = arith.constant 0.000000e+00 : f32
    %14 = vector.broadcast %cst_7 : f32 to vector<64x1xf32>
    %15 = arith.addf %14, %13 : vector<64x1xf32>
    %16 = vector.extract_strided_slice %12 {offsets = [64, 0], sizes = [64, 1], strides = [1, 1]} : vector<256x1xf32> to vector<64x1xf32>
    %17 = arith.addf %15, %16 : vector<64x1xf32>
    %18 = vector.extract_strided_slice %12 {offsets = [128, 0], sizes = [64, 1], strides = [1, 1]} : vector<256x1xf32> to vector<64x1xf32>
    %19 = arith.addf %17, %18 : vector<64x1xf32>
    %20 = vector.extract_strided_slice %12 {offsets = [192, 0], sizes = [64, 1], strides = [1, 1]} : vector<256x1xf32> to vector<64x1xf32>
    %21 = arith.addf %19, %20 : vector<64x1xf32>
    %cst_8 = arith.constant 1.280000e+02 : f32
    %22 = vector.broadcast %cst_8 : f32 to vector<64x1xf32>
    %23 = arith.divf %21, %22 : vector<64x1xf32>
    %24 = tpu.concatenate %23, %23, %23, %23 in 0 : vector<64x1xf32>, vector<64x1xf32>, vector<64x1xf32>, vector<64x1xf32> -> vector<256x1xf32>
    %25 = vector.broadcast %24 : vector<256x1xf32> to vector<256x128xf32>
    %26 = arith.subf %5, %25 : vector<256x128xf32>
    %cst_9 = arith.constant 0.000000e+00 : f32
    %27 = vector.broadcast %cst_9 : f32 to vector<256x128xf32>
    %28 = arith.select %8, %26, %27 : vector<256x128xi1>, vector<256x128xf32>
    %29 = arith.mulf %28, %28 : vector<256x128xf32>
    %cst_10 = arith.constant dense<0.000000e+00> : vector<256xf32>
    %30 = vector.multi_reduction <add>, %29, %cst_10 [1] : vector<256x128xf32> to vector<256xf32>
    %31 = vector.shape_cast %30 : vector<256xf32> to vector<256x1xf32>
    %32 = vector.extract_strided_slice %31 {offsets = [0, 0], sizes = [64, 1], strides = [1, 1]} : vector<256x1xf32> to vector<64x1xf32>
    %cst_11 = arith.constant 0.000000e+00 : f32
    %33 = vector.broadcast %cst_11 : f32 to vector<64x1xf32>
    %34 = arith.addf %33, %32 : vector<64x1xf32>
    %35 = vector.extract_strided_slice %31 {offsets = [64, 0], sizes = [64, 1], strides = [1, 1]} : vector<256x1xf32> to vector<64x1xf32>
    %36 = arith.addf %34, %35 : vector<64x1xf32>
    %37 = vector.extract_strided_slice %31 {offsets = [128, 0], sizes = [64, 1], strides = [1, 1]} : vector<256x1xf32> to vector<64x1xf32>
    %38 = arith.addf %36, %37 : vector<64x1xf32>
    %39 = vector.extract_strided_slice %31 {offsets = [192, 0], sizes = [64, 1], strides = [1, 1]} : vector<256x1xf32> to vector<64x1xf32>
    %40 = arith.addf %38, %39 : vector<64x1xf32>
    %cst_12 = arith.constant 1.280000e+02 : f32
    %41 = vector.broadcast %cst_12 : f32 to vector<64x1xf32>
    %42 = arith.divf %40, %41 : vector<64x1xf32>
    %c0_13 = arith.constant 0 : index
    %c0_14 = arith.constant 0 : index
    %43 = vector.load %arg4[%c0_13, %c0_14] : memref<64x1xf32, #tpu.memory_space<vmem>>, vector<64x1xf32>
    %cst_15 = arith.constant 9.99999974E-6 : f32
    %44 = vector.broadcast %cst_15 : f32 to vector<64x1xf32>
    %45 = arith.addf %42, %44 : vector<64x1xf32>
    %46 = math.rsqrt %45 : vector<64x1xf32>
    %47 = arith.mulf %43, %46 : vector<64x1xf32>
    %c0_16 = arith.constant 0 : index
    %c0_17 = arith.constant 0 : index
    %48 = vector.load %arg5[%c0_16, %c0_17] : memref<64x1xf32, #tpu.memory_space<vmem>>, vector<64x1xf32>
    %49 = arith.mulf %23, %47 : vector<64x1xf32>
    %50 = arith.subf %48, %49 : vector<64x1xf32>
    %51 = tpu.concatenate %47, %47, %47, %47 in 0 : vector<64x1xf32>, vector<64x1xf32>, vector<64x1xf32>, vector<64x1xf32> -> vector<256x1xf32>
    %52 = tpu.concatenate %50, %50, %50, %50 in 0 : vector<64x1xf32>, vector<64x1xf32>, vector<64x1xf32>, vector<64x1xf32> -> vector<256x1xf32>
    %53 = vector.broadcast %51 : vector<256x1xf32> to vector<256x128xf32>
    %54 = arith.mulf %5, %53 : vector<256x128xf32>
    %55 = vector.broadcast %52 : vector<256x1xf32> to vector<256x128xf32>
    %56 = arith.addf %54, %55 : vector<256x128xf32>
    %cst_18 = arith.constant 0.000000e+00 : f32
    %57 = vector.broadcast %cst_18 : f32 to vector<256x128xf32>
    %58 = arith.maximumf %56, %57 : vector<256x128xf32>
    %c0_19 = arith.constant 0 : index
    %c0_20 = arith.constant 0 : index
    %59 = vector.load %arg6[%c0_19, %c0_20] : memref<256x128xf32, #tpu.memory_space<vmem>>, vector<256x128xf32>
    tpu.vector_store %arg6[%c0_19, %c0_20], %58 {strides = array<i32>} : memref<256x128xf32, #tpu.memory_space<vmem>>, vector<256x128xf32>,
    return
  }
  func.func @transform_0(%arg0: i32) -> (i32, i32) {
    %c0_i32 = arith.constant 0 : i32
    %c0_i32_0 = arith.constant 0 : i32
    %c0_i32_1 = arith.constant 0 : i32
    return %c0_i32, %c0_i32_0 : i32, i32
  }
  func.func @transform_1(%arg0: i32) -> (i32, i32) {
    %c0_i32 = arith.constant 0 : i32
    %c0_i32_0 = arith.constant 0 : i32
    %c0_i32_1 = arith.constant 0 : i32
    return %c0_i32, %c0_i32_0 : i32, i32
  }
  func.func @transform_2(%arg0: i32) -> (i32, i32) {
    %c0_i32 = arith.constant 0 : i32
    %c0_i32_0 = arith.constant 0 : i32
    %c0_i32_1 = arith.constant 0 : i32
    return %c0_i32, %c0_i32_0 : i32, i32
  }
  func.func @transform_3(%arg0: i32) -> (i32, i32) {
    %c0_i32 = arith.constant 0 : i32
    %c0_i32_0 = arith.constant 0 : i32
    %c0_i32_1 = arith.constant 0 : i32
    return %c0_i32, %c0_i32_0 : i32, i32
  }
  func.func @transform_4(%arg0: i32) -> (i32, i32) {
    %c0_i32 = arith.constant 0 : i32
    %c0_i32_0 = arith.constant 0 : i32
    %c0_i32_1 = arith.constant 0 : i32
    return %c0_i32, %c0_i32_0 : i32, i32
  }
  func.func @transform_5(%arg0: i32) -> (i32, i32) {
    %c0_i32 = arith.constant 0 : i32
    %c0_i32_0 = arith.constant 0 : i32
    %c0_i32_1 = arith.constant 0 : i32
    return %c0_i32, %c0_i32_0 : i32, i32
  }
}

module attributes {stable_mosaic.version = 11 : i64} {
  func.func @_deconv_bn_act_t_kernel(%arg0: i32, %arg1: memref<128x256xf32, #tpu.memory_space<vmem>>, %arg2: memref<256x256xf32, #tpu.memory_space<vmem>>, %arg3: memref<128x1xf32, #tpu.memory_space<vmem>>, %arg4: memref<32x1xf32, #tpu.memory_space<vmem>>, %arg5: memref<32x1xf32, #tpu.memory_space<vmem>>, %arg6: memref<128x256xf32, #tpu.memory_space<vmem>>) attributes {dimension_semantics = [#tpu.dimension_semantics<arbitrary>], iteration_bounds = array<i64: 1>, scalar_prefetch = 0 : i64, scratch_operands = 0 : i64, tpu.core_type = #tpu.core_type<tc>, window_params = [{pipeline_mode = #tpu.pipeline_mode<synchronous>, transform_indices = @transform_0, window_bounds = array<i64: 128, 256>}, {pipeline_mode = #tpu.pipeline_mode<synchronous>, transform_indices = @transform_1, window_bounds = array<i64: 256, 256>}, {pipeline_mode = #tpu.pipeline_mode<synchronous>, transform_indices = @transform_2, window_bounds = array<i64: 128, 1>}, {pipeline_mode = #tpu.pipeline_mode<synchronous>, transform_indices = @transform_3, window_bounds = array<i64: 32, 1>}, {pipeline_mode = #tpu.pipeline_mode<synchronous>, transform_indices = @transform_4, window_bounds = array<i64: 32, 1>}, {pipeline_mode = #tpu.pipeline_mode<synchronous>, transform_indices = @transform_5, window_bounds = array<i64: 128, 256>}]} {
    %c0 = arith.constant 0 : index
    %c0_0 = arith.constant 0 : index
    %0 = vector.load %arg1[%c0, %c0_0] : memref<128x256xf32, #tpu.memory_space<vmem>>, vector<128x256xf32>
    %c0_1 = arith.constant 0 : index
    %c0_2 = arith.constant 0 : index
    %1 = vector.load %arg2[%c0_1, %c0_2] : memref<256x256xf32, #tpu.memory_space<vmem>>, vector<256x256xf32>
    %cst = arith.constant dense<0.000000e+00> : vector<128x256xf32>
    %2 = tpu.matmul %0, %1, %cst {dimension_numbers = #tpu.dot_dimension_numbers<[1], [0], [0], [1], [0, 0, 1, 1], [], []>} : vector<128x256xf32>, vector<256x256xf32>, vector<128x256xf32> -> vector<128x256xf32>
    %c0_3 = arith.constant 0 : index
    %c0_4 = arith.constant 0 : index
    %3 = vector.load %arg3[%c0_3, %c0_4] : memref<128x1xf32, #tpu.memory_space<vmem>>, vector<128x1xf32>
    %4 = vector.broadcast %3 : vector<128x1xf32> to vector<128x256xf32>
    %5 = arith.addf %2, %4 : vector<128x256xf32>
    %6 = tpu.iota {dimensions = array<i32: 1>} : vector<128x256xi32>
    %c162_i32 = arith.constant 162 : i32
    %7 = vector.broadcast %c162_i32 : i32 to vector<128x256xi32>
    %8 = arith.cmpi slt, %6, %7 : vector<128x256xi32>
    %cst_5 = arith.constant 0.000000e+00 : f32
    %9 = vector.broadcast %cst_5 : f32 to vector<128x256xf32>
    %10 = arith.select %8, %5, %9 : vector<128x256xi1>, vector<128x256xf32>
    %cst_6 = arith.constant dense<0.000000e+00> : vector<128xf32>
    %11 = vector.multi_reduction <add>, %10, %cst_6 [1] : vector<128x256xf32> to vector<128xf32>
    %12 = vector.shape_cast %11 : vector<128xf32> to vector<128x1xf32>
    %13 = vector.extract_strided_slice %12 {offsets = [0, 0], sizes = [32, 1], strides = [1, 1]} : vector<128x1xf32> to vector<32x1xf32>
    %cst_7 = arith.constant 0.000000e+00 : f32
    %14 = vector.broadcast %cst_7 : f32 to vector<32x1xf32>
    %15 = arith.addf %14, %13 : vector<32x1xf32>
    %16 = vector.extract_strided_slice %12 {offsets = [32, 0], sizes = [32, 1], strides = [1, 1]} : vector<128x1xf32> to vector<32x1xf32>
    %17 = arith.addf %15, %16 : vector<32x1xf32>
    %18 = vector.extract_strided_slice %12 {offsets = [64, 0], sizes = [32, 1], strides = [1, 1]} : vector<128x1xf32> to vector<32x1xf32>
    %19 = arith.addf %17, %18 : vector<32x1xf32>
    %20 = vector.extract_strided_slice %12 {offsets = [96, 0], sizes = [32, 1], strides = [1, 1]} : vector<128x1xf32> to vector<32x1xf32>
    %21 = arith.addf %19, %20 : vector<32x1xf32>
    %cst_8 = arith.constant 6.480000e+02 : f32
    %22 = vector.broadcast %cst_8 : f32 to vector<32x1xf32>
    %23 = arith.divf %21, %22 : vector<32x1xf32>
    %24 = tpu.concatenate %23, %23, %23, %23 in 0 : vector<32x1xf32>, vector<32x1xf32>, vector<32x1xf32>, vector<32x1xf32> -> vector<128x1xf32>
    %25 = vector.broadcast %24 : vector<128x1xf32> to vector<128x256xf32>
    %26 = arith.subf %5, %25 : vector<128x256xf32>
    %cst_9 = arith.constant 0.000000e+00 : f32
    %27 = vector.broadcast %cst_9 : f32 to vector<128x256xf32>
    %28 = arith.select %8, %26, %27 : vector<128x256xi1>, vector<128x256xf32>
    %29 = arith.mulf %28, %28 : vector<128x256xf32>
    %cst_10 = arith.constant dense<0.000000e+00> : vector<128xf32>
    %30 = vector.multi_reduction <add>, %29, %cst_10 [1] : vector<128x256xf32> to vector<128xf32>
    %31 = vector.shape_cast %30 : vector<128xf32> to vector<128x1xf32>
    %32 = vector.extract_strided_slice %31 {offsets = [0, 0], sizes = [32, 1], strides = [1, 1]} : vector<128x1xf32> to vector<32x1xf32>
    %cst_11 = arith.constant 0.000000e+00 : f32
    %33 = vector.broadcast %cst_11 : f32 to vector<32x1xf32>
    %34 = arith.addf %33, %32 : vector<32x1xf32>
    %35 = vector.extract_strided_slice %31 {offsets = [32, 0], sizes = [32, 1], strides = [1, 1]} : vector<128x1xf32> to vector<32x1xf32>
    %36 = arith.addf %34, %35 : vector<32x1xf32>
    %37 = vector.extract_strided_slice %31 {offsets = [64, 0], sizes = [32, 1], strides = [1, 1]} : vector<128x1xf32> to vector<32x1xf32>
    %38 = arith.addf %36, %37 : vector<32x1xf32>
    %39 = vector.extract_strided_slice %31 {offsets = [96, 0], sizes = [32, 1], strides = [1, 1]} : vector<128x1xf32> to vector<32x1xf32>
    %40 = arith.addf %38, %39 : vector<32x1xf32>
    %cst_12 = arith.constant 6.480000e+02 : f32
    %41 = vector.broadcast %cst_12 : f32 to vector<32x1xf32>
    %42 = arith.divf %40, %41 : vector<32x1xf32>
    %c0_13 = arith.constant 0 : index
    %c0_14 = arith.constant 0 : index
    %43 = vector.load %arg4[%c0_13, %c0_14] : memref<32x1xf32, #tpu.memory_space<vmem>>, vector<32x1xf32>
    %cst_15 = arith.constant 9.99999974E-6 : f32
    %44 = vector.broadcast %cst_15 : f32 to vector<32x1xf32>
    %45 = arith.addf %42, %44 : vector<32x1xf32>
    %46 = math.rsqrt %45 : vector<32x1xf32>
    %47 = arith.mulf %43, %46 : vector<32x1xf32>
    %c0_16 = arith.constant 0 : index
    %c0_17 = arith.constant 0 : index
    %48 = vector.load %arg5[%c0_16, %c0_17] : memref<32x1xf32, #tpu.memory_space<vmem>>, vector<32x1xf32>
    %49 = arith.mulf %23, %47 : vector<32x1xf32>
    %50 = arith.subf %48, %49 : vector<32x1xf32>
    %51 = tpu.concatenate %47, %47, %47, %47 in 0 : vector<32x1xf32>, vector<32x1xf32>, vector<32x1xf32>, vector<32x1xf32> -> vector<128x1xf32>
    %52 = tpu.concatenate %50, %50, %50, %50 in 0 : vector<32x1xf32>, vector<32x1xf32>, vector<32x1xf32>, vector<32x1xf32> -> vector<128x1xf32>
    %53 = vector.broadcast %51 : vector<128x1xf32> to vector<128x256xf32>
    %54 = arith.mulf %5, %53 : vector<128x256xf32>
    %55 = vector.broadcast %52 : vector<128x1xf32> to vector<128x256xf32>
    %56 = arith.addf %54, %55 : vector<128x256xf32>
    %cst_18 = arith.constant 0.000000e+00 : f32
    %57 = vector.broadcast %cst_18 : f32 to vector<128x256xf32>
    %58 = arith.maximumf %56, %57 : vector<128x256xf32>
    %c0_19 = arith.constant 0 : index
    %c0_20 = arith.constant 0 : index
    %59 = vector.load %arg6[%c0_19, %c0_20] : memref<128x256xf32, #tpu.memory_space<vmem>>, vector<128x256xf32>
    tpu.vector_store %arg6[%c0_19, %c0_20], %58 {strides = array<i32>} : memref<128x256xf32, #tpu.memory_space<vmem>>, vector<128x256xf32>,
    return
  }
  func.func @transform_0(%arg0: i32) -> (i32, i32) {
    %c0_i32 = arith.constant 0 : i32
    %c0_i32_0 = arith.constant 0 : i32
    %c0_i32_1 = arith.constant 0 : i32
    return %c0_i32, %c0_i32_0 : i32, i32
  }
  func.func @transform_1(%arg0: i32) -> (i32, i32) {
    %c0_i32 = arith.constant 0 : i32
    %c0_i32_0 = arith.constant 0 : i32
    %c0_i32_1 = arith.constant 0 : i32
    return %c0_i32, %c0_i32_0 : i32, i32
  }
  func.func @transform_2(%arg0: i32) -> (i32, i32) {
    %c0_i32 = arith.constant 0 : i32
    %c0_i32_0 = arith.constant 0 : i32
    %c0_i32_1 = arith.constant 0 : i32
    return %c0_i32, %c0_i32_0 : i32, i32
  }
  func.func @transform_3(%arg0: i32) -> (i32, i32) {
    %c0_i32 = arith.constant 0 : i32
    %c0_i32_0 = arith.constant 0 : i32
    %c0_i32_1 = arith.constant 0 : i32
    return %c0_i32, %c0_i32_0 : i32, i32
  }
  func.func @transform_4(%arg0: i32) -> (i32, i32) {
    %c0_i32 = arith.constant 0 : i32
    %c0_i32_0 = arith.constant 0 : i32
    %c0_i32_1 = arith.constant 0 : i32
    return %c0_i32, %c0_i32_0 : i32, i32
  }
  func.func @transform_5(%arg0: i32) -> (i32, i32) {
    %c0_i32 = arith.constant 0 : i32
    %c0_i32_0 = arith.constant 0 : i32
    %c0_i32_1 = arith.constant 0 : i32
    return %c0_i32, %c0_i32_0 : i32, i32
  }
}

module attributes {stable_mosaic.version = 11 : i64} {
  func.func @_deconv_bn_act_t_kernel(%arg0: i32, %arg1: memref<8x128xf32, #tpu.memory_space<vmem>>, %arg2: memref<128x768xf32, #tpu.memory_space<vmem>>, %arg3: memref<8x1xf32, #tpu.memory_space<vmem>>, %arg4: memref<2x1xf32, #tpu.memory_space<vmem>>, %arg5: memref<2x1xf32, #tpu.memory_space<vmem>>, %arg6: memref<8x768xf32, #tpu.memory_space<vmem>>) attributes {dimension_semantics = [#tpu.dimension_semantics<arbitrary>], iteration_bounds = array<i64: 1>, scalar_prefetch = 0 : i64, scratch_operands = 0 : i64, tpu.core_type = #tpu.core_type<tc>, window_params = [{pipeline_mode = #tpu.pipeline_mode<synchronous>, transform_indices = @transform_0, window_bounds = array<i64: 8, 128>}, {pipeline_mode = #tpu.pipeline_mode<synchronous>, transform_indices = @transform_1, window_bounds = array<i64: 128, 768>}, {pipeline_mode = #tpu.pipeline_mode<synchronous>, transform_indices = @transform_2, window_bounds = array<i64: 8, 1>}, {pipeline_mode = #tpu.pipeline_mode<synchronous>, transform_indices = @transform_3, window_bounds = array<i64: 2, 1>}, {pipeline_mode = #tpu.pipeline_mode<synchronous>, transform_indices = @transform_4, window_bounds = array<i64: 2, 1>}, {pipeline_mode = #tpu.pipeline_mode<synchronous>, transform_indices = @transform_5, window_bounds = array<i64: 8, 768>}]} {
    %c0 = arith.constant 0 : index
    %c0_0 = arith.constant 0 : index
    %0 = vector.load %arg1[%c0, %c0_0] : memref<8x128xf32, #tpu.memory_space<vmem>>, vector<8x128xf32>
    %c0_1 = arith.constant 0 : index
    %c0_2 = arith.constant 0 : index
    %1 = vector.load %arg2[%c0_1, %c0_2] : memref<128x768xf32, #tpu.memory_space<vmem>>, vector<128x768xf32>
    %cst = arith.constant dense<0.000000e+00> : vector<8x768xf32>
    %2 = tpu.matmul %0, %1, %cst {dimension_numbers = #tpu.dot_dimension_numbers<[1], [0], [0], [1], [0, 0, 1, 1], [], []>} : vector<8x128xf32>, vector<128x768xf32>, vector<8x768xf32> -> vector<8x768xf32>
    %c0_3 = arith.constant 0 : index
    %c0_4 = arith.constant 0 : index
    %3 = vector.load %arg3[%c0_3, %c0_4] : memref<8x1xf32, #tpu.memory_space<vmem>>, vector<8x1xf32>
    %4 = vector.broadcast %3 : vector<8x1xf32> to vector<8x768xf32>
    %5 = arith.addf %2, %4 : vector<8x768xf32>
    %6 = tpu.iota {dimensions = array<i32: 1>} : vector<8x768xi32>
    %c722_i32 = arith.constant 722 : i32
    %7 = vector.broadcast %c722_i32 : i32 to vector<8x768xi32>
    %8 = arith.cmpi slt, %6, %7 : vector<8x768xi32>
    %cst_5 = arith.constant 0.000000e+00 : f32
    %9 = vector.broadcast %cst_5 : f32 to vector<8x768xf32>
    %10 = arith.select %8, %5, %9 : vector<8x768xi1>, vector<8x768xf32>
    %cst_6 = arith.constant dense<0.000000e+00> : vector<8xf32>
    %11 = vector.multi_reduction <add>, %10, %cst_6 [1] : vector<8x768xf32> to vector<8xf32>
    %12 = vector.shape_cast %11 : vector<8xf32> to vector<8x1xf32>
    %13 = vector.extract_strided_slice %12 {offsets = [0, 0], sizes = [2, 1], strides = [1, 1]} : vector<8x1xf32> to vector<2x1xf32>
    %cst_7 = arith.constant 0.000000e+00 : f32
    %14 = vector.broadcast %cst_7 : f32 to vector<2x1xf32>
    %15 = arith.addf %14, %13 : vector<2x1xf32>
    %16 = vector.extract_strided_slice %12 {offsets = [2, 0], sizes = [2, 1], strides = [1, 1]} : vector<8x1xf32> to vector<2x1xf32>
    %17 = arith.addf %15, %16 : vector<2x1xf32>
    %18 = vector.extract_strided_slice %12 {offsets = [4, 0], sizes = [2, 1], strides = [1, 1]} : vector<8x1xf32> to vector<2x1xf32>
    %19 = arith.addf %17, %18 : vector<2x1xf32>
    %20 = vector.extract_strided_slice %12 {offsets = [6, 0], sizes = [2, 1], strides = [1, 1]} : vector<8x1xf32> to vector<2x1xf32>
    %21 = arith.addf %19, %20 : vector<2x1xf32>
    %cst_8 = arith.constant 2.888000e+03 : f32
    %22 = vector.broadcast %cst_8 : f32 to vector<2x1xf32>
    %23 = arith.divf %21, %22 : vector<2x1xf32>
    %24 = tpu.concatenate %23, %23, %23, %23 in 0 : vector<2x1xf32>, vector<2x1xf32>, vector<2x1xf32>, vector<2x1xf32> -> vector<8x1xf32>
    %25 = vector.broadcast %24 : vector<8x1xf32> to vector<8x768xf32>
    %26 = arith.subf %5, %25 : vector<8x768xf32>
    %cst_9 = arith.constant 0.000000e+00 : f32
    %27 = vector.broadcast %cst_9 : f32 to vector<8x768xf32>
    %28 = arith.select %8, %26, %27 : vector<8x768xi1>, vector<8x768xf32>
    %29 = arith.mulf %28, %28 : vector<8x768xf32>
    %cst_10 = arith.constant dense<0.000000e+00> : vector<8xf32>
    %30 = vector.multi_reduction <add>, %29, %cst_10 [1] : vector<8x768xf32> to vector<8xf32>
    %31 = vector.shape_cast %30 : vector<8xf32> to vector<8x1xf32>
    %32 = vector.extract_strided_slice %31 {offsets = [0, 0], sizes = [2, 1], strides = [1, 1]} : vector<8x1xf32> to vector<2x1xf32>
    %cst_11 = arith.constant 0.000000e+00 : f32
    %33 = vector.broadcast %cst_11 : f32 to vector<2x1xf32>
    %34 = arith.addf %33, %32 : vector<2x1xf32>
    %35 = vector.extract_strided_slice %31 {offsets = [2, 0], sizes = [2, 1], strides = [1, 1]} : vector<8x1xf32> to vector<2x1xf32>
    %36 = arith.addf %34, %35 : vector<2x1xf32>
    %37 = vector.extract_strided_slice %31 {offsets = [4, 0], sizes = [2, 1], strides = [1, 1]} : vector<8x1xf32> to vector<2x1xf32>
    %38 = arith.addf %36, %37 : vector<2x1xf32>
    %39 = vector.extract_strided_slice %31 {offsets = [6, 0], sizes = [2, 1], strides = [1, 1]} : vector<8x1xf32> to vector<2x1xf32>
    %40 = arith.addf %38, %39 : vector<2x1xf32>
    %cst_12 = arith.constant 2.888000e+03 : f32
    %41 = vector.broadcast %cst_12 : f32 to vector<2x1xf32>
    %42 = arith.divf %40, %41 : vector<2x1xf32>
    %c0_13 = arith.constant 0 : index
    %c0_14 = arith.constant 0 : index
    %43 = vector.load %arg4[%c0_13, %c0_14] : memref<2x1xf32, #tpu.memory_space<vmem>>, vector<2x1xf32>
    %cst_15 = arith.constant 9.99999974E-6 : f32
    %44 = vector.broadcast %cst_15 : f32 to vector<2x1xf32>
    %45 = arith.addf %42, %44 : vector<2x1xf32>
    %46 = math.rsqrt %45 : vector<2x1xf32>
    %47 = arith.mulf %43, %46 : vector<2x1xf32>
    %c0_16 = arith.constant 0 : index
    %c0_17 = arith.constant 0 : index
    %48 = vector.load %arg5[%c0_16, %c0_17] : memref<2x1xf32, #tpu.memory_space<vmem>>, vector<2x1xf32>
    %49 = arith.mulf %23, %47 : vector<2x1xf32>
    %50 = arith.subf %48, %49 : vector<2x1xf32>
    %51 = tpu.concatenate %47, %47, %47, %47 in 0 : vector<2x1xf32>, vector<2x1xf32>, vector<2x1xf32>, vector<2x1xf32> -> vector<8x1xf32>
    %52 = tpu.concatenate %50, %50, %50, %50 in 0 : vector<2x1xf32>, vector<2x1xf32>, vector<2x1xf32>, vector<2x1xf32> -> vector<8x1xf32>
    %53 = vector.broadcast %51 : vector<8x1xf32> to vector<8x768xf32>
    %54 = arith.mulf %5, %53 : vector<8x768xf32>
    %55 = vector.broadcast %52 : vector<8x1xf32> to vector<8x768xf32>
    %56 = arith.addf %54, %55 : vector<8x768xf32>
    %cst_18 = arith.constant 0.000000e+00 : f32
    %57 = vector.broadcast %cst_18 : f32 to vector<8x768xf32>
    %58 = arith.maximumf %56, %57 : vector<8x768xf32>
    %c0_19 = arith.constant 0 : index
    %c0_20 = arith.constant 0 : index
    %59 = vector.load %arg6[%c0_19, %c0_20] : memref<8x768xf32, #tpu.memory_space<vmem>>, vector<8x768xf32>
    tpu.vector_store %arg6[%c0_19, %c0_20], %58 {strides = array<i32>} : memref<8x768xf32, #tpu.memory_space<vmem>>, vector<8x768xf32>,
    return
  }
  func.func @transform_0(%arg0: i32) -> (i32, i32) {
    %c0_i32 = arith.constant 0 : i32
    %c0_i32_0 = arith.constant 0 : i32
    %c0_i32_1 = arith.constant 0 : i32
    return %c0_i32, %c0_i32_0 : i32, i32
  }
  func.func @transform_1(%arg0: i32) -> (i32, i32) {
    %c0_i32 = arith.constant 0 : i32
    %c0_i32_0 = arith.constant 0 : i32
    %c0_i32_1 = arith.constant 0 : i32
    return %c0_i32, %c0_i32_0 : i32, i32
  }
  func.func @transform_2(%arg0: i32) -> (i32, i32) {
    %c0_i32 = arith.constant 0 : i32
    %c0_i32_0 = arith.constant 0 : i32
    %c0_i32_1 = arith.constant 0 : i32
    return %c0_i32, %c0_i32_0 : i32, i32
  }
  func.func @transform_3(%arg0: i32) -> (i32, i32) {
    %c0_i32 = arith.constant 0 : i32
    %c0_i32_0 = arith.constant 0 : i32
    %c0_i32_1 = arith.constant 0 : i32
    return %c0_i32, %c0_i32_0 : i32, i32
  }
  func.func @transform_4(%arg0: i32) -> (i32, i32) {
    %c0_i32 = arith.constant 0 : i32
    %c0_i32_0 = arith.constant 0 : i32
    %c0_i32_1 = arith.constant 0 : i32
    return %c0_i32, %c0_i32_0 : i32, i32
  }
  func.func @transform_5(%arg0: i32) -> (i32, i32) {
    %c0_i32 = arith.constant 0 : i32
    %c0_i32_0 = arith.constant 0 : i32
    %c0_i32_1 = arith.constant 0 : i32
    return %c0_i32, %c0_i32_0 : i32, i32
  }
}

module attributes {stable_mosaic.version = 11 : i64} {
  func.func @_gemm_bias_act_t_kernel(%arg0: i32, %arg1: memref<1x32xf32, #tpu.memory_space<vmem>>, %arg2: memref<32x2560xf32, #tpu.memory_space<vmem>>, %arg3: memref<1x1xf32, #tpu.memory_space<vmem>>, %arg4: memref<1x2560xf32, #tpu.memory_space<vmem>>) attributes {dimension_semantics = [#tpu.dimension_semantics<arbitrary>], iteration_bounds = array<i64: 1>, scalar_prefetch = 0 : i64, scratch_operands = 0 : i64, tpu.core_type = #tpu.core_type<tc>, window_params = [{pipeline_mode = #tpu.pipeline_mode<synchronous>, transform_indices = @transform_0, window_bounds = array<i64: 1, 32>}, {pipeline_mode = #tpu.pipeline_mode<synchronous>, transform_indices = @transform_1, window_bounds = array<i64: 32, 2560>}, {pipeline_mode = #tpu.pipeline_mode<synchronous>, transform_indices = @transform_2, window_bounds = array<i64: 1, 1>}, {pipeline_mode = #tpu.pipeline_mode<synchronous>, transform_indices = @transform_3, window_bounds = array<i64: 1, 2560>}]} {
    %c0 = arith.constant 0 : index
    %c0_0 = arith.constant 0 : index
    %0 = vector.load %arg1[%c0, %c0_0] : memref<1x32xf32, #tpu.memory_space<vmem>>, vector<1x32xf32>
    %c0_1 = arith.constant 0 : index
    %c0_2 = arith.constant 0 : index
    %1 = vector.load %arg2[%c0_1, %c0_2] : memref<32x2560xf32, #tpu.memory_space<vmem>>, vector<32x2560xf32>
    %cst = arith.constant dense<0.000000e+00> : vector<1x2560xf32>
    %2 = tpu.matmul %0, %1, %cst {dimension_numbers = #tpu.dot_dimension_numbers<[1], [0], [0], [1], [0, 0, 1, 1], [], []>} : vector<1x32xf32>, vector<32x2560xf32>, vector<1x2560xf32> -> vector<1x2560xf32>
    %c0_3 = arith.constant 0 : index
    %c0_4 = arith.constant 0 : index
    %3 = vector.load %arg3[%c0_3, %c0_4] : memref<1x1xf32, #tpu.memory_space<vmem>>, vector<1x1xf32>
    %4 = vector.broadcast %3 : vector<1x1xf32> to vector<1x2560xf32>
    %5 = arith.addf %2, %4 : vector<1x2560xf32>
    %cst_5 = arith.constant 0.000000e+00 : f32
    %6 = vector.broadcast %cst_5 : f32 to vector<1x2560xf32>
    %7 = arith.subf %6, %5 : vector<1x2560xf32>
    %8 = math.exp %7 : vector<1x2560xf32>
    %cst_6 = arith.constant 1.000000e+00 : f32
    %9 = vector.broadcast %cst_6 : f32 to vector<1x2560xf32>
    %10 = arith.addf %9, %8 : vector<1x2560xf32>
    %11 = tpu.reciprocal %10 {approx = true} : vector<1x2560xf32> -> vector<1x2560xf32>
    %cst_7 = arith.constant 0.000000e+00 : f32
    %cst_8 = arith.constant 1.000000e+00 : f32
    %12 = vector.broadcast %cst_7 : f32 to vector<1x2560xf32>
    %13 = arith.maximumf %12, %11 : vector<1x2560xf32>
    %14 = vector.broadcast %cst_8 : f32 to vector<1x2560xf32>
    %15 = arith.minimumf %14, %13 : vector<1x2560xf32>
    %c0_9 = arith.constant 0 : index
    %c0_10 = arith.constant 0 : index
    %16 = vector.load %arg4[%c0_9, %c0_10] : memref<1x2560xf32, #tpu.memory_space<vmem>>, vector<1x2560xf32>
    tpu.vector_store %arg4[%c0_9, %c0_10], %15 {strides = array<i32>} : memref<1x2560xf32, #tpu.memory_space<vmem>>, vector<1x2560xf32>,
    return
  }
  func.func @transform_0(%arg0: i32) -> (i32, i32) {
    %c0_i32 = arith.constant 0 : i32
    %c0_i32_0 = arith.constant 0 : i32
    %c0_i32_1 = arith.constant 0 : i32
    return %c0_i32, %c0_i32_0 : i32, i32
  }
  func.func @transform_1(%arg0: i32) -> (i32, i32) {
    %c0_i32 = arith.constant 0 : i32
    %c0_i32_0 = arith.constant 0 : i32
    %c0_i32_1 = arith.constant 0 : i32
    return %c0_i32, %c0_i32_0 : i32, i32
  }
  func.func @transform_2(%arg0: i32) -> (i32, i32) {
    %c0_i32 = arith.constant 0 : i32
    %c0_i32_0 = arith.constant 0 : i32
    %c0_i32_1 = arith.constant 0 : i32
    return %c0_i32, %c0_i32_0 : i32, i32
  }
  func.func @transform_3(%arg0: i32) -> (i32, i32) {
    %c0_i32 = arith.constant 0 : i32
    %c0_i32_0 = arith.constant 0 : i32
    %c0_i32_1 = arith.constant 0 : i32
    return %c0_i32, %c0_i32_0 : i32, i32
  }
}

</mosaic_0001>

<bundles_post_ra>
// kernel: encoder_decoder_forward.8
= control target key start
LH: loop header
LB: loop body
LE: loop exit
PB: predicated region body
PF: predicated region fallthrough
CT: control target
= control target key end

     0   :  { %v345_v3 = vmov 0.0   ;;  %v346_v8 = vmov 0   ;;  %vm58_vm0 = vcmask 261120   ;;  %s495_s1 = inlined_call_operand.vmem [shape: f32[32,512], index: 1, kind: input, shape index: {}]   ;;  %s496_s2 = inlined_call_operand.vmem [shape: f32[32,1], index: 2, kind: input, shape index: {}]   ;;  %s497_s0 = inlined_call_operand.vmem [shape: f32[32,32], index: 0, kind: input, shape index: {}]   ;;  %s498_s3 = inlined_call_operand.vmem [shape: f32[32,512], index: 3, kind: output, shape index: {}]  }
   0x1   :  { %v19_v0 = vld [vmem:[%s495_s1 + $0x8] sm:$0xff]  ;;  %v21_v2 = vld [vmem:[%s495_s1 + $0x18] sm:$0xff]  ;;  %135 = vmatprep.mubr.f32.mxu0 %v345_v3  ;;  %224 = vmatprep.mubr.f32.mxu1 %v345_v3  ;;  %v18_v6 = vld [vmem:[%s495_s1] sm:$0xff] }
   0x2   :  { %v23_v1 = vld [vmem:[%s495_s1 + $0x28] sm:$0xff]  ;;  %v25_v5 = vld [vmem:[%s495_s1 + $0x38] sm:$0xff]  ;;  %v22_v7 = vld [vmem:[%s495_s1 + $0x20] sm:$0xff]  ;;  %343 = vset.pattern.permute.xlu0 %v346_v8  ;;  %344 = vset.pattern.permute.xlu1 %v346_v8 }
   0x3   :  { %v325_v4 = vpack.c.bf16 %v23_v1, %v19_v0  ;;  %v333_v9 = vpack.c.bf16 %v25_v5, %v21_v2  ;;  %v327_v10 = vpack.c.bf16 %v22_v7, %v18_v6  ;;  %v20_v11 = vld [vmem:[%s495_s1 + $0x10] sm:$0xff]  ;;  %v27_v13 = vld [vmem:[%s495_s1 + $0x48] sm:$0xff]  ;;  %v29_v16 = vld [vmem:[%s495_s1 + $0x58] sm:$0xff] }
   0x4   :  { %v24_v12 = vld [vmem:[%s495_s1 + $0x30] sm:$0xff]  ;;  %v31_v15 = vld [vmem:[%s495_s1 + $0x68] sm:$0xff]  ;;  %v33_v17 = vld [vmem:[%s495_s1 + $0x78] sm:$0xff] }
   0x5   :  { %326 = vmatprep.subr.bf16.mxu0 %v325_v4  ;;  %v335_v14 = vpack.c.bf16 %v24_v12, %v20_v11  ;;  %334 = vmatprep.subr.bf16.mxu1 %v333_v9  ;;  %v329_v18 = vpack.c.bf16 %v31_v15, %v27_v13  ;;  %v337_v19 = vpack.c.bf16 %v33_v17, %v29_v16  ;;  %v26_v20 = vld [vmem:[%s495_s1 + $0x40] sm:$0xff]  ;;  %v28_v22 = vld [vmem:[%s495_s1 + $0x50] sm:$0xff]  ;;  %v35_v29 = vld [vmem:[%s496_s2 + $0x8] sm:$0xff] }
   0x6   :  { %328 = vmatpush1.bf16.msra.mxu0 %v327_v10  ;;  %v30_v21 = vld [vmem:[%s495_s1 + $0x60] sm:$0xff]  ;;  %v32_v24 = vld [vmem:[%s495_s1 + $0x70] sm:$0xff]  ;;  %v37_v30 = vld [vmem:[%s496_s2 + $0x18] sm:$0xff] }
   0x7   :  { %336 = vmatpush1.bf16.msra.mxu1 %v335_v14  ;;  %v331_v23 = vpack.c.bf16 %v30_v21, %v26_v20  ;;  %330 = vmatprep.subr.bf16.mxu0 %v329_v18  ;;  %v339_v25 = vpack.c.bf16 %v32_v24, %v28_v22  ;;  %v34_v26 = vld [vmem:[%s496_s2] sm:$0xff]  ;;  %v36_v27 = vld [vmem:[%s496_s2 + $0x10] sm:$0xff]  ;;  %v15_v31 = vld [vmem:[%s497_s0 + $0x8] sm:$0xff] }
   0x8   :  { %338 = vmatprep.subr.bf16.mxu1 %v337_v19  ;;  %40 = vperm.xlu0 %343, %v34_v26   ;;  %v14_v28 = vld [vmem:[%s497_s0] sm:$0xff]  ;;  %v16_v32 = vld [vmem:[%s497_s0 + $0x10] sm:$0xff]  ;;  %v17_v33 = vld [vmem:[%s497_s0 + $0x18] sm:$0xff] }
   0x9   :  { %50 = vperm.xlu1 %344, %v36_v27  }
   0xa   :  { %332 = vmatpush1.bf16.msra.mxu0 %v331_v23 }
   0xb   :  { %340 = vmatpush1.bf16.msra.mxu1 %v339_v25 }
   0xc   :  { %45 = vperm.xlu0 %343, %v35_v29  }
   0xd   :  { %317 = vmatmul.mubr.msk.f32.vlgmr.msra.gmra.mrb[0].mxu0 %vm58_vm0, %v14_v28  ;;  %55 = vperm.xlu1 %344, %v37_v30  }
   0xe   :  { %321 = vmatmul.mubr.msk.f32.vlgmr.msra.gmra.mrb[0].mxu1 %vm58_vm0, %v14_v28  ;;  %141 = vmatprep.mubr.f32.mxu0 %v345_v3 }
   0xf   :  { %230 = vmatprep.mubr.f32.mxu1 %v345_v3 }
  0x11   :  { %318 = vmatmul.mubr.msk.f32.gmra.mrb[2].mxu0 %vm58_vm0, %v15_v31 }
  0x12   :  { %322 = vmatmul.mubr.msk.f32.gmra.mrb[2].mxu1 %vm58_vm0, %v15_v31  ;;  %147 = vmatprep.mubr.f32.mxu0 %v345_v3 }
  0x13   :  { %236 = vmatprep.mubr.f32.mxu1 %v345_v3 }
  0x15   :  { %319 = vmatmul.mubr.msk.f32.gmra.mrb[4].mxu0 %vm58_vm0, %v16_v32 }
  0x16   :  { %323 = vmatmul.mubr.msk.f32.gmra.mrb[4].mxu1 %vm58_vm0, %v16_v32  ;;  %153 = vmatprep.mubr.f32.mxu0 %v345_v3 }
  0x17   :  { %242 = vmatprep.mubr.f32.mxu1 %v345_v3 }
  0x19   :  { %320 = vmatmul.mubr.msk.f32.gmra.mrb[6].mxu0 %vm58_vm0, %v17_v33 }
  0x1a   :  { %324 = vmatmul.mubr.msk.f32.gmra.mrb[6].mxu1 %vm58_vm0, %v17_v33 }
  0x87   :  { %v41_v34 = vpop.permute.xlu0 %40 }
  0x88   :  { %v51_v62 = vpop.permute.xlu1 %50 }
  0x8b   :  { %v46_v44 = vpop.permute.xlu0 %45 }
  0x8c   :  { %v56_v16 = vpop.permute.xlu1 %55 }
  0xe0   :  { %v137_v35 = vpop.f32.mrb[0].mxu0 }
  0xe1   :  { %v138_v36 = vadd.f32 %v137_v35, %v41_v34  ;;  %v226_v37 = vpop.f32.mrb[0].mxu1  ;;  %v139_v38 = vpop.f32.mrb[1].mxu0 }
  0xe2   :  { %v227_v39 = vadd.f32 %v226_v37, %v41_v34  ;;  %v140_v40 = vadd.f32 %v139_v38, %v41_v34  ;;  %v228_v41 = vpop.f32.mrb[1].mxu1 }
  0xe3   :  { %vm249_vm1 = vcmp.ge.f32.partialorder %v138_v36, 0.0  ;;  %v265_v42 = vmul.f32 0.2, %v138_v36  ;;  %v229_v43 = vadd.f32 %v228_v41, %v41_v34 }
  0xe4   :  { %vm251_vm2 = vcmp.ge.f32.partialorder %v227_v39, 0.0  ;;  %v267_v45 = vmul.f32 0.2, %v227_v39  ;;  %vm250_vm3 = vcmp.ge.f32.partialorder %v140_v40, 0.0  ;;  %v266_v46 = vmul.f32 0.2, %v140_v40 }
  0xe5   :  { %v281_v47 = vsel %vm249_vm1, %v138_v36, %v265_v42  ;;  %vm252_vm4 = vcmp.ge.f32.partialorder %v229_v43, 0.0  ;;  %v268_v48 = vmul.f32 0.2, %v229_v43  ;;  %v143_v49 = vpop.f32.mrb[2].mxu0  ;;  %v232_v50 = vpop.f32.mrb[2].mxu1 }
  0xe6   :  { %297 = vst [vmem:[%s498_s3] sm:$0xff] %v281_v47  ;;  %v283_v51 = vsel %vm251_vm2, %v227_v39, %v267_v45  ;;  %v282_v52 = vsel %vm250_vm3, %v140_v40, %v266_v46  ;;  %v144_v53 = vadd.f32 %v143_v49, %v46_v44  ;;  %v233_v54 = vadd.f32 %v232_v50, %v46_v44  ;;  %v145_v55 = vpop.f32.mrb[3].mxu0  ;;  %v234_v56 = vpop.f32.mrb[3].mxu1 }
  0xe7   :  { %299 = vst [vmem:[%s498_s3 + $0x10] sm:$0xff] %v283_v51  ;;  %298 = vst [vmem:[%s498_s3 + $0x8] sm:$0xff] %v282_v52  ;;  %v284_v57 = vsel %vm252_vm4, %v229_v43, %v268_v48  ;;  %v146_v58 = vadd.f32 %v145_v55, %v46_v44  ;;  %v235_v59 = vadd.f32 %v234_v56, %v46_v44 }
  0xe8   :  { %300 = vst [vmem:[%s498_s3 + $0x18] sm:$0xff] %v284_v57  ;;  %vm253_vm5 = vcmp.ge.f32.partialorder %v144_v53, 0.0  ;;  %v269_v60 = vmul.f32 0.2, %v144_v53  ;;  %vm255_vm6 = vcmp.ge.f32.partialorder %v233_v54, 0.0  ;;  %v149_v3 = vpop.f32.mrb[4].mxu0 }
  0xe9   :  { %v271_v61 = vmul.f32 0.2, %v233_v54  ;;  %vm254_vm7 = vcmp.ge.f32.partialorder %v146_v58, 0.0  ;;  %v270_v63 = vmul.f32 0.2, %v146_v58  ;;  %vm256_vm8 = vcmp.ge.f32.partialorder %v235_v59, 0.0 }
  0xea   :  { %v272_v0 = vmul.f32 0.2, %v235_v59  ;;  %v285_v1 = vsel %vm253_vm5, %v144_v53, %v269_v60  ;;  %v238_v4 = vpop.f32.mrb[4].mxu1  ;;  %v150_v7 = vadd.f32 %v149_v3, %v51_v62  ;;  %v151_v9 = vpop.f32.mrb[5].mxu0 }
  0xeb   :  { %v287_v2 = vsel %vm255_vm6, %v233_v54, %v271_v61  ;;  %301 = vst [vmem:[%s498_s3 + $0x20] sm:$0xff] %v285_v1  ;;  %v286_v5 = vsel %vm254_vm7, %v146_v58, %v270_v63  ;;  %v239_v8 = vadd.f32 %v238_v4, %v51_v62  ;;  %v240_v10 = vpop.f32.mrb[5].mxu1  ;;  %v152_v11 = vadd.f32 %v151_v9, %v51_v62 }
  0xec   :  { %303 = vst [vmem:[%s498_s3 + $0x30] sm:$0xff] %v287_v2  ;;  %v288_v6 = vsel %vm256_vm8, %v235_v59, %v272_v0  ;;  %302 = vst [vmem:[%s498_s3 + $0x28] sm:$0xff] %v286_v5  ;;  %v241_v12 = vadd.f32 %v240_v10, %v51_v62  ;;  %v155_v13 = vpop.f32.mrb[6].mxu0  ;;  %vm257_vm9 = vcmp.ge.f32.partialorder %v150_v7, 0.0  ;;  %v273_v14 = vmul.f32 0.2, %v150_v7 }
  0xed   :  { %304 = vst [vmem:[%s498_s3 + $0x38] sm:$0xff] %v288_v6  ;;  %vm259_vm10 = vcmp.ge.f32.partialorder %v239_v8, 0.0  ;;  %v275_v15 = vmul.f32 0.2, %v239_v8  ;;  %vm258_vm11 = vcmp.ge.f32.partialorder %v152_v11, 0.0  ;;  %v156_v21 = vadd.f32 %v155_v13, %v56_v16  ;;  %v244_v22 = vpop.f32.mrb[6].mxu1 }
  0xee   :  { %v274_v17 = vmul.f32 0.2, %v152_v11  ;;  %vm260_vm12 = vcmp.ge.f32.partialorder %v241_v12, 0.0  ;;  %v276_v18 = vmul.f32 0.2, %v241_v12  ;;  %v289_v19 = vsel %vm257_vm9, %v150_v7, %v273_v14  ;;  %v157_v23 = vpop.f32.mrb[7].mxu0 }
  0xef   :  { %v291_v20 = vsel %vm259_vm10, %v239_v8, %v275_v15  ;;  %305 = vst [vmem:[%s498_s3 + $0x40] sm:$0xff] %v289_v19  ;;  %v245_v26 = vadd.f32 %v244_v22, %v56_v16  ;;  %v158_v27 = vadd.f32 %v157_v23, %v56_v16  ;;  %v246_v28 = vpop.f32.mrb[7].mxu1  ;;  %vm261_vm13 = vcmp.ge.f32.partialorder %v156_v21, 0.0 }
  0xf0   :  { %307 = vst [vmem:[%s498_s3 + $0x50] sm:$0xff] %v291_v20  ;;  %v290_v24 = vsel %vm258_vm11, %v152_v11, %v274_v17  ;;  %v292_v25 = vsel %vm260_vm12, %v241_v12, %v276_v18  ;;  %v277_v29 = vmul.f32 0.2, %v156_v21  ;;  %v247_v30 = vadd.f32 %v246_v28, %v56_v16 }
  0xf1   :  { %306 = vst [vmem:[%s498_s3 + $0x48] sm:$0xff] %v290_v24  ;;  %308 = vst [vmem:[%s498_s3 + $0x58] sm:$0xff] %v292_v25  ;;  %vm263_vm14 = vcmp.ge.f32.partialorder %v245_v26, 0.0  ;;  %v279_v31 = vmul.f32 0.2, %v245_v26  ;;  %vm262_vm15 = vcmp.ge.f32.partialorder %v158_v27, 0.0 }
  0xf2   :  { %v278_v32 = vmul.f32 0.2, %v158_v27  ;;  %v293_v33 = vsel %vm261_vm13, %v156_v21, %v277_v29  ;;  %vm264_vm0 = vcmp.ge.f32.partialorder %v247_v30, 0.0  ;;  %v280_v34 = vmul.f32 0.2, %v247_v30 }
  0xf3   :  { %309 = vst [vmem:[%s498_s3 + $0x60] sm:$0xff] %v293_v33  ;;  %v295_v35 = vsel %vm263_vm14, %v245_v26, %v279_v31 }
  0xf4   :  { %v294_v36 = vsel %vm262_vm15, %v158_v27, %v278_v32  ;;  %311 = vst [vmem:[%s498_s3 + $0x70] sm:$0xff] %v295_v35  ;;  %v296_v37 = vsel %vm264_vm0, %v247_v30, %v280_v34 }
  0xf5   :  { %310 = vst [vmem:[%s498_s3 + $0x68] sm:$0xff] %v294_v36  ;;  %312 = vst [vmem:[%s498_s3 + $0x78] sm:$0xff] %v296_v37 }

// kernel: encoder_decoder_forward.9
= control target key start
LH: loop header
LB: loop body
LE: loop exit
PB: predicated region body
PF: predicated region fallthrough
CT: control target
= control target key end

     0   :  { %vm1586_vm0 = vcmask 523264   ;;  %vm1587_vm13 = vcmask 523264   ;;  %s1581_s1 = inlined_call_operand.vmem [shape: f32[512,64], index: 1, kind: input, shape index: {}]   ;;  %s1582_s0 = inlined_call_operand.vmem [shape: f32[128,512], index: 0, kind: input, shape index: {}]   ;;  %s1583_s2 = inlined_call_operand.vmem [shape: f32[1,64], index: 2, kind: input, shape index: {}]   ;;  %s1584_s3 = inlined_call_operand.vmem [shape: f32[1,64], index: 3, kind: input, shape index: {}]   ;;  %s1585_s4 = inlined_call_operand.vmem [shape: f32[128,64], index: 4, kind: output, shape index: {}]  }
   0x1   :  { %v97_v0 = vld [vmem:[%s1581_s1 + $0x80] sm:$0xff]  ;;  %v98_v1 = vld [vmem:[%s1581_s1 + $0x88] sm:$0xff]  ;;  %v99_v11 = vld [vmem:[%s1581_s1 + $0x90] sm:$0xff] }
   0x2   :  { %v129_v2 = vld [vmem:[%s1581_s1 + $0x180] sm:$0xff]  ;;  %v889_v3 = vpack.c.bf16 %v98_v1, %v97_v0  ;;  %v130_v4 = vld [vmem:[%s1581_s1 + $0x188] sm:$0xff]  ;;  %v100_v13 = vld [vmem:[%s1581_s1 + $0x98] sm:$0xff] }
   0x3   :  { %v81_v5 = vld [vmem:[%s1581_s1] sm:$0xff]  ;;  %v82_v6 = vld [vmem:[%s1581_s1 + $0x8] sm:$0xff]  ;;  %v921_v7 = vpack.c.bf16 %v130_v4, %v129_v2  ;;  %v131_v14 = vld [vmem:[%s1581_s1 + $0x190] sm:$0xff]  ;;  %v893_v16 = vpack.c.bf16 %v100_v13, %v99_v11 }
   0x4   :  { %v891_v8 = vpack.c.bf16 %v82_v6, %v81_v5  ;;  %v113_v9 = vld [vmem:[%s1581_s1 + $0x100] sm:$0xff]  ;;  %v114_v10 = vld [vmem:[%s1581_s1 + $0x108] sm:$0xff]  ;;  %890 = vmatprep.subr.bf16.mxu0 %v889_v3  ;;  %v132_v15 = vld [vmem:[%s1581_s1 + $0x198] sm:$0xff] }
   0x5   :  { %v923_v12 = vpack.c.bf16 %v114_v10, %v113_v9  ;;  %922 = vmatprep.subr.bf16.mxu1 %v921_v7  ;;  %v925_v17 = vpack.c.bf16 %v132_v15, %v131_v14  ;;  %v83_v18 = vld [vmem:[%s1581_s1 + $0x10] sm:$0xff]  ;;  %v84_v19 = vld [vmem:[%s1581_s1 + $0x18] sm:$0xff]  ;;  %v101_v23 = vld [vmem:[%s1581_s1 + $0xa0] sm:$0xff] }
   0x6   :  { %892 = vmatpush3.bf16.msra.mxu0 %v891_v8  ;;  %v115_v20 = vld [vmem:[%s1581_s1 + $0x110] sm:$0xff]  ;;  %v895_v21 = vpack.c.bf16 %v84_v19, %v83_v18  ;;  %v116_v22 = vld [vmem:[%s1581_s1 + $0x118] sm:$0xff]  ;;  %v102_v24 = vld [vmem:[%s1581_s1 + $0xa8] sm:$0xff] }
   0x7   :  { %924 = vmatpush3.bf16.msra.mxu1 %v923_v12  ;;  %894 = vmatprep.subr.bf16.mxu0 %v893_v16  ;;  %v927_v25 = vpack.c.bf16 %v116_v22, %v115_v20  ;;  %v897_v26 = vpack.c.bf16 %v102_v24, %v101_v23  ;;  %v133_v27 = vld [vmem:[%s1581_s1 + $0x1a0] sm:$0xff]  ;;  %v134_v28 = vld [vmem:[%s1581_s1 + $0x1a8] sm:$0xff]  ;;  %v103_v35 = vld [vmem:[%s1581_s1 + $0xb0] sm:$0xff] }
   0x8   :  { %926 = vmatprep.subr.bf16.mxu1 %v925_v17  ;;  %v85_v29 = vld [vmem:[%s1581_s1 + $0x20] sm:$0xff]  ;;  %v929_v30 = vpack.c.bf16 %v134_v28, %v133_v27  ;;  %v86_v31 = vld [vmem:[%s1581_s1 + $0x28] sm:$0xff]  ;;  %v104_v36 = vld [vmem:[%s1581_s1 + $0xb8] sm:$0xff] }
   0x9   :  { %v117_v32 = vld [vmem:[%s1581_s1 + $0x120] sm:$0xff]  ;;  %v118_v33 = vld [vmem:[%s1581_s1 + $0x128] sm:$0xff]  ;;  %v899_v34 = vpack.c.bf16 %v86_v31, %v85_v29  ;;  %v135_v37 = vld [vmem:[%s1581_s1 + $0x1b0] sm:$0xff]  ;;  %v901_v39 = vpack.c.bf16 %v104_v36, %v103_v35 }
   0xa   :  { %896 = vmatpush3.bf16.msra.mxu0 %v895_v21  ;;  %v931_v38 = vpack.c.bf16 %v118_v33, %v117_v32  ;;  %v136_v40 = vld [vmem:[%s1581_s1 + $0x1b8] sm:$0xff]  ;;  %v87_v41 = vld [vmem:[%s1581_s1 + $0x30] sm:$0xff]  ;;  %v105_v46 = vld [vmem:[%s1581_s1 + $0xc0] sm:$0xff] }
   0xb   :  { %928 = vmatpush3.bf16.msra.mxu1 %v927_v25  ;;  %898 = vmatprep.subr.bf16.mxu0 %v897_v26  ;;  %v88_v42 = vld [vmem:[%s1581_s1 + $0x38] sm:$0xff]  ;;  %v933_v43 = vpack.c.bf16 %v136_v40, %v135_v37  ;;  %v119_v44 = vld [vmem:[%s1581_s1 + $0x130] sm:$0xff]  ;;  %v106_v47 = vld [vmem:[%s1581_s1 + $0xc8] sm:$0xff] }
   0xc   :  { %930 = vmatprep.subr.bf16.mxu1 %v929_v30  ;;  %v120_v45 = vld [vmem:[%s1581_s1 + $0x138] sm:$0xff]  ;;  %v137_v48 = vld [vmem:[%s1581_s1 + $0x1c0] sm:$0xff]  ;;  %v138_v49 = vld [vmem:[%s1581_s1 + $0x1c8] sm:$0xff]  ;;  %v903_v50 = vpack.c.bf16 %v88_v42, %v87_v41  ;;  %v905_v52 = vpack.c.bf16 %v106_v47, %v105_v46 }
   0xd   :  { %v935_v51 = vpack.c.bf16 %v120_v45, %v119_v44  ;;  %v89_v53 = vld [vmem:[%s1581_s1 + $0x40] sm:$0xff]  ;;  %v90_v54 = vld [vmem:[%s1581_s1 + $0x48] sm:$0xff]  ;;  %v937_v56 = vpack.c.bf16 %v138_v49, %v137_v48  ;;  %v107_v58 = vld [vmem:[%s1581_s1 + $0xd0] sm:$0xff] }
   0xe   :  { %900 = vmatpush3.bf16.msra.mxu0 %v899_v34  ;;  %v121_v55 = vld [vmem:[%s1581_s1 + $0x140] sm:$0xff]  ;;  %v122_v57 = vld [vmem:[%s1581_s1 + $0x148] sm:$0xff]  ;;  %v108_v59 = vld [vmem:[%s1581_s1 + $0xd8] sm:$0xff]  ;;  %v907_v62 = vpack.c.bf16 %v90_v54, %v89_v53 }
   0xf   :  { %932 = vmatpush3.bf16.msra.mxu1 %v931_v38  ;;  %902 = vmatprep.subr.bf16.mxu0 %v901_v39  ;;  %v139_v60 = vld [vmem:[%s1581_s1 + $0x1d0] sm:$0xff]  ;;  %v140_v61 = vld [vmem:[%s1581_s1 + $0x1d8] sm:$0xff]  ;;  %v939_v63 = vpack.c.bf16 %v122_v57, %v121_v55  ;;  %v909_v0 = vpack.c.bf16 %v108_v59, %v107_v58  ;;  %v109_v6 = vld [vmem:[%s1581_s1 + $0xe0] sm:$0xff] }
  0x10   :  { %934 = vmatprep.subr.bf16.mxu1 %v933_v43  ;;  %v91_v1 = vld [vmem:[%s1581_s1 + $0x50] sm:$0xff]  ;;  %v92_v2 = vld [vmem:[%s1581_s1 + $0x58] sm:$0xff]  ;;  %v941_v4 = vpack.c.bf16 %v140_v61, %v139_v60  ;;  %v110_v7 = vld [vmem:[%s1581_s1 + $0xe8] sm:$0xff] }
  0x11   :  { %v123_v3 = vld [vmem:[%s1581_s1 + $0x150] sm:$0xff]  ;;  %v124_v5 = vld [vmem:[%s1581_s1 + $0x158] sm:$0xff]  ;;  %v141_v8 = vld [vmem:[%s1581_s1 + $0x1e0] sm:$0xff]  ;;  %v911_v10 = vpack.c.bf16 %v92_v2, %v91_v1  ;;  %v913_v14 = vpack.c.bf16 %v110_v7, %v109_v6 }
  0x12   :  { %904 = vmatpush3.bf16.msra.mxu0 %v903_v50  ;;  %v142_v9 = vld [vmem:[%s1581_s1 + $0x1e8] sm:$0xff]  ;;  %v93_v11 = vld [vmem:[%s1581_s1 + $0x60] sm:$0xff]  ;;  %v943_v13 = vpack.c.bf16 %v124_v5, %v123_v3  ;;  %v20_v17 = vld [vmem:[%s1582_s0 + $0x18] sm:$0xff] }
  0x13   :  { %936 = vmatpush3.bf16.msra.mxu1 %v935_v51  ;;  %906 = vmatprep.subr.bf16.mxu0 %v905_v52  ;;  %v94_v12 = vld [vmem:[%s1581_s1 + $0x68] sm:$0xff]  ;;  %v125_v15 = vld [vmem:[%s1581_s1 + $0x160] sm:$0xff]  ;;  %v945_v18 = vpack.c.bf16 %v142_v9, %v141_v8  ;;  %v111_v20 = vld [vmem:[%s1581_s1 + $0xf0] sm:$0xff] }
  0x14   :  { %938 = vmatprep.subr.bf16.mxu1 %v937_v56  ;;  %v18_v16 = vld [vmem:[%s1582_s0 + $0x8] sm:$0xff]  ;;  %v112_v21 = vld [vmem:[%s1581_s1 + $0xf8] sm:$0xff]  ;;  %v143_v22 = vld [vmem:[%s1581_s1 + $0x1f0] sm:$0xff]  ;;  %354 = vmatprep.mubr.f32.mxu1 %v20_v17  ;;  %v915_v24 = vpack.c.bf16 %v94_v12, %v93_v11 }
  0x15   :  { %v126_v19 = vld [vmem:[%s1581_s1 + $0x168] sm:$0xff]  ;;  %209 = vmatprep.mubr.f32.mxu0 %v18_v16  ;;  %v144_v23 = vld [vmem:[%s1581_s1 + $0x1f8] sm:$0xff]  ;;  %v917_v26 = vpack.c.bf16 %v112_v21, %v111_v20  ;;  %v95_v27 = vld [vmem:[%s1581_s1 + $0x70] sm:$0xff] }
  0x16   :  { %908 = vmatpush3.bf16.msra.mxu0 %v907_v62  ;;  %v947_v25 = vpack.c.bf16 %v126_v19, %v125_v15  ;;  %v96_v28 = vld [vmem:[%s1581_s1 + $0x78] sm:$0xff]  ;;  %v949_v29 = vpack.c.bf16 %v144_v23, %v143_v22  ;;  %v127_v30 = vld [vmem:[%s1581_s1 + $0x170] sm:$0xff]  ;;  %v17_v34 = vld [vmem:[%s1582_s0] sm:$0xff] }
  0x17   :  { %940 = vmatpush3.bf16.msra.mxu1 %v939_v63  ;;  %910 = vmatprep.subr.bf16.mxu0 %v909_v0  ;;  %v128_v31 = vld [vmem:[%s1581_s1 + $0x178] sm:$0xff]  ;;  %v919_v32 = vpack.c.bf16 %v96_v28, %v95_v27  ;;  %v19_v35 = vld [vmem:[%s1582_s0 + $0x10] sm:$0xff]  ;;  %v22_v36 = vld [vmem:[%s1582_s0 + $0x28] sm:$0xff] }
  0x18   :  { %942 = vmatprep.subr.bf16.mxu1 %v941_v4  ;;  %v951_v33 = vpack.c.bf16 %v128_v31, %v127_v30  ;;  %v24_v37 = vld [vmem:[%s1582_s0 + $0x38] sm:$0xff]  ;;  %v21_v38 = vld [vmem:[%s1582_s0 + $0x20] sm:$0xff]  ;;  %v23_v39 = vld [vmem:[%s1582_s0 + $0x30] sm:$0xff] }
  0x19   :  { %v26_v40 = vld [vmem:[%s1582_s0 + $0x48] sm:$0xff]  ;;  %v28_v41 = vld [vmem:[%s1582_s0 + $0x58] sm:$0xff]  ;;  %v25_v42 = vld [vmem:[%s1582_s0 + $0x40] sm:$0xff] }
  0x1a   :  { %912 = vmatpush3.bf16.msra.mxu0 %v911_v10  ;;  %v27_v43 = vld [vmem:[%s1582_s0 + $0x50] sm:$0xff]  ;;  %v30_v44 = vld [vmem:[%s1582_s0 + $0x68] sm:$0xff]  ;;  %v32_v45 = vld [vmem:[%s1582_s0 + $0x78] sm:$0xff] }
  0x1b   :  { %944 = vmatpush3.bf16.msra.mxu1 %v943_v13  ;;  %914 = vmatprep.subr.bf16.mxu0 %v913_v14  ;;  %v29_v46 = vld [vmem:[%s1582_s0 + $0x60] sm:$0xff]  ;;  %v31_v47 = vld [vmem:[%s1582_s0 + $0x70] sm:$0xff]  ;;  %v34_v48 = vld [vmem:[%s1582_s0 + $0x88] sm:$0xff] }
  0x1c   :  { %946 = vmatprep.subr.bf16.mxu1 %v945_v18  ;;  %v36_v49 = vld [vmem:[%s1582_s0 + $0x98] sm:$0xff]  ;;  %v33_v50 = vld [vmem:[%s1582_s0 + $0x80] sm:$0xff]  ;;  %v35_v51 = vld [vmem:[%s1582_s0 + $0x90] sm:$0xff] }
  0x1d   :  { %v38_v52 = vld [vmem:[%s1582_s0 + $0xa8] sm:$0xff]  ;;  %v40_v53 = vld [vmem:[%s1582_s0 + $0xb8] sm:$0xff]  ;;  %v37_v54 = vld [vmem:[%s1582_s0 + $0xa0] sm:$0xff] }
  0x1e   :  { %916 = vmatpush3.bf16.msra.mxu0 %v915_v24  ;;  %v39_v55 = vld [vmem:[%s1582_s0 + $0xb0] sm:$0xff]  ;;  %v42_v56 = vld [vmem:[%s1582_s0 + $0xc8] sm:$0xff]  ;;  %v44_v57 = vld [vmem:[%s1582_s0 + $0xd8] sm:$0xff] }
  0x1f   :  { %948 = vmatpush3.bf16.msra.mxu1 %v947_v25  ;;  %918 = vmatprep.subr.bf16.mxu0 %v917_v26  ;;  %v41_v58 = vld [vmem:[%s1582_s0 + $0xc0] sm:$0xff]  ;;  %v43_v59 = vld [vmem:[%s1582_s0 + $0xd0] sm:$0xff]  ;;  %v46_v60 = vld [vmem:[%s1582_s0 + $0xe8] sm:$0xff] }
  0x20   :  { %950 = vmatprep.subr.bf16.mxu1 %v949_v29  ;;  %v48_v61 = vld [vmem:[%s1582_s0 + $0xf8] sm:$0xff]  ;;  %v45_v62 = vld [vmem:[%s1582_s0 + $0xe0] sm:$0xff]  ;;  %v47_v63 = vld [vmem:[%s1582_s0 + $0xf0] sm:$0xff] }
  0x21   :  { %v50_v0 = vld [vmem:[%s1582_s0 + $0x108] sm:$0xff]  ;;  %v52_v1 = vld [vmem:[%s1582_s0 + $0x118] sm:$0xff]  ;;  %v49_v2 = vld [vmem:[%s1582_s0 + $0x100] sm:$0xff] }
  0x22   :  { %920 = vmatpush3.bf16.msra.mxu0 %v919_v32  ;;  %v51_v3 = vld [vmem:[%s1582_s0 + $0x110] sm:$0xff]  ;;  %v54_v4 = vld [vmem:[%s1582_s0 + $0x128] sm:$0xff]  ;;  %v56_v5 = vld [vmem:[%s1582_s0 + $0x138] sm:$0xff] }
  0x23   :  { %952 = vmatpush3.bf16.msra.mxu1 %v951_v33  ;;  %v53_v6 = vld [vmem:[%s1582_s0 + $0x120] sm:$0xff]  ;;  %v55_v7 = vld [vmem:[%s1582_s0 + $0x130] sm:$0xff]  ;;  %v58_v8 = vld [vmem:[%s1582_s0 + $0x148] sm:$0xff] }
  0x24   :  { %v60_v9 = vld [vmem:[%s1582_s0 + $0x158] sm:$0xff]  ;;  %v57_v10 = vld [vmem:[%s1582_s0 + $0x140] sm:$0xff]  ;;  %v59_v11 = vld [vmem:[%s1582_s0 + $0x150] sm:$0xff] }
  0x25   :  { %210 = vmatmul.mubr.f32.vlgmr.msra.gmra.mrb[0].mxu0 %v17_v34  ;;  %v62_v12 = vld [vmem:[%s1582_s0 + $0x168] sm:$0xff]  ;;  %v64_v13 = vld [vmem:[%s1582_s0 + $0x178] sm:$0xff]  ;;  %v61_v14 = vld [vmem:[%s1582_s0 + $0x160] sm:$0xff] }
  0x26   :  { %355 = vmatmul.mubr.f32.vlgmr.msra.gmra.mrb[0].mxu1 %v19_v35  ;;  %214 = vmatprep.mubr.f32.mxu0 %v22_v36  ;;  %v63_v15 = vld [vmem:[%s1582_s0 + $0x170] sm:$0xff]  ;;  %v66_v16 = vld [vmem:[%s1582_s0 + $0x188] sm:$0xff]  ;;  %v68_v17 = vld [vmem:[%s1582_s0 + $0x198] sm:$0xff] }
  0x27   :  { %359 = vmatprep.mubr.f32.mxu1 %v24_v37  ;;  %v65_v18 = vld [vmem:[%s1582_s0 + $0x180] sm:$0xff]  ;;  %v67_v19 = vld [vmem:[%s1582_s0 + $0x190] sm:$0xff]  ;;  %v70_v20 = vld [vmem:[%s1582_s0 + $0x1a8] sm:$0xff] }
  0x28   :  { %v72_v21 = vld [vmem:[%s1582_s0 + $0x1b8] sm:$0xff]  ;;  %v69_v22 = vld [vmem:[%s1582_s0 + $0x1a0] sm:$0xff]  ;;  %v71_v23 = vld [vmem:[%s1582_s0 + $0x1b0] sm:$0xff] }
  0x29   :  { %215 = vmatmul.mubr.f32.gmra.mrb[2].mxu0 %v21_v38  ;;  %v74_v24 = vld [vmem:[%s1582_s0 + $0x1c8] sm:$0xff]  ;;  %v76_v25 = vld [vmem:[%s1582_s0 + $0x1d8] sm:$0xff]  ;;  %v73_v26 = vld [vmem:[%s1582_s0 + $0x1c0] sm:$0xff] }
  0x2a   :  { %360 = vmatmul.mubr.f32.gmra.mrb[2].mxu1 %v23_v39  ;;  %219 = vmatprep.mubr.f32.mxu0 %v26_v40  ;;  %v75_v27 = vld [vmem:[%s1582_s0 + $0x1d0] sm:$0xff]  ;;  %v78_v28 = vld [vmem:[%s1582_s0 + $0x1e8] sm:$0xff]  ;;  %v80_v29 = vld [vmem:[%s1582_s0 + $0x1f8] sm:$0xff] }
  0x2b   :  { %364 = vmatprep.mubr.f32.mxu1 %v28_v41  ;;  %v77_v30 = vld [vmem:[%s1582_s0 + $0x1e0] sm:$0xff]  ;;  %v79_v31 = vld [vmem:[%s1582_s0 + $0x1f0] sm:$0xff] }
  0x2d   :  { %220 = vmatmul.mubr.f32.gmra.mrb[4].mxu0 %v25_v42 }
  0x2e   :  { %365 = vmatmul.mubr.f32.gmra.mrb[4].mxu1 %v27_v43  ;;  %224 = vmatprep.mubr.f32.mxu0 %v30_v44 }
  0x2f   :  { %369 = vmatprep.mubr.f32.mxu1 %v32_v45 }
  0x31   :  { %225 = vmatmul.mubr.f32.gmra.mrb[6].mxu0 %v29_v46 }
  0x32   :  { %370 = vmatmul.mubr.f32.gmra.mrb[6].mxu1 %v31_v47  ;;  %229 = vmatprep.mubr.f32.mxu0 %v34_v48 }
  0x33   :  { %374 = vmatprep.mubr.f32.mxu1 %v36_v49 }
  0x35   :  { %230 = vmatmul.mubr.f32.gmra.mrb[8].mxu0 %v33_v50 }
  0x36   :  { %375 = vmatmul.mubr.f32.gmra.mrb[8].mxu1 %v35_v51  ;;  %234 = vmatprep.mubr.f32.mxu0 %v38_v52 }
  0x37   :  { %379 = vmatprep.mubr.f32.mxu1 %v40_v53 }
  0x39   :  { %235 = vmatmul.mubr.f32.gmra.mrb[10].mxu0 %v37_v54 }
  0x3a   :  { %380 = vmatmul.mubr.f32.gmra.mrb[10].mxu1 %v39_v55  ;;  %239 = vmatprep.mubr.f32.mxu0 %v42_v56 }
  0x3b   :  { %384 = vmatprep.mubr.f32.mxu1 %v44_v57 }
  0x3d   :  { %240 = vmatmul.mubr.f32.gmra.mrb[12].mxu0 %v41_v58 }
  0x3e   :  { %385 = vmatmul.mubr.f32.gmra.mrb[12].mxu1 %v43_v59  ;;  %244 = vmatprep.mubr.f32.mxu0 %v46_v60 }
  0x3f   :  { %389 = vmatprep.mubr.f32.mxu1 %v48_v61 }
  0x41   :  { %245 = vmatmul.mubr.f32.gmra.mrb[14].mxu0 %v45_v62 }
  0x42   :  { %390 = vmatmul.mubr.f32.gmra.mrb[14].mxu1 %v47_v63  ;;  %249 = vmatprep.mubr.f32.mxu0 %v50_v0 }
  0x43   :  { %394 = vmatprep.mubr.f32.mxu1 %v52_v1 }
  0x45   :  { %250 = vmatmul.mubr.f32.gmra.mrb[16].mxu0 %v49_v2 }
  0x46   :  { %395 = vmatmul.mubr.f32.gmra.mrb[16].mxu1 %v51_v3  ;;  %254 = vmatprep.mubr.f32.mxu0 %v54_v4 }
  0x47   :  { %399 = vmatprep.mubr.f32.mxu1 %v56_v5 }
  0x49   :  { %255 = vmatmul.mubr.f32.gmra.mrb[18].mxu0 %v53_v6 }
  0x4a   :  { %400 = vmatmul.mubr.f32.gmra.mrb[18].mxu1 %v55_v7  ;;  %259 = vmatprep.mubr.f32.mxu0 %v58_v8 }
  0x4b   :  { %404 = vmatprep.mubr.f32.mxu1 %v60_v9 }
  0x4d   :  { %260 = vmatmul.mubr.f32.gmra.mrb[20].mxu0 %v57_v10 }
  0x4e   :  { %405 = vmatmul.mubr.f32.gmra.mrb[20].mxu1 %v59_v11  ;;  %264 = vmatprep.mubr.f32.mxu0 %v62_v12 }
  0x4f   :  { %409 = vmatprep.mubr.f32.mxu1 %v64_v13 }
  0x51   :  { %265 = vmatmul.mubr.f32.gmra.mrb[22].mxu0 %v61_v14 }
  0x52   :  { %410 = vmatmul.mubr.f32.gmra.mrb[22].mxu1 %v63_v15  ;;  %269 = vmatprep.mubr.f32.mxu0 %v66_v16 }
  0x53   :  { %414 = vmatprep.mubr.f32.mxu1 %v68_v17 }
  0x55   :  { %270 = vmatmul.mubr.f32.gmra.mrb[24].mxu0 %v65_v18 }
  0x56   :  { %415 = vmatmul.mubr.f32.gmra.mrb[24].mxu1 %v67_v19  ;;  %274 = vmatprep.mubr.f32.mxu0 %v70_v20 }
  0x57   :  { %419 = vmatprep.mubr.f32.mxu1 %v72_v21 }
  0x59   :  { %275 = vmatmul.mubr.f32.gmra.mrb[26].mxu0 %v69_v22 }
  0x5a   :  { %420 = vmatmul.mubr.f32.gmra.mrb[26].mxu1 %v71_v23  ;;  %279 = vmatprep.mubr.f32.mxu0 %v74_v24 }
  0x5b   :  { %424 = vmatprep.mubr.f32.mxu1 %v76_v25 }
  0x5d   :  { %280 = vmatmul.mubr.f32.gmra.mrb[28].mxu0 %v73_v26 }
  0x5e   :  { %425 = vmatmul.mubr.f32.gmra.mrb[28].mxu1 %v75_v27  ;;  %284 = vmatprep.mubr.f32.mxu0 %v78_v28 }
  0x5f   :  { %429 = vmatprep.mubr.f32.mxu1 %v80_v29 }
  0x61   :  { %285 = vmatmul.mubr.f32.gmra.mrb[30].mxu0 %v77_v30 }
  0x62   :  { %430 = vmatmul.mubr.f32.gmra.mrb[30].mxu1 %v79_v31 }
  0xf8   :  { %v761_v32 = vpop.f32.mrb[0].mxu0 }
  0xf9   :  { %v841_v33 = vpop.f32.mrb[0].mxu1  ;;  %v762_v34 = vpop.f32.mrb[1].mxu0 }
  0xfa   :  { %v763_v35 = vadd.f32 %v762_v34, %v761_v32  ;;  %v842_v36 = vpop.f32.mrb[1].mxu1 }
  0xfb   :  { %v843_v37 = vadd.f32 %v842_v36, %v841_v33 }
  0xfc   :  { %v764_v38 = vpop.f32.mrb[2].mxu0 }
  0xfd   :  { %v1364_v39 = vadd.f32 %v843_v37, %v763_v35  ;;  %v844_v40 = vpop.f32.mrb[2].mxu1  ;;  %v765_v41 = vpop.f32.mrb[3].mxu0 }
  0xfe   :  { %v766_v42 = vadd.f32 %v765_v41, %v764_v38  ;;  %v845_v43 = vpop.f32.mrb[3].mxu1 }
  0xff   :  { %v846_v44 = vadd.f32 %v845_v43, %v844_v40  ;;  %v485_v37 = vsel %vm1586_vm0, %v1364_v39, 0.0 }
 0x100   :  { %v767_v45 = vpop.f32.mrb[4].mxu0 }
 0x101   :  { %v1366_v46 = vadd.f32 %v846_v44, %v766_v42  ;;  %v847_v47 = vpop.f32.mrb[4].mxu1  ;;  %v768_v48 = vpop.f32.mrb[5].mxu0 }
 0x102   :  { %v769_v49 = vadd.f32 %v768_v48, %v767_v45  ;;  %v848_v50 = vpop.f32.mrb[5].mxu1 }
 0x103   :  { %v849_v51 = vadd.f32 %v848_v50, %v847_v47  ;;  %v486_v31 = vsel %vm1586_vm0, %v1366_v46, 0.0 }
 0x104   :  { %v770_v52 = vpop.f32.mrb[6].mxu0  ;;  %v487_v41 = vadd.f32 %v486_v31, %v485_v37 }
 0x105   :  { %v1368_v53 = vadd.f32 %v849_v51, %v769_v49  ;;  %v850_v54 = vpop.f32.mrb[6].mxu1  ;;  %v771_v55 = vpop.f32.mrb[7].mxu0 }
 0x106   :  { %v772_v56 = vadd.f32 %v771_v55, %v770_v52  ;;  %v851_v57 = vpop.f32.mrb[7].mxu1 }
 0x107   :  { %v852_v58 = vadd.f32 %v851_v57, %v850_v54  ;;  %v488_v38 = vsel %vm1586_vm0, %v1368_v53, 0.0 }
 0x108   :  { %v773_v59 = vpop.f32.mrb[8].mxu0  ;;  %v489_v48 = vadd.f32 %v488_v38, %v487_v41 }
 0x109   :  { %v1370_v60 = vadd.f32 %v852_v58, %v772_v56  ;;  %v853_v61 = vpop.f32.mrb[8].mxu1  ;;  %v774_v62 = vpop.f32.mrb[9].mxu0 }
 0x10a   :  { %v775_v63 = vadd.f32 %v774_v62, %v773_v59  ;;  %v854_v0 = vpop.f32.mrb[9].mxu1 }
 0x10b   :  { %v855_v1 = vadd.f32 %v854_v0, %v853_v61  ;;  %v490_v43 = vsel %vm1586_vm0, %v1370_v60, 0.0 }
 0x10c   :  { %v776_v2 = vpop.f32.mrb[10].mxu0  ;;  %v491_v54 = vadd.f32 %v490_v43, %v489_v48 }
 0x10d   :  { %v1372_v3 = vadd.f32 %v855_v1, %v775_v63  ;;  %v856_v4 = vpop.f32.mrb[10].mxu1  ;;  %v777_v5 = vpop.f32.mrb[11].mxu0 }
 0x10e   :  { %v778_v6 = vadd.f32 %v777_v5, %v776_v2  ;;  %v857_v7 = vpop.f32.mrb[11].mxu1 }
 0x10f   :  { %v858_v8 = vadd.f32 %v857_v7, %v856_v4  ;;  %v492_v51 = vsel %vm1586_vm0, %v1372_v3, 0.0 }
 0x110   :  { %v779_v9 = vpop.f32.mrb[12].mxu0  ;;  %v493_v61 = vadd.f32 %v492_v51, %v491_v54 }
 0x111   :  { %v1374_v10 = vadd.f32 %v858_v8, %v778_v6  ;;  %v859_v11 = vpop.f32.mrb[12].mxu1  ;;  %v780_v12 = vpop.f32.mrb[13].mxu0 }
 0x112   :  { %v781_v13 = vadd.f32 %v780_v12, %v779_v9  ;;  %v860_v14 = vpop.f32.mrb[13].mxu1 }
 0x113   :  { %v861_v15 = vadd.f32 %v860_v14, %v859_v11  ;;  %v494_v56 = vsel %vm1586_vm0, %v1374_v10, 0.0 }
 0x114   :  { %v782_v16 = vpop.f32.mrb[14].mxu0  ;;  %v495_v2 = vadd.f32 %v494_v56, %v493_v61 }
 0x115   :  { %v1376_v17 = vadd.f32 %v861_v15, %v781_v13  ;;  %v862_v18 = vpop.f32.mrb[14].mxu1  ;;  %v783_v19 = vpop.f32.mrb[15].mxu0 }
 0x116   :  { %v784_v20 = vadd.f32 %v783_v19, %v782_v16  ;;  %v863_v21 = vpop.f32.mrb[15].mxu1 }
 0x117   :  { %v864_v22 = vadd.f32 %v863_v21, %v862_v18  ;;  %v496_v0 = vsel %vm1586_vm0, %v1376_v17, 0.0 }
 0x118   :  { %v785_v23 = vpop.f32.mrb[16].mxu0  ;;  %v497_v9 = vadd.f32 %v496_v0, %v495_v2 }
 0x119   :  { %v1378_v24 = vadd.f32 %v864_v22, %v784_v20  ;;  %v865_v25 = vpop.f32.mrb[16].mxu1  ;;  %v786_v26 = vpop.f32.mrb[17].mxu0 }
 0x11a   :  { %v787_v27 = vadd.f32 %v786_v26, %v785_v23  ;;  %v866_v28 = vpop.f32.mrb[17].mxu1 }
 0x11b   :  { %v867_v29 = vadd.f32 %v866_v28, %v865_v25  ;;  %v498_v5 = vsel %vm1586_vm0, %v1378_v24, 0.0 }
 0x11c   :  { %v788_v30 = vpop.f32.mrb[18].mxu0  ;;  %v499_v15 = vadd.f32 %v498_v5, %v497_v9 }
 0x11d   :  { %v1382_v32 = vadd.f32 %v867_v29, %v787_v27  ;;  %v868_v33 = vpop.f32.mrb[18].mxu1  ;;  %v789_v34 = vpop.f32.mrb[19].mxu0 }
 0x11e   :  { %v790_v35 = vadd.f32 %v789_v34, %v788_v30  ;;  %v869_v36 = vpop.f32.mrb[19].mxu1 }
 0x11f   :  { %v870_v40 = vadd.f32 %v869_v36, %v868_v33  ;;  %v500_v13 = vsel %vm1586_vm0, %v1382_v32, 0.0 }
 0x120   :  { %v791_v42 = vpop.f32.mrb[20].mxu0  ;;  %v501_v22 = vadd.f32 %v500_v13, %v499_v15 }
 0x121   :  { %v1390_v44 = vadd.f32 %v870_v40, %v790_v35  ;;  %v871_v45 = vpop.f32.mrb[20].mxu1  ;;  %v792_v47 = vpop.f32.mrb[21].mxu0 }
 0x122   :  { %v793_v49 = vadd.f32 %v792_v47, %v791_v42  ;;  %v872_v50 = vpop.f32.mrb[21].mxu1 }
 0x123   :  { %v873_v52 = vadd.f32 %v872_v50, %v871_v45  ;;  %v502_v18 = vsel %vm1586_vm0, %v1390_v44, 0.0 }
 0x124   :  { %v794_v55 = vpop.f32.mrb[22].mxu0  ;;  %v503_v28 = vadd.f32 %v502_v18, %v501_v22 }
 0x125   :  { %v1396_v57 = vadd.f32 %v873_v52, %v793_v49  ;;  %v874_v58 = vpop.f32.mrb[22].mxu1  ;;  %v795_v59 = vpop.f32.mrb[23].mxu0 }
 0x126   :  { %v796_v62 = vadd.f32 %v795_v59, %v794_v55  ;;  %v875_v63 = vpop.f32.mrb[23].mxu1 }
 0x127   :  { %v876_v1 = vadd.f32 %v875_v63, %v874_v58  ;;  %v504_v26 = vsel %vm1586_vm0, %v1396_v57, 0.0 }
 0x128   :  { %v797_v4 = vpop.f32.mrb[24].mxu0  ;;  %v505_v35 = vadd.f32 %v504_v26, %v503_v28 }
 0x129   :  { %v1402_v6 = vadd.f32 %v876_v1, %v796_v62  ;;  %v877_v7 = vpop.f32.mrb[24].mxu1  ;;  %v798_v8 = vpop.f32.mrb[25].mxu0 }
 0x12a   :  { %v799_v11 = vadd.f32 %v798_v8, %v797_v4  ;;  %v878_v12 = vpop.f32.mrb[25].mxu1 }
 0x12b   :  { %v879_v14 = vadd.f32 %v878_v12, %v877_v7  ;;  %v506_v30 = vsel %vm1586_vm0, %v1402_v6, 0.0 }
 0x12c   :  { %v800_v16 = vpop.f32.mrb[26].mxu0  ;;  %v507_v41 = vadd.f32 %v506_v30, %v505_v35 }
 0x12d   :  { %v1408_v19 = vadd.f32 %v879_v14, %v799_v11  ;;  %v880_v20 = vpop.f32.mrb[26].mxu1  ;;  %v801_v21 = vpop.f32.mrb[27].mxu0 }
 0x12e   :  { %v802_v23 = vadd.f32 %v801_v21, %v800_v16  ;;  %v881_v25 = vpop.f32.mrb[27].mxu1 }
 0x12f   :  { %v882_v27 = vadd.f32 %v881_v25, %v880_v20  ;;  %v508_v38 = vsel %vm1586_vm0, %v1408_v19, 0.0 }
 0x130   :  { %v803_v29 = vpop.f32.mrb[28].mxu0  ;;  %v509_v49 = vadd.f32 %v508_v38, %v507_v41 }
 0x131   :  { %v1414_v31 = vadd.f32 %v882_v27, %v802_v23  ;;  %v883_v33 = vpop.f32.mrb[28].mxu1  ;;  %v804_v34 = vpop.f32.mrb[29].mxu0 }
 0x132   :  { %v805_v36 = vadd.f32 %v804_v34, %v803_v29  ;;  %v884_v37 = vpop.f32.mrb[29].mxu1 }
 0x133   :  { %v885_v40 = vadd.f32 %v884_v37, %v883_v33  ;;  %v510_v43 = vsel %vm1586_vm0, %v1414_v31, 0.0 }
 0x134   :  { %v806_v42 = vpop.f32.mrb[30].mxu0  ;;  %v511_v55 = vadd.f32 %v510_v43, %v509_v49 }
 0x135   :  { %v1420_v45 = vadd.f32 %v885_v40, %v805_v36  ;;  %v886_v47 = vpop.f32.mrb[30].mxu1  ;;  %v807_v48 = vpop.f32.mrb[31].mxu0 }
 0x136   :  { %v808_v50 = vadd.f32 %v807_v48, %v806_v42  ;;  %v887_v51 = vpop.f32.mrb[31].mxu1 }
 0x137   :  { %v512_v52 = vsel %vm1586_vm0, %v1420_v45, 0.0  ;;  %v888_v54 = vadd.f32 %v887_v51, %v886_v47 }
 0x138   :  { %v513_v58 = vadd.f32 %v512_v52, %v511_v55 }
 0x139   :  { %v1424_v56 = vadd.f32 %v888_v54, %v808_v50 }
 0x13b   :  { %v514_v59 = vsel %vm1586_vm0, %v1424_v56, 0.0 }
 0x13c   :  { %v515_v61 = vadd.f32 %v514_v59, %v513_v58 }
 0x13e   :  { %v516_v62 = vrot.slane %v515_v61, 4 }
 0x140   :  { %v517_v63 = vadd.f32 %v516_v62, %v515_v61 }
 0x142   :  { %v518_v0 = vrot.slane %v517_v63, 2 }
 0x144   :  { %v519_v1 = vadd.f32 %v518_v0, %v517_v63 }
 0x146   :  { %v520_v2 = vrot.slane %v519_v1, 1 }
 0x148   :  { %v521_v4 = vadd.f32 %v520_v2, %v519_v1 }
 0x14a   :  { %v1428_v5 = vmul.f32 0.0078125, %v521_v4 }
 0x14c   :  { %v524_v7 = vsub.f32 %v1364_v39, %v1428_v5  ;;  %v525_v8 = vsub.f32 %v1366_v46, %v1428_v5  ;;  %v526_v9 = vsub.f32 %v1368_v53, %v1428_v5  ;;  %v527_v11 = vsub.f32 %v1370_v60, %v1428_v5 }
 0x14d   :  { %v528_v14 = vsub.f32 %v1372_v3, %v1428_v5  ;;  %v529_v16 = vsub.f32 %v1374_v10, %v1428_v5  ;;  %v530_v23 = vsub.f32 %v1376_v17, %v1428_v5  ;;  %v531_v28 = vsub.f32 %v1378_v24, %v1428_v5 }
 0x14e   :  { %v556_v12 = vmul.f32 %v524_v7, %v524_v7  ;;  %v557_v13 = vmul.f32 %v525_v8, %v525_v8  ;;  %v558_v15 = vmul.f32 %v526_v9, %v526_v9  ;;  %v559_v18 = vmul.f32 %v527_v11, %v527_v11 }
 0x14f   :  { %v560_v25 = vmul.f32 %v528_v14, %v528_v14  ;;  %v561_v29 = vmul.f32 %v529_v16, %v529_v16  ;;  %v532_v34 = vsub.f32 %v1382_v32, %v1428_v5  ;;  %v562_v35 = vmul.f32 %v530_v23, %v530_v23 }
 0x150   :  { %v572_v20 = vsel %vm1586_vm0, %v556_v12, 0.0  ;;  %v573_v21 = vsel %vm1586_vm0, %v557_v13, 0.0  ;;  %v575_v26 = vsel %vm1586_vm0, %v558_v15, 0.0  ;;  %v577_v30 = vsel %vm1586_vm0, %v559_v18, 0.0 }
 0x151   :  { %v574_v22 = vadd.f32 %v573_v21, %v572_v20  ;;  %v579_v36 = vsel %vm1586_vm0, %v560_v25, 0.0  ;;  %v533_v38 = vsub.f32 %v1390_v44, %v1428_v5  ;;  %v563_v40 = vmul.f32 %v531_v28, %v531_v28 }
 0x152   :  { %v581_v41 = vsel %vm1586_vm0, %v561_v29, 0.0  ;;  %v534_v43 = vsub.f32 %v1396_v57, %v1428_v5  ;;  %v564_v47 = vmul.f32 %v532_v34, %v532_v34  ;;  %v583_v48 = vsel %vm1586_vm0, %v562_v35, 0.0 }
 0x153   :  { %v576_v27 = vadd.f32 %v575_v26, %v574_v22  ;;  %v535_v50 = vsub.f32 %v1402_v6, %v1428_v5  ;;  %v565_v51 = vmul.f32 %v533_v38, %v533_v38  ;;  %v585_v52 = vsel %vm1586_vm0, %v563_v40, 0.0  ;;  %v610_v40 = vld [vmem:[%s1583_s2] sm:$0x1] }
 0x154   :  { %v536_v55 = vsub.f32 %v1408_v19, %v1428_v5  ;;  %v566_v58 = vmul.f32 %v534_v43, %v534_v43  ;;  %v587_v59 = vsel %vm1586_vm0, %v564_v47, 0.0  ;;  %v537_v62 = vsub.f32 %v1414_v31, %v1428_v5  ;;  %v614_v47 = vld [vmem:[%s1584_s3] sm:$0x1] }
 0x155   :  { %v578_v33 = vadd.f32 %v577_v30, %v576_v27  ;;  %v567_v63 = vmul.f32 %v535_v50, %v535_v50  ;;  %v589_v0 = vsel %vm1586_vm0, %v565_v51, 0.0  ;;  %v538_v2 = vsub.f32 %v1420_v45, %v1428_v5 }
 0x156   :  { %v568_v4 = vmul.f32 %v536_v55, %v536_v55  ;;  %v591_v7 = vsel %vm1586_vm0, %v566_v58, 0.0  ;;  %v539_v9 = vsub.f32 %v1424_v56, %v1428_v5  ;;  %v569_v11 = vmul.f32 %v537_v62, %v537_v62 }
 0x157   :  { %v580_v37 = vadd.f32 %v579_v36, %v578_v33  ;;  %v593_v12 = vsel %vm1586_vm0, %v567_v63, 0.0  ;;  %v570_v14 = vmul.f32 %v538_v2, %v538_v2 }
 0x158   :  { %v595_v15 = vsel %vm1586_vm0, %v568_v4, 0.0  ;;  %v571_v18 = vmul.f32 %v539_v9, %v539_v9  ;;  %v597_v20 = vsel %vm1586_vm0, %v569_v11, 0.0 }
 0x159   :  { %v582_v42 = vadd.f32 %v581_v41, %v580_v37  ;;  %v599_v22 = vsel %vm1586_vm0, %v570_v14, 0.0  ;;  %v618_v37 = vlaneseq }
 0x15a   :  { %v601_v25 = vsel %vm1586_vm0, %v571_v18, 0.0  ;;  %vm1588_vm0 = vmmov %vm1587_vm13 }
 0x15b   :  { %v584_v49 = vadd.f32 %v583_v48, %v582_v42  ;;  %v619_v38 = vshrl.u32 %v618_v37, 7 }
 0x15d   :  { %v586_v54 = vadd.f32 %v585_v52, %v584_v49  ;;  %v620_v41 = vsub.s32 0, %v619_v38 }
 0x15f   :  { %v588_v61 = vadd.f32 %v587_v59, %v586_v54 }
 0x161   :  { %v590_v1 = vadd.f32 %v589_v0, %v588_v61 }
 0x163   :  { %v592_v8 = vadd.f32 %v591_v7, %v590_v1 }
 0x165   :  { %v594_v13 = vadd.f32 %v593_v12, %v592_v8 }
 0x167   :  { %v596_v16 = vadd.f32 %v595_v15, %v594_v13 }
 0x169   :  { %v598_v21 = vadd.f32 %v597_v20, %v596_v16 }
 0x16b   :  { %v600_v23 = vadd.f32 %v599_v22, %v598_v21 }
 0x16d   :  { %v602_v26 = vadd.f32 %v601_v25, %v600_v23 }
 0x16f   :  { %v603_v27 = vrot.slane %v602_v26, 4 }
 0x171   :  { %v604_v28 = vadd.f32 %v603_v27, %v602_v26 }
 0x173   :  { %v605_v29 = vrot.slane %v604_v28, 2 }
 0x175   :  { %v606_v30 = vadd.f32 %v605_v29, %v604_v28 }
 0x177   :  { %v607_v33 = vrot.slane %v606_v30, 1 }
 0x179   :  { %v608_v34 = vadd.f32 %v607_v33, %v606_v30 }
 0x17b   :  { %v609_v35 = vmul.f32 0.0078125, %v608_v34 }
 0x17d   :  { %v611_v36 = vadd.f32 1e-05, %v609_v35 }
 0x17f   :  { %953 = vrsqrt.f32 %v611_v36 }
 0x189   :  { %v954_v42 = vpop.eup %953 }
 0x18a   :  { %v613_v43 = vmul.f32 %v954_v42, %v610_v40 }
 0x18c   :  { %v615_v48 = vmul.f32 %v613_v43, %v1428_v5  ;;  %v621_v49 = vrot.slane %v613_v43, %v620_v41 }
 0x18e   :  { %v616_v50 = vsub.f32 %v614_v47, %v615_v48  ;;  %v623_v51 = vmul.f32 %v621_v49, %v1364_v39  ;;  %v624_v52 = vmul.f32 %v621_v49, %v1366_v46  ;;  %v625_v54 = vmul.f32 %v621_v49, %v1368_v53 }
 0x18f   :  { %v626_v55 = vmul.f32 %v621_v49, %v1370_v60  ;;  %v627_v58 = vmul.f32 %v621_v49, %v1372_v3  ;;  %v628_v59 = vmul.f32 %v621_v49, %v1374_v10  ;;  %v629_v61 = vmul.f32 %v621_v49, %v1376_v17 }
 0x190   :  { %v630_v62 = vmul.f32 %v621_v49, %v1378_v24  ;;  %v631_v5 = vmul.f32 %v621_v49, %v1382_v32  ;;  %v632_v63 = vmul.f32 %v621_v49, %v1390_v44  ;;  %v633_v39 = vmul.f32 %v621_v49, %v1396_v57 }
 0x191   :  { %v634_v46 = vmul.f32 %v621_v49, %v1402_v6  ;;  %v643_v0 = vrot.slane %v616_v50, %v620_v41  ;;  %v635_v53 = vmul.f32 %v621_v49, %v1408_v19  ;;  %v636_v60 = vmul.f32 %v621_v49, %v1414_v31 }
 0x192   :  { %v637_v3 = vmul.f32 %v621_v49, %v1420_v45  ;;  %v638_v10 = vmul.f32 %v621_v49, %v1424_v56 }
 0x193   :  { %v645_v17 = vadd.f32 %v643_v0, %v623_v51  ;;  %v646_v1 = vadd.f32 %v643_v0, %v624_v52  ;;  %v647_v24 = vadd.f32 %v643_v0, %v625_v54  ;;  %v648_v2 = vadd.f32 %v643_v0, %v626_v55 }
 0x194   :  { %v649_v32 = vadd.f32 %v643_v0, %v627_v58  ;;  %v650_v4 = vadd.f32 %v643_v0, %v628_v59  ;;  %v651_v44 = vadd.f32 %v643_v0, %v629_v61  ;;  %v652_v7 = vadd.f32 %v643_v0, %v630_v62 }
 0x195   :  { %v653_v57 = vadd.f32 %v643_v0, %v631_v5  ;;  %v654_v8 = vadd.f32 %v643_v0, %v632_v63  ;;  %v655_v6 = vadd.f32 %v643_v0, %v633_v39  ;;  %v656_v9 = vadd.f32 %v643_v0, %v634_v46 }
 0x196   :  { %v657_v11 = vadd.f32 %v643_v0, %v635_v53  ;;  %v658_v19 = vadd.f32 %v643_v0, %v636_v60  ;;  %v659_v12 = vadd.f32 %v643_v0, %v637_v3  ;;  %v660_v31 = vadd.f32 %v643_v0, %v638_v10 }
 0x197   :  { %vm661_vm1 = vcmp.ge.f32.partialorder %v645_v17, 0.0  ;;  %vm662_vm2 = vcmp.ge.f32.partialorder %v646_v1, 0.0  ;;  %vm663_vm3 = vcmp.ge.f32.partialorder %v647_v24, 0.0  ;;  %vm664_vm4 = vcmp.ge.f32.partialorder %v648_v2, 0.0 }
 0x198   :  { %vm665_vm5 = vcmp.ge.f32.partialorder %v649_v32, 0.0  ;;  %vm666_vm6 = vcmp.ge.f32.partialorder %v650_v4, 0.0  ;;  %vm667_vm7 = vcmp.ge.f32.partialorder %v651_v44, 0.0  ;;  %vm668_vm8 = vcmp.ge.f32.partialorder %v652_v7, 0.0 }
 0x199   :  { %vm669_vm9 = vcmp.ge.f32.partialorder %v653_v57, 0.0  ;;  %vm670_vm10 = vcmp.ge.f32.partialorder %v654_v8, 0.0  ;;  %vm671_vm11 = vcmp.ge.f32.partialorder %v655_v6, 0.0  ;;  %vm672_vm12 = vcmp.ge.f32.partialorder %v656_v9, 0.0 }
 0x19a   :  { %vm674_vm14 = vcmp.ge.f32.partialorder %v658_v19, 0.0  ;;  %vm675_vm15 = vcmp.ge.f32.partialorder %v659_v12, 0.0  ;;  %v677_v45 = vmul.f32 0.2, %v645_v17  ;;  %v678_v56 = vmul.f32 0.2, %v646_v1 }
 0x19b   :  { %v679_v13 = vmul.f32 0.2, %v647_v24  ;;  %v680_v14 = vmul.f32 0.2, %v648_v2  ;;  %v681_v15 = vmul.f32 0.2, %v649_v32 }
 0x19c   :  { %v682_v16 = vmul.f32 0.2, %v650_v4  ;;  %v683_v18 = vmul.f32 0.2, %v651_v44  ;;  %v684_v20 = vmul.f32 0.2, %v652_v7  ;;  %v693_v22 = vsel %vm661_vm1, %v645_v17, %v677_v45  ;;  %vm1589_vm1 = vmmov %vm1588_vm0 }
 0x19d   :  { %v685_v21 = vmul.f32 0.2, %v653_v57  ;;  %v686_v23 = vmul.f32 0.2, %v654_v8  ;;  %v687_v25 = vmul.f32 0.2, %v655_v6  ;;  %v694_v27 = vsel %vm662_vm2, %v646_v1, %v678_v56  ;;  %vm1590_vm2 = vmmov %vm1588_vm0 }
 0x19e   :  { %v688_v26 = vmul.f32 0.2, %v656_v9  ;;  %709 = vst.msk [vmem:[%s1585_s4] sm:$0xff] %vm1587_vm13, %v693_v22  ;;  %v689_v28 = vmul.f32 0.2, %v657_v11  ;;  %v695_v33 = vsel %vm663_vm3, %v647_v24, %v679_v13  ;;  %v696_v35 = vsel %vm664_vm4, %v648_v2, %v680_v14  ;;  %vm1591_vm3 = vmmov %vm1588_vm0 }
 0x19f   :  { %v690_v29 = vmul.f32 0.2, %v658_v19  ;;  %v691_v30 = vmul.f32 0.2, %v659_v12  ;;  %710 = vst.msk [vmem:[%s1585_s4 + $0x8] sm:$0xff] %vm1588_vm0, %v694_v27  ;;  %v697_v36 = vsel %vm665_vm5, %v649_v32, %v681_v15  ;;  %v698_v37 = vsel %vm666_vm6, %v650_v4, %v682_v16  ;;  %712 = vst.msk [vmem:[%s1585_s4 + $0x18] sm:$0xff] %vm1588_vm0, %v696_v35 }
 0x1a0   :  { %v692_v34 = vmul.f32 0.2, %v660_v31  ;;  %711 = vst.msk [vmem:[%s1585_s4 + $0x10] sm:$0xff] %vm1589_vm1, %v695_v33  ;;  %v699_v38 = vsel %vm667_vm7, %v651_v44, %v683_v18  ;;  %v700_v40 = vsel %vm668_vm8, %v652_v7, %v684_v20  ;;  %v701_v41 = vsel %vm669_vm9, %v653_v57, %v685_v21  ;;  %vm1593_vm5 = vmmov %vm1588_vm0 }
 0x1a1   :  { %v702_v42 = vsel %vm670_vm10, %v654_v8, %v686_v23  ;;  %713 = vst.msk [vmem:[%s1585_s4 + $0x20] sm:$0xff] %vm1590_vm2, %v697_v36  ;;  %v703_v43 = vsel %vm671_vm11, %v655_v6, %v687_v25  ;;  %v704_v47 = vsel %vm672_vm12, %v656_v9, %v688_v26  ;;  %vm1592_vm4 = vcmp.ge.f32.partialorder %v657_v11, 0.0  ;;  %vm1594_vm6 = vmmov %vm1588_vm0 }
 0x1a2   :  { %714 = vst.msk [vmem:[%s1585_s4 + $0x28] sm:$0xff] %vm1591_vm3, %v698_v37  ;;  %v705_v48 = vsel %vm1592_vm4, %v657_v11, %v689_v28  ;;  %v706_v49 = vsel %vm674_vm14, %v658_v19, %v690_v29  ;;  %vm1595_vm7 = vmmov %vm1588_vm0  ;;  %v707_v50 = vsel %vm675_vm15, %v659_v12, %v691_v30  ;;  %vm1597_vm9 = vcmp.ge.f32.partialorder %v660_v31, 0.0 }
 0x1a3   :  { %715 = vst.msk [vmem:[%s1585_s4 + $0x30] sm:$0xff] %vm1593_vm5, %v699_v38  ;;  %vm1596_vm8 = vmmov %vm1588_vm0  ;;  %v708_v51 = vsel %vm1597_vm9, %v660_v31, %v692_v34 }
 0x1a4   :  { %716 = vst.msk [vmem:[%s1585_s4 + $0x38] sm:$0xff] %vm1594_vm6, %v700_v40  ;;  %vm1598_vm10 = vmmov %vm1588_vm0 }
 0x1a5   :  { %717 = vst.msk [vmem:[%s1585_s4 + $0x40] sm:$0xff] %vm1595_vm7, %v701_v41  ;;  %vm1599_vm11 = vmmov %vm1588_vm0 }
 0x1a6   :  { %718 = vst.msk [vmem:[%s1585_s4 + $0x48] sm:$0xff] %vm1596_vm8, %v702_v42  ;;  %vm1600_vm12 = vmmov %vm1588_vm0 }
 0x1a7   :  { %719 = vst.msk [vmem:[%s1585_s4 + $0x50] sm:$0xff] %vm1598_vm10, %v703_v43  ;;  %vm1601_vm13 = vmmov %vm1588_vm0 }
 0x1a8   :  { %720 = vst.msk [vmem:[%s1585_s4 + $0x58] sm:$0xff] %vm1599_vm11, %v704_v47  ;;  %vm1602_vm14 = vmmov %vm1588_vm0 }
 0x1a9   :  { %721 = vst.msk [vmem:[%s1585_s4 + $0x60] sm:$0xff] %vm1600_vm12, %v705_v48  ;;  %vm1603_vm15 = vmmov %vm1588_vm0 }
 0x1aa   :  { %722 = vst.msk [vmem:[%s1585_s4 + $0x68] sm:$0xff] %vm1601_vm13, %v706_v49 }
 0x1ab   :  { %723 = vst.msk [vmem:[%s1585_s4 + $0x70] sm:$0xff] %vm1602_vm14, %v707_v50 }
 0x1ac   :  { %724 = vst.msk [vmem:[%s1585_s4 + $0x78] sm:$0xff] %vm1603_vm15, %v708_v51 }

// kernel: encoder_decoder_forward.10
= control target key start
LH: loop header
LB: loop body
LE: loop exit
PB: predicated region body
PF: predicated region fallthrough
CT: control target
= control target key end

     0   :  { %s1444_s1 = inlined_call_operand.vmem [shape: f32[1024,128], index: 1, kind: input, shape index: {}]   ;;  %s1445_s0 = inlined_call_operand.vmem [shape: f32[32,1024], index: 0, kind: input, shape index: {}]   ;;  %s1446_s2 = inlined_call_operand.vmem [shape: f32[1,128], index: 2, kind: input, shape index: {}]   ;;  %s1447_s3 = inlined_call_operand.vmem [shape: f32[1,128], index: 3, kind: input, shape index: {}]   ;;  %s1448_s4 = inlined_call_operand.vmem [shape: f32[32,128], index: 4, kind: output, shape index: {}]  }
   0x1   :  { %v65_v0 = vld [vmem:[%s1444_s1 + $0x80] sm:$0xff]  ;;  %v66_v1 = vld [vmem:[%s1444_s1 + $0x88] sm:$0xff]  ;;  %v67_v11 = vld [vmem:[%s1444_s1 + $0x90] sm:$0xff] }
   0x2   :  { %v97_v2 = vld [vmem:[%s1444_s1 + $0x180] sm:$0xff]  ;;  %v786_v3 = vpack.c.bf16 %v66_v1, %v65_v0  ;;  %v98_v4 = vld [vmem:[%s1444_s1 + $0x188] sm:$0xff]  ;;  %v68_v13 = vld [vmem:[%s1444_s1 + $0x98] sm:$0xff] }
   0x3   :  { %v49_v5 = vld [vmem:[%s1444_s1] sm:$0xff]  ;;  %v50_v6 = vld [vmem:[%s1444_s1 + $0x8] sm:$0xff]  ;;  %v818_v7 = vpack.c.bf16 %v98_v4, %v97_v2  ;;  %v99_v14 = vld [vmem:[%s1444_s1 + $0x190] sm:$0xff]  ;;  %v790_v16 = vpack.c.bf16 %v68_v13, %v67_v11 }
   0x4   :  { %v788_v8 = vpack.c.bf16 %v50_v6, %v49_v5  ;;  %v81_v9 = vld [vmem:[%s1444_s1 + $0x100] sm:$0xff]  ;;  %v82_v10 = vld [vmem:[%s1444_s1 + $0x108] sm:$0xff]  ;;  %787 = vmatprep.subr.bf16.mxu0 %v786_v3  ;;  %v100_v15 = vld [vmem:[%s1444_s1 + $0x198] sm:$0xff] }
   0x5   :  { %v820_v12 = vpack.c.bf16 %v82_v10, %v81_v9  ;;  %819 = vmatprep.subr.bf16.mxu1 %v818_v7  ;;  %v822_v17 = vpack.c.bf16 %v100_v15, %v99_v14  ;;  %v51_v18 = vld [vmem:[%s1444_s1 + $0x10] sm:$0xff]  ;;  %v52_v19 = vld [vmem:[%s1444_s1 + $0x18] sm:$0xff]  ;;  %v69_v23 = vld [vmem:[%s1444_s1 + $0xa0] sm:$0xff] }
   0x6   :  { %789 = vmatpush3.bf16.msra.mxu0 %v788_v8  ;;  %v83_v20 = vld [vmem:[%s1444_s1 + $0x110] sm:$0xff]  ;;  %v792_v21 = vpack.c.bf16 %v52_v19, %v51_v18  ;;  %v84_v22 = vld [vmem:[%s1444_s1 + $0x118] sm:$0xff]  ;;  %v70_v24 = vld [vmem:[%s1444_s1 + $0xa8] sm:$0xff] }
   0x7   :  { %821 = vmatpush3.bf16.msra.mxu1 %v820_v12  ;;  %791 = vmatprep.subr.bf16.mxu0 %v790_v16  ;;  %v824_v25 = vpack.c.bf16 %v84_v22, %v83_v20  ;;  %v794_v26 = vpack.c.bf16 %v70_v24, %v69_v23  ;;  %v101_v27 = vld [vmem:[%s1444_s1 + $0x1a0] sm:$0xff]  ;;  %v102_v28 = vld [vmem:[%s1444_s1 + $0x1a8] sm:$0xff]  ;;  %v71_v35 = vld [vmem:[%s1444_s1 + $0xb0] sm:$0xff] }
   0x8   :  { %823 = vmatprep.subr.bf16.mxu1 %v822_v17  ;;  %v53_v29 = vld [vmem:[%s1444_s1 + $0x20] sm:$0xff]  ;;  %v826_v30 = vpack.c.bf16 %v102_v28, %v101_v27  ;;  %v54_v31 = vld [vmem:[%s1444_s1 + $0x28] sm:$0xff]  ;;  %v72_v36 = vld [vmem:[%s1444_s1 + $0xb8] sm:$0xff] }
   0x9   :  { %v85_v32 = vld [vmem:[%s1444_s1 + $0x120] sm:$0xff]  ;;  %v86_v33 = vld [vmem:[%s1444_s1 + $0x128] sm:$0xff]  ;;  %v796_v34 = vpack.c.bf16 %v54_v31, %v53_v29  ;;  %v103_v37 = vld [vmem:[%s1444_s1 + $0x1b0] sm:$0xff]  ;;  %v798_v39 = vpack.c.bf16 %v72_v36, %v71_v35 }
   0xa   :  { %793 = vmatpush3.bf16.msra.mxu0 %v792_v21  ;;  %v828_v38 = vpack.c.bf16 %v86_v33, %v85_v32  ;;  %v104_v40 = vld [vmem:[%s1444_s1 + $0x1b8] sm:$0xff]  ;;  %v55_v41 = vld [vmem:[%s1444_s1 + $0x30] sm:$0xff]  ;;  %v73_v46 = vld [vmem:[%s1444_s1 + $0xc0] sm:$0xff] }
   0xb   :  { %825 = vmatpush3.bf16.msra.mxu1 %v824_v25  ;;  %795 = vmatprep.subr.bf16.mxu0 %v794_v26  ;;  %v56_v42 = vld [vmem:[%s1444_s1 + $0x38] sm:$0xff]  ;;  %v830_v43 = vpack.c.bf16 %v104_v40, %v103_v37  ;;  %v87_v44 = vld [vmem:[%s1444_s1 + $0x130] sm:$0xff]  ;;  %v74_v47 = vld [vmem:[%s1444_s1 + $0xc8] sm:$0xff] }
   0xc   :  { %827 = vmatprep.subr.bf16.mxu1 %v826_v30  ;;  %v88_v45 = vld [vmem:[%s1444_s1 + $0x138] sm:$0xff]  ;;  %v105_v48 = vld [vmem:[%s1444_s1 + $0x1c0] sm:$0xff]  ;;  %v106_v49 = vld [vmem:[%s1444_s1 + $0x1c8] sm:$0xff]  ;;  %v800_v50 = vpack.c.bf16 %v56_v42, %v55_v41  ;;  %v802_v52 = vpack.c.bf16 %v74_v47, %v73_v46 }
   0xd   :  { %v832_v51 = vpack.c.bf16 %v88_v45, %v87_v44  ;;  %v57_v53 = vld [vmem:[%s1444_s1 + $0x40] sm:$0xff]  ;;  %v58_v54 = vld [vmem:[%s1444_s1 + $0x48] sm:$0xff]  ;;  %v834_v56 = vpack.c.bf16 %v106_v49, %v105_v48  ;;  %v75_v58 = vld [vmem:[%s1444_s1 + $0xd0] sm:$0xff] }
   0xe   :  { %797 = vmatpush3.bf16.msra.mxu0 %v796_v34  ;;  %v89_v55 = vld [vmem:[%s1444_s1 + $0x140] sm:$0xff]  ;;  %v90_v57 = vld [vmem:[%s1444_s1 + $0x148] sm:$0xff]  ;;  %v76_v59 = vld [vmem:[%s1444_s1 + $0xd8] sm:$0xff]  ;;  %v804_v62 = vpack.c.bf16 %v58_v54, %v57_v53 }
   0xf   :  { %829 = vmatpush3.bf16.msra.mxu1 %v828_v38  ;;  %799 = vmatprep.subr.bf16.mxu0 %v798_v39  ;;  %v107_v60 = vld [vmem:[%s1444_s1 + $0x1d0] sm:$0xff]  ;;  %v108_v61 = vld [vmem:[%s1444_s1 + $0x1d8] sm:$0xff]  ;;  %v836_v63 = vpack.c.bf16 %v90_v57, %v89_v55  ;;  %v806_v0 = vpack.c.bf16 %v76_v59, %v75_v58  ;;  %v77_v6 = vld [vmem:[%s1444_s1 + $0xe0] sm:$0xff] }
  0x10   :  { %831 = vmatprep.subr.bf16.mxu1 %v830_v43  ;;  %v59_v1 = vld [vmem:[%s1444_s1 + $0x50] sm:$0xff]  ;;  %v60_v2 = vld [vmem:[%s1444_s1 + $0x58] sm:$0xff]  ;;  %v838_v4 = vpack.c.bf16 %v108_v61, %v107_v60  ;;  %v78_v7 = vld [vmem:[%s1444_s1 + $0xe8] sm:$0xff] }
  0x11   :  { %v91_v3 = vld [vmem:[%s1444_s1 + $0x150] sm:$0xff]  ;;  %v92_v5 = vld [vmem:[%s1444_s1 + $0x158] sm:$0xff]  ;;  %v109_v8 = vld [vmem:[%s1444_s1 + $0x1e0] sm:$0xff]  ;;  %v808_v10 = vpack.c.bf16 %v60_v2, %v59_v1  ;;  %v810_v14 = vpack.c.bf16 %v78_v7, %v77_v6 }
  0x12   :  { %801 = vmatpush3.bf16.msra.mxu0 %v800_v50  ;;  %v110_v9 = vld [vmem:[%s1444_s1 + $0x1e8] sm:$0xff]  ;;  %v61_v11 = vld [vmem:[%s1444_s1 + $0x60] sm:$0xff]  ;;  %v840_v13 = vpack.c.bf16 %v92_v5, %v91_v3  ;;  %v20_v17 = vld [vmem:[%s1445_s0 + $0x18] sm:$0xff] }
  0x13   :  { %833 = vmatpush3.bf16.msra.mxu1 %v832_v51  ;;  %803 = vmatprep.subr.bf16.mxu0 %v802_v52  ;;  %v62_v12 = vld [vmem:[%s1444_s1 + $0x68] sm:$0xff]  ;;  %v93_v15 = vld [vmem:[%s1444_s1 + $0x160] sm:$0xff]  ;;  %v842_v18 = vpack.c.bf16 %v110_v9, %v109_v8  ;;  %v79_v20 = vld [vmem:[%s1444_s1 + $0xf0] sm:$0xff] }
  0x14   :  { %835 = vmatprep.subr.bf16.mxu1 %v834_v56  ;;  %v18_v16 = vld [vmem:[%s1445_s0 + $0x8] sm:$0xff]  ;;  %v80_v21 = vld [vmem:[%s1444_s1 + $0xf8] sm:$0xff]  ;;  %v111_v22 = vld [vmem:[%s1444_s1 + $0x1f0] sm:$0xff]  ;;  %326 = vmatprep.mubr.f32.mxu1 %v20_v17  ;;  %v812_v24 = vpack.c.bf16 %v62_v12, %v61_v11 }
  0x15   :  { %v94_v19 = vld [vmem:[%s1444_s1 + $0x168] sm:$0xff]  ;;  %241 = vmatprep.mubr.f32.mxu0 %v18_v16  ;;  %v112_v23 = vld [vmem:[%s1444_s1 + $0x1f8] sm:$0xff]  ;;  %v814_v26 = vpack.c.bf16 %v80_v21, %v79_v20  ;;  %v63_v27 = vld [vmem:[%s1444_s1 + $0x70] sm:$0xff] }
  0x16   :  { %805 = vmatpush3.bf16.msra.mxu0 %v804_v62  ;;  %v844_v25 = vpack.c.bf16 %v94_v19, %v93_v15  ;;  %v64_v28 = vld [vmem:[%s1444_s1 + $0x78] sm:$0xff]  ;;  %v95_v29 = vld [vmem:[%s1444_s1 + $0x170] sm:$0xff]  ;;  %v846_v30 = vpack.c.bf16 %v112_v23, %v111_v22  ;;  %v129_v32 = vld [vmem:[%s1444_s1 + $0x280] sm:$0xff] }
  0x17   :  { %837 = vmatpush3.bf16.msra.mxu1 %v836_v63  ;;  %807 = vmatprep.subr.bf16.mxu0 %v806_v0  ;;  %v96_v31 = vld [vmem:[%s1444_s1 + $0x178] sm:$0xff]  ;;  %v130_v33 = vld [vmem:[%s1444_s1 + $0x288] sm:$0xff]  ;;  %v161_v34 = vld [vmem:[%s1444_s1 + $0x380] sm:$0xff]  ;;  %v816_v36 = vpack.c.bf16 %v64_v28, %v63_v27 }
  0x18   :  { %839 = vmatprep.subr.bf16.mxu1 %v838_v4  ;;  %v162_v35 = vld [vmem:[%s1444_s1 + $0x388] sm:$0xff]  ;;  %v848_v37 = vpack.c.bf16 %v96_v31, %v95_v29  ;;  %v850_v38 = vpack.c.bf16 %v130_v33, %v129_v32  ;;  %v113_v39 = vld [vmem:[%s1444_s1 + $0x200] sm:$0xff]  ;;  %v131_v44 = vld [vmem:[%s1444_s1 + $0x290] sm:$0xff] }
  0x19   :  { %v114_v40 = vld [vmem:[%s1444_s1 + $0x208] sm:$0xff]  ;;  %v145_v41 = vld [vmem:[%s1444_s1 + $0x300] sm:$0xff]  ;;  %v882_v42 = vpack.c.bf16 %v162_v35, %v161_v34  ;;  %v132_v45 = vld [vmem:[%s1444_s1 + $0x298] sm:$0xff] }
  0x1a   :  { %809 = vmatpush3.bf16.msra.mxu0 %v808_v10  ;;  %v146_v43 = vld [vmem:[%s1444_s1 + $0x308] sm:$0xff]  ;;  %v163_v46 = vld [vmem:[%s1444_s1 + $0x390] sm:$0xff]  ;;  %v164_v47 = vld [vmem:[%s1444_s1 + $0x398] sm:$0xff]  ;;  %v852_v50 = vpack.c.bf16 %v114_v40, %v113_v39  ;;  %v854_v52 = vpack.c.bf16 %v132_v45, %v131_v44 }
  0x1b   :  { %841 = vmatpush3.bf16.msra.mxu1 %v840_v13  ;;  %811 = vmatprep.subr.bf16.mxu0 %v810_v14  ;;  %v17_v48 = vld [vmem:[%s1445_s0] sm:$0xff]  ;;  %v19_v49 = vld [vmem:[%s1445_s0 + $0x10] sm:$0xff]  ;;  %v884_v51 = vpack.c.bf16 %v146_v43, %v145_v41  ;;  %v116_v54 = vld [vmem:[%s1444_s1 + $0x218] sm:$0xff]  ;;  %v886_v56 = vpack.c.bf16 %v164_v47, %v163_v46 }
  0x1c   :  { %843 = vmatprep.subr.bf16.mxu1 %v842_v18  ;;  %v115_v53 = vld [vmem:[%s1444_s1 + $0x210] sm:$0xff]  ;;  %v148_v57 = vld [vmem:[%s1444_s1 + $0x318] sm:$0xff]  ;;  %v133_v58 = vld [vmem:[%s1444_s1 + $0x2a0] sm:$0xff] }
  0x1d   :  { %v147_v55 = vld [vmem:[%s1444_s1 + $0x310] sm:$0xff]  ;;  %v134_v59 = vld [vmem:[%s1444_s1 + $0x2a8] sm:$0xff]  ;;  %v165_v60 = vld [vmem:[%s1444_s1 + $0x3a0] sm:$0xff]  ;;  %v856_v63 = vpack.c.bf16 %v116_v54, %v115_v53 }
  0x1e   :  { %813 = vmatpush3.bf16.msra.mxu0 %v812_v24  ;;  %v166_v61 = vld [vmem:[%s1444_s1 + $0x3a8] sm:$0xff]  ;;  %v117_v0 = vld [vmem:[%s1444_s1 + $0x220] sm:$0xff]  ;;  %v28_v1 = vld [vmem:[%s1445_s0 + $0x58] sm:$0xff]  ;;  %v888_v3 = vpack.c.bf16 %v148_v57, %v147_v55  ;;  %v858_v4 = vpack.c.bf16 %v134_v59, %v133_v58 }
  0x1f   :  { %845 = vmatpush3.bf16.msra.mxu1 %v844_v25  ;;  %815 = vmatprep.subr.bf16.mxu0 %v814_v26  ;;  %v26_v62 = vld [vmem:[%s1445_s0 + $0x48] sm:$0xff]  ;;  %v25_v2 = vld [vmem:[%s1445_s0 + $0x40] sm:$0xff]  ;;  %v27_v7 = vld [vmem:[%s1445_s0 + $0x50] sm:$0xff]  ;;  %v890_v8 = vpack.c.bf16 %v166_v61, %v165_v60 }
  0x20   :  { %847 = vmatprep.subr.bf16.mxu1 %v846_v30  ;;  %v118_v5 = vld [vmem:[%s1444_s1 + $0x228] sm:$0xff]  ;;  %v149_v6 = vld [vmem:[%s1444_s1 + $0x320] sm:$0xff]  ;;  %v135_v10 = vld [vmem:[%s1444_s1 + $0x2b0] sm:$0xff] }
  0x21   :  { %v150_v9 = vld [vmem:[%s1444_s1 + $0x328] sm:$0xff]  ;;  %v136_v11 = vld [vmem:[%s1444_s1 + $0x2b8] sm:$0xff]  ;;  %v167_v12 = vld [vmem:[%s1444_s1 + $0x3b0] sm:$0xff]  ;;  %v860_v15 = vpack.c.bf16 %v118_v5, %v117_v0 }
  0x22   :  { %817 = vmatpush3.bf16.msra.mxu0 %v816_v36  ;;  %v168_v13 = vld [vmem:[%s1444_s1 + $0x3b8] sm:$0xff]  ;;  %v34_v14 = vld [vmem:[%s1445_s0 + $0x88] sm:$0xff]  ;;  %v119_v16 = vld [vmem:[%s1444_s1 + $0x230] sm:$0xff]  ;;  %v892_v19 = vpack.c.bf16 %v150_v9, %v149_v6  ;;  %v862_v20 = vpack.c.bf16 %v136_v11, %v135_v10 }
  0x23   :  { %849 = vmatpush3.bf16.msra.mxu1 %v848_v37  ;;  %851 = vmatprep.subr.bf16.mxu0 %v850_v38  ;;  %v36_v17 = vld [vmem:[%s1445_s0 + $0x98] sm:$0xff]  ;;  %v33_v18 = vld [vmem:[%s1445_s0 + $0x80] sm:$0xff]  ;;  %v151_v22 = vld [vmem:[%s1444_s1 + $0x330] sm:$0xff]  ;;  %v894_v24 = vpack.c.bf16 %v168_v13, %v167_v12 }
  0x24   :  { %883 = vmatprep.subr.bf16.mxu1 %v882_v42  ;;  %v120_v21 = vld [vmem:[%s1444_s1 + $0x238] sm:$0xff]  ;;  %v35_v23 = vld [vmem:[%s1445_s0 + $0x90] sm:$0xff]  ;;  %v137_v26 = vld [vmem:[%s1444_s1 + $0x2c0] sm:$0xff] }
  0x25   :  { %242 = vmatmul.mubr.f32.vlgmr.msra.gmra.mrb[0].mxu0 %v17_v48  ;;  %v152_v25 = vld [vmem:[%s1444_s1 + $0x338] sm:$0xff]  ;;  %v138_v27 = vld [vmem:[%s1444_s1 + $0x2c8] sm:$0xff]  ;;  %v169_v28 = vld [vmem:[%s1444_s1 + $0x3c0] sm:$0xff]  ;;  %v864_v31 = vpack.c.bf16 %v120_v21, %v119_v16 }
  0x26   :  { %327 = vmatmul.mubr.f32.vlgmr.msra.gmra.mrb[0].mxu1 %v19_v49  ;;  %853 = vmatpush3.bf16.msra.mxu0 %v852_v50  ;;  %v170_v29 = vld [vmem:[%s1444_s1 + $0x3c8] sm:$0xff]  ;;  %v121_v32 = vld [vmem:[%s1444_s1 + $0x240] sm:$0xff]  ;;  %v44_v33 = vld [vmem:[%s1445_s0 + $0xd8] sm:$0xff]  ;;  %v896_v35 = vpack.c.bf16 %v152_v25, %v151_v22  ;;  %v866_v36 = vpack.c.bf16 %v138_v27, %v137_v26 }
  0x27   :  { %885 = vmatpush3.bf16.msra.mxu1 %v884_v51  ;;  %855 = vmatprep.subr.bf16.mxu0 %v854_v52  ;;  %v42_v30 = vld [vmem:[%s1445_s0 + $0xc8] sm:$0xff]  ;;  %v41_v34 = vld [vmem:[%s1445_s0 + $0xc0] sm:$0xff]  ;;  %v43_v39 = vld [vmem:[%s1445_s0 + $0xd0] sm:$0xff]  ;;  %v898_v40 = vpack.c.bf16 %v170_v29, %v169_v28 }
  0x28   :  { %887 = vmatprep.subr.bf16.mxu1 %v886_v56  ;;  %246 = vmatprep.mubr.f32.mxu0 %v26_v62  ;;  %v122_v37 = vld [vmem:[%s1444_s1 + $0x248] sm:$0xff]  ;;  %v153_v38 = vld [vmem:[%s1444_s1 + $0x340] sm:$0xff]  ;;  %v139_v42 = vld [vmem:[%s1444_s1 + $0x2d0] sm:$0xff] }
  0x29   :  { %331 = vmatprep.mubr.f32.mxu1 %v28_v1  ;;  %247 = vmatmul.mubr.f32.gmra.mrb[2].mxu0 %v25_v2  ;;  %v154_v41 = vld [vmem:[%s1444_s1 + $0x348] sm:$0xff]  ;;  %v140_v43 = vld [vmem:[%s1444_s1 + $0x2d8] sm:$0xff]  ;;  %v171_v44 = vld [vmem:[%s1444_s1 + $0x3d0] sm:$0xff]  ;;  %v868_v46 = vpack.c.bf16 %v122_v37, %v121_v32 }
  0x2a   :  { %857 = vmatpush3.bf16.msra.mxu0 %v856_v63  ;;  %332 = vmatmul.mubr.f32.gmra.mrb[2].mxu1 %v27_v7  ;;  %v172_v45 = vld [vmem:[%s1444_s1 + $0x3d8] sm:$0xff]  ;;  %v22_v47 = vld [vmem:[%s1445_s0 + $0x28] sm:$0xff]  ;;  %v900_v49 = vpack.c.bf16 %v154_v41, %v153_v38  ;;  %v870_v50 = vpack.c.bf16 %v140_v43, %v139_v42  ;;  %v123_v51 = vld [vmem:[%s1444_s1 + $0x250] sm:$0xff] }
  0x2b   :  { %889 = vmatpush3.bf16.msra.mxu1 %v888_v3  ;;  %859 = vmatprep.subr.bf16.mxu0 %v858_v4  ;;  %v24_v48 = vld [vmem:[%s1445_s0 + $0x38] sm:$0xff]  ;;  %v155_v53 = vld [vmem:[%s1444_s1 + $0x350] sm:$0xff]  ;;  %v902_v54 = vpack.c.bf16 %v172_v45, %v171_v44  ;;  %v141_v56 = vld [vmem:[%s1444_s1 + $0x2e0] sm:$0xff] }
  0x2c   :  { %891 = vmatprep.subr.bf16.mxu1 %v890_v8  ;;  %251 = vmatprep.mubr.f32.mxu0 %v34_v14  ;;  %v124_v52 = vld [vmem:[%s1444_s1 + $0x258] sm:$0xff]  ;;  %v142_v57 = vld [vmem:[%s1444_s1 + $0x2e8] sm:$0xff]  ;;  %v173_v58 = vld [vmem:[%s1444_s1 + $0x3e0] sm:$0xff] }
  0x2d   :  { %336 = vmatprep.mubr.f32.mxu1 %v36_v17  ;;  %252 = vmatmul.mubr.f32.gmra.mrb[4].mxu0 %v33_v18  ;;  %v156_v55 = vld [vmem:[%s1444_s1 + $0x358] sm:$0xff]  ;;  %v174_v59 = vld [vmem:[%s1444_s1 + $0x3e8] sm:$0xff]  ;;  %v872_v60 = vpack.c.bf16 %v124_v52, %v123_v51  ;;  %v874_v62 = vpack.c.bf16 %v142_v57, %v141_v56  ;;  %v125_v63 = vld [vmem:[%s1444_s1 + $0x260] sm:$0xff] }
  0x2e   :  { %861 = vmatpush3.bf16.msra.mxu0 %v860_v15  ;;  %337 = vmatmul.mubr.f32.gmra.mrb[4].mxu1 %v35_v23  ;;  %v904_v61 = vpack.c.bf16 %v156_v55, %v155_v53  ;;  %v126_v0 = vld [vmem:[%s1444_s1 + $0x268] sm:$0xff]  ;;  %v157_v1 = vld [vmem:[%s1444_s1 + $0x360] sm:$0xff]  ;;  %v906_v2 = vpack.c.bf16 %v174_v59, %v173_v58  ;;  %v143_v4 = vld [vmem:[%s1444_s1 + $0x2f0] sm:$0xff] }
  0x2f   :  { %893 = vmatpush3.bf16.msra.mxu1 %v892_v19  ;;  %863 = vmatprep.subr.bf16.mxu0 %v862_v20  ;;  %v158_v3 = vld [vmem:[%s1444_s1 + $0x368] sm:$0xff]  ;;  %v144_v5 = vld [vmem:[%s1444_s1 + $0x2f8] sm:$0xff]  ;;  %v175_v6 = vld [vmem:[%s1444_s1 + $0x3f0] sm:$0xff]  ;;  %v876_v8 = vpack.c.bf16 %v126_v0, %v125_v63 }
  0x30   :  { %895 = vmatprep.subr.bf16.mxu1 %v894_v24  ;;  %256 = vmatprep.mubr.f32.mxu0 %v42_v30  ;;  %v176_v7 = vld [vmem:[%s1444_s1 + $0x3f8] sm:$0xff]  ;;  %v908_v9 = vpack.c.bf16 %v158_v3, %v157_v1  ;;  %v878_v10 = vpack.c.bf16 %v144_v5, %v143_v4  ;;  %v127_v11 = vld [vmem:[%s1444_s1 + $0x270] sm:$0xff]  ;;  %v21_v18 = vld [vmem:[%s1445_s0 + $0x20] sm:$0xff] }
  0x31   :  { %341 = vmatprep.mubr.f32.mxu1 %v44_v33  ;;  %257 = vmatmul.mubr.f32.gmra.mrb[6].mxu0 %v41_v34  ;;  %v128_v12 = vld [vmem:[%s1444_s1 + $0x278] sm:$0xff]  ;;  %v910_v13 = vpack.c.bf16 %v176_v7, %v175_v6  ;;  %v159_v14 = vld [vmem:[%s1444_s1 + $0x370] sm:$0xff]  ;;  %v30_v20 = vld [vmem:[%s1445_s0 + $0x68] sm:$0xff] }
  0x32   :  { %865 = vmatpush3.bf16.msra.mxu0 %v864_v31  ;;  %342 = vmatmul.mubr.f32.gmra.mrb[6].mxu1 %v43_v39  ;;  %v160_v15 = vld [vmem:[%s1444_s1 + $0x378] sm:$0xff]  ;;  %v880_v16 = vpack.c.bf16 %v128_v12, %v127_v11  ;;  %v23_v19 = vld [vmem:[%s1445_s0 + $0x30] sm:$0xff]  ;;  %v29_v22 = vld [vmem:[%s1445_s0 + $0x60] sm:$0xff] }
  0x33   :  { %897 = vmatpush3.bf16.msra.mxu1 %v896_v35  ;;  %867 = vmatprep.subr.bf16.mxu0 %v866_v36  ;;  %v912_v17 = vpack.c.bf16 %v160_v15, %v159_v14  ;;  %v32_v21 = vld [vmem:[%s1445_s0 + $0x78] sm:$0xff]  ;;  %v31_v23 = vld [vmem:[%s1445_s0 + $0x70] sm:$0xff]  ;;  %v38_v24 = vld [vmem:[%s1445_s0 + $0xa8] sm:$0xff] }
  0x34   :  { %899 = vmatprep.subr.bf16.mxu1 %v898_v40  ;;  %411 = vmatprep.mubr.f32.mxu0 %v22_v47  ;;  %v40_v25 = vld [vmem:[%s1445_s0 + $0xb8] sm:$0xff]  ;;  %v37_v26 = vld [vmem:[%s1445_s0 + $0xa0] sm:$0xff]  ;;  %v39_v27 = vld [vmem:[%s1445_s0 + $0xb0] sm:$0xff] }
  0x35   :  { %496 = vmatprep.mubr.f32.mxu1 %v24_v48  ;;  %v46_v28 = vld [vmem:[%s1445_s0 + $0xe8] sm:$0xff]  ;;  %v48_v29 = vld [vmem:[%s1445_s0 + $0xf8] sm:$0xff]  ;;  %v45_v30 = vld [vmem:[%s1445_s0 + $0xe0] sm:$0xff] }
  0x36   :  { %869 = vmatpush3.bf16.msra.mxu0 %v868_v46  ;;  %v47_v31 = vld [vmem:[%s1445_s0 + $0xf0] sm:$0xff] }
  0x37   :  { %901 = vmatpush3.bf16.msra.mxu1 %v900_v49  ;;  %871 = vmatprep.subr.bf16.mxu0 %v870_v50 }
  0x38   :  { %903 = vmatprep.subr.bf16.mxu1 %v902_v54 }
  0x3a   :  { %873 = vmatpush3.bf16.msra.mxu0 %v872_v60 }
  0x3b   :  { %905 = vmatpush3.bf16.msra.mxu1 %v904_v61  ;;  %875 = vmatprep.subr.bf16.mxu0 %v874_v62 }
  0x3c   :  { %907 = vmatprep.subr.bf16.mxu1 %v906_v2 }
  0x3e   :  { %877 = vmatpush3.bf16.msra.mxu0 %v876_v8 }
  0x3f   :  { %909 = vmatpush3.bf16.msra.mxu1 %v908_v9  ;;  %879 = vmatprep.subr.bf16.mxu0 %v878_v10 }
  0x40   :  { %911 = vmatprep.subr.bf16.mxu1 %v910_v13 }
  0x42   :  { %881 = vmatpush3.bf16.msra.mxu0 %v880_v16 }
  0x43   :  { %913 = vmatpush3.bf16.msra.mxu1 %v912_v17 }
  0x45   :  { %412 = vmatmul.mubr.f32.vlgmr.msra.gmra.mrb[8].mxu0 %v21_v18 }
  0x46   :  { %497 = vmatmul.mubr.f32.vlgmr.msra.gmra.mrb[8].mxu1 %v23_v19  ;;  %416 = vmatprep.mubr.f32.mxu0 %v30_v20 }
  0x47   :  { %501 = vmatprep.mubr.f32.mxu1 %v32_v21 }
  0x49   :  { %417 = vmatmul.mubr.f32.gmra.mrb[10].mxu0 %v29_v22 }
  0x4a   :  { %502 = vmatmul.mubr.f32.gmra.mrb[10].mxu1 %v31_v23  ;;  %421 = vmatprep.mubr.f32.mxu0 %v38_v24 }
  0x4b   :  { %506 = vmatprep.mubr.f32.mxu1 %v40_v25 }
  0x4d   :  { %422 = vmatmul.mubr.f32.gmra.mrb[12].mxu0 %v37_v26 }
  0x4e   :  { %507 = vmatmul.mubr.f32.gmra.mrb[12].mxu1 %v39_v27  ;;  %426 = vmatprep.mubr.f32.mxu0 %v46_v28 }
  0x4f   :  { %511 = vmatprep.mubr.f32.mxu1 %v48_v29 }
  0x51   :  { %427 = vmatmul.mubr.f32.gmra.mrb[14].mxu0 %v45_v30 }
  0x52   :  { %512 = vmatmul.mubr.f32.gmra.mrb[14].mxu1 %v47_v31 }
  0xf8   :  { %v642_v32 = vpop.f32.mrb[0].mxu0 }
  0xf9   :  { %v686_v33 = vpop.f32.mrb[0].mxu1  ;;  %v643_v34 = vpop.f32.mrb[1].mxu0 }
  0xfa   :  { %v644_v35 = vadd.f32 %v643_v34, %v642_v32  ;;  %v687_v36 = vpop.f32.mrb[1].mxu1 }
  0xfb   :  { %v688_v37 = vadd.f32 %v687_v36, %v686_v33 }
  0xfc   :  { %v645_v38 = vpop.f32.mrb[2].mxu0 }
  0xfd   :  { %v329_v39 = vadd.f32 %v688_v37, %v644_v35  ;;  %v689_v40 = vpop.f32.mrb[2].mxu1  ;;  %v646_v41 = vpop.f32.mrb[3].mxu0 }
  0xfe   :  { %v647_v42 = vadd.f32 %v646_v41, %v645_v38  ;;  %v690_v43 = vpop.f32.mrb[3].mxu1 }
  0xff   :  { %v691_v44 = vadd.f32 %v690_v43, %v689_v40 }
 0x100   :  { %v648_v45 = vpop.f32.mrb[4].mxu0 }
 0x101   :  { %v334_v46 = vadd.f32 %v691_v44, %v647_v42  ;;  %v692_v47 = vpop.f32.mrb[4].mxu1  ;;  %v649_v48 = vpop.f32.mrb[5].mxu0 }
 0x102   :  { %v650_v49 = vadd.f32 %v649_v48, %v648_v45  ;;  %v693_v50 = vpop.f32.mrb[5].mxu1 }
 0x103   :  { %v694_v51 = vadd.f32 %v693_v50, %v692_v47 }
 0x104   :  { %v651_v52 = vpop.f32.mrb[6].mxu0 }
 0x105   :  { %v339_v53 = vadd.f32 %v694_v51, %v650_v49  ;;  %v695_v54 = vpop.f32.mrb[6].mxu1  ;;  %v652_v55 = vpop.f32.mrb[7].mxu0 }
 0x106   :  { %v653_v56 = vadd.f32 %v652_v55, %v651_v52  ;;  %v696_v57 = vpop.f32.mrb[7].mxu1 }
 0x107   :  { %v697_v58 = vadd.f32 %v696_v57, %v695_v54  ;;  %v571_v57 = vlaneseq }
 0x109   :  { %v344_v59 = vadd.f32 %v697_v58, %v653_v56  ;;  %v572_v58 = vshrl.u32 %v571_v57, 7 }
 0x118   :  { %v730_v60 = vpop.f32.mrb[8].mxu0 }
 0x119   :  { %v731_v61 = vpop.f32.mrb[9].mxu0  ;;  %v774_v62 = vpop.f32.mrb[8].mxu1 }
 0x11a   :  { %v732_v63 = vadd.f32 %v731_v61, %v730_v60  ;;  %v775_v0 = vpop.f32.mrb[9].mxu1  ;;  %v573_v60 = vsub.s32 0, %v572_v58 }
 0x11b   :  { %v776_v1 = vadd.f32 %v775_v0, %v774_v62 }
 0x11c   :  { %v414_v2 = vadd.f32 %v732_v63, %v329_v39  ;;  %v733_v3 = vpop.f32.mrb[10].mxu0  ;;  %v567_v63 = vld [vmem:[%s1447_s3] sm:$0x1] }
 0x11d   :  { %v734_v4 = vpop.f32.mrb[11].mxu0  ;;  %v777_v5 = vpop.f32.mrb[10].mxu1 }
 0x11e   :  { %v1421_v6 = vadd.f32 %v776_v1, %v414_v2  ;;  %v735_v7 = vadd.f32 %v734_v4, %v733_v3  ;;  %v778_v8 = vpop.f32.mrb[11].mxu1 }
 0x11f   :  { %v779_v9 = vadd.f32 %v778_v8, %v777_v5 }
 0x120   :  { %v419_v10 = vadd.f32 %v735_v7, %v334_v46  ;;  %v736_v11 = vpop.f32.mrb[12].mxu0 }
 0x121   :  { %v737_v12 = vpop.f32.mrb[13].mxu0  ;;  %v780_v13 = vpop.f32.mrb[12].mxu1 }
 0x122   :  { %v504_v14 = vadd.f32 %v779_v9, %v419_v10  ;;  %v738_v15 = vadd.f32 %v737_v12, %v736_v11  ;;  %v781_v16 = vpop.f32.mrb[13].mxu1 }
 0x123   :  { %v782_v17 = vadd.f32 %v781_v16, %v780_v13 }
 0x124   :  { %v530_v18 = vadd.f32 %v504_v14, %v1421_v6  ;;  %v424_v19 = vadd.f32 %v738_v15, %v339_v53  ;;  %v739_v20 = vpop.f32.mrb[14].mxu0 }
 0x125   :  { %v740_v21 = vpop.f32.mrb[15].mxu0  ;;  %v783_v22 = vpop.f32.mrb[14].mxu1 }
 0x126   :  { %v509_v23 = vadd.f32 %v782_v17, %v424_v19  ;;  %v741_v24 = vadd.f32 %v740_v21, %v739_v20  ;;  %v784_v25 = vpop.f32.mrb[15].mxu1 }
 0x127   :  { %v785_v26 = vadd.f32 %v784_v25, %v783_v22 }
 0x128   :  { %v531_v27 = vadd.f32 %v530_v18, %v509_v23  ;;  %v429_v28 = vadd.f32 %v741_v24, %v344_v59  ;;  %v563_v59 = vld [vmem:[%s1446_s2] sm:$0x1] }
 0x12a   :  { %v514_v29 = vadd.f32 %v785_v26, %v429_v28 }
 0x12c   :  { %v532_v30 = vadd.f32 %v531_v27, %v514_v29 }
 0x12e   :  { %v533_v31 = vrot.slane %v532_v30, 4 }
 0x130   :  { %v534_v32 = vadd.f32 %v533_v31, %v532_v30 }
 0x132   :  { %v535_v33 = vrot.slane %v534_v32, 2 }
 0x134   :  { %v536_v34 = vadd.f32 %v535_v33, %v534_v32 }
 0x136   :  { %v537_v35 = vrot.slane %v536_v34, 1 }
 0x138   :  { %v538_v36 = vadd.f32 %v537_v35, %v536_v34 }
 0x13a   :  { %v540_v37 = vmul.f32 0.03125, %v538_v36 }
 0x13c   :  { %v541_v38 = vsub.f32 %v1421_v6, %v540_v37  ;;  %v542_v39 = vsub.f32 %v504_v14, %v540_v37  ;;  %v543_v40 = vsub.f32 %v509_v23, %v540_v37  ;;  %v544_v41 = vsub.f32 %v514_v29, %v540_v37 }
 0x13e   :  { %v549_v42 = vmul.f32 %v541_v38, %v541_v38  ;;  %v550_v43 = vmul.f32 %v542_v39, %v542_v39  ;;  %v551_v44 = vmul.f32 %v543_v40, %v543_v40  ;;  %v552_v46 = vmul.f32 %v544_v41, %v544_v41 }
 0x140   :  { %v553_v45 = vadd.f32 %v550_v43, %v549_v42 }
 0x142   :  { %v554_v47 = vadd.f32 %v553_v45, %v551_v44 }
 0x144   :  { %v555_v48 = vadd.f32 %v554_v47, %v552_v46 }
 0x146   :  { %v556_v49 = vrot.slane %v555_v48, 4 }
 0x148   :  { %v557_v50 = vadd.f32 %v556_v49, %v555_v48 }
 0x14a   :  { %v558_v51 = vrot.slane %v557_v50, 2 }
 0x14c   :  { %v559_v52 = vadd.f32 %v558_v51, %v557_v50 }
 0x14e   :  { %v560_v53 = vrot.slane %v559_v52, 1 }
 0x150   :  { %v561_v54 = vadd.f32 %v560_v53, %v559_v52 }
 0x152   :  { %v562_v55 = vmul.f32 0.03125, %v561_v54 }
 0x154   :  { %v564_v56 = vadd.f32 1e-05, %v562_v55 }
 0x156   :  { %914 = vrsqrt.f32 %v564_v56 }
 0x160   :  { %v915_v61 = vpop.eup %914 }
 0x161   :  { %v566_v62 = vmul.f32 %v915_v61, %v563_v59 }
 0x163   :  { %v568_v0 = vmul.f32 %v566_v62, %v540_v37  ;;  %v574_v1 = vrot.slane %v566_v62, %v573_v60 }
 0x165   :  { %v569_v2 = vsub.f32 %v567_v63, %v568_v0  ;;  %v576_v3 = vmul.f32 %v574_v1, %v1421_v6  ;;  %v577_v4 = vmul.f32 %v574_v1, %v504_v14  ;;  %v578_v5 = vmul.f32 %v574_v1, %v509_v23 }
 0x166   :  { %v579_v7 = vmul.f32 %v574_v1, %v514_v29 }
 0x167   :  { %v584_v8 = vrot.slane %v569_v2, %v573_v60 }
 0x169   :  { %v586_v9 = vadd.f32 %v584_v8, %v576_v3  ;;  %v587_v10 = vadd.f32 %v584_v8, %v577_v4  ;;  %v588_v11 = vadd.f32 %v584_v8, %v578_v5  ;;  %v589_v12 = vadd.f32 %v584_v8, %v579_v7 }
 0x16b   :  { %vm590_vm0 = vcmp.ge.f32.partialorder %v586_v9, 0.0  ;;  %vm591_vm1 = vcmp.ge.f32.partialorder %v587_v10, 0.0  ;;  %vm592_vm2 = vcmp.ge.f32.partialorder %v588_v11, 0.0  ;;  %vm593_vm3 = vcmp.ge.f32.partialorder %v589_v12, 0.0 }
 0x16c   :  { %v594_v13 = vmul.f32 0.2, %v586_v9  ;;  %v595_v15 = vmul.f32 0.2, %v587_v10  ;;  %v596_v16 = vmul.f32 0.2, %v588_v11 }
 0x16d   :  { %v597_v17 = vmul.f32 0.2, %v589_v12 }
 0x16e   :  { %v598_v18 = vsel %vm590_vm0, %v586_v9, %v594_v13  ;;  %v599_v19 = vsel %vm591_vm1, %v587_v10, %v595_v15  ;;  %v600_v20 = vsel %vm592_vm2, %v588_v11, %v596_v16 }
 0x16f   :  { %v601_v6 = vsel %vm593_vm3, %v589_v12, %v597_v17  ;;  %602 = vst [vmem:[%s1448_s4] sm:$0xff] %v598_v18  ;;  %603 = vst [vmem:[%s1448_s4 + $0x8] sm:$0xff] %v599_v19 }
 0x170   :  { %604 = vst [vmem:[%s1448_s4 + $0x10] sm:$0xff] %v600_v20  ;;  %605 = vst [vmem:[%s1448_s4 + $0x18] sm:$0xff] %v601_v6 }

// kernel: encoder_decoder_forward.11
= control target key start
LH: loop header
LB: loop body
LE: loop exit
PB: predicated region body
PF: predicated region fallthrough
CT: control target
= control target key end

     0   :  { %s2578_s1 = inlined_call_operand.vmem [shape: f32[2048,128], index: 1, kind: input, shape index: {}]   ;;  %s2579_s0 = inlined_call_operand.vmem [shape: f32[24,2048], index: 0, kind: input, shape index: {}]   ;;  %s2580_s2 = inlined_call_operand.vmem [shape: f32[1,128], index: 2, kind: input, shape index: {}]   ;;  %s2581_s3 = inlined_call_operand.vmem [shape: f32[1,128], index: 3, kind: input, shape index: {}]   ;;  %s2582_s4 = inlined_call_operand.vmem [shape: f32[24,128], index: 4, kind: output, shape index: {}]  }
   0x1   :  { %v81_v0 = vld [vmem:[%s2578_s1 + $0x80] sm:$0xff]  ;;  %v82_v1 = vld [vmem:[%s2578_s1 + $0x88] sm:$0xff]  ;;  %v83_v11 = vld [vmem:[%s2578_s1 + $0x90] sm:$0xff] }
   0x2   :  { %v113_v2 = vld [vmem:[%s2578_s1 + $0x180] sm:$0xff]  ;;  %v1368_v3 = vpack.c.bf16 %v82_v1, %v81_v0  ;;  %v114_v4 = vld [vmem:[%s2578_s1 + $0x188] sm:$0xff]  ;;  %v84_v13 = vld [vmem:[%s2578_s1 + $0x98] sm:$0xff] }
   0x3   :  { %v65_v5 = vld [vmem:[%s2578_s1] sm:$0xff]  ;;  %v66_v6 = vld [vmem:[%s2578_s1 + $0x8] sm:$0xff]  ;;  %v1400_v7 = vpack.c.bf16 %v114_v4, %v113_v2  ;;  %v115_v14 = vld [vmem:[%s2578_s1 + $0x190] sm:$0xff]  ;;  %v1372_v16 = vpack.c.bf16 %v84_v13, %v83_v11 }
   0x4   :  { %v1370_v8 = vpack.c.bf16 %v66_v6, %v65_v5  ;;  %v97_v9 = vld [vmem:[%s2578_s1 + $0x100] sm:$0xff]  ;;  %v98_v10 = vld [vmem:[%s2578_s1 + $0x108] sm:$0xff]  ;;  %1369 = vmatprep.subr.bf16.mxu0 %v1368_v3  ;;  %v116_v15 = vld [vmem:[%s2578_s1 + $0x198] sm:$0xff] }
   0x5   :  { %v1402_v12 = vpack.c.bf16 %v98_v10, %v97_v9  ;;  %1401 = vmatprep.subr.bf16.mxu1 %v1400_v7  ;;  %v1404_v17 = vpack.c.bf16 %v116_v15, %v115_v14  ;;  %v67_v18 = vld [vmem:[%s2578_s1 + $0x10] sm:$0xff]  ;;  %v68_v19 = vld [vmem:[%s2578_s1 + $0x18] sm:$0xff]  ;;  %v85_v23 = vld [vmem:[%s2578_s1 + $0xa0] sm:$0xff] }
   0x6   :  { %1371 = vmatpush3.bf16.msra.mxu0 %v1370_v8  ;;  %v99_v20 = vld [vmem:[%s2578_s1 + $0x110] sm:$0xff]  ;;  %v1374_v21 = vpack.c.bf16 %v68_v19, %v67_v18  ;;  %v100_v22 = vld [vmem:[%s2578_s1 + $0x118] sm:$0xff]  ;;  %v86_v24 = vld [vmem:[%s2578_s1 + $0xa8] sm:$0xff] }
   0x7   :  { %1403 = vmatpush3.bf16.msra.mxu1 %v1402_v12  ;;  %1373 = vmatprep.subr.bf16.mxu0 %v1372_v16  ;;  %v1406_v25 = vpack.c.bf16 %v100_v22, %v99_v20  ;;  %v1376_v26 = vpack.c.bf16 %v86_v24, %v85_v23  ;;  %v117_v27 = vld [vmem:[%s2578_s1 + $0x1a0] sm:$0xff]  ;;  %v118_v28 = vld [vmem:[%s2578_s1 + $0x1a8] sm:$0xff]  ;;  %v87_v35 = vld [vmem:[%s2578_s1 + $0xb0] sm:$0xff] }
   0x8   :  { %1405 = vmatprep.subr.bf16.mxu1 %v1404_v17  ;;  %v69_v29 = vld [vmem:[%s2578_s1 + $0x20] sm:$0xff]  ;;  %v1408_v30 = vpack.c.bf16 %v118_v28, %v117_v27  ;;  %v70_v31 = vld [vmem:[%s2578_s1 + $0x28] sm:$0xff]  ;;  %v88_v36 = vld [vmem:[%s2578_s1 + $0xb8] sm:$0xff] }
   0x9   :  { %v101_v32 = vld [vmem:[%s2578_s1 + $0x120] sm:$0xff]  ;;  %v102_v33 = vld [vmem:[%s2578_s1 + $0x128] sm:$0xff]  ;;  %v1378_v34 = vpack.c.bf16 %v70_v31, %v69_v29  ;;  %v119_v37 = vld [vmem:[%s2578_s1 + $0x1b0] sm:$0xff]  ;;  %v1380_v39 = vpack.c.bf16 %v88_v36, %v87_v35 }
   0xa   :  { %1375 = vmatpush3.bf16.msra.mxu0 %v1374_v21  ;;  %v1410_v38 = vpack.c.bf16 %v102_v33, %v101_v32  ;;  %v120_v40 = vld [vmem:[%s2578_s1 + $0x1b8] sm:$0xff]  ;;  %v71_v41 = vld [vmem:[%s2578_s1 + $0x30] sm:$0xff]  ;;  %v89_v46 = vld [vmem:[%s2578_s1 + $0xc0] sm:$0xff] }
   0xb   :  { %1407 = vmatpush3.bf16.msra.mxu1 %v1406_v25  ;;  %1377 = vmatprep.subr.bf16.mxu0 %v1376_v26  ;;  %v72_v42 = vld [vmem:[%s2578_s1 + $0x38] sm:$0xff]  ;;  %v1412_v43 = vpack.c.bf16 %v120_v40, %v119_v37  ;;  %v103_v44 = vld [vmem:[%s2578_s1 + $0x130] sm:$0xff]  ;;  %v90_v47 = vld [vmem:[%s2578_s1 + $0xc8] sm:$0xff] }
   0xc   :  { %1409 = vmatprep.subr.bf16.mxu1 %v1408_v30  ;;  %v104_v45 = vld [vmem:[%s2578_s1 + $0x138] sm:$0xff]  ;;  %v121_v48 = vld [vmem:[%s2578_s1 + $0x1c0] sm:$0xff]  ;;  %v122_v49 = vld [vmem:[%s2578_s1 + $0x1c8] sm:$0xff]  ;;  %v1382_v50 = vpack.c.bf16 %v72_v42, %v71_v41  ;;  %v1384_v52 = vpack.c.bf16 %v90_v47, %v89_v46 }
   0xd   :  { %v1414_v51 = vpack.c.bf16 %v104_v45, %v103_v44  ;;  %v73_v53 = vld [vmem:[%s2578_s1 + $0x40] sm:$0xff]  ;;  %v74_v54 = vld [vmem:[%s2578_s1 + $0x48] sm:$0xff]  ;;  %v1416_v56 = vpack.c.bf16 %v122_v49, %v121_v48  ;;  %v91_v58 = vld [vmem:[%s2578_s1 + $0xd0] sm:$0xff] }
   0xe   :  { %1379 = vmatpush3.bf16.msra.mxu0 %v1378_v34  ;;  %v105_v55 = vld [vmem:[%s2578_s1 + $0x140] sm:$0xff]  ;;  %v106_v57 = vld [vmem:[%s2578_s1 + $0x148] sm:$0xff]  ;;  %v92_v59 = vld [vmem:[%s2578_s1 + $0xd8] sm:$0xff]  ;;  %v1386_v62 = vpack.c.bf16 %v74_v54, %v73_v53 }
   0xf   :  { %1411 = vmatpush3.bf16.msra.mxu1 %v1410_v38  ;;  %1381 = vmatprep.subr.bf16.mxu0 %v1380_v39  ;;  %v123_v60 = vld [vmem:[%s2578_s1 + $0x1d0] sm:$0xff]  ;;  %v124_v61 = vld [vmem:[%s2578_s1 + $0x1d8] sm:$0xff]  ;;  %v1418_v63 = vpack.c.bf16 %v106_v57, %v105_v55  ;;  %v1388_v0 = vpack.c.bf16 %v92_v59, %v91_v58  ;;  %v93_v6 = vld [vmem:[%s2578_s1 + $0xe0] sm:$0xff] }
  0x10   :  { %1413 = vmatprep.subr.bf16.mxu1 %v1412_v43  ;;  %v75_v1 = vld [vmem:[%s2578_s1 + $0x50] sm:$0xff]  ;;  %v76_v2 = vld [vmem:[%s2578_s1 + $0x58] sm:$0xff]  ;;  %v1420_v4 = vpack.c.bf16 %v124_v61, %v123_v60  ;;  %v94_v7 = vld [vmem:[%s2578_s1 + $0xe8] sm:$0xff] }
  0x11   :  { %v107_v3 = vld [vmem:[%s2578_s1 + $0x150] sm:$0xff]  ;;  %v108_v5 = vld [vmem:[%s2578_s1 + $0x158] sm:$0xff]  ;;  %v125_v8 = vld [vmem:[%s2578_s1 + $0x1e0] sm:$0xff]  ;;  %v1390_v10 = vpack.c.bf16 %v76_v2, %v75_v1  ;;  %v1392_v14 = vpack.c.bf16 %v94_v7, %v93_v6 }
  0x12   :  { %1383 = vmatpush3.bf16.msra.mxu0 %v1382_v50  ;;  %v126_v9 = vld [vmem:[%s2578_s1 + $0x1e8] sm:$0xff]  ;;  %v77_v11 = vld [vmem:[%s2578_s1 + $0x60] sm:$0xff]  ;;  %v1422_v13 = vpack.c.bf16 %v108_v5, %v107_v3  ;;  %v20_v17 = vld [vmem:[%s2579_s0 + $0x18] sm:$0xff] }
  0x13   :  { %1415 = vmatpush3.bf16.msra.mxu1 %v1414_v51  ;;  %1385 = vmatprep.subr.bf16.mxu0 %v1384_v52  ;;  %v78_v12 = vld [vmem:[%s2578_s1 + $0x68] sm:$0xff]  ;;  %v109_v15 = vld [vmem:[%s2578_s1 + $0x160] sm:$0xff]  ;;  %v1424_v18 = vpack.c.bf16 %v126_v9, %v125_v8  ;;  %v95_v20 = vld [vmem:[%s2578_s1 + $0xf0] sm:$0xff] }
  0x14   :  { %1417 = vmatprep.subr.bf16.mxu1 %v1416_v56  ;;  %v18_v16 = vld [vmem:[%s2579_s0 + $0x8] sm:$0xff]  ;;  %v96_v21 = vld [vmem:[%s2578_s1 + $0xf8] sm:$0xff]  ;;  %v127_v22 = vld [vmem:[%s2578_s1 + $0x1f0] sm:$0xff]  ;;  %465 = vmatprep.mubr.f32.mxu1 %v20_v17  ;;  %v1394_v24 = vpack.c.bf16 %v78_v12, %v77_v11 }
  0x15   :  { %v110_v19 = vld [vmem:[%s2578_s1 + $0x168] sm:$0xff]  ;;  %385 = vmatprep.mubr.f32.mxu0 %v18_v16  ;;  %v128_v23 = vld [vmem:[%s2578_s1 + $0x1f8] sm:$0xff]  ;;  %v1396_v26 = vpack.c.bf16 %v96_v21, %v95_v20  ;;  %v79_v27 = vld [vmem:[%s2578_s1 + $0x70] sm:$0xff] }
  0x16   :  { %1387 = vmatpush3.bf16.msra.mxu0 %v1386_v62  ;;  %v1426_v25 = vpack.c.bf16 %v110_v19, %v109_v15  ;;  %v80_v28 = vld [vmem:[%s2578_s1 + $0x78] sm:$0xff]  ;;  %v111_v29 = vld [vmem:[%s2578_s1 + $0x170] sm:$0xff]  ;;  %v1428_v30 = vpack.c.bf16 %v128_v23, %v127_v22  ;;  %v145_v32 = vld [vmem:[%s2578_s1 + $0x280] sm:$0xff] }
  0x17   :  { %1419 = vmatpush3.bf16.msra.mxu1 %v1418_v63  ;;  %1389 = vmatprep.subr.bf16.mxu0 %v1388_v0  ;;  %v112_v31 = vld [vmem:[%s2578_s1 + $0x178] sm:$0xff]  ;;  %v146_v33 = vld [vmem:[%s2578_s1 + $0x288] sm:$0xff]  ;;  %v177_v34 = vld [vmem:[%s2578_s1 + $0x380] sm:$0xff]  ;;  %v1398_v36 = vpack.c.bf16 %v80_v28, %v79_v27 }
  0x18   :  { %1421 = vmatprep.subr.bf16.mxu1 %v1420_v4  ;;  %v178_v35 = vld [vmem:[%s2578_s1 + $0x388] sm:$0xff]  ;;  %v1430_v37 = vpack.c.bf16 %v112_v31, %v111_v29  ;;  %v1432_v38 = vpack.c.bf16 %v146_v33, %v145_v32  ;;  %v129_v39 = vld [vmem:[%s2578_s1 + $0x200] sm:$0xff]  ;;  %v147_v44 = vld [vmem:[%s2578_s1 + $0x290] sm:$0xff] }
  0x19   :  { %v130_v40 = vld [vmem:[%s2578_s1 + $0x208] sm:$0xff]  ;;  %v161_v41 = vld [vmem:[%s2578_s1 + $0x300] sm:$0xff]  ;;  %v1464_v42 = vpack.c.bf16 %v178_v35, %v177_v34  ;;  %v148_v45 = vld [vmem:[%s2578_s1 + $0x298] sm:$0xff] }
  0x1a   :  { %1391 = vmatpush3.bf16.msra.mxu0 %v1390_v10  ;;  %v162_v43 = vld [vmem:[%s2578_s1 + $0x308] sm:$0xff]  ;;  %v179_v46 = vld [vmem:[%s2578_s1 + $0x390] sm:$0xff]  ;;  %v180_v47 = vld [vmem:[%s2578_s1 + $0x398] sm:$0xff]  ;;  %v1434_v50 = vpack.c.bf16 %v130_v40, %v129_v39  ;;  %v1436_v52 = vpack.c.bf16 %v148_v45, %v147_v44 }
  0x1b   :  { %1423 = vmatpush3.bf16.msra.mxu1 %v1422_v13  ;;  %1393 = vmatprep.subr.bf16.mxu0 %v1392_v14  ;;  %v17_v48 = vld [vmem:[%s2579_s0] sm:$0xff]  ;;  %v19_v49 = vld [vmem:[%s2579_s0 + $0x10] sm:$0xff]  ;;  %v1466_v51 = vpack.c.bf16 %v162_v43, %v161_v41  ;;  %v132_v54 = vld [vmem:[%s2578_s1 + $0x218] sm:$0xff]  ;;  %v1468_v56 = vpack.c.bf16 %v180_v47, %v179_v46 }
  0x1c   :  { %1425 = vmatprep.subr.bf16.mxu1 %v1424_v18  ;;  %v131_v53 = vld [vmem:[%s2578_s1 + $0x210] sm:$0xff]  ;;  %v164_v57 = vld [vmem:[%s2578_s1 + $0x318] sm:$0xff]  ;;  %v149_v58 = vld [vmem:[%s2578_s1 + $0x2a0] sm:$0xff] }
  0x1d   :  { %v163_v55 = vld [vmem:[%s2578_s1 + $0x310] sm:$0xff]  ;;  %v150_v59 = vld [vmem:[%s2578_s1 + $0x2a8] sm:$0xff]  ;;  %v181_v60 = vld [vmem:[%s2578_s1 + $0x3a0] sm:$0xff]  ;;  %v1438_v62 = vpack.c.bf16 %v132_v54, %v131_v53 }
  0x1e   :  { %1395 = vmatpush3.bf16.msra.mxu0 %v1394_v24  ;;  %v182_v61 = vld [vmem:[%s2578_s1 + $0x3a8] sm:$0xff]  ;;  %v133_v63 = vld [vmem:[%s2578_s1 + $0x220] sm:$0xff]  ;;  %v1470_v1 = vpack.c.bf16 %v164_v57, %v163_v55  ;;  %v1440_v2 = vpack.c.bf16 %v150_v59, %v149_v58  ;;  %v151_v5 = vld [vmem:[%s2578_s1 + $0x2b0] sm:$0xff] }
  0x1f   :  { %1427 = vmatpush3.bf16.msra.mxu1 %v1426_v25  ;;  %1397 = vmatprep.subr.bf16.mxu0 %v1396_v26  ;;  %v134_v0 = vld [vmem:[%s2578_s1 + $0x228] sm:$0xff]  ;;  %v165_v3 = vld [vmem:[%s2578_s1 + $0x320] sm:$0xff]  ;;  %v1472_v6 = vpack.c.bf16 %v182_v61, %v181_v60  ;;  %v152_v7 = vld [vmem:[%s2578_s1 + $0x2b8] sm:$0xff] }
  0x20   :  { %1429 = vmatprep.subr.bf16.mxu1 %v1428_v30  ;;  %v166_v4 = vld [vmem:[%s2578_s1 + $0x328] sm:$0xff]  ;;  %v183_v8 = vld [vmem:[%s2578_s1 + $0x3b0] sm:$0xff]  ;;  %v184_v10 = vld [vmem:[%s2578_s1 + $0x3b8] sm:$0xff]  ;;  %v1442_v13 = vpack.c.bf16 %v134_v0, %v133_v63  ;;  %v1444_v18 = vpack.c.bf16 %v152_v7, %v151_v5 }
  0x21   :  { %v34_v9 = vld [vmem:[%s2579_s0 + $0x88] sm:$0xff]  ;;  %v36_v11 = vld [vmem:[%s2579_s0 + $0x98] sm:$0xff]  ;;  %v33_v12 = vld [vmem:[%s2579_s0 + $0x80] sm:$0xff]  ;;  %v1474_v17 = vpack.c.bf16 %v166_v4, %v165_v3  ;;  %v1476_v22 = vpack.c.bf16 %v184_v10, %v183_v8 }
  0x22   :  { %1399 = vmatpush3.bf16.msra.mxu0 %v1398_v36  ;;  %v135_v14 = vld [vmem:[%s2578_s1 + $0x230] sm:$0xff]  ;;  %v136_v15 = vld [vmem:[%s2578_s1 + $0x238] sm:$0xff]  ;;  %v153_v21 = vld [vmem:[%s2578_s1 + $0x2c0] sm:$0xff] }
  0x23   :  { %1431 = vmatpush3.bf16.msra.mxu1 %v1430_v37  ;;  %1433 = vmatprep.subr.bf16.mxu0 %v1432_v38  ;;  %v35_v16 = vld [vmem:[%s2579_s0 + $0x90] sm:$0xff]  ;;  %v168_v20 = vld [vmem:[%s2578_s1 + $0x338] sm:$0xff]  ;;  %v154_v23 = vld [vmem:[%s2578_s1 + $0x2c8] sm:$0xff]  ;;  %v1446_v29 = vpack.c.bf16 %v136_v15, %v135_v14 }
  0x24   :  { %1465 = vmatprep.subr.bf16.mxu1 %v1464_v42  ;;  %v167_v19 = vld [vmem:[%s2578_s1 + $0x330] sm:$0xff]  ;;  %v185_v24 = vld [vmem:[%s2578_s1 + $0x3c0] sm:$0xff]  ;;  %v50_v25 = vld [vmem:[%s2579_s0 + $0x108] sm:$0xff]  ;;  %v1448_v33 = vpack.c.bf16 %v154_v23, %v153_v21 }
  0x25   :  { %386 = vmatmul.mubr.f32.vlgmr.msra.gmra.mrb[0].mxu0 %v17_v48  ;;  %v186_v26 = vld [vmem:[%s2578_s1 + $0x3c8] sm:$0xff]  ;;  %v52_v27 = vld [vmem:[%s2579_s0 + $0x118] sm:$0xff]  ;;  %v49_v28 = vld [vmem:[%s2579_s0 + $0x100] sm:$0xff]  ;;  %v1478_v32 = vpack.c.bf16 %v168_v20, %v167_v19 }
  0x26   :  { %466 = vmatmul.mubr.f32.vlgmr.msra.gmra.mrb[0].mxu1 %v19_v49  ;;  %1435 = vmatpush3.bf16.msra.mxu0 %v1434_v50  ;;  %v137_v30 = vld [vmem:[%s2578_s1 + $0x240] sm:$0xff]  ;;  %v51_v31 = vld [vmem:[%s2579_s0 + $0x110] sm:$0xff]  ;;  %v138_v34 = vld [vmem:[%s2578_s1 + $0x248] sm:$0xff]  ;;  %v1480_v37 = vpack.c.bf16 %v186_v26, %v185_v24 }
  0x27   :  { %1467 = vmatpush3.bf16.msra.mxu1 %v1466_v51  ;;  %1437 = vmatprep.subr.bf16.mxu0 %v1436_v52  ;;  %v169_v35 = vld [vmem:[%s2578_s1 + $0x340] sm:$0xff]  ;;  %v170_v36 = vld [vmem:[%s2578_s1 + $0x348] sm:$0xff]  ;;  %v155_v38 = vld [vmem:[%s2578_s1 + $0x2d0] sm:$0xff]  ;;  %v1450_v43 = vpack.c.bf16 %v138_v34, %v137_v30 }
  0x28   :  { %1469 = vmatprep.subr.bf16.mxu1 %v1468_v56  ;;  %390 = vmatprep.mubr.f32.mxu0 %v34_v9  ;;  %v156_v39 = vld [vmem:[%s2578_s1 + $0x2d8] sm:$0xff]  ;;  %v22_v40 = vld [vmem:[%s2579_s0 + $0x28] sm:$0xff]  ;;  %v187_v41 = vld [vmem:[%s2578_s1 + $0x3d0] sm:$0xff]  ;;  %v1482_v45 = vpack.c.bf16 %v170_v36, %v169_v35 }
  0x29   :  { %470 = vmatprep.mubr.f32.mxu1 %v36_v11  ;;  %391 = vmatmul.mubr.f32.gmra.mrb[2].mxu0 %v33_v12  ;;  %v188_v42 = vld [vmem:[%s2578_s1 + $0x3d8] sm:$0xff]  ;;  %v1452_v46 = vpack.c.bf16 %v156_v39, %v155_v38  ;;  %v139_v47 = vld [vmem:[%s2578_s1 + $0x250] sm:$0xff]  ;;  %v157_v52 = vld [vmem:[%s2578_s1 + $0x2e0] sm:$0xff] }
  0x2a   :  { %1439 = vmatpush3.bf16.msra.mxu0 %v1438_v62  ;;  %471 = vmatmul.mubr.f32.gmra.mrb[2].mxu1 %v35_v16  ;;  %v24_v44 = vld [vmem:[%s2579_s0 + $0x38] sm:$0xff]  ;;  %v171_v49 = vld [vmem:[%s2578_s1 + $0x350] sm:$0xff]  ;;  %v1484_v50 = vpack.c.bf16 %v188_v42, %v187_v41  ;;  %v158_v53 = vld [vmem:[%s2578_s1 + $0x2e8] sm:$0xff] }
  0x2b   :  { %1471 = vmatpush3.bf16.msra.mxu1 %v1470_v1  ;;  %1441 = vmatprep.subr.bf16.mxu0 %v1440_v2  ;;  %v140_v48 = vld [vmem:[%s2578_s1 + $0x258] sm:$0xff]  ;;  %v189_v54 = vld [vmem:[%s2578_s1 + $0x3e0] sm:$0xff]  ;;  %v190_v55 = vld [vmem:[%s2578_s1 + $0x3e8] sm:$0xff]  ;;  %v1456_v58 = vpack.c.bf16 %v158_v53, %v157_v52 }
  0x2c   :  { %1473 = vmatprep.subr.bf16.mxu1 %v1472_v6  ;;  %395 = vmatprep.mubr.f32.mxu0 %v50_v25  ;;  %v172_v51 = vld [vmem:[%s2578_s1 + $0x358] sm:$0xff]  ;;  %v1454_v56 = vpack.c.bf16 %v140_v48, %v139_v47  ;;  %v141_v59 = vld [vmem:[%s2578_s1 + $0x260] sm:$0xff]  ;;  %v142_v60 = vld [vmem:[%s2578_s1 + $0x268] sm:$0xff]  ;;  %v1488_v62 = vpack.c.bf16 %v190_v55, %v189_v54 }
  0x2d   :  { %475 = vmatprep.mubr.f32.mxu1 %v52_v27  ;;  %396 = vmatmul.mubr.f32.gmra.mrb[4].mxu0 %v49_v28  ;;  %v1486_v57 = vpack.c.bf16 %v172_v51, %v171_v49  ;;  %v173_v61 = vld [vmem:[%s2578_s1 + $0x360] sm:$0xff]  ;;  %v174_v63 = vld [vmem:[%s2578_s1 + $0x368] sm:$0xff]  ;;  %v159_v0 = vld [vmem:[%s2578_s1 + $0x2f0] sm:$0xff]  ;;  %v1458_v4 = vpack.c.bf16 %v142_v60, %v141_v59 }
  0x2e   :  { %1443 = vmatpush3.bf16.msra.mxu0 %v1442_v13  ;;  %476 = vmatmul.mubr.f32.gmra.mrb[4].mxu1 %v51_v31  ;;  %v160_v1 = vld [vmem:[%s2578_s1 + $0x2f8] sm:$0xff]  ;;  %v191_v2 = vld [vmem:[%s2578_s1 + $0x3f0] sm:$0xff]  ;;  %v1490_v5 = vpack.c.bf16 %v174_v63, %v173_v61  ;;  %v209_v12 = vld [vmem:[%s2578_s1 + $0x480] sm:$0xff] }
  0x2f   :  { %1475 = vmatpush3.bf16.msra.mxu1 %v1474_v17  ;;  %1445 = vmatprep.subr.bf16.mxu0 %v1444_v18  ;;  %v192_v3 = vld [vmem:[%s2578_s1 + $0x3f8] sm:$0xff]  ;;  %v1460_v6 = vpack.c.bf16 %v160_v1, %v159_v0  ;;  %v143_v7 = vld [vmem:[%s2578_s1 + $0x270] sm:$0xff]  ;;  %v210_v13 = vld [vmem:[%s2578_s1 + $0x488] sm:$0xff] }
  0x30   :  { %1477 = vmatprep.subr.bf16.mxu1 %v1476_v22  ;;  %545 = vmatprep.mubr.f32.mxu0 %v22_v40  ;;  %v144_v8 = vld [vmem:[%s2578_s1 + $0x278] sm:$0xff]  ;;  %v175_v9 = vld [vmem:[%s2578_s1 + $0x370] sm:$0xff]  ;;  %v1492_v10 = vpack.c.bf16 %v192_v3, %v191_v2  ;;  %v241_v14 = vld [vmem:[%s2578_s1 + $0x580] sm:$0xff]  ;;  %v1496_v18 = vpack.c.bf16 %v210_v13, %v209_v12 }
  0x31   :  { %625 = vmatprep.mubr.f32.mxu1 %v24_v44  ;;  %v176_v11 = vld [vmem:[%s2578_s1 + $0x378] sm:$0xff]  ;;  %v242_v15 = vld [vmem:[%s2578_s1 + $0x588] sm:$0xff]  ;;  %v1462_v16 = vpack.c.bf16 %v144_v8, %v143_v7  ;;  %v193_v19 = vld [vmem:[%s2578_s1 + $0x400] sm:$0xff] }
  0x32   :  { %1447 = vmatpush3.bf16.msra.mxu0 %v1446_v29  ;;  %v1494_v17 = vpack.c.bf16 %v176_v11, %v175_v9  ;;  %v194_v20 = vld [vmem:[%s2578_s1 + $0x408] sm:$0xff]  ;;  %v1528_v21 = vpack.c.bf16 %v242_v15, %v241_v14  ;;  %v225_v22 = vld [vmem:[%s2578_s1 + $0x500] sm:$0xff]  ;;  %v211_v25 = vld [vmem:[%s2578_s1 + $0x490] sm:$0xff] }
  0x33   :  { %1479 = vmatpush3.bf16.msra.mxu1 %v1478_v32  ;;  %1449 = vmatprep.subr.bf16.mxu0 %v1448_v33  ;;  %v226_v23 = vld [vmem:[%s2578_s1 + $0x508] sm:$0xff]  ;;  %v21_v24 = vld [vmem:[%s2579_s0 + $0x20] sm:$0xff]  ;;  %v212_v26 = vld [vmem:[%s2578_s1 + $0x498] sm:$0xff]  ;;  %v1498_v27 = vpack.c.bf16 %v194_v20, %v193_v19 }
  0x34   :  { %1481 = vmatprep.subr.bf16.mxu1 %v1480_v37  ;;  %v23_v28 = vld [vmem:[%s2579_s0 + $0x30] sm:$0xff]  ;;  %v244_v30 = vld [vmem:[%s2578_s1 + $0x598] sm:$0xff]  ;;  %v1530_v31 = vpack.c.bf16 %v226_v23, %v225_v22  ;;  %v38_v32 = vld [vmem:[%s2579_s0 + $0xa8] sm:$0xff]  ;;  %v1500_v36 = vpack.c.bf16 %v212_v26, %v211_v25 }
  0x35   :  { %v243_v29 = vld [vmem:[%s2578_s1 + $0x590] sm:$0xff]  ;;  %v196_v34 = vld [vmem:[%s2578_s1 + $0x418] sm:$0xff]  ;;  %v37_v35 = vld [vmem:[%s2579_s0 + $0xa0] sm:$0xff] }
  0x36   :  { %1451 = vmatpush3.bf16.msra.mxu0 %v1450_v43  ;;  %v195_v33 = vld [vmem:[%s2578_s1 + $0x410] sm:$0xff]  ;;  %v40_v37 = vld [vmem:[%s2579_s0 + $0xb8] sm:$0xff]  ;;  %v1532_v40 = vpack.c.bf16 %v244_v30, %v243_v29  ;;  %v213_v42 = vld [vmem:[%s2578_s1 + $0x4a0] sm:$0xff] }
  0x37   :  { %1483 = vmatpush3.bf16.msra.mxu1 %v1482_v45  ;;  %1453 = vmatprep.subr.bf16.mxu0 %v1452_v46  ;;  %v227_v38 = vld [vmem:[%s2578_s1 + $0x510] sm:$0xff]  ;;  %v228_v39 = vld [vmem:[%s2578_s1 + $0x518] sm:$0xff]  ;;  %v214_v43 = vld [vmem:[%s2578_s1 + $0x4a8] sm:$0xff]  ;;  %v1502_v44 = vpack.c.bf16 %v196_v34, %v195_v33 }
  0x38   :  { %1485 = vmatprep.subr.bf16.mxu1 %v1484_v50  ;;  %v39_v41 = vld [vmem:[%s2579_s0 + $0xb0] sm:$0xff]  ;;  %v54_v45 = vld [vmem:[%s2579_s0 + $0x128] sm:$0xff]  ;;  %v245_v46 = vld [vmem:[%s2578_s1 + $0x5a0] sm:$0xff]  ;;  %v1534_v48 = vpack.c.bf16 %v228_v39, %v227_v38  ;;  %v1504_v52 = vpack.c.bf16 %v214_v43, %v213_v42 }
  0x39   :  { %v246_v47 = vld [vmem:[%s2578_s1 + $0x5a8] sm:$0xff]  ;;  %v197_v49 = vld [vmem:[%s2578_s1 + $0x420] sm:$0xff]  ;;  %v215_v54 = vld [vmem:[%s2578_s1 + $0x4b0] sm:$0xff] }
  0x3a   :  { %1455 = vmatpush3.bf16.msra.mxu0 %v1454_v56  ;;  %v198_v50 = vld [vmem:[%s2578_s1 + $0x428] sm:$0xff]  ;;  %v229_v51 = vld [vmem:[%s2578_s1 + $0x520] sm:$0xff]  ;;  %v216_v55 = vld [vmem:[%s2578_s1 + $0x4b8] sm:$0xff] }
  0x3b   :  { %1487 = vmatpush3.bf16.msra.mxu1 %v1486_v57  ;;  %1457 = vmatprep.subr.bf16.mxu0 %v1456_v58  ;;  %v230_v53 = vld [vmem:[%s2578_s1 + $0x528] sm:$0xff]  ;;  %v56_v56 = vld [vmem:[%s2579_s0 + $0x138] sm:$0xff]  ;;  %v1536_v57 = vpack.c.bf16 %v246_v47, %v245_v46  ;;  %v247_v58 = vld [vmem:[%s2578_s1 + $0x5b0] sm:$0xff]  ;;  %v1506_v61 = vpack.c.bf16 %v198_v50, %v197_v49  ;;  %v1508_v0 = vpack.c.bf16 %v216_v55, %v215_v54 }
  0x3c   :  { %1489 = vmatprep.subr.bf16.mxu1 %v1488_v62  ;;  %v248_v59 = vld [vmem:[%s2578_s1 + $0x5b8] sm:$0xff]  ;;  %v53_v60 = vld [vmem:[%s2579_s0 + $0x120] sm:$0xff]  ;;  %v55_v62 = vld [vmem:[%s2579_s0 + $0x130] sm:$0xff]  ;;  %v1538_v63 = vpack.c.bf16 %v230_v53, %v229_v51 }
  0x3d   :  { %v199_v1 = vld [vmem:[%s2578_s1 + $0x430] sm:$0xff]  ;;  %v200_v2 = vld [vmem:[%s2578_s1 + $0x438] sm:$0xff]  ;;  %v218_v7 = vld [vmem:[%s2578_s1 + $0x4c8] sm:$0xff] }
  0x3e   :  { %1459 = vmatpush3.bf16.msra.mxu0 %v1458_v4  ;;  %v231_v3 = vld [vmem:[%s2578_s1 + $0x530] sm:$0xff]  ;;  %v1540_v4 = vpack.c.bf16 %v248_v59, %v247_v58  ;;  %v249_v8 = vld [vmem:[%s2578_s1 + $0x5c0] sm:$0xff]  ;;  %v250_v9 = vld [vmem:[%s2578_s1 + $0x5c8] sm:$0xff]  ;;  %v1510_v11 = vpack.c.bf16 %v200_v2, %v199_v1 }
  0x3f   :  { %1491 = vmatpush3.bf16.msra.mxu1 %v1490_v5  ;;  %1461 = vmatprep.subr.bf16.mxu0 %v1460_v6  ;;  %v232_v5 = vld [vmem:[%s2578_s1 + $0x538] sm:$0xff]  ;;  %v217_v6 = vld [vmem:[%s2578_s1 + $0x4c0] sm:$0xff]  ;;  %v234_v19 = vld [vmem:[%s2578_s1 + $0x548] sm:$0xff] }
  0x40   :  { %1493 = vmatprep.subr.bf16.mxu1 %v1492_v10  ;;  %v26_v10 = vld [vmem:[%s2579_s0 + $0x48] sm:$0xff]  ;;  %v28_v12 = vld [vmem:[%s2579_s0 + $0x58] sm:$0xff]  ;;  %v1542_v13 = vpack.c.bf16 %v232_v5, %v231_v3  ;;  %v1512_v14 = vpack.c.bf16 %v218_v7, %v217_v6  ;;  %v201_v15 = vld [vmem:[%s2578_s1 + $0x440] sm:$0xff] }
  0x41   :  { %v219_v20 = vld [vmem:[%s2578_s1 + $0x4d0] sm:$0xff]  ;;  %v252_v23 = vld [vmem:[%s2578_s1 + $0x5d8] sm:$0xff]  ;;  %v222_v33 = vld [vmem:[%s2578_s1 + $0x4e8] sm:$0xff] }
  0x42   :  { %1463 = vmatpush3.bf16.msra.mxu0 %v1462_v16  ;;  %v202_v16 = vld [vmem:[%s2578_s1 + $0x448] sm:$0xff]  ;;  %v251_v22 = vld [vmem:[%s2578_s1 + $0x5d0] sm:$0xff]  ;;  %v253_v34 = vld [vmem:[%s2578_s1 + $0x5e0] sm:$0xff] }
  0x43   :  { %1495 = vmatpush3.bf16.msra.mxu1 %v1494_v17  ;;  %1497 = vmatprep.subr.bf16.mxu0 %v1496_v18  ;;  %v233_v17 = vld [vmem:[%s2578_s1 + $0x540] sm:$0xff]  ;;  %v1544_v18 = vpack.c.bf16 %v250_v9, %v249_v8  ;;  %v235_v29 = vld [vmem:[%s2578_s1 + $0x550] sm:$0xff]  ;;  %v1548_v30 = vpack.c.bf16 %v252_v23, %v251_v22  ;;  %v238_v43 = vld [vmem:[%s2578_s1 + $0x568] sm:$0xff] }
  0x44   :  { %1529 = vmatprep.subr.bf16.mxu1 %v1528_v21  ;;  %v220_v21 = vld [vmem:[%s2578_s1 + $0x4d8] sm:$0xff]  ;;  %v1546_v25 = vpack.c.bf16 %v234_v19, %v233_v17  ;;  %v205_v39 = vld [vmem:[%s2578_s1 + $0x460] sm:$0xff]  ;;  %v255_v46 = vld [vmem:[%s2578_s1 + $0x5f0] sm:$0xff] }
  0x45   :  { %546 = vmatmul.mubr.f32.vlgmr.msra.gmra.mrb[6].mxu0 %v21_v24  ;;  %v1514_v24 = vpack.c.bf16 %v202_v16, %v201_v15  ;;  %v1516_v26 = vpack.c.bf16 %v220_v21, %v219_v20  ;;  %v256_v47 = vld [vmem:[%s2578_s1 + $0x5f8] sm:$0xff]  ;;  %v207_v51 = vld [vmem:[%s2578_s1 + $0x470] sm:$0xff]  ;;  %v305_v58 = vld [vmem:[%s2578_s1 + $0x780] sm:$0xff] }
  0x46   :  { %1499 = vmatpush3.bf16.msra.mxu0 %v1498_v27  ;;  %626 = vmatmul.mubr.f32.vlgmr.msra.gmra.mrb[6].mxu1 %v23_v28  ;;  %v203_v27 = vld [vmem:[%s2578_s1 + $0x450] sm:$0xff]  ;;  %v204_v28 = vld [vmem:[%s2578_s1 + $0x458] sm:$0xff]  ;;  %v1556_v54 = vpack.c.bf16 %v256_v47, %v255_v46  ;;  %v306_v59 = vld [vmem:[%s2578_s1 + $0x788] sm:$0xff] }
  0x47   :  { %1531 = vmatpush3.bf16.msra.mxu1 %v1530_v31  ;;  %550 = vmatprep.mubr.f32.mxu0 %v38_v32  ;;  %v236_v31 = vld [vmem:[%s2578_s1 + $0x558] sm:$0xff]  ;;  %v221_v32 = vld [vmem:[%s2578_s1 + $0x4e0] sm:$0xff]  ;;  %v239_v53 = vld [vmem:[%s2578_s1 + $0x570] sm:$0xff]  ;;  %v1592_v1 = vpack.c.bf16 %v306_v59, %v305_v58 }
  0x48   :  { %1501 = vmatprep.subr.bf16.mxu0 %v1500_v36  ;;  %630 = vmatprep.mubr.f32.mxu1 %v40_v37  ;;  %v1518_v36 = vpack.c.bf16 %v204_v28, %v203_v27  ;;  %v1550_v37 = vpack.c.bf16 %v236_v31, %v235_v29  ;;  %v1520_v38 = vpack.c.bf16 %v222_v33, %v221_v32  ;;  %v240_v55 = vld [vmem:[%s2578_s1 + $0x578] sm:$0xff]  ;;  %v289_v2 = vld [vmem:[%s2578_s1 + $0x700] sm:$0xff]  ;;  %v290_v3 = vld [vmem:[%s2578_s1 + $0x708] sm:$0xff] }
  0x49   :  { %551 = vmatmul.mubr.f32.gmra.mrb[8].mxu0 %v37_v35  ;;  %1533 = vmatprep.subr.bf16.mxu1 %v1532_v40  ;;  %v254_v35 = vld [vmem:[%s2578_s1 + $0x5e8] sm:$0xff]  ;;  %v275_v5 = vld [vmem:[%s2578_s1 + $0x690] sm:$0xff]  ;;  %v276_v6 = vld [vmem:[%s2578_s1 + $0x698] sm:$0xff] }
  0x4a   :  { %1503 = vmatpush3.bf16.msra.mxu0 %v1502_v44  ;;  %631 = vmatmul.mubr.f32.gmra.mrb[8].mxu1 %v39_v41  ;;  %v206_v40 = vld [vmem:[%s2578_s1 + $0x468] sm:$0xff]  ;;  %v237_v41 = vld [vmem:[%s2578_s1 + $0x560] sm:$0xff]  ;;  %v1552_v42 = vpack.c.bf16 %v254_v35, %v253_v34  ;;  %v223_v44 = vld [vmem:[%s2578_s1 + $0x4f0] sm:$0xff]  ;;  %v1564_v16 = vpack.c.bf16 %v276_v6, %v275_v5 }
  0x4b   :  { %1535 = vmatpush3.bf16.msra.mxu1 %v1534_v48  ;;  %555 = vmatprep.mubr.f32.mxu0 %v54_v45  ;;  %v224_v45 = vld [vmem:[%s2578_s1 + $0x4f8] sm:$0xff]  ;;  %v1522_v48 = vpack.c.bf16 %v206_v40, %v205_v39  ;;  %v1554_v49 = vpack.c.bf16 %v238_v43, %v237_v41  ;;  %v27_v8 = vld [vmem:[%s2579_s0 + $0x50] sm:$0xff]  ;;  %v41_v15 = vld [vmem:[%s2579_s0 + $0xc0] sm:$0xff] }
  0x4c   :  { %1505 = vmatprep.subr.bf16.mxu0 %v1504_v52  ;;  %635 = vmatprep.mubr.f32.mxu1 %v56_v56  ;;  %v1524_v50 = vpack.c.bf16 %v224_v45, %v223_v44  ;;  %v208_v52 = vld [vmem:[%s2578_s1 + $0x478] sm:$0xff]  ;;  %v273_v56 = vld [vmem:[%s2578_s1 + $0x680] sm:$0xff]  ;;  %v307_v9 = vld [vmem:[%s2578_s1 + $0x790] sm:$0xff] }
  0x4d   :  { %556 = vmatmul.mubr.f32.gmra.mrb[10].mxu0 %v53_v60  ;;  %1537 = vmatprep.subr.bf16.mxu1 %v1536_v57  ;;  %v274_v57 = vld [vmem:[%s2578_s1 + $0x688] sm:$0xff]  ;;  %v1526_v60 = vpack.c.bf16 %v208_v52, %v207_v51  ;;  %v44_v17 = vld [vmem:[%s2579_s0 + $0xd8] sm:$0xff]  ;;  %v43_v21 = vld [vmem:[%s2579_s0 + $0xd0] sm:$0xff] }
  0x4e   :  { %1507 = vmatpush3.bf16.msra.mxu0 %v1506_v61  ;;  %636 = vmatmul.mubr.f32.gmra.mrb[10].mxu1 %v55_v62  ;;  %v1558_v61 = vpack.c.bf16 %v240_v55, %v239_v53  ;;  %v1560_v62 = vpack.c.bf16 %v274_v57, %v273_v56  ;;  %v292_v19 = vld [vmem:[%s2578_s1 + $0x718] sm:$0xff]  ;;  %v277_v22 = vld [vmem:[%s2578_s1 + $0x6a0] sm:$0xff]  ;;  %v278_v23 = vld [vmem:[%s2578_s1 + $0x6a8] sm:$0xff] }
  0x4f   :  { %1539 = vmatpush3.bf16.msra.mxu1 %v1538_v63  ;;  %1509 = vmatprep.subr.bf16.mxu0 %v1508_v0  ;;  %v257_v63 = vld [vmem:[%s2578_s1 + $0x600] sm:$0xff]  ;;  %v258_v0 = vld [vmem:[%s2578_s1 + $0x608] sm:$0xff]  ;;  %v1568_v32 = vpack.c.bf16 %v278_v23, %v277_v22  ;;  %v279_v34 = vld [vmem:[%s2578_s1 + $0x6b0] sm:$0xff] }
  0x50   :  { %1541 = vmatprep.subr.bf16.mxu1 %v1540_v4  ;;  %705 = vmatprep.mubr.f32.mxu0 %v26_v10  ;;  %v25_v4 = vld [vmem:[%s2579_s0 + $0x40] sm:$0xff]  ;;  %v1562_v7 = vpack.c.bf16 %v258_v0, %v257_v63  ;;  %v308_v10 = vld [vmem:[%s2578_s1 + $0x798] sm:$0xff]  ;;  %v310_v27 = vld [vmem:[%s2578_s1 + $0x7a8] sm:$0xff] }
  0x51   :  { %785 = vmatprep.mubr.f32.mxu1 %v28_v12  ;;  %v42_v12 = vld [vmem:[%s2579_s0 + $0xc8] sm:$0xff]  ;;  %v1596_v20 = vpack.c.bf16 %v308_v10, %v307_v9  ;;  %v261_v29 = vld [vmem:[%s2578_s1 + $0x620] sm:$0xff]  ;;  %v280_v35 = vld [vmem:[%s2578_s1 + $0x6b8] sm:$0xff] }
  0x52   :  { %1511 = vmatpush3.bf16.msra.mxu0 %v1510_v11  ;;  %v1594_v11 = vpack.c.bf16 %v290_v3, %v289_v2  ;;  %v293_v31 = vld [vmem:[%s2578_s1 + $0x720] sm:$0xff]  ;;  %v294_v33 = vld [vmem:[%s2578_s1 + $0x728] sm:$0xff]  ;;  %v312_v39 = vld [vmem:[%s2578_s1 + $0x7b8] sm:$0xff]  ;;  %v1572_v44 = vpack.c.bf16 %v280_v35, %v279_v34 }
  0x53   :  { %1543 = vmatpush3.bf16.msra.mxu1 %v1542_v13  ;;  %1513 = vmatprep.subr.bf16.mxu0 %v1512_v14  ;;  %v259_v13 = vld [vmem:[%s2578_s1 + $0x610] sm:$0xff]  ;;  %v260_v14 = vld [vmem:[%s2578_s1 + $0x618] sm:$0xff]  ;;  %v57_v40 = vld [vmem:[%s2579_s0 + $0x140] sm:$0xff]  ;;  %v1602_v43 = vpack.c.bf16 %v294_v33, %v293_v31 }
  0x54   :  { %1545 = vmatprep.subr.bf16.mxu1 %v1544_v18  ;;  %v291_v18 = vld [vmem:[%s2578_s1 + $0x710] sm:$0xff]  ;;  %v264_v46 = vld [vmem:[%s2578_s1 + $0x638] sm:$0xff]  ;;  %v282_v51 = vld [vmem:[%s2578_s1 + $0x6c8] sm:$0xff] }
  0x55   :  { %v1598_v28 = vpack.c.bf16 %v292_v19, %v291_v18  ;;  %v263_v45 = vld [vmem:[%s2578_s1 + $0x630] sm:$0xff]  ;;  %v313_v52 = vld [vmem:[%s2578_s1 + $0x7c0] sm:$0xff]  ;;  %v314_v53 = vld [vmem:[%s2578_s1 + $0x7c8] sm:$0xff] }
  0x56   :  { %1515 = vmatpush3.bf16.msra.mxu0 %v1514_v24  ;;  %v1566_v24 = vpack.c.bf16 %v260_v14, %v259_v13  ;;  %v295_v47 = vld [vmem:[%s2578_s1 + $0x730] sm:$0xff]  ;;  %v1574_v55 = vpack.c.bf16 %v264_v46, %v263_v45  ;;  %v32_v56 = vld [vmem:[%s2579_s0 + $0x78] sm:$0xff]  ;;  %v265_v59 = vld [vmem:[%s2578_s1 + $0x640] sm:$0xff] }
  0x57   :  { %1547 = vmatpush3.bf16.msra.mxu1 %v1546_v25  ;;  %1517 = vmatprep.subr.bf16.mxu0 %v1516_v26  ;;  %v58_v25 = vld [vmem:[%s2579_s0 + $0x148] sm:$0xff]  ;;  %v309_v26 = vld [vmem:[%s2578_s1 + $0x7a0] sm:$0xff]  ;;  %v283_v0 = vld [vmem:[%s2578_s1 + $0x6d0] sm:$0xff] }
  0x58   :  { %1549 = vmatprep.subr.bf16.mxu1 %v1548_v30  ;;  %v262_v30 = vld [vmem:[%s2578_s1 + $0x628] sm:$0xff]  ;;  %v315_v2 = vld [vmem:[%s2578_s1 + $0x7d0] sm:$0xff]  ;;  %v316_v3 = vld [vmem:[%s2578_s1 + $0x7d8] sm:$0xff] }
  0x59   :  { %v1570_v41 = vpack.c.bf16 %v262_v30, %v261_v29  ;;  %v298_v63 = vld [vmem:[%s2578_s1 + $0x748] sm:$0xff]  ;;  %v299_v9 = vld [vmem:[%s2578_s1 + $0x750] sm:$0xff]  ;;  %v1612_v10 = vpack.c.bf16 %v316_v3, %v315_v2  ;;  %v317_v14 = vld [vmem:[%s2578_s1 + $0x7e0] sm:$0xff] }
  0x5a   :  { %1519 = vmatpush3.bf16.msra.mxu0 %v1518_v36  ;;  %v60_v36 = vld [vmem:[%s2579_s0 + $0x158] sm:$0xff]  ;;  %v286_v13 = vld [vmem:[%s2578_s1 + $0x6e8] sm:$0xff]  ;;  %v269_v19 = vld [vmem:[%s2578_s1 + $0x660] sm:$0xff] }
  0x5b   :  { %1551 = vmatpush3.bf16.msra.mxu1 %v1550_v37  ;;  %1521 = vmatprep.subr.bf16.mxu0 %v1520_v38  ;;  %v1600_v37 = vpack.c.bf16 %v310_v27, %v309_v26  ;;  %v311_v38 = vld [vmem:[%s2578_s1 + $0x7b0] sm:$0xff]  ;;  %v302_v23 = vld [vmem:[%s2578_s1 + $0x768] sm:$0xff]  ;;  %v320_v27 = vld [vmem:[%s2578_s1 + $0x7f8] sm:$0xff] }
  0x5c   :  { %1553 = vmatprep.subr.bf16.mxu1 %v1552_v42  ;;  %v59_v42 = vld [vmem:[%s2579_s0 + $0x150] sm:$0xff]  ;;  %v304_v35 = vld [vmem:[%s2578_s1 + $0x778] sm:$0xff]  ;;  %v61_v46 = vld [vmem:[%s2579_s0 + $0x160] sm:$0xff] }
  0x5d   :  { %v319_v26 = vld [vmem:[%s2578_s1 + $0x7f0] sm:$0xff]  ;;  %v64_v45 = vld [vmem:[%s2579_s0 + $0x178] sm:$0xff] }
  0x5e   :  { %1523 = vmatpush3.bf16.msra.mxu0 %v1522_v48  ;;  %v1604_v48 = vpack.c.bf16 %v312_v39, %v311_v38  ;;  %v271_v31 = vld [vmem:[%s2578_s1 + $0x670] sm:$0xff]  ;;  %v1620_v33 = vpack.c.bf16 %v320_v27, %v319_v26  ;;  %v29_v38 = vld [vmem:[%s2579_s0 + $0x60] sm:$0xff] }
  0x5f   :  { %1555 = vmatpush3.bf16.msra.mxu1 %v1554_v49  ;;  %1525 = vmatprep.subr.bf16.mxu0 %v1524_v50  ;;  %v296_v49 = vld [vmem:[%s2578_s1 + $0x738] sm:$0xff]  ;;  %v281_v50 = vld [vmem:[%s2578_s1 + $0x6c0] sm:$0xff]  ;;  %v303_v34 = vld [vmem:[%s2578_s1 + $0x770] sm:$0xff] }
  0x60   :  { %1557 = vmatprep.subr.bf16.mxu1 %v1556_v54  ;;  %v30_v54 = vld [vmem:[%s2579_s0 + $0x68] sm:$0xff]  ;;  %v1606_v57 = vpack.c.bf16 %v296_v49, %v295_v47  ;;  %v1576_v58 = vpack.c.bf16 %v282_v51, %v281_v50  ;;  %v31_v39 = vld [vmem:[%s2579_s0 + $0x70] sm:$0xff] }
  0x61   :  { %v63_v47 = vld [vmem:[%s2579_s0 + $0x170] sm:$0xff] }
  0x62   :  { %1527 = vmatpush3.bf16.msra.mxu0 %v1526_v60  ;;  %v266_v60 = vld [vmem:[%s2578_s1 + $0x648] sm:$0xff] }
  0x63   :  { %1559 = vmatpush3.bf16.msra.mxu1 %v1558_v61  ;;  %1561 = vmatprep.subr.bf16.mxu0 %v1560_v62  ;;  %v297_v61 = vld [vmem:[%s2578_s1 + $0x740] sm:$0xff]  ;;  %v1608_v62 = vpack.c.bf16 %v314_v53, %v313_v52 }
  0x64   :  { %1593 = vmatprep.subr.bf16.mxu1 %v1592_v1  ;;  %v284_v1 = vld [vmem:[%s2578_s1 + $0x6d8] sm:$0xff]  ;;  %v1610_v5 = vpack.c.bf16 %v298_v63, %v297_v61 }
  0x65   :  { %706 = vmatmul.mubr.f32.vlgmr.msra.gmra.mrb[12].mxu0 %v25_v4  ;;  %v1578_v4 = vpack.c.bf16 %v266_v60, %v265_v59  ;;  %v1580_v6 = vpack.c.bf16 %v284_v1, %v283_v0 }
  0x66   :  { %1563 = vmatpush3.bf16.msra.mxu0 %v1562_v7  ;;  %786 = vmatmul.mubr.f32.vlgmr.msra.gmra.mrb[12].mxu1 %v27_v8  ;;  %v267_v7 = vld [vmem:[%s2578_s1 + $0x650] sm:$0xff]  ;;  %v268_v8 = vld [vmem:[%s2578_s1 + $0x658] sm:$0xff] }
  0x67   :  { %1595 = vmatpush3.bf16.msra.mxu1 %v1594_v11  ;;  %710 = vmatprep.mubr.f32.mxu0 %v42_v12  ;;  %v300_v11 = vld [vmem:[%s2578_s1 + $0x758] sm:$0xff]  ;;  %v285_v12 = vld [vmem:[%s2578_s1 + $0x6e0] sm:$0xff] }
  0x68   :  { %1565 = vmatprep.subr.bf16.mxu0 %v1564_v16  ;;  %790 = vmatprep.mubr.f32.mxu1 %v44_v17  ;;  %v1582_v16 = vpack.c.bf16 %v268_v8, %v267_v7  ;;  %v1614_v17 = vpack.c.bf16 %v300_v11, %v299_v9  ;;  %v1584_v18 = vpack.c.bf16 %v286_v13, %v285_v12 }
  0x69   :  { %711 = vmatmul.mubr.f32.gmra.mrb[14].mxu0 %v41_v15  ;;  %1597 = vmatprep.subr.bf16.mxu1 %v1596_v20  ;;  %v318_v15 = vld [vmem:[%s2578_s1 + $0x7e8] sm:$0xff] }
  0x6a   :  { %1567 = vmatpush3.bf16.msra.mxu0 %v1566_v24  ;;  %791 = vmatmul.mubr.f32.gmra.mrb[14].mxu1 %v43_v21  ;;  %v270_v20 = vld [vmem:[%s2578_s1 + $0x668] sm:$0xff]  ;;  %v301_v21 = vld [vmem:[%s2578_s1 + $0x760] sm:$0xff]  ;;  %v1616_v22 = vpack.c.bf16 %v318_v15, %v317_v14  ;;  %v287_v24 = vld [vmem:[%s2578_s1 + $0x6f0] sm:$0xff] }
  0x6b   :  { %1599 = vmatpush3.bf16.msra.mxu1 %v1598_v28  ;;  %715 = vmatprep.mubr.f32.mxu0 %v58_v25  ;;  %v288_v25 = vld [vmem:[%s2578_s1 + $0x6f8] sm:$0xff]  ;;  %v1586_v28 = vpack.c.bf16 %v270_v20, %v269_v19  ;;  %v1618_v29 = vpack.c.bf16 %v302_v23, %v301_v21 }
  0x6c   :  { %1569 = vmatprep.subr.bf16.mxu0 %v1568_v32  ;;  %795 = vmatprep.mubr.f32.mxu1 %v60_v36  ;;  %v1588_v30 = vpack.c.bf16 %v288_v25, %v287_v24  ;;  %v272_v32 = vld [vmem:[%s2578_s1 + $0x678] sm:$0xff] }
  0x6d   :  { %716 = vmatmul.mubr.f32.gmra.mrb[16].mxu0 %v57_v40  ;;  %1601 = vmatprep.subr.bf16.mxu1 %v1600_v37  ;;  %v1590_v36 = vpack.c.bf16 %v272_v32, %v271_v31  ;;  %v1622_v37 = vpack.c.bf16 %v304_v35, %v303_v34  ;;  %v46_v40 = vld [vmem:[%s2579_s0 + $0xe8] sm:$0xff] }
  0x6e   :  { %1571 = vmatpush3.bf16.msra.mxu0 %v1570_v41  ;;  %796 = vmatmul.mubr.f32.gmra.mrb[16].mxu1 %v59_v42  ;;  %v48_v41 = vld [vmem:[%s2579_s0 + $0xf8] sm:$0xff]  ;;  %v45_v42 = vld [vmem:[%s2579_s0 + $0xe0] sm:$0xff] }
  0x6f   :  { %1603 = vmatpush3.bf16.msra.mxu1 %v1602_v43  ;;  %1573 = vmatprep.subr.bf16.mxu0 %v1572_v44  ;;  %v47_v43 = vld [vmem:[%s2579_s0 + $0xf0] sm:$0xff]  ;;  %v62_v44 = vld [vmem:[%s2579_s0 + $0x168] sm:$0xff] }
  0x70   :  { %1605 = vmatprep.subr.bf16.mxu1 %v1604_v48  ;;  %865 = vmatprep.mubr.f32.mxu0 %v30_v54 }
  0x71   :  { %945 = vmatprep.mubr.f32.mxu1 %v32_v56 }
  0x72   :  { %1575 = vmatpush3.bf16.msra.mxu0 %v1574_v55 }
  0x73   :  { %1607 = vmatpush3.bf16.msra.mxu1 %v1606_v57  ;;  %1577 = vmatprep.subr.bf16.mxu0 %v1576_v58 }
  0x74   :  { %1609 = vmatprep.subr.bf16.mxu1 %v1608_v62 }
  0x76   :  { %1579 = vmatpush3.bf16.msra.mxu0 %v1578_v4 }
  0x77   :  { %1611 = vmatpush3.bf16.msra.mxu1 %v1610_v5  ;;  %1581 = vmatprep.subr.bf16.mxu0 %v1580_v6 }
  0x78   :  { %1613 = vmatprep.subr.bf16.mxu1 %v1612_v10 }
  0x7a   :  { %1583 = vmatpush3.bf16.msra.mxu0 %v1582_v16 }
  0x7b   :  { %1615 = vmatpush3.bf16.msra.mxu1 %v1614_v17  ;;  %1585 = vmatprep.subr.bf16.mxu0 %v1584_v18 }
  0x7c   :  { %1617 = vmatprep.subr.bf16.mxu1 %v1616_v22 }
  0x7e   :  { %1587 = vmatpush3.bf16.msra.mxu0 %v1586_v28 }
  0x7f   :  { %1619 = vmatpush3.bf16.msra.mxu1 %v1618_v29  ;;  %1589 = vmatprep.subr.bf16.mxu0 %v1588_v30 }
  0x80   :  { %1621 = vmatprep.subr.bf16.mxu1 %v1620_v33 }
  0x82   :  { %1591 = vmatpush3.bf16.msra.mxu0 %v1590_v36 }
  0x83   :  { %1623 = vmatpush3.bf16.msra.mxu1 %v1622_v37 }
  0x85   :  { %866 = vmatmul.mubr.f32.vlgmr.msra.gmra.mrb[18].mxu0 %v29_v38 }
  0x86   :  { %946 = vmatmul.mubr.f32.vlgmr.msra.gmra.mrb[18].mxu1 %v31_v39  ;;  %870 = vmatprep.mubr.f32.mxu0 %v46_v40 }
  0x87   :  { %950 = vmatprep.mubr.f32.mxu1 %v48_v41 }
  0x89   :  { %871 = vmatmul.mubr.f32.gmra.mrb[20].mxu0 %v45_v42 }
  0x8a   :  { %951 = vmatmul.mubr.f32.gmra.mrb[20].mxu1 %v47_v43  ;;  %875 = vmatprep.mubr.f32.mxu0 %v62_v44 }
  0x8b   :  { %955 = vmatprep.mubr.f32.mxu1 %v64_v45 }
  0x8d   :  { %876 = vmatmul.mubr.f32.gmra.mrb[22].mxu0 %v61_v46 }
  0x8e   :  { %956 = vmatmul.mubr.f32.gmra.mrb[22].mxu1 %v63_v47 }
  0xf8   :  { %v1072_v48 = vpop.f32.mrb[0].mxu0 }
  0xf9   :  { %v1113_v49 = vpop.f32.mrb[0].mxu1  ;;  %v1073_v50 = vpop.f32.mrb[1].mxu0 }
  0xfa   :  { %v1074_v51 = vadd.f32 %v1073_v50, %v1072_v48  ;;  %v1114_v52 = vpop.f32.mrb[1].mxu1 }
  0xfb   :  { %v1115_v53 = vadd.f32 %v1114_v52, %v1113_v49 }
  0xfc   :  { %v1075_v55 = vpop.f32.mrb[2].mxu0 }
  0xfd   :  { %v468_v54 = vadd.f32 %v1115_v53, %v1074_v51  ;;  %v1116_v56 = vpop.f32.mrb[2].mxu1  ;;  %v1076_v57 = vpop.f32.mrb[3].mxu0 }
  0xfe   :  { %v1077_v58 = vadd.f32 %v1076_v57, %v1075_v55  ;;  %v1117_v59 = vpop.f32.mrb[3].mxu1 }
  0xff   :  { %v1118_v60 = vadd.f32 %v1117_v59, %v1116_v56  ;;  %v961_v56 = vlaneseq }
 0x100   :  { %v1078_v61 = vpop.f32.mrb[4].mxu0 }
 0x101   :  { %v473_v62 = vadd.f32 %v1118_v60, %v1077_v58  ;;  %v1119_v63 = vpop.f32.mrb[4].mxu1  ;;  %v1079_v0 = vpop.f32.mrb[5].mxu0 }
 0x102   :  { %v1080_v1 = vadd.f32 %v1079_v0, %v1078_v61  ;;  %v1120_v2 = vpop.f32.mrb[5].mxu1  ;;  %v962_v0 = vshrl.u32 %v961_v56, 7 }
 0x103   :  { %v1121_v3 = vadd.f32 %v1120_v2, %v1119_v63 }
 0x105   :  { %v478_v4 = vadd.f32 %v1121_v3, %v1080_v1 }
 0x118   :  { %v1154_v5 = vpop.f32.mrb[6].mxu0 }
 0x119   :  { %v1155_v6 = vpop.f32.mrb[7].mxu0  ;;  %v1195_v7 = vpop.f32.mrb[6].mxu1 }
 0x11a   :  { %v1156_v8 = vadd.f32 %v1155_v6, %v1154_v5  ;;  %v1196_v9 = vpop.f32.mrb[7].mxu1 }
 0x11b   :  { %v1197_v10 = vadd.f32 %v1196_v9, %v1195_v7  ;;  %v964_v9 = vadd.s32 16, %v962_v0 }
 0x11c   :  { %v548_v11 = vadd.f32 %v1156_v8, %v468_v54  ;;  %v1157_v12 = vpop.f32.mrb[8].mxu0 }
 0x11d   :  { %v1158_v13 = vpop.f32.mrb[9].mxu0  ;;  %v1198_v14 = vpop.f32.mrb[8].mxu1  ;;  %vm967_vm0 = vcmp.lt.s32.totalorder %v964_v9, 18 }
 0x11e   :  { %v628_v15 = vadd.f32 %v1197_v10, %v548_v11  ;;  %v1159_v16 = vadd.f32 %v1158_v13, %v1157_v12  ;;  %v1199_v17 = vpop.f32.mrb[9].mxu1 }
 0x11f   :  { %v1200_v18 = vadd.f32 %v1199_v17, %v1198_v14 }
 0x120   :  { %v553_v19 = vadd.f32 %v1159_v16, %v473_v62  ;;  %v1160_v20 = vpop.f32.mrb[10].mxu0 }
 0x121   :  { %v1161_v21 = vpop.f32.mrb[11].mxu0  ;;  %v1201_v22 = vpop.f32.mrb[10].mxu1 }
 0x122   :  { %v633_v23 = vadd.f32 %v1200_v18, %v553_v19  ;;  %v1162_v24 = vadd.f32 %v1161_v21, %v1160_v20  ;;  %v1202_v25 = vpop.f32.mrb[11].mxu1 }
 0x123   :  { %v1203_v26 = vadd.f32 %v1202_v25, %v1201_v22 }
 0x124   :  { %v558_v27 = vadd.f32 %v1162_v24, %v478_v4 }
 0x126   :  { %v638_v28 = vadd.f32 %v1203_v26, %v558_v27 }
 0x138   :  { %v1236_v29 = vpop.f32.mrb[12].mxu0 }
 0x139   :  { %v1237_v30 = vpop.f32.mrb[13].mxu0  ;;  %v1277_v31 = vpop.f32.mrb[12].mxu1 }
 0x13a   :  { %v1238_v32 = vadd.f32 %v1237_v30, %v1236_v29  ;;  %v1278_v33 = vpop.f32.mrb[13].mxu1 }
 0x13b   :  { %v1279_v34 = vadd.f32 %v1278_v33, %v1277_v31 }
 0x13c   :  { %v708_v35 = vadd.f32 %v1238_v32, %v628_v15  ;;  %v1239_v36 = vpop.f32.mrb[14].mxu0 }
 0x13d   :  { %v1240_v37 = vpop.f32.mrb[15].mxu0  ;;  %v1280_v38 = vpop.f32.mrb[14].mxu1 }
 0x13e   :  { %v788_v39 = vadd.f32 %v1279_v34, %v708_v35  ;;  %v1241_v40 = vadd.f32 %v1240_v37, %v1239_v36  ;;  %v1281_v41 = vpop.f32.mrb[15].mxu1 }
 0x13f   :  { %v1282_v42 = vadd.f32 %v1281_v41, %v1280_v38 }
 0x140   :  { %v713_v43 = vadd.f32 %v1241_v40, %v633_v23  ;;  %v1242_v44 = vpop.f32.mrb[16].mxu0 }
 0x141   :  { %v1243_v45 = vpop.f32.mrb[17].mxu0  ;;  %v1283_v46 = vpop.f32.mrb[16].mxu1 }
 0x142   :  { %v793_v47 = vadd.f32 %v1282_v42, %v713_v43  ;;  %v1244_v48 = vadd.f32 %v1243_v45, %v1242_v44  ;;  %v1284_v49 = vpop.f32.mrb[17].mxu1  ;;  %v999_v43 = vld [vmem:[%s2580_s2] sm:$0x1]  ;;  %v1009_v44 = vsub.s32 0, %v962_v0 }
 0x143   :  { %v1285_v50 = vadd.f32 %v1284_v49, %v1283_v46 }
 0x144   :  { %v718_v51 = vadd.f32 %v1244_v48, %v638_v28 }
 0x146   :  { %v798_v52 = vadd.f32 %v1285_v50, %v718_v51 }
 0x158   :  { %v1318_v53 = vpop.f32.mrb[18].mxu0 }
 0x159   :  { %v1319_v54 = vpop.f32.mrb[19].mxu0  ;;  %v1359_v55 = vpop.f32.mrb[18].mxu1 }
 0x15a   :  { %v1320_v57 = vadd.f32 %v1319_v54, %v1318_v53  ;;  %v1360_v58 = vpop.f32.mrb[19].mxu1 }
 0x15b   :  { %v1361_v59 = vadd.f32 %v1360_v58, %v1359_v55 }
 0x15c   :  { %v868_v60 = vadd.f32 %v1320_v57, %v788_v39  ;;  %v1321_v61 = vpop.f32.mrb[20].mxu0 }
 0x15d   :  { %v1322_v62 = vpop.f32.mrb[21].mxu0  ;;  %v1362_v63 = vpop.f32.mrb[20].mxu1 }
 0x15e   :  { %v948_v1 = vadd.f32 %v1361_v59, %v868_v60  ;;  %v1323_v2 = vadd.f32 %v1322_v62, %v1321_v61  ;;  %v1363_v3 = vpop.f32.mrb[21].mxu1 }
 0x15f   :  { %v1364_v4 = vadd.f32 %v1363_v3, %v1362_v63 }
 0x160   :  { %v873_v5 = vadd.f32 %v1323_v2, %v793_v47  ;;  %v1324_v6 = vpop.f32.mrb[22].mxu0  ;;  %v1003_v47 = vld [vmem:[%s2581_s3] sm:$0x1] }
 0x161   :  { %v1325_v7 = vpop.f32.mrb[23].mxu0  ;;  %v1365_v8 = vpop.f32.mrb[22].mxu1 }
 0x162   :  { %v953_v10 = vadd.f32 %v1364_v4, %v873_v5  ;;  %v1326_v11 = vadd.f32 %v1325_v7, %v1324_v6  ;;  %v1366_v12 = vpop.f32.mrb[23].mxu1 }
 0x163   :  { %v1367_v13 = vadd.f32 %v1366_v12, %v1365_v8 }
 0x164   :  { %v971_v14 = vadd.f32 %v953_v10, %v948_v1  ;;  %v878_v15 = vadd.f32 %v1326_v11, %v798_v52 }
 0x166   :  { %v958_v16 = vadd.f32 %v1367_v13, %v878_v15 }
 0x168   :  { %v970_v17 = vsel %vm967_vm0, %v958_v16, 0.0 }
 0x169   :  { %v972_v18 = vadd.f32 %v971_v14, %v970_v17 }
 0x16b   :  { %v973_v19 = vrot.slane %v972_v18, 4 }
 0x16d   :  { %v974_v20 = vadd.f32 %v973_v19, %v972_v18 }
 0x16f   :  { %v975_v21 = vrot.slane %v974_v20, 2 }
 0x171   :  { %v976_v22 = vadd.f32 %v975_v21, %v974_v20 }
 0x173   :  { %v977_v23 = vrot.slane %v976_v22, 1 }
 0x175   :  { %v978_v24 = vadd.f32 %v977_v23, %v976_v22 }
 0x177   :  { %v980_v25 = vmul.f32 0.055555556, %v978_v24 }
 0x179   :  { %v981_v26 = vsub.f32 %v948_v1, %v980_v25  ;;  %v982_v27 = vsub.f32 %v953_v10, %v980_v25  ;;  %v983_v28 = vsub.f32 %v958_v16, %v980_v25 }
 0x17b   :  { %v986_v29 = vsel %vm967_vm0, %v983_v28, 0.0  ;;  %v987_v30 = vmul.f32 %v981_v26, %v981_v26  ;;  %v988_v31 = vmul.f32 %v982_v27, %v982_v27 }
 0x17c   :  { %v989_v32 = vmul.f32 %v986_v29, %v986_v29 }
 0x17d   :  { %v990_v33 = vadd.f32 %v988_v31, %v987_v30 }
 0x17f   :  { %v991_v34 = vadd.f32 %v990_v33, %v989_v32 }
 0x181   :  { %v992_v35 = vrot.slane %v991_v34, 4 }
 0x183   :  { %v993_v36 = vadd.f32 %v992_v35, %v991_v34 }
 0x185   :  { %v994_v37 = vrot.slane %v993_v36, 2 }
 0x187   :  { %v995_v38 = vadd.f32 %v994_v37, %v993_v36 }
 0x189   :  { %v996_v39 = vrot.slane %v995_v38, 1 }
 0x18b   :  { %v997_v40 = vadd.f32 %v996_v39, %v995_v38 }
 0x18d   :  { %v998_v41 = vmul.f32 0.055555556, %v997_v40 }
 0x18f   :  { %v1000_v42 = vadd.f32 1e-05, %v998_v41 }
 0x191   :  { %1624 = vrsqrt.f32 %v1000_v42 }
 0x19b   :  { %v1625_v45 = vpop.eup %1624 }
 0x19c   :  { %v1002_v46 = vmul.f32 %v1625_v45, %v999_v43 }
 0x19e   :  { %v1004_v48 = vmul.f32 %v1002_v46, %v980_v25  ;;  %v1010_v49 = vrot.slane %v1002_v46, %v1009_v44 }
 0x1a0   :  { %v1005_v50 = vsub.f32 %v1003_v47, %v1004_v48  ;;  %v1012_v51 = vmul.f32 %v1010_v49, %v948_v1  ;;  %v1013_v52 = vmul.f32 %v1010_v49, %v953_v10  ;;  %v1014_v53 = vmul.f32 %v1010_v49, %v958_v16 }
 0x1a2   :  { %v1019_v54 = vrot.slane %v1005_v50, %v1009_v44 }
 0x1a4   :  { %v1021_v55 = vadd.f32 %v1019_v54, %v1012_v51  ;;  %v1022_v56 = vadd.f32 %v1019_v54, %v1013_v52  ;;  %v1023_v57 = vadd.f32 %v1019_v54, %v1014_v53 }
 0x1a6   :  { %vm1024_vm1 = vcmp.ge.f32.partialorder %v1021_v55, 0.0  ;;  %vm1025_vm2 = vcmp.ge.f32.partialorder %v1022_v56, 0.0  ;;  %vm1026_vm3 = vcmp.ge.f32.partialorder %v1023_v57, 0.0  ;;  %v1027_v58 = vmul.f32 0.2, %v1021_v55 }
 0x1a7   :  { %v1028_v59 = vmul.f32 0.2, %v1022_v56  ;;  %v1029_v60 = vmul.f32 0.2, %v1023_v57 }
 0x1a8   :  { %v1030_v61 = vsel %vm1024_vm1, %v1021_v55, %v1027_v58 }
 0x1a9   :  { %v1031_v62 = vsel %vm1025_vm2, %v1022_v56, %v1028_v59  ;;  %v1032_v63 = vsel %vm1026_vm3, %v1023_v57, %v1029_v60  ;;  %1033 = vst [vmem:[%s2582_s4] sm:$0xff] %v1030_v61 }
 0x1aa   :  { %1034 = vst [vmem:[%s2582_s4 + $0x8] sm:$0xff] %v1031_v62  ;;  %1035 = vst [vmem:[%s2582_s4 + $0x10] sm:$0xff] %v1032_v63 }

// kernel: tile.18
= control target key start
LH: loop header
LB: loop body
LE: loop exit
PB: predicated region body
PF: predicated region fallthrough
CT: control target
= control target key end

     0   :  { %s22_s0 = inlined_call_operand.vmem [shape: f32[64], index: 0, kind: input, shape index: {}]   ;;  %s23_s1 = inlined_call_operand.vmem [shape: f32[4,64], index: 1, kind: output, shape index: {}]  }
   0x1   :  { %v4_v0 = vld [vmem:[%s22_s0] ss:$0 sm:$0xff] }
   0x2   :  { %5 = vst [vmem:[%s23_s1] sm:$0xf] %v4_v0 }

// kernel: tile.0
= control target key start
LH: loop header
LB: loop body
LE: loop exit
PB: predicated region body
PF: predicated region fallthrough
CT: control target
= control target key end

     0   :  { %s1090_s8 = smov 125   ;;  %s1091_s9 = smov 126   ;;  %vm7_vm0 = vcmask 7168   ;;  %s2189_s0 = inlined_call_operand.vmem [shape: f32[4,64], index: 0, kind: input, shape index: {}]   ;;  %s2190_s1 = inlined_call_operand.vmem [shape: f32[256,1], index: 1, kind: output, shape index: {}]  }
   0x1   :  { %v4_v0 = vld [vmem:[%s2189_s0] sm:$0xf]  ;;  %s1089_s0 = smov 127   ;;  %s1092_s10 = smov 124  }
   0x2   :  { %5 = vst [vmem:[#allocation0] sm:$0xf] %v4_v0  ;;  %s1093_s11 = smov 123   ;;  %s1094_s12 = smov 122  }
   0x3   :  { %s1095_s13 = smov 121   ;;  %s1096_s14 = smov 120  }
   0x4   :  { %s1097_s15 = smov 119   ;;  %s1098_s16 = smov 118  }
   0x5   :  { %s1099_s17 = smov 117   ;;  %s1100_s18 = smov 116  }
   0x6   :  { %s1101_s19 = smov 115   ;;  %s1102_s20 = smov 114  }
   0x7   :  { %s1103_s21 = smov 113   ;;  %s1104_s22 = smov 112  }
   0x8   :  { %s1105_s23 = smov 111   ;;  %s1106_s24 = smov 110  }
   0x9   :  { %v15_v1 = vld [vmem:[#allocation0] sm:$0xf]   ;;  %s1107_s25 = smov 109   ;;  %s1108_s26 = smov 108  }
   0xa   :  { %v39_v2 = vld [vmem:[#allocation0] sm:$0xf]   ;;  %16 = vrot.lane.b32.xlu0 %v15_v1, %s1089_s0  ;;  %s1109_s27 = smov 107   ;;  %s1110_s28 = smov 106  }
   0xb   :  { %40 = vrot.lane.b32.xlu1 %v39_v2, %s1090_s8  ;;  %v27_v3 = vld [vmem:[#allocation0] sm:$0xf]   ;;  %s1111_s29 = smov 105   ;;  %s1112_s30 = smov 104  }
   0xc   :  { %v51_v4 = vld [vmem:[#allocation0] sm:$0xf]   ;;  %s1113_s2 = smov 103   ;;  %s1114_s3 = smov 102  }
   0xd   :  { %v63_v5 = vld [vmem:[#allocation0] sm:$0xf]   ;;  %s1115_s4 = smov 101   ;;  %s1116_s5 = smov 100  }
   0xe   :  { %28 = vrot.lane.b32.xlu0 %v27_v3, %s1091_s9  ;;  %v75_v6 = vld [vmem:[#allocation0] sm:$0xf]   ;;  %s1117_s6 = smov 99   ;;  %s1118_s7 = smov 98  }
   0xf   :  { %52 = vrot.lane.b32.xlu1 %v51_v4, %s1092_s10  ;;  %v87_v7 = vld [vmem:[#allocation0] sm:$0xf]   ;;  %s1119_s0 = smov 97   ;;  %s1120_s8 = smov 96  }
  0x10   :  { %v99_v8 = vld [vmem:[#allocation0] sm:$0xf]   ;;  %s1121_s9 = smov 95   ;;  %s1122_s10 = smov 94  }
  0x11   :  { %v111_v9 = vld [vmem:[#allocation0] sm:$0xf]  }
  0x12   :  { %64 = vrot.lane.b32.xlu0 %v63_v5, %s1093_s11  ;;  %v123_v10 = vld [vmem:[#allocation0] sm:$0xf]   ;;  %s1123_s11 = smov 93  }
  0x13   :  { %76 = vrot.lane.b32.xlu1 %v75_v6, %s1094_s12  ;;  %v135_v11 = vld [vmem:[#allocation0] sm:$0xf]   ;;  %s1124_s12 = smov 92  }
  0x14   :  { %v147_v12 = vld [vmem:[#allocation0] sm:$0xf]  }
  0x15   :  { %v159_v13 = vld [vmem:[#allocation0] sm:$0xf]  }
  0x16   :  { %88 = vrot.lane.b32.xlu0 %v87_v7, %s1095_s13  ;;  %v171_v14 = vld [vmem:[#allocation0] sm:$0xf]   ;;  %s1125_s13 = smov 91  }
  0x17   :  { %100 = vrot.lane.b32.xlu1 %v99_v8, %s1096_s14  ;;  %v183_v15 = vld [vmem:[#allocation0] sm:$0xf]   ;;  %s1126_s14 = smov 90  }
  0x18   :  { %v195_v16 = vld [vmem:[#allocation0] sm:$0xf]  }
  0x19   :  { %v207_v17 = vld [vmem:[#allocation0] sm:$0xf]  }
  0x1a   :  { %112 = vrot.lane.b32.xlu0 %v111_v9, %s1097_s15  ;;  %v219_v18 = vld [vmem:[#allocation0] sm:$0xf]   ;;  %s1127_s15 = smov 89  }
  0x1b   :  { %124 = vrot.lane.b32.xlu1 %v123_v10, %s1098_s16  ;;  %v231_v19 = vld [vmem:[#allocation0] sm:$0xf]   ;;  %s1128_s16 = smov 88  }
  0x1c   :  { %v243_v20 = vld [vmem:[#allocation0] sm:$0xf]  }
  0x1d   :  { %v255_v21 = vld [vmem:[#allocation0] sm:$0xf]  }
  0x1e   :  { %136 = vrot.lane.b32.xlu0 %v135_v11, %s1099_s17  ;;  %v267_v22 = vld [vmem:[#allocation0] sm:$0xf]   ;;  %s1129_s17 = smov 87  }
  0x1f   :  { %148 = vrot.lane.b32.xlu1 %v147_v12, %s1100_s18  ;;  %v279_v23 = vld [vmem:[#allocation0] sm:$0xf]   ;;  %s1130_s18 = smov 86  }
  0x20   :  { %v291_v24 = vld [vmem:[#allocation0] sm:$0xf]  }
  0x21   :  { %v303_v25 = vld [vmem:[#allocation0] sm:$0xf]  }
  0x22   :  { %160 = vrot.lane.b32.xlu0 %v159_v13, %s1101_s19  ;;  %v315_v26 = vld [vmem:[#allocation0] sm:$0xf]   ;;  %s1131_s19 = smov 85  }
  0x23   :  { %172 = vrot.lane.b32.xlu1 %v171_v14, %s1102_s20  ;;  %v327_v27 = vld [vmem:[#allocation0] sm:$0xf]   ;;  %s1132_s20 = smov 84  }
  0x24   :  { %v339_v28 = vld [vmem:[#allocation0] sm:$0xf]  }
  0x25   :  { %v351_v29 = vld [vmem:[#allocation0] sm:$0xf]  }
  0x26   :  { %184 = vrot.lane.b32.xlu0 %v183_v15, %s1103_s21  ;;  %v363_v30 = vld [vmem:[#allocation0] sm:$0xf]   ;;  %s1133_s21 = smov 83  }
  0x27   :  { %196 = vrot.lane.b32.xlu1 %v195_v16, %s1104_s22  ;;  %v375_v31 = vld [vmem:[#allocation0] sm:$0xf]   ;;  %s1134_s22 = smov 82  }
  0x28   :  { %v387_v32 = vld [vmem:[#allocation0] sm:$0xf]  }
  0x29   :  { %v399_v33 = vld [vmem:[#allocation0] sm:$0xf]  }
  0x2a   :  { %208 = vrot.lane.b32.xlu0 %v207_v17, %s1105_s23  ;;  %v411_v34 = vld [vmem:[#allocation0] sm:$0xf]   ;;  %s1135_s23 = smov 81  }
  0x2b   :  { %220 = vrot.lane.b32.xlu1 %v219_v18, %s1106_s24  ;;  %v423_v35 = vld [vmem:[#allocation0] sm:$0xf]   ;;  %s1136_s24 = smov 80  }
  0x2c   :  { %v435_v36 = vld [vmem:[#allocation0] sm:$0xf]  }
  0x2d   :  { %v447_v37 = vld [vmem:[#allocation0] sm:$0xf]  }
  0x2e   :  { %232 = vrot.lane.b32.xlu0 %v231_v19, %s1107_s25  ;;  %v459_v38 = vld [vmem:[#allocation0] sm:$0xf]   ;;  %s1137_s25 = smov 79  }
  0x2f   :  { %244 = vrot.lane.b32.xlu1 %v243_v20, %s1108_s26  ;;  %v471_v39 = vld [vmem:[#allocation0] sm:$0xf]   ;;  %s1138_s26 = smov 78  }
  0x30   :  { %v483_v40 = vld [vmem:[#allocation0] sm:$0xf]  }
  0x31   :  { %v495_v41 = vld [vmem:[#allocation0] sm:$0xf]  }
  0x32   :  { %256 = vrot.lane.b32.xlu0 %v255_v21, %s1109_s27  ;;  %v507_v42 = vld [vmem:[#allocation0] sm:$0xf]   ;;  %s1139_s27 = smov 77  }
  0x33   :  { %268 = vrot.lane.b32.xlu1 %v267_v22, %s1110_s28  ;;  %v519_v43 = vld [vmem:[#allocation0] sm:$0xf]   ;;  %s1140_s28 = smov 76  }
  0x34   :  { %v531_v44 = vld [vmem:[#allocation0] sm:$0xf]  }
  0x35   :  { %v543_v45 = vld [vmem:[#allocation0] sm:$0xf]  }
  0x36   :  { %280 = vrot.lane.b32.xlu0 %v279_v23, %s1111_s29  ;;  %v555_v46 = vld [vmem:[#allocation0] sm:$0xf]   ;;  %s1141_s29 = smov 75  }
  0x37   :  { %292 = vrot.lane.b32.xlu1 %v291_v24, %s1112_s30  ;;  %v567_v47 = vld [vmem:[#allocation0] sm:$0xf]   ;;  %s1142_s30 = smov 74  }
  0x38   :  { %v579_v48 = vld [vmem:[#allocation0] sm:$0xf]  }
  0x39   :  { %v591_v49 = vld [vmem:[#allocation0] sm:$0xf]  }
  0x3a   :  { %304 = vrot.lane.b32.xlu0 %v303_v25, %s1113_s2  ;;  %v603_v50 = vld [vmem:[#allocation0] sm:$0xf]   ;;  %s1143_s2 = smov 73  }
  0x3b   :  { %316 = vrot.lane.b32.xlu1 %v315_v26, %s1114_s3  ;;  %v615_v51 = vld [vmem:[#allocation0] sm:$0xf]   ;;  %s1144_s3 = smov 72  }
  0x3c   :  { %v627_v52 = vld [vmem:[#allocation0] sm:$0xf]  }
  0x3d   :  { %v639_v53 = vld [vmem:[#allocation0] sm:$0xf]  }
  0x3e   :  { %328 = vrot.lane.b32.xlu0 %v327_v27, %s1115_s4  ;;  %v651_v54 = vld [vmem:[#allocation0] sm:$0xf]  }
  0x3f   :  { %340 = vrot.lane.b32.xlu1 %v339_v28, %s1116_s5  ;;  %v663_v55 = vld [vmem:[#allocation0] sm:$0xf]  }
  0x40   :  { %v675_v56 = vld [vmem:[#allocation0] sm:$0xf]  }
  0x41   :  { %v687_v57 = vld [vmem:[#allocation0] sm:$0xf]  }
  0x42   :  { %352 = vrot.lane.b32.xlu0 %v351_v29, %s1117_s6  ;;  %v699_v58 = vld [vmem:[#allocation0] sm:$0xf]   ;;  %s1151_s6 = smov 65  }
  0x43   :  { %364 = vrot.lane.b32.xlu1 %v363_v30, %s1118_s7  ;;  %v6_v59 = vld [vmem:[#allocation0] sm:$0xf]  }
  0x44   :  { %8 = vst.msk [vmem:[%s2190_s1] sm:$0x1] %vm7_vm0, %v6_v59   ;;  %771 = vst.msk [vmem:[%s2190_s1 + $0x3f] sm:$0x2] %vm7_vm0, %v6_v59   ;;  %v711_v60 = vld [vmem:[#allocation0] sm:$0xf]  }
  0x45   :  { %772 = vst.msk [vmem:[%s2190_s1 + $0x7e] sm:$0x4] %vm7_vm0, %v6_v59   ;;  %773 = vst.msk [vmem:[%s2190_s1 + $0xbd] sm:$0x8] %vm7_vm0, %v6_v59   ;;  %v723_v61 = vld [vmem:[#allocation0] sm:$0xf]  }
  0x46   :  { %376 = vrot.lane.b32.xlu0 %v375_v31, %s1119_s0  ;;  %v735_v0 = vld [vmem:[#allocation0] sm:$0xf]  }
  0x47   :  { %388 = vrot.lane.b32.xlu1 %v387_v32, %s1120_s8  ;;  %v747_v1 = vld [vmem:[#allocation0] sm:$0xf]  }
  0x48   :  { %v759_v4 = vld [vmem:[#allocation0] sm:$0xf]  }
  0x4a   :  { %400 = vrot.lane.b32.xlu0 %v399_v33, %s1121_s9 }
  0x4b   :  { %412 = vrot.lane.b32.xlu1 %v411_v34, %s1122_s10 }
  0x4e   :  { %424 = vrot.lane.b32.xlu0 %v423_v35, %s1123_s11  ;;  %s1145_s11 = smov 71  }
  0x4f   :  { %436 = vrot.lane.b32.xlu1 %v435_v36, %s1124_s12  ;;  %s1146_s12 = smov 70  }
  0x52   :  { %448 = vrot.lane.b32.xlu0 %v447_v37, %s1125_s13 }
  0x53   :  { %460 = vrot.lane.b32.xlu1 %v459_v38, %s1126_s14 }
  0x56   :  { %472 = vrot.lane.b32.xlu0 %v471_v39, %s1127_s15 }
  0x57   :  { %484 = vrot.lane.b32.xlu1 %v483_v40, %s1128_s16 }
  0x5a   :  { %496 = vrot.lane.b32.xlu0 %v495_v41, %s1129_s17  ;;  %s1149_s17 = smov 67  }
  0x5b   :  { %508 = vrot.lane.b32.xlu1 %v507_v42, %s1130_s18  ;;  %s1150_s18 = smov 66  }
  0x5e   :  { %520 = vrot.lane.b32.xlu0 %v519_v43, %s1131_s19 }
  0x5f   :  { %532 = vrot.lane.b32.xlu1 %v531_v44, %s1132_s20 }
  0x62   :  { %544 = vrot.lane.b32.xlu0 %v543_v45, %s1133_s21 }
  0x63   :  { %556 = vrot.lane.b32.xlu1 %v555_v46, %s1134_s22 }
  0x66   :  { %568 = vrot.lane.b32.xlu0 %v567_v47, %s1135_s23 }
  0x67   :  { %580 = vrot.lane.b32.xlu1 %v579_v48, %s1136_s24 }
  0x6a   :  { %592 = vrot.lane.b32.xlu0 %v591_v49, %s1137_s25 }
  0x6b   :  { %604 = vrot.lane.b32.xlu1 %v603_v50, %s1138_s26 }
  0x6e   :  { %616 = vrot.lane.b32.xlu0 %v615_v51, %s1139_s27 }
  0x6f   :  { %628 = vrot.lane.b32.xlu1 %v627_v52, %s1140_s28 }
  0x72   :  { %640 = vrot.lane.b32.xlu0 %v639_v53, %s1141_s29  ;;  %s1147_s29 = smov 69  }
  0x73   :  { %652 = vrot.lane.b32.xlu1 %v651_v54, %s1142_s30  ;;  %s1148_s30 = smov 68  }
  0x76   :  { %664 = vrot.lane.b32.xlu0 %v663_v55, %s1143_s2 }
  0x77   :  { %676 = vrot.lane.b32.xlu1 %v675_v56, %s1144_s3 }
  0x7a   :  { %688 = vrot.lane.b32.xlu0 %v687_v57, %s1145_s11 }
  0x7b   :  { %700 = vrot.lane.b32.xlu1 %v699_v58, %s1146_s12 }
  0x7c   :  { %v17_v62 = vpop.permute.xlu0 %16  }
  0x7d   :  { %v41_v63 = vpop.permute.xlu1 %40   ;;  %774 = vst.msk [vmem:[%s2190_s1 + $0x1] sm:$0x1] %vm7_vm0, %v17_v62   ;;  %775 = vst.msk [vmem:[%s2190_s1 + $0x40] sm:$0x2] %vm7_vm0, %v17_v62  }
  0x7e   :  { %776 = vst.msk [vmem:[%s2190_s1 + $0x7f] sm:$0x4] %vm7_vm0, %v17_v62   ;;  %777 = vst.msk [vmem:[%s2190_s1 + $0xbe] sm:$0x8] %vm7_vm0, %v17_v62   ;;  %712 = vrot.lane.b32.xlu0 %v711_v60, %s1147_s29 }
  0x7f   :  { %782 = vst.msk [vmem:[%s2190_s1 + $0x3] sm:$0x1] %vm7_vm0, %v41_v63   ;;  %783 = vst.msk [vmem:[%s2190_s1 + $0x42] sm:$0x2] %vm7_vm0, %v41_v63   ;;  %724 = vrot.lane.b32.xlu1 %v723_v61, %s1148_s30 }
  0x80   :  { %784 = vst.msk [vmem:[%s2190_s1 + $0x81] sm:$0x4] %vm7_vm0, %v41_v63   ;;  %785 = vst.msk [vmem:[%s2190_s1 + $0xc0] sm:$0x8] %vm7_vm0, %v41_v63   ;;  %v29_v2 = vpop.permute.xlu0 %28  }
  0x81   :  { %v53_v3 = vpop.permute.xlu1 %52   ;;  %778 = vst.msk [vmem:[%s2190_s1 + $0x2] sm:$0x1] %vm7_vm0, %v29_v2   ;;  %779 = vst.msk [vmem:[%s2190_s1 + $0x41] sm:$0x2] %vm7_vm0, %v29_v2  }
  0x82   :  { %780 = vst.msk [vmem:[%s2190_s1 + $0x80] sm:$0x4] %vm7_vm0, %v29_v2   ;;  %781 = vst.msk [vmem:[%s2190_s1 + $0xbf] sm:$0x8] %vm7_vm0, %v29_v2   ;;  %736 = vrot.lane.b32.xlu0 %v735_v0, %s1149_s17 }
  0x83   :  { %786 = vst.msk [vmem:[%s2190_s1 + $0x4] sm:$0x1] %vm7_vm0, %v53_v3   ;;  %787 = vst.msk [vmem:[%s2190_s1 + $0x43] sm:$0x2] %vm7_vm0, %v53_v3   ;;  %748 = vrot.lane.b32.xlu1 %v747_v1, %s1150_s18 }
  0x84   :  { %788 = vst.msk [vmem:[%s2190_s1 + $0x82] sm:$0x4] %vm7_vm0, %v53_v3   ;;  %789 = vst.msk [vmem:[%s2190_s1 + $0xc1] sm:$0x8] %vm7_vm0, %v53_v3   ;;  %v65_v5 = vpop.permute.xlu0 %64  }
  0x85   :  { %v77_v6 = vpop.permute.xlu1 %76   ;;  %790 = vst.msk [vmem:[%s2190_s1 + $0x5] sm:$0x1] %vm7_vm0, %v65_v5   ;;  %791 = vst.msk [vmem:[%s2190_s1 + $0x44] sm:$0x2] %vm7_vm0, %v65_v5  }
  0x86   :  { %792 = vst.msk [vmem:[%s2190_s1 + $0x83] sm:$0x4] %vm7_vm0, %v65_v5   ;;  %793 = vst.msk [vmem:[%s2190_s1 + $0xc2] sm:$0x8] %vm7_vm0, %v65_v5   ;;  %760 = vrot.lane.b32.xlu0 %v759_v4, %s1151_s6 }
  0x87   :  { %794 = vst.msk [vmem:[%s2190_s1 + $0x6] sm:$0x1] %vm7_vm0, %v77_v6   ;;  %795 = vst.msk [vmem:[%s2190_s1 + $0x45] sm:$0x2] %vm7_vm0, %v77_v6  }
  0x88   :  { %796 = vst.msk [vmem:[%s2190_s1 + $0x84] sm:$0x4] %vm7_vm0, %v77_v6   ;;  %797 = vst.msk [vmem:[%s2190_s1 + $0xc3] sm:$0x8] %vm7_vm0, %v77_v6   ;;  %v89_v7 = vpop.permute.xlu0 %88  }
  0x89   :  { %v101_v8 = vpop.permute.xlu1 %100   ;;  %798 = vst.msk [vmem:[%s2190_s1 + $0x7] sm:$0x1] %vm7_vm0, %v89_v7   ;;  %799 = vst.msk [vmem:[%s2190_s1 + $0x46] sm:$0x2] %vm7_vm0, %v89_v7  }
  0x8a   :  { %800 = vst.msk [vmem:[%s2190_s1 + $0x85] sm:$0x4] %vm7_vm0, %v89_v7   ;;  %801 = vst.msk [vmem:[%s2190_s1 + $0xc4] sm:$0x8] %vm7_vm0, %v89_v7  }
  0x8b   :  { %802 = vst.msk [vmem:[%s2190_s1 + $0x8] sm:$0x1] %vm7_vm0, %v101_v8   ;;  %803 = vst.msk [vmem:[%s2190_s1 + $0x47] sm:$0x2] %vm7_vm0, %v101_v8  }
  0x8c   :  { %804 = vst.msk [vmem:[%s2190_s1 + $0x86] sm:$0x4] %vm7_vm0, %v101_v8   ;;  %805 = vst.msk [vmem:[%s2190_s1 + $0xc5] sm:$0x8] %vm7_vm0, %v101_v8   ;;  %v113_v9 = vpop.permute.xlu0 %112  }
  0x8d   :  { %v125_v10 = vpop.permute.xlu1 %124   ;;  %806 = vst.msk [vmem:[%s2190_s1 + $0x9] sm:$0x1] %vm7_vm0, %v113_v9   ;;  %807 = vst.msk [vmem:[%s2190_s1 + $0x48] sm:$0x2] %vm7_vm0, %v113_v9  }
  0x8e   :  { %808 = vst.msk [vmem:[%s2190_s1 + $0x87] sm:$0x4] %vm7_vm0, %v113_v9   ;;  %809 = vst.msk [vmem:[%s2190_s1 + $0xc6] sm:$0x8] %vm7_vm0, %v113_v9  }
  0x8f   :  { %810 = vst.msk [vmem:[%s2190_s1 + $0xa] sm:$0x1] %vm7_vm0, %v125_v10   ;;  %811 = vst.msk [vmem:[%s2190_s1 + $0x49] sm:$0x2] %vm7_vm0, %v125_v10  }
  0x90   :  { %812 = vst.msk [vmem:[%s2190_s1 + $0x88] sm:$0x4] %vm7_vm0, %v125_v10   ;;  %813 = vst.msk [vmem:[%s2190_s1 + $0xc7] sm:$0x8] %vm7_vm0, %v125_v10   ;;  %v137_v11 = vpop.permute.xlu0 %136  }
  0x91   :  { %v149_v12 = vpop.permute.xlu1 %148   ;;  %814 = vst.msk [vmem:[%s2190_s1 + $0xb] sm:$0x1] %vm7_vm0, %v137_v11   ;;  %815 = vst.msk [vmem:[%s2190_s1 + $0x4a] sm:$0x2] %vm7_vm0, %v137_v11  }
  0x92   :  { %816 = vst.msk [vmem:[%s2190_s1 + $0x89] sm:$0x4] %vm7_vm0, %v137_v11   ;;  %817 = vst.msk [vmem:[%s2190_s1 + $0xc8] sm:$0x8] %vm7_vm0, %v137_v11  }
  0x93   :  { %818 = vst.msk [vmem:[%s2190_s1 + $0xc] sm:$0x1] %vm7_vm0, %v149_v12   ;;  %819 = vst.msk [vmem:[%s2190_s1 + $0x4b] sm:$0x2] %vm7_vm0, %v149_v12  }
  0x94   :  { %820 = vst.msk [vmem:[%s2190_s1 + $0x8a] sm:$0x4] %vm7_vm0, %v149_v12   ;;  %821 = vst.msk [vmem:[%s2190_s1 + $0xc9] sm:$0x8] %vm7_vm0, %v149_v12   ;;  %v161_v13 = vpop.permute.xlu0 %160  }
  0x95   :  { %v173_v14 = vpop.permute.xlu1 %172   ;;  %822 = vst.msk [vmem:[%s2190_s1 + $0xd] sm:$0x1] %vm7_vm0, %v161_v13   ;;  %823 = vst.msk [vmem:[%s2190_s1 + $0x4c] sm:$0x2] %vm7_vm0, %v161_v13  }
  0x96   :  { %824 = vst.msk [vmem:[%s2190_s1 + $0x8b] sm:$0x4] %vm7_vm0, %v161_v13   ;;  %825 = vst.msk [vmem:[%s2190_s1 + $0xca] sm:$0x8] %vm7_vm0, %v161_v13  }
  0x97   :  { %826 = vst.msk [vmem:[%s2190_s1 + $0xe] sm:$0x1] %vm7_vm0, %v173_v14   ;;  %827 = vst.msk [vmem:[%s2190_s1 + $0x4d] sm:$0x2] %vm7_vm0, %v173_v14  }
  0x98   :  { %828 = vst.msk [vmem:[%s2190_s1 + $0x8c] sm:$0x4] %vm7_vm0, %v173_v14   ;;  %829 = vst.msk [vmem:[%s2190_s1 + $0xcb] sm:$0x8] %vm7_vm0, %v173_v14   ;;  %v185_v15 = vpop.permute.xlu0 %184  }
  0x99   :  { %v197_v16 = vpop.permute.xlu1 %196   ;;  %830 = vst.msk [vmem:[%s2190_s1 + $0xf] sm:$0x1] %vm7_vm0, %v185_v15   ;;  %831 = vst.msk [vmem:[%s2190_s1 + $0x4e] sm:$0x2] %vm7_vm0, %v185_v15  }
  0x9a   :  { %832 = vst.msk [vmem:[%s2190_s1 + $0x8d] sm:$0x4] %vm7_vm0, %v185_v15   ;;  %833 = vst.msk [vmem:[%s2190_s1 + $0xcc] sm:$0x8] %vm7_vm0, %v185_v15  }
  0x9b   :  { %834 = vst.msk [vmem:[%s2190_s1 + $0x10] sm:$0x1] %vm7_vm0, %v197_v16   ;;  %835 = vst.msk [vmem:[%s2190_s1 + $0x4f] sm:$0x2] %vm7_vm0, %v197_v16  }
  0x9c   :  { %836 = vst.msk [vmem:[%s2190_s1 + $0x8e] sm:$0x4] %vm7_vm0, %v197_v16   ;;  %837 = vst.msk [vmem:[%s2190_s1 + $0xcd] sm:$0x8] %vm7_vm0, %v197_v16   ;;  %v209_v17 = vpop.permute.xlu0 %208  }
  0x9d   :  { %v221_v18 = vpop.permute.xlu1 %220   ;;  %838 = vst.msk [vmem:[%s2190_s1 + $0x11] sm:$0x1] %vm7_vm0, %v209_v17   ;;  %839 = vst.msk [vmem:[%s2190_s1 + $0x50] sm:$0x2] %vm7_vm0, %v209_v17  }
  0x9e   :  { %840 = vst.msk [vmem:[%s2190_s1 + $0x8f] sm:$0x4] %vm7_vm0, %v209_v17   ;;  %841 = vst.msk [vmem:[%s2190_s1 + $0xce] sm:$0x8] %vm7_vm0, %v209_v17  }
  0x9f   :  { %842 = vst.msk [vmem:[%s2190_s1 + $0x12] sm:$0x1] %vm7_vm0, %v221_v18   ;;  %843 = vst.msk [vmem:[%s2190_s1 + $0x51] sm:$0x2] %vm7_vm0, %v221_v18  }
  0xa0   :  { %844 = vst.msk [vmem:[%s2190_s1 + $0x90] sm:$0x4] %vm7_vm0, %v221_v18   ;;  %845 = vst.msk [vmem:[%s2190_s1 + $0xcf] sm:$0x8] %vm7_vm0, %v221_v18   ;;  %v233_v19 = vpop.permute.xlu0 %232  }
  0xa1   :  { %v245_v20 = vpop.permute.xlu1 %244   ;;  %846 = vst.msk [vmem:[%s2190_s1 + $0x13] sm:$0x1] %vm7_vm0, %v233_v19   ;;  %847 = vst.msk [vmem:[%s2190_s1 + $0x52] sm:$0x2] %vm7_vm0, %v233_v19  }
  0xa2   :  { %848 = vst.msk [vmem:[%s2190_s1 + $0x91] sm:$0x4] %vm7_vm0, %v233_v19   ;;  %849 = vst.msk [vmem:[%s2190_s1 + $0xd0] sm:$0x8] %vm7_vm0, %v233_v19  }
  0xa3   :  { %850 = vst.msk [vmem:[%s2190_s1 + $0x14] sm:$0x1] %vm7_vm0, %v245_v20   ;;  %851 = vst.msk [vmem:[%s2190_s1 + $0x53] sm:$0x2] %vm7_vm0, %v245_v20  }
  0xa4   :  { %852 = vst.msk [vmem:[%s2190_s1 + $0x92] sm:$0x4] %vm7_vm0, %v245_v20   ;;  %853 = vst.msk [vmem:[%s2190_s1 + $0xd1] sm:$0x8] %vm7_vm0, %v245_v20   ;;  %v257_v21 = vpop.permute.xlu0 %256  }
  0xa5   :  { %v269_v22 = vpop.permute.xlu1 %268   ;;  %854 = vst.msk [vmem:[%s2190_s1 + $0x15] sm:$0x1] %vm7_vm0, %v257_v21   ;;  %855 = vst.msk [vmem:[%s2190_s1 + $0x54] sm:$0x2] %vm7_vm0, %v257_v21  }
  0xa6   :  { %856 = vst.msk [vmem:[%s2190_s1 + $0x93] sm:$0x4] %vm7_vm0, %v257_v21   ;;  %857 = vst.msk [vmem:[%s2190_s1 + $0xd2] sm:$0x8] %vm7_vm0, %v257_v21  }
  0xa7   :  { %858 = vst.msk [vmem:[%s2190_s1 + $0x16] sm:$0x1] %vm7_vm0, %v269_v22   ;;  %859 = vst.msk [vmem:[%s2190_s1 + $0x55] sm:$0x2] %vm7_vm0, %v269_v22  }
  0xa8   :  { %860 = vst.msk [vmem:[%s2190_s1 + $0x94] sm:$0x4] %vm7_vm0, %v269_v22   ;;  %861 = vst.msk [vmem:[%s2190_s1 + $0xd3] sm:$0x8] %vm7_vm0, %v269_v22   ;;  %v281_v23 = vpop.permute.xlu0 %280  }
  0xa9   :  { %v293_v24 = vpop.permute.xlu1 %292   ;;  %862 = vst.msk [vmem:[%s2190_s1 + $0x17] sm:$0x1] %vm7_vm0, %v281_v23   ;;  %863 = vst.msk [vmem:[%s2190_s1 + $0x56] sm:$0x2] %vm7_vm0, %v281_v23  }
  0xaa   :  { %864 = vst.msk [vmem:[%s2190_s1 + $0x95] sm:$0x4] %vm7_vm0, %v281_v23   ;;  %865 = vst.msk [vmem:[%s2190_s1 + $0xd4] sm:$0x8] %vm7_vm0, %v281_v23  }
  0xab   :  { %866 = vst.msk [vmem:[%s2190_s1 + $0x18] sm:$0x1] %vm7_vm0, %v293_v24   ;;  %867 = vst.msk [vmem:[%s2190_s1 + $0x57] sm:$0x2] %vm7_vm0, %v293_v24  }
  0xac   :  { %868 = vst.msk [vmem:[%s2190_s1 + $0x96] sm:$0x4] %vm7_vm0, %v293_v24   ;;  %869 = vst.msk [vmem:[%s2190_s1 + $0xd5] sm:$0x8] %vm7_vm0, %v293_v24   ;;  %v305_v25 = vpop.permute.xlu0 %304  }
  0xad   :  { %v317_v26 = vpop.permute.xlu1 %316   ;;  %870 = vst.msk [vmem:[%s2190_s1 + $0x19] sm:$0x1] %vm7_vm0, %v305_v25   ;;  %871 = vst.msk [vmem:[%s2190_s1 + $0x58] sm:$0x2] %vm7_vm0, %v305_v25  }
  0xae   :  { %872 = vst.msk [vmem:[%s2190_s1 + $0x97] sm:$0x4] %vm7_vm0, %v305_v25   ;;  %873 = vst.msk [vmem:[%s2190_s1 + $0xd6] sm:$0x8] %vm7_vm0, %v305_v25  }
  0xaf   :  { %874 = vst.msk [vmem:[%s2190_s1 + $0x1a] sm:$0x1] %vm7_vm0, %v317_v26   ;;  %875 = vst.msk [vmem:[%s2190_s1 + $0x59] sm:$0x2] %vm7_vm0, %v317_v26  }
  0xb0   :  { %876 = vst.msk [vmem:[%s2190_s1 + $0x98] sm:$0x4] %vm7_vm0, %v317_v26   ;;  %877 = vst.msk [vmem:[%s2190_s1 + $0xd7] sm:$0x8] %vm7_vm0, %v317_v26   ;;  %v329_v27 = vpop.permute.xlu0 %328  }
  0xb1   :  { %v341_v28 = vpop.permute.xlu1 %340   ;;  %878 = vst.msk [vmem:[%s2190_s1 + $0x1b] sm:$0x1] %vm7_vm0, %v329_v27   ;;  %879 = vst.msk [vmem:[%s2190_s1 + $0x5a] sm:$0x2] %vm7_vm0, %v329_v27  }
  0xb2   :  { %880 = vst.msk [vmem:[%s2190_s1 + $0x99] sm:$0x4] %vm7_vm0, %v329_v27   ;;  %881 = vst.msk [vmem:[%s2190_s1 + $0xd8] sm:$0x8] %vm7_vm0, %v329_v27  }
  0xb3   :  { %882 = vst.msk [vmem:[%s2190_s1 + $0x1c] sm:$0x1] %vm7_vm0, %v341_v28   ;;  %883 = vst.msk [vmem:[%s2190_s1 + $0x5b] sm:$0x2] %vm7_vm0, %v341_v28  }
  0xb4   :  { %884 = vst.msk [vmem:[%s2190_s1 + $0x9a] sm:$0x4] %vm7_vm0, %v341_v28   ;;  %885 = vst.msk [vmem:[%s2190_s1 + $0xd9] sm:$0x8] %vm7_vm0, %v341_v28   ;;  %v353_v29 = vpop.permute.xlu0 %352  }
  0xb5   :  { %v365_v30 = vpop.permute.xlu1 %364   ;;  %886 = vst.msk [vmem:[%s2190_s1 + $0x1d] sm:$0x1] %vm7_vm0, %v353_v29   ;;  %887 = vst.msk [vmem:[%s2190_s1 + $0x5c] sm:$0x2] %vm7_vm0, %v353_v29  }
  0xb6   :  { %888 = vst.msk [vmem:[%s2190_s1 + $0x9b] sm:$0x4] %vm7_vm0, %v353_v29   ;;  %889 = vst.msk [vmem:[%s2190_s1 + $0xda] sm:$0x8] %vm7_vm0, %v353_v29  }
  0xb7   :  { %890 = vst.msk [vmem:[%s2190_s1 + $0x1e] sm:$0x1] %vm7_vm0, %v365_v30   ;;  %891 = vst.msk [vmem:[%s2190_s1 + $0x5d] sm:$0x2] %vm7_vm0, %v365_v30  }
  0xb8   :  { %892 = vst.msk [vmem:[%s2190_s1 + $0x9c] sm:$0x4] %vm7_vm0, %v365_v30   ;;  %893 = vst.msk [vmem:[%s2190_s1 + $0xdb] sm:$0x8] %vm7_vm0, %v365_v30   ;;  %v377_v31 = vpop.permute.xlu0 %376  }
  0xb9   :  { %v389_v32 = vpop.permute.xlu1 %388   ;;  %894 = vst.msk [vmem:[%s2190_s1 + $0x1f] sm:$0x1] %vm7_vm0, %v377_v31   ;;  %895 = vst.msk [vmem:[%s2190_s1 + $0x5e] sm:$0x2] %vm7_vm0, %v377_v31  }
  0xba   :  { %896 = vst.msk [vmem:[%s2190_s1 + $0x9d] sm:$0x4] %vm7_vm0, %v377_v31   ;;  %897 = vst.msk [vmem:[%s2190_s1 + $0xdc] sm:$0x8] %vm7_vm0, %v377_v31  }
  0xbb   :  { %898 = vst.msk [vmem:[%s2190_s1 + $0x20] sm:$0x1] %vm7_vm0, %v389_v32   ;;  %899 = vst.msk [vmem:[%s2190_s1 + $0x5f] sm:$0x2] %vm7_vm0, %v389_v32  }
  0xbc   :  { %900 = vst.msk [vmem:[%s2190_s1 + $0x9e] sm:$0x4] %vm7_vm0, %v389_v32   ;;  %901 = vst.msk [vmem:[%s2190_s1 + $0xdd] sm:$0x8] %vm7_vm0, %v389_v32   ;;  %v401_v33 = vpop.permute.xlu0 %400  }
  0xbd   :  { %v413_v34 = vpop.permute.xlu1 %412   ;;  %902 = vst.msk [vmem:[%s2190_s1 + $0x21] sm:$0x1] %vm7_vm0, %v401_v33   ;;  %903 = vst.msk [vmem:[%s2190_s1 + $0x60] sm:$0x2] %vm7_vm0, %v401_v33  }
  0xbe   :  { %904 = vst.msk [vmem:[%s2190_s1 + $0x9f] sm:$0x4] %vm7_vm0, %v401_v33   ;;  %905 = vst.msk [vmem:[%s2190_s1 + $0xde] sm:$0x8] %vm7_vm0, %v401_v33  }
  0xbf   :  { %906 = vst.msk [vmem:[%s2190_s1 + $0x22] sm:$0x1] %vm7_vm0, %v413_v34   ;;  %907 = vst.msk [vmem:[%s2190_s1 + $0x61] sm:$0x2] %vm7_vm0, %v413_v34  }
  0xc0   :  { %908 = vst.msk [vmem:[%s2190_s1 + $0xa0] sm:$0x4] %vm7_vm0, %v413_v34   ;;  %909 = vst.msk [vmem:[%s2190_s1 + $0xdf] sm:$0x8] %vm7_vm0, %v413_v34   ;;  %v425_v35 = vpop.permute.xlu0 %424  }
  0xc1   :  { %v437_v36 = vpop.permute.xlu1 %436   ;;  %910 = vst.msk [vmem:[%s2190_s1 + $0x23] sm:$0x1] %vm7_vm0, %v425_v35   ;;  %911 = vst.msk [vmem:[%s2190_s1 + $0x62] sm:$0x2] %vm7_vm0, %v425_v35  }
  0xc2   :  { %912 = vst.msk [vmem:[%s2190_s1 + $0xa1] sm:$0x4] %vm7_vm0, %v425_v35   ;;  %913 = vst.msk [vmem:[%s2190_s1 + $0xe0] sm:$0x8] %vm7_vm0, %v425_v35  }
  0xc3   :  { %914 = vst.msk [vmem:[%s2190_s1 + $0x24] sm:$0x1] %vm7_vm0, %v437_v36   ;;  %915 = vst.msk [vmem:[%s2190_s1 + $0x63] sm:$0x2] %vm7_vm0, %v437_v36  }
  0xc4   :  { %916 = vst.msk [vmem:[%s2190_s1 + $0xa2] sm:$0x4] %vm7_vm0, %v437_v36   ;;  %917 = vst.msk [vmem:[%s2190_s1 + $0xe1] sm:$0x8] %vm7_vm0, %v437_v36   ;;  %v449_v37 = vpop.permute.xlu0 %448  }
  0xc5   :  { %v461_v38 = vpop.permute.xlu1 %460   ;;  %918 = vst.msk [vmem:[%s2190_s1 + $0x25] sm:$0x1] %vm7_vm0, %v449_v37   ;;  %919 = vst.msk [vmem:[%s2190_s1 + $0x64] sm:$0x2] %vm7_vm0, %v449_v37  }
  0xc6   :  { %920 = vst.msk [vmem:[%s2190_s1 + $0xa3] sm:$0x4] %vm7_vm0, %v449_v37   ;;  %921 = vst.msk [vmem:[%s2190_s1 + $0xe2] sm:$0x8] %vm7_vm0, %v449_v37  }
  0xc7   :  { %922 = vst.msk [vmem:[%s2190_s1 + $0x26] sm:$0x1] %vm7_vm0, %v461_v38   ;;  %923 = vst.msk [vmem:[%s2190_s1 + $0x65] sm:$0x2] %vm7_vm0, %v461_v38  }
  0xc8   :  { %924 = vst.msk [vmem:[%s2190_s1 + $0xa4] sm:$0x4] %vm7_vm0, %v461_v38   ;;  %925 = vst.msk [vmem:[%s2190_s1 + $0xe3] sm:$0x8] %vm7_vm0, %v461_v38   ;;  %v473_v39 = vpop.permute.xlu0 %472  }
  0xc9   :  { %v485_v40 = vpop.permute.xlu1 %484   ;;  %926 = vst.msk [vmem:[%s2190_s1 + $0x27] sm:$0x1] %vm7_vm0, %v473_v39   ;;  %927 = vst.msk [vmem:[%s2190_s1 + $0x66] sm:$0x2] %vm7_vm0, %v473_v39  }
  0xca   :  { %928 = vst.msk [vmem:[%s2190_s1 + $0xa5] sm:$0x4] %vm7_vm0, %v473_v39   ;;  %929 = vst.msk [vmem:[%s2190_s1 + $0xe4] sm:$0x8] %vm7_vm0, %v473_v39  }
  0xcb   :  { %930 = vst.msk [vmem:[%s2190_s1 + $0x28] sm:$0x1] %vm7_vm0, %v485_v40   ;;  %931 = vst.msk [vmem:[%s2190_s1 + $0x67] sm:$0x2] %vm7_vm0, %v485_v40  }
  0xcc   :  { %932 = vst.msk [vmem:[%s2190_s1 + $0xa6] sm:$0x4] %vm7_vm0, %v485_v40   ;;  %933 = vst.msk [vmem:[%s2190_s1 + $0xe5] sm:$0x8] %vm7_vm0, %v485_v40   ;;  %v497_v41 = vpop.permute.xlu0 %496  }
  0xcd   :  { %v509_v42 = vpop.permute.xlu1 %508   ;;  %934 = vst.msk [vmem:[%s2190_s1 + $0x29] sm:$0x1] %vm7_vm0, %v497_v41   ;;  %935 = vst.msk [vmem:[%s2190_s1 + $0x68] sm:$0x2] %vm7_vm0, %v497_v41  }
  0xce   :  { %936 = vst.msk [vmem:[%s2190_s1 + $0xa7] sm:$0x4] %vm7_vm0, %v497_v41   ;;  %937 = vst.msk [vmem:[%s2190_s1 + $0xe6] sm:$0x8] %vm7_vm0, %v497_v41  }
  0xcf   :  { %938 = vst.msk [vmem:[%s2190_s1 + $0x2a] sm:$0x1] %vm7_vm0, %v509_v42   ;;  %939 = vst.msk [vmem:[%s2190_s1 + $0x69] sm:$0x2] %vm7_vm0, %v509_v42  }
  0xd0   :  { %940 = vst.msk [vmem:[%s2190_s1 + $0xa8] sm:$0x4] %vm7_vm0, %v509_v42   ;;  %941 = vst.msk [vmem:[%s2190_s1 + $0xe7] sm:$0x8] %vm7_vm0, %v509_v42   ;;  %v521_v43 = vpop.permute.xlu0 %520  }
  0xd1   :  { %v533_v44 = vpop.permute.xlu1 %532   ;;  %942 = vst.msk [vmem:[%s2190_s1 + $0x2b] sm:$0x1] %vm7_vm0, %v521_v43   ;;  %943 = vst.msk [vmem:[%s2190_s1 + $0x6a] sm:$0x2] %vm7_vm0, %v521_v43  }
  0xd2   :  { %944 = vst.msk [vmem:[%s2190_s1 + $0xa9] sm:$0x4] %vm7_vm0, %v521_v43   ;;  %945 = vst.msk [vmem:[%s2190_s1 + $0xe8] sm:$0x8] %vm7_vm0, %v521_v43  }
  0xd3   :  { %946 = vst.msk [vmem:[%s2190_s1 + $0x2c] sm:$0x1] %vm7_vm0, %v533_v44   ;;  %947 = vst.msk [vmem:[%s2190_s1 + $0x6b] sm:$0x2] %vm7_vm0, %v533_v44  }
  0xd4   :  { %948 = vst.msk [vmem:[%s2190_s1 + $0xaa] sm:$0x4] %vm7_vm0, %v533_v44   ;;  %949 = vst.msk [vmem:[%s2190_s1 + $0xe9] sm:$0x8] %vm7_vm0, %v533_v44   ;;  %v545_v45 = vpop.permute.xlu0 %544  }
  0xd5   :  { %v557_v46 = vpop.permute.xlu1 %556   ;;  %950 = vst.msk [vmem:[%s2190_s1 + $0x2d] sm:$0x1] %vm7_vm0, %v545_v45   ;;  %951 = vst.msk [vmem:[%s2190_s1 + $0x6c] sm:$0x2] %vm7_vm0, %v545_v45  }
  0xd6   :  { %952 = vst.msk [vmem:[%s2190_s1 + $0xab] sm:$0x4] %vm7_vm0, %v545_v45   ;;  %953 = vst.msk [vmem:[%s2190_s1 + $0xea] sm:$0x8] %vm7_vm0, %v545_v45  }
  0xd7   :  { %954 = vst.msk [vmem:[%s2190_s1 + $0x2e] sm:$0x1] %vm7_vm0, %v557_v46   ;;  %955 = vst.msk [vmem:[%s2190_s1 + $0x6d] sm:$0x2] %vm7_vm0, %v557_v46  }
  0xd8   :  { %956 = vst.msk [vmem:[%s2190_s1 + $0xac] sm:$0x4] %vm7_vm0, %v557_v46   ;;  %957 = vst.msk [vmem:[%s2190_s1 + $0xeb] sm:$0x8] %vm7_vm0, %v557_v46   ;;  %v569_v47 = vpop.permute.xlu0 %568  }
  0xd9   :  { %v581_v48 = vpop.permute.xlu1 %580   ;;  %958 = vst.msk [vmem:[%s2190_s1 + $0x2f] sm:$0x1] %vm7_vm0, %v569_v47   ;;  %959 = vst.msk [vmem:[%s2190_s1 + $0x6e] sm:$0x2] %vm7_vm0, %v569_v47  }
  0xda   :  { %960 = vst.msk [vmem:[%s2190_s1 + $0xad] sm:$0x4] %vm7_vm0, %v569_v47   ;;  %961 = vst.msk [vmem:[%s2190_s1 + $0xec] sm:$0x8] %vm7_vm0, %v569_v47  }
  0xdb   :  { %962 = vst.msk [vmem:[%s2190_s1 + $0x30] sm:$0x1] %vm7_vm0, %v581_v48   ;;  %963 = vst.msk [vmem:[%s2190_s1 + $0x6f] sm:$0x2] %vm7_vm0, %v581_v48  }
  0xdc   :  { %964 = vst.msk [vmem:[%s2190_s1 + $0xae] sm:$0x4] %vm7_vm0, %v581_v48   ;;  %965 = vst.msk [vmem:[%s2190_s1 + $0xed] sm:$0x8] %vm7_vm0, %v581_v48   ;;  %v593_v49 = vpop.permute.xlu0 %592  }
  0xdd   :  { %v605_v50 = vpop.permute.xlu1 %604   ;;  %966 = vst.msk [vmem:[%s2190_s1 + $0x31] sm:$0x1] %vm7_vm0, %v593_v49   ;;  %967 = vst.msk [vmem:[%s2190_s1 + $0x70] sm:$0x2] %vm7_vm0, %v593_v49  }
  0xde   :  { %968 = vst.msk [vmem:[%s2190_s1 + $0xaf] sm:$0x4] %vm7_vm0, %v593_v49   ;;  %969 = vst.msk [vmem:[%s2190_s1 + $0xee] sm:$0x8] %vm7_vm0, %v593_v49  }
  0xdf   :  { %970 = vst.msk [vmem:[%s2190_s1 + $0x32] sm:$0x1] %vm7_vm0, %v605_v50   ;;  %971 = vst.msk [vmem:[%s2190_s1 + $0x71] sm:$0x2] %vm7_vm0, %v605_v50  }
  0xe0   :  { %972 = vst.msk [vmem:[%s2190_s1 + $0xb0] sm:$0x4] %vm7_vm0, %v605_v50   ;;  %973 = vst.msk [vmem:[%s2190_s1 + $0xef] sm:$0x8] %vm7_vm0, %v605_v50   ;;  %v617_v51 = vpop.permute.xlu0 %616  }
  0xe1   :  { %v629_v52 = vpop.permute.xlu1 %628   ;;  %974 = vst.msk [vmem:[%s2190_s1 + $0x33] sm:$0x1] %vm7_vm0, %v617_v51   ;;  %975 = vst.msk [vmem:[%s2190_s1 + $0x72] sm:$0x2] %vm7_vm0, %v617_v51  }
  0xe2   :  { %976 = vst.msk [vmem:[%s2190_s1 + $0xb1] sm:$0x4] %vm7_vm0, %v617_v51   ;;  %977 = vst.msk [vmem:[%s2190_s1 + $0xf0] sm:$0x8] %vm7_vm0, %v617_v51  }
  0xe3   :  { %978 = vst.msk [vmem:[%s2190_s1 + $0x34] sm:$0x1] %vm7_vm0, %v629_v52   ;;  %979 = vst.msk [vmem:[%s2190_s1 + $0x73] sm:$0x2] %vm7_vm0, %v629_v52  }
  0xe4   :  { %980 = vst.msk [vmem:[%s2190_s1 + $0xb2] sm:$0x4] %vm7_vm0, %v629_v52   ;;  %981 = vst.msk [vmem:[%s2190_s1 + $0xf1] sm:$0x8] %vm7_vm0, %v629_v52   ;;  %v641_v53 = vpop.permute.xlu0 %640  }
  0xe5   :  { %v653_v54 = vpop.permute.xlu1 %652   ;;  %982 = vst.msk [vmem:[%s2190_s1 + $0x35] sm:$0x1] %vm7_vm0, %v641_v53   ;;  %983 = vst.msk [vmem:[%s2190_s1 + $0x74] sm:$0x2] %vm7_vm0, %v641_v53  }
  0xe6   :  { %984 = vst.msk [vmem:[%s2190_s1 + $0xb3] sm:$0x4] %vm7_vm0, %v641_v53   ;;  %985 = vst.msk [vmem:[%s2190_s1 + $0xf2] sm:$0x8] %vm7_vm0, %v641_v53  }
  0xe7   :  { %986 = vst.msk [vmem:[%s2190_s1 + $0x36] sm:$0x1] %vm7_vm0, %v653_v54   ;;  %987 = vst.msk [vmem:[%s2190_s1 + $0x75] sm:$0x2] %vm7_vm0, %v653_v54  }
  0xe8   :  { %988 = vst.msk [vmem:[%s2190_s1 + $0xb4] sm:$0x4] %vm7_vm0, %v653_v54   ;;  %989 = vst.msk [vmem:[%s2190_s1 + $0xf3] sm:$0x8] %vm7_vm0, %v653_v54   ;;  %v665_v55 = vpop.permute.xlu0 %664  }
  0xe9   :  { %v677_v56 = vpop.permute.xlu1 %676   ;;  %990 = vst.msk [vmem:[%s2190_s1 + $0x37] sm:$0x1] %vm7_vm0, %v665_v55   ;;  %991 = vst.msk [vmem:[%s2190_s1 + $0x76] sm:$0x2] %vm7_vm0, %v665_v55  }
  0xea   :  { %992 = vst.msk [vmem:[%s2190_s1 + $0xb5] sm:$0x4] %vm7_vm0, %v665_v55   ;;  %993 = vst.msk [vmem:[%s2190_s1 + $0xf4] sm:$0x8] %vm7_vm0, %v665_v55  }
  0xeb   :  { %994 = vst.msk [vmem:[%s2190_s1 + $0x38] sm:$0x1] %vm7_vm0, %v677_v56   ;;  %995 = vst.msk [vmem:[%s2190_s1 + $0x77] sm:$0x2] %vm7_vm0, %v677_v56  }
  0xec   :  { %996 = vst.msk [vmem:[%s2190_s1 + $0xb6] sm:$0x4] %vm7_vm0, %v677_v56   ;;  %997 = vst.msk [vmem:[%s2190_s1 + $0xf5] sm:$0x8] %vm7_vm0, %v677_v56   ;;  %v689_v57 = vpop.permute.xlu0 %688  }
  0xed   :  { %v701_v58 = vpop.permute.xlu1 %700   ;;  %998 = vst.msk [vmem:[%s2190_s1 + $0x39] sm:$0x1] %vm7_vm0, %v689_v57   ;;  %999 = vst.msk [vmem:[%s2190_s1 + $0x78] sm:$0x2] %vm7_vm0, %v689_v57  }
  0xee   :  { %1000 = vst.msk [vmem:[%s2190_s1 + $0xb7] sm:$0x4] %vm7_vm0, %v689_v57   ;;  %1001 = vst.msk [vmem:[%s2190_s1 + $0xf6] sm:$0x8] %vm7_vm0, %v689_v57  }
  0xef   :  { %1002 = vst.msk [vmem:[%s2190_s1 + $0x3a] sm:$0x1] %vm7_vm0, %v701_v58   ;;  %1003 = vst.msk [vmem:[%s2190_s1 + $0x79] sm:$0x2] %vm7_vm0, %v701_v58  }
  0xf0   :  { %1004 = vst.msk [vmem:[%s2190_s1 + $0xb8] sm:$0x4] %vm7_vm0, %v701_v58   ;;  %1005 = vst.msk [vmem:[%s2190_s1 + $0xf7] sm:$0x8] %vm7_vm0, %v701_v58   ;;  %v713_v59 = vpop.permute.xlu0 %712  }
  0xf1   :  { %v725_v60 = vpop.permute.xlu1 %724   ;;  %1006 = vst.msk [vmem:[%s2190_s1 + $0x3b] sm:$0x1] %vm7_vm0, %v713_v59   ;;  %1007 = vst.msk [vmem:[%s2190_s1 + $0x7a] sm:$0x2] %vm7_vm0, %v713_v59  }
  0xf2   :  { %1008 = vst.msk [vmem:[%s2190_s1 + $0xb9] sm:$0x4] %vm7_vm0, %v713_v59   ;;  %1009 = vst.msk [vmem:[%s2190_s1 + $0xf8] sm:$0x8] %vm7_vm0, %v713_v59  }
  0xf3   :  { %1010 = vst.msk [vmem:[%s2190_s1 + $0x3c] sm:$0x1] %vm7_vm0, %v725_v60   ;;  %1011 = vst.msk [vmem:[%s2190_s1 + $0x7b] sm:$0x2] %vm7_vm0, %v725_v60  }
  0xf4   :  { %1012 = vst.msk [vmem:[%s2190_s1 + $0xba] sm:$0x4] %vm7_vm0, %v725_v60   ;;  %1013 = vst.msk [vmem:[%s2190_s1 + $0xf9] sm:$0x8] %vm7_vm0, %v725_v60   ;;  %v737_v61 = vpop.permute.xlu0 %736  }
  0xf5   :  { %v749_v62 = vpop.permute.xlu1 %748   ;;  %1014 = vst.msk [vmem:[%s2190_s1 + $0x3d] sm:$0x1] %vm7_vm0, %v737_v61   ;;  %1015 = vst.msk [vmem:[%s2190_s1 + $0x7c] sm:$0x2] %vm7_vm0, %v737_v61  }
  0xf6   :  { %1016 = vst.msk [vmem:[%s2190_s1 + $0xbb] sm:$0x4] %vm7_vm0, %v737_v61   ;;  %1017 = vst.msk [vmem:[%s2190_s1 + $0xfa] sm:$0x8] %vm7_vm0, %v737_v61  }
  0xf7   :  { %1018 = vst.msk [vmem:[%s2190_s1 + $0x3e] sm:$0x1] %vm7_vm0, %v749_v62   ;;  %1019 = vst.msk [vmem:[%s2190_s1 + $0x7d] sm:$0x2] %vm7_vm0, %v749_v62  }
  0xf8   :  { %1020 = vst.msk [vmem:[%s2190_s1 + $0xbc] sm:$0x4] %vm7_vm0, %v749_v62   ;;  %1021 = vst.msk [vmem:[%s2190_s1 + $0xfb] sm:$0x8] %vm7_vm0, %v749_v62   ;;  %v761_v63 = vpop.permute.xlu0 %760  }
  0xf9   :  { %1022 = vst.msk [vmem:[%s2190_s1 + $0x3f] sm:$0x1] %vm7_vm0, %v761_v63   ;;  %1023 = vst.msk [vmem:[%s2190_s1 + $0x7e] sm:$0x2] %vm7_vm0, %v761_v63  }
  0xfa   :  { %1024 = vst.msk [vmem:[%s2190_s1 + $0xbd] sm:$0x4] %vm7_vm0, %v761_v63   ;;  %1025 = vst.msk [vmem:[%s2190_s1 + $0xfc] sm:$0x8] %vm7_vm0, %v761_v63  }

// kernel: encoder_decoder_forward.12
= control target key start
LH: loop header
LB: loop body
LE: loop exit
PB: predicated region body
PF: predicated region fallthrough
CT: control target
= control target key end

     0   :  { %v1682_v0 = vmov 0.0|0.0   ;;  %v1683_v23 = vmov 0   ;;  %s2885_s1 = inlined_call_operand.vmem [shape: f32[512,128], index: 1, kind: input, shape index: {}]   ;;  %s2886_s0 = inlined_call_operand.vmem [shape: f32[256,512], index: 0, kind: input, shape index: {}]   ;;  %s2887_s2 = inlined_call_operand.vmem [shape: f32[256,1], index: 2, kind: input, shape index: {}]   ;;  %s2888_s3 = inlined_call_operand.vmem [shape: f32[64,1], index: 3, kind: input, shape index: {}]   ;;  %s2889_s4 = inlined_call_operand.vmem [shape: f32[64,1], index: 4, kind: input, shape index: {}]   ;;  %s2890_s5 = inlined_call_operand.vmem [shape: f32[256,128], index: 5, kind: output, shape index: {}]  }
   0x1   :  { %1502 = vmatprep.subr.bf16.mxu1 %v1682_v0  ;;  %v148_v1 = vld [vmem:[%s2885_s1] sm:$0xff]  ;;  %v149_v2 = vld [vmem:[%s2885_s1 + $0x8] sm:$0xff]  ;;  %1550 = vmatprep.subr.bf16.mxu0 %v1682_v0  ;;  %v150_v6 = vld [vmem:[%s2885_s1 + $0x10] sm:$0xff] }
   0x2   :  { %v180_v3 = vld [vmem:[%s2885_s1 + $0x100] sm:$0xff]  ;;  %v1503_v4 = vpack.c.bf16 %v149_v2, %v148_v1  ;;  %v181_v5 = vld [vmem:[%s2885_s1 + $0x108] sm:$0xff]  ;;  %v151_v7 = vld [vmem:[%s2885_s1 + $0x18] sm:$0xff]  ;;  %1664 = vset.pattern.permute.xlu0 %v1683_v23  ;;  %1665 = vset.pattern.permute.xlu1 %v1683_v23 }
   0x3   :  { %v1551_v8 = vpack.c.bf16 %v181_v5, %v180_v3  ;;  %v182_v9 = vld [vmem:[%s2885_s1 + $0x110] sm:$0xff]  ;;  %v183_v10 = vld [vmem:[%s2885_s1 + $0x118] sm:$0xff]  ;;  %v1506_v11 = vpack.c.bf16 %v151_v7, %v150_v6  ;;  %v152_v13 = vld [vmem:[%s2885_s1 + $0x20] sm:$0xff] }
   0x4   :  { %1504 = vmatpush1.bf16.msra.mxu1 %v1503_v4  ;;  %v1554_v12 = vpack.c.bf16 %v183_v10, %v182_v9  ;;  %v153_v14 = vld [vmem:[%s2885_s1 + $0x28] sm:$0xff]  ;;  %v184_v15 = vld [vmem:[%s2885_s1 + $0x120] sm:$0xff]  ;;  %v154_v19 = vld [vmem:[%s2885_s1 + $0x30] sm:$0xff] }
   0x5   :  { %1552 = vmatpush1.bf16.msra.mxu0 %v1551_v8  ;;  %1505 = vmatprep.subr.bf16.mxu1 %v1682_v0  ;;  %v185_v16 = vld [vmem:[%s2885_s1 + $0x128] sm:$0xff]  ;;  %v1509_v17 = vpack.c.bf16 %v153_v14, %v152_v13  ;;  %v155_v20 = vld [vmem:[%s2885_s1 + $0x38] sm:$0xff]  ;;  %v186_v21 = vld [vmem:[%s2885_s1 + $0x130] sm:$0xff] }
   0x6   :  { %1553 = vmatprep.subr.bf16.mxu0 %v1682_v0  ;;  %v1557_v18 = vpack.c.bf16 %v185_v16, %v184_v15  ;;  %v187_v22 = vld [vmem:[%s2885_s1 + $0x138] sm:$0xff]  ;;  %v1512_v24 = vpack.c.bf16 %v155_v20, %v154_v19  ;;  %v156_v26 = vld [vmem:[%s2885_s1 + $0x40] sm:$0xff]  ;;  %v157_v27 = vld [vmem:[%s2885_s1 + $0x48] sm:$0xff] }
   0x7   :  { %v1560_v25 = vpack.c.bf16 %v187_v22, %v186_v21  ;;  %v188_v28 = vld [vmem:[%s2885_s1 + $0x140] sm:$0xff]  ;;  %v189_v29 = vld [vmem:[%s2885_s1 + $0x148] sm:$0xff]  ;;  %v1515_v30 = vpack.c.bf16 %v157_v27, %v156_v26  ;;  %v158_v32 = vld [vmem:[%s2885_s1 + $0x50] sm:$0xff] }
   0x8   :  { %1507 = vmatpush1.bf16.msra.mxu1 %v1506_v11  ;;  %v1563_v31 = vpack.c.bf16 %v189_v29, %v188_v28  ;;  %v159_v33 = vld [vmem:[%s2885_s1 + $0x58] sm:$0xff]  ;;  %v190_v34 = vld [vmem:[%s2885_s1 + $0x150] sm:$0xff]  ;;  %v160_v38 = vld [vmem:[%s2885_s1 + $0x60] sm:$0xff] }
   0x9   :  { %1555 = vmatpush1.bf16.msra.mxu0 %v1554_v12  ;;  %1508 = vmatprep.subr.bf16.mxu1 %v1682_v0  ;;  %v191_v35 = vld [vmem:[%s2885_s1 + $0x158] sm:$0xff]  ;;  %v1518_v36 = vpack.c.bf16 %v159_v33, %v158_v32  ;;  %v161_v39 = vld [vmem:[%s2885_s1 + $0x68] sm:$0xff]  ;;  %v192_v40 = vld [vmem:[%s2885_s1 + $0x160] sm:$0xff] }
   0xa   :  { %1556 = vmatprep.subr.bf16.mxu0 %v1682_v0  ;;  %v1566_v37 = vpack.c.bf16 %v191_v35, %v190_v34  ;;  %v193_v41 = vld [vmem:[%s2885_s1 + $0x168] sm:$0xff]  ;;  %v23_v43 = vld [vmem:[%s2886_s0 + $0x18] sm:$0xff]  ;;  %v1521_v44 = vpack.c.bf16 %v161_v39, %v160_v38  ;;  %v162_v46 = vld [vmem:[%s2885_s1 + $0x70] sm:$0xff] }
   0xb   :  { %v21_v42 = vld [vmem:[%s2886_s0 + $0x8] sm:$0xff]  ;;  %693 = vmatprep.mubr.f32.mxu0 %v23_v43  ;;  %v1569_v45 = vpack.c.bf16 %v193_v41, %v192_v40  ;;  %v163_v47 = vld [vmem:[%s2885_s1 + $0x78] sm:$0xff]  ;;  %v194_v48 = vld [vmem:[%s2885_s1 + $0x170] sm:$0xff] }
   0xc   :  { %1510 = vmatpush1.bf16.msra.mxu1 %v1509_v17  ;;  %468 = vmatprep.mubr.f32.mxu1 %v21_v42  ;;  %v195_v49 = vld [vmem:[%s2885_s1 + $0x178] sm:$0xff]  ;;  %v1524_v50 = vpack.c.bf16 %v163_v47, %v162_v46  ;;  %v164_v52 = vld [vmem:[%s2885_s1 + $0x80] sm:$0xff]  ;;  %v165_v53 = vld [vmem:[%s2885_s1 + $0x88] sm:$0xff] }
   0xd   :  { %1558 = vmatpush1.bf16.msra.mxu0 %v1557_v18  ;;  %1511 = vmatprep.subr.bf16.mxu1 %v1682_v0  ;;  %v1572_v51 = vpack.c.bf16 %v195_v49, %v194_v48  ;;  %v196_v54 = vld [vmem:[%s2885_s1 + $0x180] sm:$0xff]  ;;  %v197_v55 = vld [vmem:[%s2885_s1 + $0x188] sm:$0xff]  ;;  %v1527_v56 = vpack.c.bf16 %v165_v53, %v164_v52  ;;  %v166_v58 = vld [vmem:[%s2885_s1 + $0x90] sm:$0xff] }
   0xe   :  { %1559 = vmatprep.subr.bf16.mxu0 %v1682_v0  ;;  %v1575_v57 = vpack.c.bf16 %v197_v55, %v196_v54  ;;  %v167_v59 = vld [vmem:[%s2885_s1 + $0x98] sm:$0xff]  ;;  %v198_v60 = vld [vmem:[%s2885_s1 + $0x190] sm:$0xff]  ;;  %v168_v1 = vld [vmem:[%s2885_s1 + $0xa0] sm:$0xff] }
   0xf   :  { %v199_v61 = vld [vmem:[%s2885_s1 + $0x198] sm:$0xff]  ;;  %v1530_v62 = vpack.c.bf16 %v167_v59, %v166_v58  ;;  %v169_v2 = vld [vmem:[%s2885_s1 + $0xa8] sm:$0xff]  ;;  %v200_v3 = vld [vmem:[%s2885_s1 + $0x1a0] sm:$0xff] }
  0x10   :  { %1513 = vmatpush1.bf16.msra.mxu1 %v1512_v24  ;;  %v1578_v63 = vpack.c.bf16 %v199_v61, %v198_v60  ;;  %v201_v4 = vld [vmem:[%s2885_s1 + $0x1a8] sm:$0xff]  ;;  %v1533_v5 = vpack.c.bf16 %v169_v2, %v168_v1  ;;  %v170_v7 = vld [vmem:[%s2885_s1 + $0xb0] sm:$0xff]  ;;  %v171_v8 = vld [vmem:[%s2885_s1 + $0xb8] sm:$0xff] }
  0x11   :  { %1561 = vmatpush1.bf16.msra.mxu0 %v1560_v25  ;;  %1514 = vmatprep.subr.bf16.mxu1 %v1682_v0  ;;  %v1581_v6 = vpack.c.bf16 %v201_v4, %v200_v3  ;;  %v202_v9 = vld [vmem:[%s2885_s1 + $0x1b0] sm:$0xff]  ;;  %v203_v10 = vld [vmem:[%s2885_s1 + $0x1b8] sm:$0xff]  ;;  %v1536_v11 = vpack.c.bf16 %v171_v8, %v170_v7  ;;  %v172_v13 = vld [vmem:[%s2885_s1 + $0xc0] sm:$0xff] }
  0x12   :  { %1562 = vmatprep.subr.bf16.mxu0 %v1682_v0  ;;  %v1584_v12 = vpack.c.bf16 %v203_v10, %v202_v9  ;;  %v173_v14 = vld [vmem:[%s2885_s1 + $0xc8] sm:$0xff]  ;;  %v204_v15 = vld [vmem:[%s2885_s1 + $0x1c0] sm:$0xff]  ;;  %v214_v19 = vld [vmem:[%s2887_s2 + $0x10] sm:$0xff] }
  0x13   :  { %v205_v16 = vld [vmem:[%s2885_s1 + $0x1c8] sm:$0xff]  ;;  %v212_v17 = vld [vmem:[%s2887_s2] sm:$0xff]  ;;  %v1539_v18 = vpack.c.bf16 %v173_v14, %v172_v13  ;;  %v174_v22 = vld [vmem:[%s2885_s1 + $0xd0] sm:$0xff]  ;;  %256 = vperm.xlu1 %1665, %v214_v19  }
  0x14   :  { %1516 = vmatpush1.bf16.msra.mxu1 %v1515_v30  ;;  %246 = vperm.xlu0 %1664, %v212_v17   ;;  %v213_v20 = vld [vmem:[%s2887_s2 + $0x8] sm:$0xff]  ;;  %v1587_v21 = vpack.c.bf16 %v205_v16, %v204_v15  ;;  %v175_v23 = vld [vmem:[%s2885_s1 + $0xd8] sm:$0xff]  ;;  %v206_v24 = vld [vmem:[%s2885_s1 + $0x1d0] sm:$0xff] }
  0x15   :  { %1564 = vmatpush1.bf16.msra.mxu0 %v1563_v31  ;;  %1517 = vmatprep.subr.bf16.mxu1 %v1682_v0  ;;  %v207_v25 = vld [vmem:[%s2885_s1 + $0x1d8] sm:$0xff]  ;;  %v1542_v27 = vpack.c.bf16 %v175_v23, %v174_v22  ;;  %v216_v28 = vld [vmem:[%s2887_s2 + $0x20] sm:$0xff]  ;;  %v177_v31 = vld [vmem:[%s2885_s1 + $0xe8] sm:$0xff] }
  0x16   :  { %1565 = vmatprep.subr.bf16.mxu0 %v1682_v0  ;;  %v215_v26 = vld [vmem:[%s2887_s2 + $0x18] sm:$0xff]  ;;  %v1590_v29 = vpack.c.bf16 %v207_v25, %v206_v24  ;;  %v176_v30 = vld [vmem:[%s2885_s1 + $0xe0] sm:$0xff]  ;;  %v209_v33 = vld [vmem:[%s2885_s1 + $0x1e8] sm:$0xff] }
  0x17   :  { %v208_v32 = vld [vmem:[%s2885_s1 + $0x1e0] sm:$0xff]  ;;  %261 = vperm.xlu1 %1665, %v215_v26   ;;  %v217_v34 = vld [vmem:[%s2887_s2 + $0x28] sm:$0xff]  ;;  %v1545_v35 = vpack.c.bf16 %v177_v31, %v176_v30  ;;  %v178_v38 = vld [vmem:[%s2885_s1 + $0xf0] sm:$0xff] }
  0x18   :  { %1519 = vmatpush1.bf16.msra.mxu1 %v1518_v36  ;;  %251 = vperm.xlu0 %1664, %v213_v20   ;;  %v218_v36 = vld [vmem:[%s2887_s2 + $0x30] sm:$0xff]  ;;  %v179_v39 = vld [vmem:[%s2885_s1 + $0xf8] sm:$0xff]  ;;  %v221_v46 = vld [vmem:[%s2887_s2 + $0x48] sm:$0xff] }
  0x19   :  { %1567 = vmatpush1.bf16.msra.mxu0 %v1566_v37  ;;  %1520 = vmatprep.subr.bf16.mxu1 %v1682_v0  ;;  %v1593_v37 = vpack.c.bf16 %v209_v33, %v208_v32  ;;  %v210_v40 = vld [vmem:[%s2885_s1 + $0x1f0] sm:$0xff]  ;;  %v211_v41 = vld [vmem:[%s2885_s1 + $0x1f8] sm:$0xff]  ;;  %v1548_v43 = vpack.c.bf16 %v179_v39, %v178_v38  ;;  %v20_v47 = vld [vmem:[%s2886_s0] sm:$0xff] }
  0x1a   :  { %1568 = vmatprep.subr.bf16.mxu0 %v1682_v0  ;;  %v219_v42 = vld [vmem:[%s2887_s2 + $0x38] sm:$0xff]  ;;  %v222_v48 = vld [vmem:[%s2887_s2 + $0x50] sm:$0xff]  ;;  %v25_v49 = vld [vmem:[%s2886_s0 + $0x28] sm:$0xff] }
  0x1b   :  { %271 = vperm.xlu1 %1665, %v217_v34   ;;  %v24_v52 = vld [vmem:[%s2886_s0 + $0x20] sm:$0xff]  ;;  %v26_v54 = vld [vmem:[%s2886_s0 + $0x30] sm:$0xff]  ;;  %v29_v55 = vld [vmem:[%s2886_s0 + $0x48] sm:$0xff] }
  0x1c   :  { %1522 = vmatpush1.bf16.msra.mxu1 %v1521_v44  ;;  %266 = vperm.xlu0 %1664, %v216_v28   ;;  %v220_v44 = vld [vmem:[%s2887_s2 + $0x40] sm:$0xff]  ;;  %v226_v59 = vld [vmem:[%s2887_s2 + $0x70] sm:$0xff]  ;;  %v33_v61 = vld [vmem:[%s2886_s0 + $0x68] sm:$0xff] }
  0x1d   :  { %1570 = vmatpush1.bf16.msra.mxu0 %v1569_v45  ;;  %1523 = vmatprep.subr.bf16.mxu1 %v1682_v0  ;;  %v1596_v45 = vpack.c.bf16 %v211_v41, %v210_v40  ;;  %v224_v53 = vld [vmem:[%s2887_s2 + $0x60] sm:$0xff]  ;;  %v30_v60 = vld [vmem:[%s2886_s0 + $0x50] sm:$0xff]  ;;  %v37_v4 = vld [vmem:[%s2886_s0 + $0x88] sm:$0xff] }
  0x1e   :  { %1571 = vmatprep.subr.bf16.mxu0 %v1682_v0  ;;  %v28_v58 = vld [vmem:[%s2886_s0 + $0x40] sm:$0xff]  ;;  %v34_v3 = vld [vmem:[%s2886_s0 + $0x70] sm:$0xff]  ;;  %v41_v10 = vld [vmem:[%s2886_s0 + $0xa8] sm:$0xff] }
  0x1f   :  { %281 = vperm.xlu1 %1665, %v219_v42   ;;  %v32_v1 = vld [vmem:[%s2886_s0 + $0x60] sm:$0xff]  ;;  %v230_v8 = vld [vmem:[%s2887_s2 + $0x90] sm:$0xff]  ;;  %v45_v16 = vld [vmem:[%s2886_s0 + $0xc8] sm:$0xff] }
  0x20   :  { %1525 = vmatpush1.bf16.msra.mxu1 %v1524_v50  ;;  %276 = vperm.xlu0 %1664, %v218_v36   ;;  %v27_v50 = vld [vmem:[%s2886_s0 + $0x38] sm:$0xff]  ;;  %v228_v2 = vld [vmem:[%s2887_s2 + $0x80] sm:$0xff]  ;;  %v38_v9 = vld [vmem:[%s2886_s0 + $0x90] sm:$0xff] }
  0x21   :  { %1573 = vmatpush1.bf16.msra.mxu0 %v1572_v51  ;;  %1526 = vmatprep.subr.bf16.mxu1 %v1682_v0  ;;  %v223_v51 = vld [vmem:[%s2887_s2 + $0x58] sm:$0xff]  ;;  %v36_v7 = vld [vmem:[%s2886_s0 + $0x80] sm:$0xff]  ;;  %v42_v15 = vld [vmem:[%s2886_s0 + $0xb0] sm:$0xff] }
  0x22   :  { %1574 = vmatprep.subr.bf16.mxu0 %v1682_v0  ;;  %v40_v13 = vld [vmem:[%s2886_s0 + $0xa0] sm:$0xff]  ;;  %v47_v17 = vld [vmem:[%s2886_s0 + $0xd8] sm:$0xff]  ;;  %v234_v20 = vld [vmem:[%s2887_s2 + $0xb0] sm:$0xff] }
  0x23   :  { %291 = vperm.xlu1 %1665, %v221_v46   ;;  %v232_v14 = vld [vmem:[%s2887_s2 + $0xa0] sm:$0xff]  ;;  %v49_v22 = vld [vmem:[%s2886_s0 + $0xe8] sm:$0xff]  ;;  %v51_v23 = vld [vmem:[%s2886_s0 + $0xf8] sm:$0xff] }
  0x24   :  { %1528 = vmatpush1.bf16.msra.mxu1 %v1527_v56  ;;  %286 = vperm.xlu0 %1664, %v220_v44   ;;  %v31_v56 = vld [vmem:[%s2886_s0 + $0x58] sm:$0xff]  ;;  %v44_v19 = vld [vmem:[%s2886_s0 + $0xc0] sm:$0xff]  ;;  %v53_v28 = vld [vmem:[%s2886_s0 + $0x108] sm:$0xff] }
  0x25   :  { %1576 = vmatpush1.bf16.msra.mxu0 %v1575_v57  ;;  %1529 = vmatprep.subr.bf16.mxu1 %v1682_v0  ;;  %v225_v57 = vld [vmem:[%s2887_s2 + $0x68] sm:$0xff]  ;;  %v235_v24 = vld [vmem:[%s2887_s2 + $0xb8] sm:$0xff]  ;;  %v48_v25 = vld [vmem:[%s2886_s0 + $0xe0] sm:$0xff] }
  0x26   :  { %1577 = vmatprep.subr.bf16.mxu0 %v1682_v0  ;;  %v236_v26 = vld [vmem:[%s2887_s2 + $0xc0] sm:$0xff]  ;;  %v237_v30 = vld [vmem:[%s2887_s2 + $0xc8] sm:$0xff]  ;;  %v238_v32 = vld [vmem:[%s2887_s2 + $0xd0] sm:$0xff] }
  0x27   :  { %301 = vperm.xlu1 %1665, %v223_v51   ;;  %v52_v31 = vld [vmem:[%s2886_s0 + $0x100] sm:$0xff]  ;;  %v54_v33 = vld [vmem:[%s2886_s0 + $0x110] sm:$0xff]  ;;  %v57_v34 = vld [vmem:[%s2886_s0 + $0x128] sm:$0xff] }
  0x28   :  { %1531 = vmatpush1.bf16.msra.mxu1 %v1530_v62  ;;  %296 = vperm.xlu0 %1664, %v222_v48   ;;  %v35_v62 = vld [vmem:[%s2886_s0 + $0x78] sm:$0xff]  ;;  %v240_v38 = vld [vmem:[%s2887_s2 + $0xe0] sm:$0xff]  ;;  %v58_v39 = vld [vmem:[%s2886_s0 + $0x130] sm:$0xff] }
  0x29   :  { %1579 = vmatpush1.bf16.msra.mxu0 %v1578_v63  ;;  %1532 = vmatprep.subr.bf16.mxu1 %v1682_v0  ;;  %v227_v63 = vld [vmem:[%s2887_s2 + $0x78] sm:$0xff]  ;;  %v61_v40 = vld [vmem:[%s2886_s0 + $0x148] sm:$0xff]  ;;  %v242_v44 = vld [vmem:[%s2887_s2 + $0xf0] sm:$0xff] }
  0x2a   :  { %1580 = vmatprep.subr.bf16.mxu0 %v1682_v0  ;;  %v239_v36 = vld [vmem:[%s2887_s2 + $0xd8] sm:$0xff]  ;;  %v241_v42 = vld [vmem:[%s2887_s2 + $0xe8] sm:$0xff] }
  0x2b   :  { %311 = vperm.xlu1 %1665, %v225_v57   ;;  %v63_v41 = vld [vmem:[%s2886_s0 + $0x158] sm:$0xff]  ;;  %v65_v46 = vld [vmem:[%s2886_s0 + $0x168] sm:$0xff]  ;;  %v74_v57 = vld [vmem:[%s2886_s0 + $0x1b0] sm:$0xff] }
  0x2c   :  { %1534 = vmatpush1.bf16.msra.mxu1 %v1533_v5  ;;  %306 = vperm.xlu0 %1664, %v224_v53   ;;  %v39_v5 = vld [vmem:[%s2886_s0 + $0x98] sm:$0xff]  ;;  %v70_v53 = vld [vmem:[%s2886_s0 + $0x190] sm:$0xff] }
  0x2d   :  { %1582 = vmatpush1.bf16.msra.mxu0 %v1581_v6  ;;  %1535 = vmatprep.subr.bf16.mxu1 %v1682_v0  ;;  %v229_v6 = vld [vmem:[%s2887_s2 + $0x88] sm:$0xff]  ;;  %v243_v48 = vld [vmem:[%s2887_s2 + $0xf8] sm:$0xff] }
  0x2e   :  { %1583 = vmatprep.subr.bf16.mxu0 %v1682_v0  ;;  %v71_v51 = vld [vmem:[%s2886_s0 + $0x198] sm:$0xff] }
  0x2f   :  { %321 = vperm.xlu1 %1665, %v227_v63   ;;  %v83_v63 = vld [vmem:[%s2886_s0 + $0x1f8] sm:$0xff] }
  0x30   :  { %1537 = vmatpush1.bf16.msra.mxu1 %v1536_v11  ;;  %316 = vperm.xlu0 %1664, %v226_v59   ;;  %v43_v11 = vld [vmem:[%s2886_s0 + $0xb8] sm:$0xff] }
  0x31   :  { %1585 = vmatpush1.bf16.msra.mxu0 %v1584_v12  ;;  %1538 = vmatprep.subr.bf16.mxu1 %v1682_v0  ;;  %v231_v12 = vld [vmem:[%s2887_s2 + $0x98] sm:$0xff] }
  0x32   :  { %1586 = vmatprep.subr.bf16.mxu0 %v1682_v0  ;;  %v79_v59 = vld [vmem:[%s2886_s0 + $0x1d8] sm:$0xff] }
  0x33   :  { %331 = vperm.xlu1 %1665, %v229_v6   ;;  %v86_v6 = vld [vmem:[%s2886_s0 + $0x210] sm:$0xff] }
  0x34   :  { %1540 = vmatpush1.bf16.msra.mxu1 %v1539_v18  ;;  %326 = vperm.xlu0 %1664, %v228_v2   ;;  %v233_v18 = vld [vmem:[%s2887_s2 + $0xa8] sm:$0xff]  ;;  %v82_v2 = vld [vmem:[%s2886_s0 + $0x1f0] sm:$0xff] }
  0x35   :  { %1588 = vmatpush1.bf16.msra.mxu0 %v1587_v21  ;;  %1541 = vmatprep.subr.bf16.mxu1 %v1682_v0  ;;  %v46_v21 = vld [vmem:[%s2886_s0 + $0xd0] sm:$0xff] }
  0x36   :  { %1589 = vmatprep.subr.bf16.mxu0 %v1682_v0 }
  0x37   :  { %341 = vperm.xlu1 %1665, %v231_v12   ;;  %v95_v12 = vld [vmem:[%s2886_s0 + $0x258] sm:$0xff] }
  0x38   :  { %1543 = vmatpush1.bf16.msra.mxu1 %v1542_v27  ;;  %336 = vperm.xlu0 %1664, %v230_v8   ;;  %v50_v27 = vld [vmem:[%s2886_s0 + $0xf0] sm:$0xff]  ;;  %v91_v8 = vld [vmem:[%s2886_s0 + $0x238] sm:$0xff] }
  0x39   :  { %1591 = vmatpush1.bf16.msra.mxu0 %v1590_v29  ;;  %1544 = vmatprep.subr.bf16.mxu1 %v1682_v0  ;;  %v55_v29 = vld [vmem:[%s2886_s0 + $0x118] sm:$0xff] }
  0x3a   :  { %1592 = vmatprep.subr.bf16.mxu0 %v1682_v0 }
  0x3b   :  { %351 = vperm.xlu1 %1665, %v233_v18   ;;  %v98_v18 = vld [vmem:[%s2886_s0 + $0x270] sm:$0xff] }
  0x3c   :  { %1546 = vmatpush1.bf16.msra.mxu1 %v1545_v35  ;;  %346 = vperm.xlu0 %1664, %v232_v14   ;;  %v59_v35 = vld [vmem:[%s2886_s0 + $0x138] sm:$0xff]  ;;  %v94_v14 = vld [vmem:[%s2886_s0 + $0x250] sm:$0xff] }
  0x3d   :  { %1594 = vmatpush1.bf16.msra.mxu0 %v1593_v37  ;;  %1547 = vmatprep.subr.bf16.mxu1 %v1682_v0  ;;  %v56_v37 = vld [vmem:[%s2886_s0 + $0x120] sm:$0xff] }
  0x3e   :  { %1595 = vmatprep.subr.bf16.mxu0 %v1682_v0  ;;  %v22_v0 = vld [vmem:[%s2886_s0 + $0x10] sm:$0xff] }
  0x3f   :  { %361 = vperm.xlu1 %1665, %v235_v24   ;;  %v107_v24 = vld [vmem:[%s2886_s0 + $0x2b8] sm:$0xff] }
  0x40   :  { %1549 = vmatpush1.bf16.msra.mxu1 %v1548_v43  ;;  %356 = vperm.xlu0 %1664, %v234_v20   ;;  %v60_v43 = vld [vmem:[%s2886_s0 + $0x140] sm:$0xff]  ;;  %v103_v20 = vld [vmem:[%s2886_s0 + $0x298] sm:$0xff] }
  0x41   :  { %1597 = vmatpush1.bf16.msra.mxu0 %v1596_v45  ;;  %v62_v45 = vld [vmem:[%s2886_s0 + $0x150] sm:$0xff] }
  0x43   :  { %469 = vmatmul.mubr.f32.vlgmr.msra.gmra.mrb[0].mxu1 %v20_v47  ;;  %371 = vperm.xlu1 %1665, %v237_v30   ;;  %v67_v47 = vld [vmem:[%s2886_s0 + $0x178] sm:$0xff]  ;;  %v110_v30 = vld [vmem:[%s2886_s0 + $0x2d0] sm:$0xff] }
  0x44   :  { %694 = vmatmul.mubr.f32.vlgmr.msra.gmra.mrb[0].mxu0 %v22_v0  ;;  %473 = vmatprep.mubr.f32.mxu1 %v25_v49  ;;  %v64_v0 = vld [vmem:[%s2886_s0 + $0x160] sm:$0xff]  ;;  %v66_v49 = vld [vmem:[%s2886_s0 + $0x170] sm:$0xff] }
  0x45   :  { %698 = vmatprep.mubr.f32.mxu0 %v27_v50  ;;  %366 = vperm.xlu0 %1664, %v236_v26   ;;  %v69_v50 = vld [vmem:[%s2886_s0 + $0x188] sm:$0xff]  ;;  %v106_v26 = vld [vmem:[%s2886_s0 + $0x2b0] sm:$0xff] }
  0x47   :  { %474 = vmatmul.mubr.f32.gmra.mrb[2].mxu1 %v24_v52  ;;  %381 = vperm.xlu1 %1665, %v239_v36   ;;  %v68_v52 = vld [vmem:[%s2886_s0 + $0x180] sm:$0xff]  ;;  %v119_v36 = vld [vmem:[%s2886_s0 + $0x318] sm:$0xff] }
  0x48   :  { %699 = vmatmul.mubr.f32.gmra.mrb[2].mxu0 %v26_v54  ;;  %478 = vmatprep.mubr.f32.mxu1 %v29_v55  ;;  %v73_v54 = vld [vmem:[%s2886_s0 + $0x1a8] sm:$0xff]  ;;  %v75_v55 = vld [vmem:[%s2886_s0 + $0x1b8] sm:$0xff] }
  0x49   :  { %703 = vmatprep.mubr.f32.mxu0 %v31_v56  ;;  %376 = vperm.xlu0 %1664, %v238_v32   ;;  %v72_v56 = vld [vmem:[%s2886_s0 + $0x1a0] sm:$0xff]  ;;  %v115_v32 = vld [vmem:[%s2886_s0 + $0x2f8] sm:$0xff] }
  0x4b   :  { %479 = vmatmul.mubr.f32.gmra.mrb[4].mxu1 %v28_v58  ;;  %391 = vperm.xlu1 %1665, %v241_v42   ;;  %v77_v58 = vld [vmem:[%s2886_s0 + $0x1c8] sm:$0xff]  ;;  %v122_v42 = vld [vmem:[%s2886_s0 + $0x330] sm:$0xff] }
  0x4c   :  { %704 = vmatmul.mubr.f32.gmra.mrb[4].mxu0 %v30_v60  ;;  %483 = vmatprep.mubr.f32.mxu1 %v33_v61  ;;  %v76_v60 = vld [vmem:[%s2886_s0 + $0x1c0] sm:$0xff]  ;;  %v78_v61 = vld [vmem:[%s2886_s0 + $0x1d0] sm:$0xff] }
  0x4d   :  { %708 = vmatprep.mubr.f32.mxu0 %v35_v62  ;;  %386 = vperm.xlu0 %1664, %v240_v38   ;;  %v81_v62 = vld [vmem:[%s2886_s0 + $0x1e8] sm:$0xff]  ;;  %v118_v38 = vld [vmem:[%s2886_s0 + $0x310] sm:$0xff] }
  0x4f   :  { %484 = vmatmul.mubr.f32.gmra.mrb[6].mxu1 %v32_v1  ;;  %401 = vperm.xlu1 %1665, %v243_v48   ;;  %v80_v1 = vld [vmem:[%s2886_s0 + $0x1e0] sm:$0xff]  ;;  %v131_v48 = vld [vmem:[%s2886_s0 + $0x378] sm:$0xff] }
  0x50   :  { %709 = vmatmul.mubr.f32.gmra.mrb[6].mxu0 %v34_v3  ;;  %488 = vmatprep.mubr.f32.mxu1 %v37_v4  ;;  %v85_v3 = vld [vmem:[%s2886_s0 + $0x208] sm:$0xff]  ;;  %v87_v4 = vld [vmem:[%s2886_s0 + $0x218] sm:$0xff] }
  0x51   :  { %713 = vmatprep.mubr.f32.mxu0 %v39_v5  ;;  %396 = vperm.xlu0 %1664, %v242_v44   ;;  %v84_v5 = vld [vmem:[%s2886_s0 + $0x200] sm:$0xff]  ;;  %v127_v44 = vld [vmem:[%s2886_s0 + $0x358] sm:$0xff] }
  0x53   :  { %489 = vmatmul.mubr.f32.gmra.mrb[8].mxu1 %v36_v7  ;;  %v89_v7 = vld [vmem:[%s2886_s0 + $0x228] sm:$0xff] }
  0x54   :  { %714 = vmatmul.mubr.f32.gmra.mrb[8].mxu0 %v38_v9  ;;  %493 = vmatprep.mubr.f32.mxu1 %v41_v10  ;;  %v88_v9 = vld [vmem:[%s2886_s0 + $0x220] sm:$0xff]  ;;  %v90_v10 = vld [vmem:[%s2886_s0 + $0x230] sm:$0xff] }
  0x55   :  { %718 = vmatprep.mubr.f32.mxu0 %v43_v11  ;;  %v93_v11 = vld [vmem:[%s2886_s0 + $0x248] sm:$0xff] }
  0x57   :  { %494 = vmatmul.mubr.f32.gmra.mrb[10].mxu1 %v40_v13  ;;  %v92_v13 = vld [vmem:[%s2886_s0 + $0x240] sm:$0xff] }
  0x58   :  { %719 = vmatmul.mubr.f32.gmra.mrb[10].mxu0 %v42_v15  ;;  %498 = vmatprep.mubr.f32.mxu1 %v45_v16  ;;  %v97_v15 = vld [vmem:[%s2886_s0 + $0x268] sm:$0xff]  ;;  %v99_v16 = vld [vmem:[%s2886_s0 + $0x278] sm:$0xff] }
  0x59   :  { %723 = vmatprep.mubr.f32.mxu0 %v47_v17  ;;  %v96_v17 = vld [vmem:[%s2886_s0 + $0x260] sm:$0xff] }
  0x5b   :  { %499 = vmatmul.mubr.f32.gmra.mrb[12].mxu1 %v44_v19  ;;  %v101_v19 = vld [vmem:[%s2886_s0 + $0x288] sm:$0xff] }
  0x5c   :  { %724 = vmatmul.mubr.f32.gmra.mrb[12].mxu0 %v46_v21  ;;  %503 = vmatprep.mubr.f32.mxu1 %v49_v22  ;;  %v100_v21 = vld [vmem:[%s2886_s0 + $0x280] sm:$0xff]  ;;  %v102_v22 = vld [vmem:[%s2886_s0 + $0x290] sm:$0xff] }
  0x5d   :  { %728 = vmatprep.mubr.f32.mxu0 %v51_v23  ;;  %v105_v23 = vld [vmem:[%s2886_s0 + $0x2a8] sm:$0xff] }
  0x5f   :  { %504 = vmatmul.mubr.f32.gmra.mrb[14].mxu1 %v48_v25  ;;  %v104_v25 = vld [vmem:[%s2886_s0 + $0x2a0] sm:$0xff] }
  0x60   :  { %729 = vmatmul.mubr.f32.gmra.mrb[14].mxu0 %v50_v27  ;;  %508 = vmatprep.mubr.f32.mxu1 %v53_v28  ;;  %v109_v27 = vld [vmem:[%s2886_s0 + $0x2c8] sm:$0xff]  ;;  %v111_v28 = vld [vmem:[%s2886_s0 + $0x2d8] sm:$0xff] }
  0x61   :  { %733 = vmatprep.mubr.f32.mxu0 %v55_v29  ;;  %v108_v29 = vld [vmem:[%s2886_s0 + $0x2c0] sm:$0xff] }
  0x63   :  { %509 = vmatmul.mubr.f32.gmra.mrb[16].mxu1 %v52_v31  ;;  %v113_v31 = vld [vmem:[%s2886_s0 + $0x2e8] sm:$0xff] }
  0x64   :  { %734 = vmatmul.mubr.f32.gmra.mrb[16].mxu0 %v54_v33  ;;  %513 = vmatprep.mubr.f32.mxu1 %v57_v34  ;;  %v112_v33 = vld [vmem:[%s2886_s0 + $0x2e0] sm:$0xff]  ;;  %v114_v34 = vld [vmem:[%s2886_s0 + $0x2f0] sm:$0xff] }
  0x65   :  { %738 = vmatprep.mubr.f32.mxu0 %v59_v35  ;;  %v117_v35 = vld [vmem:[%s2886_s0 + $0x308] sm:$0xff] }
  0x67   :  { %514 = vmatmul.mubr.f32.gmra.mrb[18].mxu1 %v56_v37  ;;  %v116_v37 = vld [vmem:[%s2886_s0 + $0x300] sm:$0xff] }
  0x68   :  { %739 = vmatmul.mubr.f32.gmra.mrb[18].mxu0 %v58_v39  ;;  %518 = vmatprep.mubr.f32.mxu1 %v61_v40  ;;  %v121_v39 = vld [vmem:[%s2886_s0 + $0x328] sm:$0xff]  ;;  %v123_v40 = vld [vmem:[%s2886_s0 + $0x338] sm:$0xff] }
  0x69   :  { %743 = vmatprep.mubr.f32.mxu0 %v63_v41  ;;  %v120_v41 = vld [vmem:[%s2886_s0 + $0x320] sm:$0xff] }
  0x6b   :  { %519 = vmatmul.mubr.f32.gmra.mrb[20].mxu1 %v60_v43  ;;  %v125_v43 = vld [vmem:[%s2886_s0 + $0x348] sm:$0xff] }
  0x6c   :  { %744 = vmatmul.mubr.f32.gmra.mrb[20].mxu0 %v62_v45  ;;  %523 = vmatprep.mubr.f32.mxu1 %v65_v46  ;;  %v124_v45 = vld [vmem:[%s2886_s0 + $0x340] sm:$0xff]  ;;  %v126_v46 = vld [vmem:[%s2886_s0 + $0x350] sm:$0xff] }
  0x6d   :  { %748 = vmatprep.mubr.f32.mxu0 %v67_v47  ;;  %v129_v47 = vld [vmem:[%s2886_s0 + $0x368] sm:$0xff] }
  0x6f   :  { %524 = vmatmul.mubr.f32.gmra.mrb[22].mxu1 %v64_v0  ;;  %v128_v0 = vld [vmem:[%s2886_s0 + $0x360] sm:$0xff] }
  0x70   :  { %749 = vmatmul.mubr.f32.gmra.mrb[22].mxu0 %v66_v49  ;;  %528 = vmatprep.mubr.f32.mxu1 %v69_v50  ;;  %v130_v49 = vld [vmem:[%s2886_s0 + $0x370] sm:$0xff]  ;;  %v133_v50 = vld [vmem:[%s2886_s0 + $0x388] sm:$0xff] }
  0x71   :  { %753 = vmatprep.mubr.f32.mxu0 %v71_v51  ;;  %v135_v51 = vld [vmem:[%s2886_s0 + $0x398] sm:$0xff] }
  0x73   :  { %529 = vmatmul.mubr.f32.gmra.mrb[24].mxu1 %v68_v52  ;;  %v132_v52 = vld [vmem:[%s2886_s0 + $0x380] sm:$0xff] }
  0x74   :  { %754 = vmatmul.mubr.f32.gmra.mrb[24].mxu0 %v70_v53  ;;  %533 = vmatprep.mubr.f32.mxu1 %v73_v54  ;;  %v134_v53 = vld [vmem:[%s2886_s0 + $0x390] sm:$0xff]  ;;  %v137_v54 = vld [vmem:[%s2886_s0 + $0x3a8] sm:$0xff] }
  0x75   :  { %758 = vmatprep.mubr.f32.mxu0 %v75_v55  ;;  %v139_v55 = vld [vmem:[%s2886_s0 + $0x3b8] sm:$0xff] }
  0x77   :  { %534 = vmatmul.mubr.f32.gmra.mrb[26].mxu1 %v72_v56  ;;  %v136_v56 = vld [vmem:[%s2886_s0 + $0x3a0] sm:$0xff] }
  0x78   :  { %759 = vmatmul.mubr.f32.gmra.mrb[26].mxu0 %v74_v57  ;;  %538 = vmatprep.mubr.f32.mxu1 %v77_v58  ;;  %v138_v57 = vld [vmem:[%s2886_s0 + $0x3b0] sm:$0xff]  ;;  %v141_v58 = vld [vmem:[%s2886_s0 + $0x3c8] sm:$0xff] }
  0x79   :  { %763 = vmatprep.mubr.f32.mxu0 %v79_v59  ;;  %v143_v59 = vld [vmem:[%s2886_s0 + $0x3d8] sm:$0xff] }
  0x7b   :  { %539 = vmatmul.mubr.f32.gmra.mrb[28].mxu1 %v76_v60  ;;  %v140_v60 = vld [vmem:[%s2886_s0 + $0x3c0] sm:$0xff] }
  0x7c   :  { %764 = vmatmul.mubr.f32.gmra.mrb[28].mxu0 %v78_v61  ;;  %543 = vmatprep.mubr.f32.mxu1 %v81_v62  ;;  %v142_v61 = vld [vmem:[%s2886_s0 + $0x3d0] sm:$0xff]  ;;  %v145_v62 = vld [vmem:[%s2886_s0 + $0x3e8] sm:$0xff] }
  0x7d   :  { %768 = vmatprep.mubr.f32.mxu0 %v83_v63  ;;  %v147_v63 = vld [vmem:[%s2886_s0 + $0x3f8] sm:$0xff] }
  0x7f   :  { %544 = vmatmul.mubr.f32.gmra.mrb[30].mxu1 %v80_v1  ;;  %v144_v1 = vld [vmem:[%s2886_s0 + $0x3e0] sm:$0xff] }
  0x80   :  { %769 = vmatmul.mubr.f32.gmra.mrb[30].mxu0 %v82_v2  ;;  %548 = vmatprep.mubr.f32.mxu1 %v85_v3  ;;  %v146_v2 = vld [vmem:[%s2886_s0 + $0x3f0] sm:$0xff]  ;;  %v854_v3 = vlaneseq }
  0x81   :  { %773 = vmatprep.mubr.f32.mxu0 %v87_v4 }
  0x83   :  { %549 = vmatmul.mubr.f32.gmra.mrb[32].mxu1 %v84_v5  ;;  %v2418_v5 = vand.u32 127, %v854_v3 }
  0x84   :  { %774 = vmatmul.mubr.f32.gmra.mrb[32].mxu0 %v86_v6  ;;  %553 = vmatprep.mubr.f32.mxu1 %v89_v7 }
  0x85   :  { %778 = vmatprep.mubr.f32.mxu0 %v91_v8  ;;  %vm856_vm0 = vcmp.lt.s32.totalorder %v2418_v5, 32 }
  0x87   :  { %554 = vmatmul.mubr.f32.gmra.mrb[34].mxu1 %v88_v9 }
  0x88   :  { %779 = vmatmul.mubr.f32.gmra.mrb[34].mxu0 %v90_v10  ;;  %558 = vmatprep.mubr.f32.mxu1 %v93_v11 }
  0x89   :  { %783 = vmatprep.mubr.f32.mxu0 %v95_v12 }
  0x8b   :  { %559 = vmatmul.mubr.f32.gmra.mrb[36].mxu1 %v92_v13 }
  0x8c   :  { %784 = vmatmul.mubr.f32.gmra.mrb[36].mxu0 %v94_v14  ;;  %563 = vmatprep.mubr.f32.mxu1 %v97_v15 }
  0x8d   :  { %788 = vmatprep.mubr.f32.mxu0 %v99_v16 }
  0x8f   :  { %564 = vmatmul.mubr.f32.gmra.mrb[38].mxu1 %v96_v17 }
  0x90   :  { %789 = vmatmul.mubr.f32.gmra.mrb[38].mxu0 %v98_v18  ;;  %568 = vmatprep.mubr.f32.mxu1 %v101_v19 }
  0x91   :  { %793 = vmatprep.mubr.f32.mxu0 %v103_v20 }
  0x92   :  { %v257_v18 = vpop.permute.xlu1 %256 }
  0x93   :  { %569 = vmatmul.mubr.f32.gmra.mrb[40].mxu1 %v100_v21  ;;  %v247_v4 = vpop.permute.xlu0 %246 }
  0x94   :  { %794 = vmatmul.mubr.f32.gmra.mrb[40].mxu0 %v102_v22  ;;  %573 = vmatprep.mubr.f32.mxu1 %v105_v23 }
  0x95   :  { %798 = vmatprep.mubr.f32.mxu0 %v107_v24 }
  0x97   :  { %574 = vmatmul.mubr.f32.gmra.mrb[42].mxu1 %v104_v25  ;;  %v252_v12 = vpop.permute.xlu0 %251 }
  0x98   :  { %799 = vmatmul.mubr.f32.gmra.mrb[42].mxu0 %v106_v26  ;;  %578 = vmatprep.mubr.f32.mxu1 %v109_v27 }
  0x99   :  { %803 = vmatprep.mubr.f32.mxu0 %v111_v28  ;;  %v262_v28 = vpop.permute.xlu1 %261 }
  0x9b   :  { %579 = vmatmul.mubr.f32.gmra.mrb[44].mxu1 %v108_v29 }
  0x9c   :  { %804 = vmatmul.mubr.f32.gmra.mrb[44].mxu0 %v110_v30  ;;  %583 = vmatprep.mubr.f32.mxu1 %v113_v31 }
  0x9d   :  { %808 = vmatprep.mubr.f32.mxu0 %v115_v32 }
  0x9f   :  { %584 = vmatmul.mubr.f32.gmra.mrb[46].mxu1 %v112_v33 }
  0xa0   :  { %809 = vmatmul.mubr.f32.gmra.mrb[46].mxu0 %v114_v34  ;;  %588 = vmatprep.mubr.f32.mxu1 %v117_v35 }
  0xa1   :  { %813 = vmatprep.mubr.f32.mxu0 %v119_v36  ;;  %v267_v36 = vpop.permute.xlu0 %266 }
  0xa3   :  { %589 = vmatmul.mubr.f32.gmra.mrb[48].mxu1 %v116_v37 }
  0xa4   :  { %814 = vmatmul.mubr.f32.gmra.mrb[48].mxu0 %v118_v38  ;;  %593 = vmatprep.mubr.f32.mxu1 %v121_v39 }
  0xa5   :  { %818 = vmatprep.mubr.f32.mxu0 %v123_v40 }
  0xa7   :  { %594 = vmatmul.mubr.f32.gmra.mrb[50].mxu1 %v120_v41 }
  0xa8   :  { %819 = vmatmul.mubr.f32.gmra.mrb[50].mxu0 %v122_v42  ;;  %598 = vmatprep.mubr.f32.mxu1 %v125_v43 }
  0xa9   :  { %823 = vmatprep.mubr.f32.mxu0 %v127_v44  ;;  %v272_v44 = vpop.permute.xlu1 %271 }
  0xab   :  { %599 = vmatmul.mubr.f32.gmra.mrb[52].mxu1 %v124_v45 }
  0xac   :  { %824 = vmatmul.mubr.f32.gmra.mrb[52].mxu0 %v126_v46  ;;  %603 = vmatprep.mubr.f32.mxu1 %v129_v47 }
  0xad   :  { %828 = vmatprep.mubr.f32.mxu0 %v131_v48 }
  0xaf   :  { %604 = vmatmul.mubr.f32.gmra.mrb[54].mxu1 %v128_v0 }
  0xb0   :  { %829 = vmatmul.mubr.f32.gmra.mrb[54].mxu0 %v130_v49  ;;  %608 = vmatprep.mubr.f32.mxu1 %v133_v50 }
  0xb1   :  { %833 = vmatprep.mubr.f32.mxu0 %v135_v51  ;;  %v277_v51 = vpop.permute.xlu0 %276 }
  0xb3   :  { %609 = vmatmul.mubr.f32.gmra.mrb[56].mxu1 %v132_v52 }
  0xb4   :  { %834 = vmatmul.mubr.f32.gmra.mrb[56].mxu0 %v134_v53  ;;  %613 = vmatprep.mubr.f32.mxu1 %v137_v54 }
  0xb5   :  { %838 = vmatprep.mubr.f32.mxu0 %v139_v55 }
  0xb7   :  { %614 = vmatmul.mubr.f32.gmra.mrb[58].mxu1 %v136_v56 }
  0xb8   :  { %839 = vmatmul.mubr.f32.gmra.mrb[58].mxu0 %v138_v57  ;;  %618 = vmatprep.mubr.f32.mxu1 %v141_v58 }
  0xb9   :  { %843 = vmatprep.mubr.f32.mxu0 %v143_v59  ;;  %v282_v59 = vpop.permute.xlu1 %281 }
  0xbb   :  { %619 = vmatmul.mubr.f32.gmra.mrb[60].mxu1 %v140_v60 }
  0xbc   :  { %844 = vmatmul.mubr.f32.gmra.mrb[60].mxu0 %v142_v61  ;;  %623 = vmatprep.mubr.f32.mxu1 %v145_v62 }
  0xbd   :  { %848 = vmatprep.mubr.f32.mxu0 %v147_v63 }
  0xbf   :  { %624 = vmatmul.mubr.f32.gmra.mrb[62].mxu1 %v144_v1 }
  0xc0   :  { %849 = vmatmul.mubr.f32.gmra.mrb[62].mxu0 %v146_v2 }
 0x116   :  { %v470_v6 = vpop.f32.mrb[0].mxu1 }
 0x117   :  { %v471_v7 = vadd.f32 %v470_v6, %v247_v4  ;;  %v472_v8 = vpop.f32.mrb[1].mxu1  ;;  %v695_v9 = vpop.f32.mrb[0].mxu0 }
 0x118   :  { %v697_v10 = vpop.f32.mrb[1].mxu0  ;;  %v287_v4 = vpop.permute.xlu0 %286 }
 0x119   :  { %v2421_v11 = vadd.f32 %v695_v9, %v471_v7 }
 0x11a   :  { %v475_v13 = vpop.f32.mrb[2].mxu1 }
 0x11b   :  { %v476_v14 = vadd.f32 %v475_v13, %v252_v12  ;;  %v477_v15 = vpop.f32.mrb[3].mxu1  ;;  %v700_v16 = vpop.f32.mrb[2].mxu0  ;;  %v857_v17 = vsel %vm856_vm0, %v2421_v11, 0.0 }
 0x11c   :  { %v702_v19 = vpop.f32.mrb[3].mxu0  ;;  %889 = vadd.xlane.f32.xlu0 %v857_v17 }
 0x11d   :  { %v2426_v20 = vadd.f32 %v700_v16, %v476_v14  ;;  %v292_v14 = vpop.permute.xlu1 %291 }
 0x11e   :  { %v480_v21 = vpop.f32.mrb[4].mxu1 }
 0x11f   :  { %v481_v22 = vadd.f32 %v480_v21, %v257_v18  ;;  %v482_v23 = vpop.f32.mrb[5].mxu1  ;;  %v705_v24 = vpop.f32.mrb[4].mxu0  ;;  %v858_v25 = vsel %vm856_vm0, %v2426_v20, 0.0 }
 0x120   :  { %v707_v26 = vpop.f32.mrb[5].mxu0  ;;  %891 = vadd.xlane.f32.xlu1 %v858_v25  ;;  %v297_v23 = vpop.permute.xlu0 %296 }
 0x121   :  { %v2431_v27 = vadd.f32 %v705_v24, %v481_v22 }
 0x122   :  { %v485_v29 = vpop.f32.mrb[6].mxu1 }
 0x123   :  { %v486_v30 = vadd.f32 %v485_v29, %v262_v28  ;;  %v487_v31 = vpop.f32.mrb[7].mxu1  ;;  %v710_v32 = vpop.f32.mrb[6].mxu0  ;;  %v859_v33 = vsel %vm856_vm0, %v2431_v27, 0.0 }
 0x124   :  { %v712_v34 = vpop.f32.mrb[7].mxu0  ;;  %893 = vadd.xlane.f32.xlu0 %v859_v33 }
 0x125   :  { %v2436_v35 = vadd.f32 %v710_v32, %v486_v30  ;;  %v302_v32 = vpop.permute.xlu1 %301 }
 0x126   :  { %v490_v37 = vpop.f32.mrb[8].mxu1 }
 0x127   :  { %v491_v38 = vadd.f32 %v490_v37, %v267_v36  ;;  %v492_v39 = vpop.f32.mrb[9].mxu1  ;;  %v715_v40 = vpop.f32.mrb[8].mxu0  ;;  %v860_v41 = vsel %vm856_vm0, %v2436_v35, 0.0 }
 0x128   :  { %v717_v42 = vpop.f32.mrb[9].mxu0  ;;  %895 = vadd.xlane.f32.xlu0 %v860_v41  ;;  %v307_v41 = vpop.permute.xlu0 %306 }
 0x129   :  { %v2441_v43 = vadd.f32 %v715_v40, %v491_v38 }
 0x12a   :  { %v495_v45 = vpop.f32.mrb[10].mxu1 }
 0x12b   :  { %v496_v46 = vadd.f32 %v495_v45, %v272_v44  ;;  %v497_v47 = vpop.f32.mrb[11].mxu1  ;;  %v720_v48 = vpop.f32.mrb[10].mxu0  ;;  %v861_v0 = vsel %vm856_vm0, %v2441_v43, 0.0 }
 0x12c   :  { %v722_v49 = vpop.f32.mrb[11].mxu0  ;;  %897 = vadd.xlane.f32.xlu1 %v861_v0 }
 0x12d   :  { %v2446_v50 = vadd.f32 %v720_v48, %v496_v46  ;;  %v312_v49 = vpop.permute.xlu1 %311 }
 0x12e   :  { %v500_v52 = vpop.f32.mrb[12].mxu1 }
 0x12f   :  { %v501_v53 = vadd.f32 %v500_v52, %v277_v51  ;;  %v502_v54 = vpop.f32.mrb[13].mxu1  ;;  %v725_v55 = vpop.f32.mrb[12].mxu0  ;;  %v862_v56 = vsel %vm856_vm0, %v2446_v50, 0.0 }
 0x130   :  { %v727_v57 = vpop.f32.mrb[13].mxu0  ;;  %899 = vadd.xlane.f32.xlu0 %v862_v56 }
 0x131   :  { %v2451_v58 = vadd.f32 %v725_v55, %v501_v53 }
 0x132   :  { %v505_v60 = vpop.f32.mrb[14].mxu1 }
 0x133   :  { %v506_v61 = vadd.f32 %v505_v60, %v282_v59  ;;  %v507_v62 = vpop.f32.mrb[15].mxu1  ;;  %v730_v63 = vpop.f32.mrb[14].mxu0  ;;  %v863_v1 = vsel %vm856_vm0, %v2451_v58, 0.0 }
 0x134   :  { %v732_v2 = vpop.f32.mrb[15].mxu0  ;;  %901 = vadd.xlane.f32.xlu1 %v863_v1  ;;  %v317_v59 = vpop.permute.xlu0 %316 }
 0x135   :  { %v2456_v3 = vadd.f32 %v730_v63, %v506_v61 }
 0x136   :  { %v510_v6 = vpop.f32.mrb[16].mxu1 }
 0x137   :  { %2907 = vst [vmem:[#allocation2_spill] sm:$0xff] %v2456_v3  ;;  %v511_v7 = vadd.f32 %v510_v6, %v287_v4  ;;  %v512_v8 = vpop.f32.mrb[17].mxu1  ;;  %v735_v9 = vpop.f32.mrb[16].mxu0  ;;  %v864_v10 = vsel %vm856_vm0, %v2456_v3, 0.0 }
 0x138   :  { %v737_v12 = vpop.f32.mrb[17].mxu0  ;;  %903 = vadd.xlane.f32.xlu0 %v864_v10  ;;  %v322_v6 = vpop.permute.xlu1 %321 }
 0x139   :  { %v2461_v13 = vadd.f32 %v735_v9, %v511_v7 }
 0x13a   :  { %v515_v15 = vpop.f32.mrb[18].mxu1 }
 0x13b   :  { %v516_v16 = vadd.f32 %v515_v15, %v292_v14  ;;  %v517_v17 = vpop.f32.mrb[19].mxu1  ;;  %v740_v18 = vpop.f32.mrb[18].mxu0  ;;  %v865_v19 = vsel %vm856_vm0, %v2461_v13, 0.0 }
 0x13c   :  { %v742_v21 = vpop.f32.mrb[19].mxu0  ;;  %905 = vadd.xlane.f32.xlu1 %v865_v19 }
 0x13d   :  { %v2466_v22 = vadd.f32 %v740_v18, %v516_v16  ;;  %v327_v16 = vpop.permute.xlu0 %326 }
 0x13e   :  { %v520_v24 = vpop.f32.mrb[20].mxu1 }
 0x13f   :  { %v521_v25 = vadd.f32 %v520_v24, %v297_v23  ;;  %v522_v26 = vpop.f32.mrb[21].mxu1  ;;  %v745_v28 = vpop.f32.mrb[20].mxu0  ;;  %v866_v29 = vsel %vm856_vm0, %v2466_v22, 0.0 }
 0x140   :  { %v747_v30 = vpop.f32.mrb[21].mxu0  ;;  %907 = vadd.xlane.f32.xlu0 %v866_v29  ;;  %v332_v26 = vpop.permute.xlu1 %331 }
 0x141   :  { %v2471_v31 = vadd.f32 %v745_v28, %v521_v25 }
 0x142   :  { %v525_v33 = vpop.f32.mrb[22].mxu1 }
 0x143   :  { %v526_v34 = vadd.f32 %v525_v33, %v302_v32  ;;  %v527_v36 = vpop.f32.mrb[23].mxu1  ;;  %v750_v37 = vpop.f32.mrb[22].mxu0  ;;  %v867_v38 = vsel %vm856_vm0, %v2471_v31, 0.0 }
 0x144   :  { %v752_v39 = vpop.f32.mrb[23].mxu0  ;;  %909 = vadd.xlane.f32.xlu1 %v867_v38 }
 0x145   :  { %v2476_v40 = vadd.f32 %v750_v37, %v526_v34  ;;  %v337_v37 = vpop.permute.xlu0 %336 }
 0x146   :  { %v530_v42 = vpop.f32.mrb[24].mxu1 }
 0x147   :  { %v531_v44 = vadd.f32 %v530_v42, %v307_v41  ;;  %v532_v45 = vpop.f32.mrb[25].mxu1  ;;  %v755_v46 = vpop.f32.mrb[24].mxu0  ;;  %v868_v47 = vsel %vm856_vm0, %v2476_v40, 0.0 }
 0x148   :  { %v757_v48 = vpop.f32.mrb[25].mxu0  ;;  %911 = vadd.xlane.f32.xlu0 %v868_v47  ;;  %v342_v47 = vpop.permute.xlu1 %341 }
 0x149   :  { %v2481_v0 = vadd.f32 %v755_v46, %v531_v44 }
 0x14a   :  { %v535_v51 = vpop.f32.mrb[26].mxu1 }
 0x14b   :  { %v536_v52 = vadd.f32 %v535_v51, %v312_v49  ;;  %v537_v53 = vpop.f32.mrb[27].mxu1  ;;  %v760_v54 = vpop.f32.mrb[26].mxu0  ;;  %v869_v55 = vsel %vm856_vm0, %v2481_v0, 0.0 }
 0x14c   :  { %v762_v56 = vpop.f32.mrb[27].mxu0  ;;  %913 = vadd.xlane.f32.xlu1 %v869_v55 }
 0x14d   :  { %v2486_v57 = vadd.f32 %v760_v54, %v536_v52  ;;  %v347_v56 = vpop.permute.xlu0 %346 }
 0x14e   :  { %v540_v60 = vpop.f32.mrb[28].mxu1 }
 0x14f   :  { %v541_v61 = vadd.f32 %v540_v60, %v317_v59  ;;  %v542_v62 = vpop.f32.mrb[29].mxu1  ;;  %v765_v63 = vpop.f32.mrb[28].mxu0  ;;  %v870_v1 = vsel %vm856_vm0, %v2486_v57, 0.0 }
 0x150   :  { %v767_v2 = vpop.f32.mrb[29].mxu0  ;;  %915 = vadd.xlane.f32.xlu0 %v870_v1 }
 0x151   :  { %v2491_v4 = vadd.f32 %v765_v63, %v541_v61 }
 0x152   :  { %v545_v7 = vpop.f32.mrb[30].mxu1 }
 0x153   :  { %2908 = vst [vmem:[#allocation3_spill] sm:$0xff] %v2491_v4  ;;  %v546_v8 = vadd.f32 %v545_v7, %v322_v6  ;;  %v547_v9 = vpop.f32.mrb[31].mxu1  ;;  %v770_v10 = vpop.f32.mrb[30].mxu0  ;;  %v871_v12 = vsel %vm856_vm0, %v2491_v4, 0.0 }
 0x154   :  { %v772_v14 = vpop.f32.mrb[31].mxu0  ;;  %917 = vadd.xlane.f32.xlu1 %v871_v12  ;;  %v352_v6 = vpop.permute.xlu1 %351 }
 0x155   :  { %v2496_v15 = vadd.f32 %v770_v10, %v546_v8 }
 0x156   :  { %v550_v17 = vpop.f32.mrb[32].mxu1 }
 0x157   :  { %2909 = vst [vmem:[#allocation4_spill] sm:$0xff] %v2496_v15  ;;  %v551_v18 = vadd.f32 %v550_v17, %v327_v16  ;;  %v552_v19 = vpop.f32.mrb[33].mxu1  ;;  %v775_v21 = vpop.f32.mrb[32].mxu0  ;;  %v872_v23 = vsel %vm856_vm0, %v2496_v15, 0.0 }
 0x158   :  { %v777_v24 = vpop.f32.mrb[33].mxu0  ;;  %919 = vadd.xlane.f32.xlu0 %v872_v23  ;;  %v357_v17 = vpop.permute.xlu0 %356 }
 0x159   :  { %v2501_v25 = vadd.f32 %v775_v21, %v551_v18 }
 0x15a   :  { %v555_v28 = vpop.f32.mrb[34].mxu1 }
 0x15b   :  { %v556_v29 = vadd.f32 %v555_v28, %v332_v26  ;;  %v557_v30 = vpop.f32.mrb[35].mxu1  ;;  %v780_v32 = vpop.f32.mrb[34].mxu0  ;;  %v873_v33 = vsel %vm856_vm0, %v2501_v25, 0.0 }
 0x15c   :  { %v782_v34 = vpop.f32.mrb[35].mxu0  ;;  %921 = vadd.xlane.f32.xlu1 %v873_v33 }
 0x15d   :  { %v2506_v36 = vadd.f32 %v780_v32, %v556_v29  ;;  %v362_v29 = vpop.permute.xlu1 %361 }
 0x15e   :  { %v560_v38 = vpop.f32.mrb[36].mxu1 }
 0x15f   :  { %v561_v39 = vadd.f32 %v560_v38, %v337_v37  ;;  %v562_v41 = vpop.f32.mrb[37].mxu1  ;;  %v785_v42 = vpop.f32.mrb[36].mxu0  ;;  %v874_v44 = vsel %vm856_vm0, %v2506_v36, 0.0 }
 0x160   :  { %v787_v45 = vpop.f32.mrb[37].mxu0  ;;  %923 = vadd.xlane.f32.xlu0 %v874_v44  ;;  %v367_v41 = vpop.permute.xlu0 %366 }
 0x161   :  { %v2511_v46 = vadd.f32 %v785_v42, %v561_v39 }
 0x162   :  { %v565_v48 = vpop.f32.mrb[38].mxu1 }
 0x163   :  { %v566_v49 = vadd.f32 %v565_v48, %v342_v47  ;;  %v567_v51 = vpop.f32.mrb[39].mxu1  ;;  %v790_v52 = vpop.f32.mrb[38].mxu0  ;;  %v875_v53 = vsel %vm856_vm0, %v2511_v46, 0.0 }
 0x164   :  { %v792_v54 = vpop.f32.mrb[39].mxu0  ;;  %925 = vadd.xlane.f32.xlu1 %v875_v53 }
 0x165   :  { %v2516_v55 = vadd.f32 %v790_v52, %v566_v49  ;;  %v372_v52 = vpop.permute.xlu1 %371 }
 0x166   :  { %v570_v59 = vpop.f32.mrb[40].mxu1 }
 0x167   :  { %v571_v60 = vadd.f32 %v570_v59, %v347_v56  ;;  %v572_v61 = vpop.f32.mrb[41].mxu1  ;;  %v795_v62 = vpop.f32.mrb[40].mxu0  ;;  %v876_v63 = vsel %vm856_vm0, %v2516_v55, 0.0 }
 0x168   :  { %v797_v1 = vpop.f32.mrb[41].mxu0  ;;  %927 = vadd.xlane.f32.xlu0 %v876_v63  ;;  %v377_v63 = vpop.permute.xlu0 %376 }
 0x169   :  { %v2521_v2 = vadd.f32 %v795_v62, %v571_v60 }
 0x16a   :  { %v575_v7 = vpop.f32.mrb[42].mxu1 }
 0x16b   :  { %v576_v8 = vadd.f32 %v575_v7, %v352_v6  ;;  %v577_v9 = vpop.f32.mrb[43].mxu1  ;;  %v800_v10 = vpop.f32.mrb[42].mxu0  ;;  %v877_v12 = vsel %vm856_vm0, %v2521_v2, 0.0 }
 0x16c   :  { %v802_v14 = vpop.f32.mrb[43].mxu0  ;;  %929 = vadd.xlane.f32.xlu1 %v877_v12 }
 0x16d   :  { %v2526_v16 = vadd.f32 %v800_v10, %v576_v8  ;;  %v382_v14 = vpop.permute.xlu1 %381 }
 0x16e   :  { %v580_v18 = vpop.f32.mrb[44].mxu1 }
 0x16f   :  { %v581_v19 = vadd.f32 %v580_v18, %v357_v17  ;;  %v582_v21 = vpop.f32.mrb[45].mxu1  ;;  %v805_v23 = vpop.f32.mrb[44].mxu0  ;;  %v878_v24 = vsel %vm856_vm0, %v2526_v16, 0.0 }
 0x170   :  { %v807_v26 = vpop.f32.mrb[45].mxu0  ;;  %931 = vadd.xlane.f32.xlu0 %v878_v24 }
 0x171   :  { %v2531_v28 = vadd.f32 %v805_v23, %v581_v19 }
 0x172   :  { %v585_v30 = vpop.f32.mrb[46].mxu1 }
 0x173   :  { %2910 = vst [vmem:[#allocation5_spill] sm:$0xff] %v2531_v28  ;;  %v586_v32 = vadd.f32 %v585_v30, %v362_v29  ;;  %v587_v33 = vpop.f32.mrb[47].mxu1  ;;  %v810_v34 = vpop.f32.mrb[46].mxu0  ;;  %v879_v37 = vsel %vm856_vm0, %v2531_v28, 0.0 }
 0x174   :  { %v812_v38 = vpop.f32.mrb[47].mxu0  ;;  %933 = vadd.xlane.f32.xlu1 %v879_v37  ;;  %v387_v29 = vpop.permute.xlu0 %386 }
 0x175   :  { %v2536_v39 = vadd.f32 %v810_v34, %v586_v32 }
 0x176   :  { %v590_v42 = vpop.f32.mrb[48].mxu1 }
 0x177   :  { %2911 = vst [vmem:[#allocation6_spill] sm:$0xff] %v2536_v39  ;;  %v591_v44 = vadd.f32 %v590_v42, %v367_v41  ;;  %v592_v45 = vpop.f32.mrb[49].mxu1  ;;  %v815_v47 = vpop.f32.mrb[48].mxu0  ;;  %v880_v48 = vsel %vm856_vm0, %v2536_v39, 0.0 }
 0x178   :  { %v817_v49 = vpop.f32.mrb[49].mxu0  ;;  %935 = vadd.xlane.f32.xlu0 %v880_v48  ;;  %v392_v42 = vpop.permute.xlu1 %391 }
 0x179   :  { %v2541_v51 = vadd.f32 %v815_v47, %v591_v44 }
 0x17a   :  { %v595_v53 = vpop.f32.mrb[50].mxu1 }
 0x17b   :  { %v596_v54 = vadd.f32 %v595_v53, %v372_v52  ;;  %v597_v56 = vpop.f32.mrb[51].mxu1  ;;  %v820_v59 = vpop.f32.mrb[50].mxu0  ;;  %v881_v60 = vsel %vm856_vm0, %v2541_v51, 0.0 }
 0x17c   :  { %v822_v61 = vpop.f32.mrb[51].mxu0  ;;  %937 = vadd.xlane.f32.xlu1 %v881_v60 }
 0x17d   :  { %v2546_v62 = vadd.f32 %v820_v59, %v596_v54  ;;  %v397_v54 = vpop.permute.xlu0 %396 }
 0x17e   :  { %v600_v1 = vpop.f32.mrb[52].mxu1 }
 0x17f   :  { %v601_v6 = vadd.f32 %v600_v1, %v377_v63  ;;  %v825_v7 = vpop.f32.mrb[52].mxu0  ;;  %v882_v8 = vsel %vm856_vm0, %v2546_v62, 0.0  ;;  %v602_v9 = vpop.f32.mrb[53].mxu1 }
 0x180   :  { %939 = vadd.xlane.f32.xlu0 %v882_v8  ;;  %v827_v10 = vpop.f32.mrb[53].mxu0 }
 0x181   :  { %v2551_v12 = vadd.f32 %v825_v7, %v601_v6  ;;  %v402_v7 = vpop.permute.xlu1 %401 }
 0x182   :  { %v605_v17 = vpop.f32.mrb[54].mxu1 }
 0x183   :  { %v606_v18 = vadd.f32 %v605_v17, %v382_v14  ;;  %v830_v19 = vpop.f32.mrb[54].mxu0  ;;  %v883_v21 = vsel %vm856_vm0, %v2551_v12, 0.0  ;;  %v607_v23 = vpop.f32.mrb[55].mxu1 }
 0x184   :  { %941 = vadd.xlane.f32.xlu1 %v883_v21  ;;  %v832_v24 = vpop.f32.mrb[55].mxu0 }
 0x185   :  { %v2556_v26 = vadd.f32 %v830_v19, %v606_v18 }
 0x186   :  { %v610_v30 = vpop.f32.mrb[56].mxu1 }
 0x187   :  { %v611_v32 = vadd.f32 %v610_v30, %v387_v29  ;;  %v835_v33 = vpop.f32.mrb[56].mxu0  ;;  %v884_v34 = vsel %vm856_vm0, %v2556_v26, 0.0  ;;  %v612_v37 = vpop.f32.mrb[57].mxu1 }
 0x188   :  { %943 = vadd.xlane.f32.xlu0 %v884_v34  ;;  %v837_v38 = vpop.f32.mrb[57].mxu0 }
 0x189   :  { %v2561_v41 = vadd.f32 %v835_v33, %v611_v32 }
 0x18a   :  { %v615_v44 = vpop.f32.mrb[58].mxu1 }
 0x18b   :  { %v616_v45 = vadd.f32 %v615_v44, %v392_v42  ;;  %v840_v47 = vpop.f32.mrb[58].mxu0  ;;  %v885_v48 = vsel %vm856_vm0, %v2561_v41, 0.0  ;;  %v617_v49 = vpop.f32.mrb[59].mxu1 }
 0x18c   :  { %945 = vadd.xlane.f32.xlu1 %v885_v48  ;;  %v842_v52 = vpop.f32.mrb[59].mxu0 }
 0x18d   :  { %v2566_v53 = vadd.f32 %v840_v47, %v616_v45 }
 0x18e   :  { %v620_v56 = vpop.f32.mrb[60].mxu1 }
 0x18f   :  { %2912 = vst [vmem:[#allocation7_spill] sm:$0xff] %v2566_v53  ;;  %v621_v59 = vadd.f32 %v620_v56, %v397_v54  ;;  %v845_v60 = vpop.f32.mrb[60].mxu0  ;;  %v886_v61 = vsel %vm856_vm0, %v2566_v53, 0.0  ;;  %v622_v63 = vpop.f32.mrb[61].mxu1 }
 0x190   :  { %947 = vadd.xlane.f32.xlu0 %v886_v61  ;;  %v847_v1 = vpop.f32.mrb[61].mxu0 }
 0x191   :  { %v2571_v6 = vadd.f32 %v845_v60, %v621_v59 }
 0x192   :  { %v625_v8 = vpop.f32.mrb[62].mxu1 }
 0x193   :  { %2913 = vst [vmem:[#allocation8_spill] sm:$0xff] %v2571_v6  ;;  %v626_v9 = vadd.f32 %v625_v8, %v402_v7  ;;  %v850_v10 = vpop.f32.mrb[62].mxu0  ;;  %v887_v14 = vsel %vm856_vm0, %v2571_v6, 0.0  ;;  %v627_v17 = vpop.f32.mrb[63].mxu1 }
 0x194   :  { %949 = vadd.xlane.f32.xlu1 %v887_v14  ;;  %v852_v18 = vpop.f32.mrb[63].mxu0 }
 0x195   :  { %v2576_v19 = vadd.f32 %v850_v10, %v626_v9 }
 0x197   :  { %2914 = vst [vmem:[#allocation9_spill] sm:$0xff] %v2576_v19  ;;  %v888_v21 = vsel %vm856_vm0, %v2576_v19, 0.0 }
 0x198   :  { %951 = vadd.xlane.f32.xlu0 %v888_v21 }
 0x1a9   :  { %v890_v23 = vpop.xlane.xlu0 %889 }
 0x1ad   :  { %v892_v29 = vpop.xlane.xlu1 %891 }
 0x1b1   :  { %v894_v24 = vpop.xlane.xlu0 %893 }
 0x1b5   :  { %v896_v30 = vpop.xlane.xlu0 %895 }
 0x1b9   :  { %v898_v32 = vpop.xlane.xlu1 %897 }
 0x1bd   :  { %v900_v33 = vpop.xlane.xlu0 %899 }
 0x1c1   :  { %v902_v34 = vpop.xlane.xlu1 %901 }
 0x1c5   :  { %v904_v37 = vpop.xlane.xlu0 %903 }
 0x1c9   :  { %v906_v38 = vpop.xlane.xlu1 %905 }
 0x1ca   :  { %v961_v7 = vadd.f32 %v906_v38, %v890_v23 }
 0x1cd   :  { %v908_v42 = vpop.xlane.xlu0 %907 }
 0x1ce   :  { %v962_v14 = vadd.f32 %v908_v42, %v892_v29 }
 0x1d1   :  { %v910_v44 = vpop.xlane.xlu1 %909 }
 0x1d2   :  { %v963_v39 = vadd.f32 %v910_v44, %v894_v24 }
 0x1d5   :  { %v912_v45 = vpop.xlane.xlu0 %911 }
 0x1d6   :  { %v964_v4 = vadd.f32 %v912_v45, %v896_v30 }
 0x1d9   :  { %v914_v47 = vpop.xlane.xlu1 %913 }
 0x1da   :  { %v965_v42 = vadd.f32 %v914_v47, %v898_v32 }
 0x1dd   :  { %v916_v48 = vpop.xlane.xlu0 %915 }
 0x1e1   :  { %v918_v49 = vpop.xlane.xlu1 %917 }
 0x1e5   :  { %v920_v52 = vpop.xlane.xlu0 %919 }
 0x1e9   :  { %v922_v54 = vpop.xlane.xlu1 %921 }
 0x1ea   :  { %v969_v8 = vadd.f32 %v961_v7, %v922_v54 }
 0x1ed   :  { %v924_v56 = vpop.xlane.xlu0 %923 }
 0x1ee   :  { %v970_v18 = vadd.f32 %v962_v14, %v924_v56  ;;  %v968_v56 = vadd.f32 %v920_v52, %v904_v37 }
 0x1f1   :  { %v926_v59 = vpop.xlane.xlu1 %925 }
 0x1f2   :  { %v971_v6 = vadd.f32 %v963_v39, %v926_v59  ;;  %v966_v39 = vadd.f32 %v916_v48, %v900_v33 }
 0x1f5   :  { %v928_v60 = vpop.xlane.xlu0 %927 }
 0x1f6   :  { %v972_v23 = vadd.f32 %v964_v4, %v928_v60  ;;  %v967_v4 = vadd.f32 %v918_v49, %v902_v34 }
 0x1f9   :  { %v930_v61 = vpop.xlane.xlu1 %929 }
 0x1fa   :  { %v973_v24 = vadd.f32 %v965_v42, %v930_v61 }
 0x1fd   :  { %v932_v63 = vpop.xlane.xlu0 %931 }
 0x1fe   :  { %v974_v30 = vadd.f32 %v966_v39, %v932_v63 }
 0x201   :  { %v934_v1 = vpop.xlane.xlu1 %933 }
 0x202   :  { %v975_v32 = vadd.f32 %v967_v4, %v934_v1 }
 0x205   :  { %v936_v9 = vpop.xlane.xlu0 %935 }
 0x206   :  { %v976_v33 = vadd.f32 %v968_v56, %v936_v9 }
 0x209   :  { %v938_v10 = vpop.xlane.xlu1 %937 }
 0x20a   :  { %v977_v17 = vadd.f32 %v969_v8, %v938_v10 }
 0x20c   :  { %v2581_v21 = vmul.f32 0.0078125, %v977_v17 }
 0x20d   :  { %v940_v19 = vpop.xlane.xlu0 %939 }
 0x20e   :  { %v978_v15 = vadd.f32 %v970_v18, %v940_v19  ;;  %996 = vperm.xlu1 %1665, %v2581_v21  }
 0x210   :  { %v2584_v3 = vmul.f32 0.0078125, %v978_v15 }
 0x211   :  { %v942_v28 = vpop.xlane.xlu1 %941 }
 0x212   :  { %v979_v53 = vadd.f32 %v971_v6, %v942_v28  ;;  %1001 = vperm.xlu0 %1664, %v2584_v3  }
 0x214   :  { %v2587_v38 = vmul.f32 0.0078125, %v979_v53 }
 0x215   :  { %v944_v29 = vpop.xlane.xlu0 %943 }
 0x216   :  { %v980_v54 = vadd.f32 %v972_v23, %v944_v29  ;;  %1006 = vperm.xlu1 %1665, %v2587_v38  }
 0x218   :  { %v2590_v19 = vmul.f32 0.0078125, %v980_v54 }
 0x219   :  { %v946_v44 = vpop.xlane.xlu1 %945 }
 0x21a   :  { %v981_v15 = vadd.f32 %v973_v24, %v946_v44  ;;  %1011 = vperm.xlu1 %1665, %v2590_v19  }
 0x21c   :  { %v2593_v28 = vmul.f32 0.0078125, %v981_v15 }
 0x21d   :  { %v948_v6 = vpop.xlane.xlu0 %947 }
 0x21e   :  { %v982_v53 = vadd.f32 %v974_v30, %v948_v6  ;;  %1016 = vperm.xlu0 %1664, %v2593_v28  }
 0x220   :  { %v2596_v45 = vmul.f32 0.0078125, %v982_v53 }
 0x221   :  { %v950_v47 = vpop.xlane.xlu1 %949 }
 0x222   :  { %v983_v59 = vadd.f32 %v975_v32, %v950_v47  ;;  %1021 = vperm.xlu1 %1665, %v2596_v45  }
 0x224   :  { %v2599_v48 = vmul.f32 0.0078125, %v983_v59 }
 0x225   :  { %v952_v60 = vpop.xlane.xlu0 %951 }
 0x226   :  { %v984_v61 = vadd.f32 %v976_v33, %v952_v60  ;;  %1026 = vperm.xlu0 %1664, %v2599_v48  }
 0x228   :  { %v2602_v63 = vmul.f32 0.0078125, %v984_v61 }
 0x22a   :  { %1031 = vperm.xlu1 %1665, %v2602_v63  }
 0x28d   :  { %v997_v34 = vpop.permute.xlu1 %996 }
 0x28e   :  { %v1034_v49 = vsub.f32 %v2421_v11, %v997_v34  ;;  %v1042_v1 = vsub.f32 %v2461_v13, %v997_v34  ;;  %v1050_v37 = vsub.f32 %v2501_v25, %v997_v34  ;;  %v1058_v18 = vsub.f32 %v2541_v51, %v997_v34 }
 0x290   :  { %v1066_v52 = vsel %vm856_vm0, %v1034_v49, 0.0  ;;  %v1074_v7 = vsel %vm856_vm0, %v1042_v1, 0.0  ;;  %v1082_v14 = vsel %vm856_vm0, %v1050_v37, 0.0  ;;  %v1090_v44 = vsel %vm856_vm0, %v1058_v18, 0.0 }
 0x291   :  { %v1002_v8 = vpop.permute.xlu0 %1001  ;;  %v1098_v9 = vmul.f32 %v1066_v52, %v1066_v52  ;;  %v1106_v10 = vmul.f32 %v1074_v7, %v1074_v7  ;;  %v1114_v54 = vmul.f32 %v1082_v14, %v1082_v14  ;;  %v1122_v6 = vmul.f32 %v1090_v44, %v1090_v44 }
 0x292   :  { %v1043_v17 = vsub.f32 %v2466_v22, %v1002_v8  ;;  %v1051_v23 = vsub.f32 %v2506_v36, %v1002_v8  ;;  %v1059_v15 = vsub.f32 %v2546_v62, %v1002_v8  ;;  %v1035_v30 = vsub.f32 %v2426_v20, %v1002_v8 }
 0x293   :  { %1130 = vadd.xlane.f32.xlu0 %v1098_v9  ;;  %1146 = vadd.xlane.f32.xlu1 %v1106_v10 }
 0x294   :  { %v1075_v29 = vsel %vm856_vm0, %v1043_v17, 0.0  ;;  %v1083_v39 = vsel %vm856_vm0, %v1051_v23, 0.0  ;;  %v1091_v53 = vsel %vm856_vm0, %v1059_v15, 0.0  ;;  %v1067_v32 = vsel %vm856_vm0, %v1035_v30, 0.0 }
 0x295   :  { %v1007_v42 = vpop.permute.xlu1 %1006  ;;  %v1107_v24 = vmul.f32 %v1075_v29, %v1075_v29  ;;  %v1115_v4 = vmul.f32 %v1083_v39, %v1083_v39  ;;  %v1123_v33 = vmul.f32 %v1091_v53, %v1091_v53  ;;  %v1099_v60 = vmul.f32 %v1067_v32, %v1067_v32 }
 0x296   :  { %v1036_v47 = vsub.f32 %v2431_v27, %v1007_v42  ;;  %v1044_v56 = vsub.f32 %v2471_v31, %v1007_v42  ;;  %v1052_v1 = vsub.f32 %v2511_v46, %v1007_v42  ;;  %v1060_v10 = vsub.f32 %v2551_v12, %v1007_v42 }
 0x297   :  { %1162 = vadd.xlane.f32.xlu1 %v1114_v54  ;;  %1148 = vadd.xlane.f32.xlu0 %v1107_v24 }
 0x298   :  { %v1068_v61 = vsel %vm856_vm0, %v1036_v47, 0.0  ;;  %v1076_v34 = vsel %vm856_vm0, %v1044_v56, 0.0  ;;  %v1084_v8 = vsel %vm856_vm0, %v1052_v1, 0.0  ;;  %v1092_v29 = vsel %vm856_vm0, %v1060_v10, 0.0 }
 0x299   :  { %v1012_v59 = vpop.permute.xlu1 %1011  ;;  %v1100_v37 = vmul.f32 %v1068_v61, %v1068_v61  ;;  %v1108_v52 = vmul.f32 %v1076_v34, %v1076_v34  ;;  %v1116_v18 = vmul.f32 %v1084_v8, %v1084_v8  ;;  %v1124_v39 = vmul.f32 %v1092_v29, %v1092_v29 }
 0x29a   :  { %v1037_v49 = vsub.f32 %v2436_v35, %v1012_v59  ;;  %v1045_v9 = vsub.f32 %v2476_v40, %v1012_v59  ;;  %v1053_v54 = vsub.f32 %v2516_v55, %v1012_v59  ;;  %v1061_v30 = vsub.f32 %v2556_v26, %v1012_v59 }
 0x29b   :  { %1178 = vadd.xlane.f32.xlu1 %v1122_v6  ;;  %1164 = vadd.xlane.f32.xlu0 %v1115_v4 }
 0x29c   :  { %v1069_v7 = vsel %vm856_vm0, %v1037_v49, 0.0  ;;  %v1077_v23 = vsel %vm856_vm0, %v1045_v9, 0.0  ;;  %v1085_v42 = vsel %vm856_vm0, %v1053_v54, 0.0  ;;  %v1093_v47 = vsel %vm856_vm0, %v1061_v30, 0.0 }
 0x29d   :  { %v1017_v14 = vpop.permute.xlu0 %1016  ;;  %v1101_v17 = vmul.f32 %v1069_v7, %v1069_v7  ;;  %v1109_v44 = vmul.f32 %v1077_v23, %v1077_v23  ;;  %v1117_v53 = vmul.f32 %v1085_v42, %v1085_v42  ;;  %v1125_v59 = vmul.f32 %v1093_v47, %v1093_v47  ;;  %v2918_v47 = vld [vmem:[#allocation2_spill] sm:$0xff] }
 0x29e   :  { %v1038_v24 = vsub.f32 %v2441_v43, %v1017_v14  ;;  %v1046_v6 = vsub.f32 %v2481_v0, %v1017_v14 }
 0x29f   :  { %1180 = vadd.xlane.f32.xlu0 %v1123_v33  ;;  %1132 = vadd.xlane.f32.xlu1 %v1099_v60  ;;  %v1054_v60 = vsub.f32 %v2521_v2, %v1017_v14 }
 0x2a0   :  { %v1070_v15 = vsel %vm856_vm0, %v1038_v24, 0.0  ;;  %v1078_v56 = vsel %vm856_vm0, %v1046_v6, 0.0  ;;  %v2915_v24 = vld [vmem:[#allocation7_spill] sm:$0xff] }
 0x2a1   :  { %v1022_v4 = vpop.permute.xlu1 %1021  ;;  %v1102_v32 = vmul.f32 %v1070_v15, %v1070_v15  ;;  %v1110_v61 = vmul.f32 %v1078_v56, %v1078_v56  ;;  %v1086_v49 = vsel %vm856_vm0, %v1054_v60, 0.0 }
 0x2a2   :  { %v1039_v33 = vsub.f32 %v2446_v50, %v1022_v4  ;;  %v1047_v1 = vsub.f32 %v2486_v57, %v1022_v4  ;;  %v1118_v8 = vmul.f32 %v1086_v49, %v1086_v49  ;;  %v2920_v49 = vld [vmem:[#allocation4_spill] sm:$0xff] }
 0x2a3   :  { %1134 = vadd.xlane.f32.xlu0 %v1100_v37  ;;  %1150 = vadd.xlane.f32.xlu1 %v1108_v52  ;;  %v1062_v37 = vsub.f32 %v2561_v41, %v1017_v14 }
 0x2a4   :  { %v1071_v34 = vsel %vm856_vm0, %v1039_v33, 0.0  ;;  %v1079_v9 = vsel %vm856_vm0, %v1047_v1, 0.0 }
 0x2a5   :  { %v1027_v52 = vpop.permute.xlu0 %1026  ;;  %v1103_v7 = vmul.f32 %v1071_v34, %v1071_v34  ;;  %v1094_v10 = vsel %vm856_vm0, %v1062_v37, 0.0  ;;  %v1111_v23 = vmul.f32 %v1079_v9, %v1079_v9 }
 0x2a6   :  { %v1126_v29 = vmul.f32 %v1094_v10, %v1094_v10  ;;  %v2921_v10 = vld [vmem:[#allocation6_spill] sm:$0xff] }
 0x2a7   :  { %1136 = vadd.xlane.f32.xlu0 %v1101_v17  ;;  %1166 = vadd.xlane.f32.xlu1 %v1116_v18  ;;  %v1055_v17 = vsub.f32 %v2526_v16, %v1022_v4  ;;  %v1040_v18 = vsub.f32 %v2451_v58, %v1027_v52 }
 0x2a9   :  { %v1087_v14 = vsel %vm856_vm0, %v1055_v17, 0.0  ;;  %v1072_v54 = vsel %vm856_vm0, %v1040_v18, 0.0  ;;  %v1032_v15 = vpop.permute.xlu1 %1031 }
 0x2aa   :  { %v1119_v30 = vmul.f32 %v1087_v14, %v1087_v14  ;;  %v1104_v6 = vmul.f32 %v1072_v54, %v1072_v54  ;;  %v1041_v56 = vsub.f32 %v2918_v47, %v1032_v15  ;;  %v1049_v1 = vsub.f32 %v2920_v49, %v1032_v15  ;;  %v2922_v14 = vld [vmem:[#allocation9_spill] sm:$0xff] }
 0x2ab   :  { %1152 = vadd.xlane.f32.xlu0 %v1109_v44  ;;  %1182 = vadd.xlane.f32.xlu1 %v1124_v39  ;;  %v1063_v44 = vsub.f32 %v2915_v24, %v1022_v4  ;;  %v2916_v39 = vld [vmem:[#allocation3_spill] sm:$0xff]  ;;  %v1057_v17 = vsub.f32 %v2921_v10, %v1032_v15  ;;  %v1065_v54 = vsub.f32 %v2922_v14, %v1032_v15 }
 0x2ac   :  { %v1048_v42 = vsub.f32 %v2916_v39, %v1027_v52  ;;  %v1073_v37 = vsel %vm856_vm0, %v1041_v56, 0.0  ;;  %v1081_v18 = vsel %vm856_vm0, %v1049_v1, 0.0 }
 0x2ad   :  { %v1095_v33 = vsel %vm856_vm0, %v1063_v44, 0.0  ;;  %v1089_v44 = vsel %vm856_vm0, %v1057_v17, 0.0 }
 0x2ae   :  { %v1080_v60 = vsel %vm856_vm0, %v1048_v42, 0.0  ;;  %v1127_v4 = vmul.f32 %v1095_v33, %v1095_v33  ;;  %v1121_v42 = vmul.f32 %v1089_v44, %v1089_v44 }
 0x2af   :  { %1168 = vadd.xlane.f32.xlu0 %v1117_v53  ;;  %1138 = vadd.xlane.f32.xlu1 %v1102_v32  ;;  %v2917_v53 = vld [vmem:[#allocation5_spill] sm:$0xff] }
 0x2b0   :  { %v1056_v32 = vsub.f32 %v2917_v53, %v1027_v52 }
 0x2b3   :  { %1184 = vadd.xlane.f32.xlu0 %v1125_v59  ;;  %1154 = vadd.xlane.f32.xlu1 %v1110_v61  ;;  %v1112_v59 = vmul.f32 %v1080_v60, %v1080_v60  ;;  %v2919_v61 = vld [vmem:[#allocation8_spill] sm:$0xff] }
 0x2b4   :  { %v1064_v34 = vsub.f32 %v2919_v61, %v1027_v52 }
 0x2b6   :  { %v1096_v52 = vsel %vm856_vm0, %v1064_v34, 0.0 }
 0x2b7   :  { %1140 = vadd.xlane.f32.xlu0 %v1103_v7  ;;  %1170 = vadd.xlane.f32.xlu1 %v1118_v8  ;;  %v1088_v7 = vsel %vm856_vm0, %v1056_v32, 0.0  ;;  %v1105_v8 = vmul.f32 %v1073_v37, %v1073_v37 }
 0x2b8   :  { %v1120_v9 = vmul.f32 %v1088_v7, %v1088_v7 }
 0x2bb   :  { %1156 = vadd.xlane.f32.xlu0 %v1111_v23  ;;  %1186 = vadd.xlane.f32.xlu1 %v1126_v29  ;;  %v1113_v23 = vmul.f32 %v1081_v18, %v1081_v18  ;;  %v1128_v29 = vmul.f32 %v1096_v52, %v1096_v52 }
 0x2bf   :  { %1172 = vadd.xlane.f32.xlu0 %v1119_v30  ;;  %1142 = vadd.xlane.f32.xlu1 %v1104_v6  ;;  %v1097_v30 = vsel %vm856_vm0, %v1065_v54, 0.0 }
 0x2c0   :  { %v1129_v6 = vmul.f32 %v1097_v30, %v1097_v30 }
 0x2c3   :  { %1188 = vadd.xlane.f32.xlu0 %v1127_v4  ;;  %1158 = vadd.xlane.f32.xlu1 %v1112_v59 }
 0x2c7   :  { %1144 = vadd.xlane.f32.xlu0 %v1105_v8  ;;  %1174 = vadd.xlane.f32.xlu1 %v1120_v9 }
 0x2cb   :  { %1160 = vadd.xlane.f32.xlu0 %v1113_v23  ;;  %1190 = vadd.xlane.f32.xlu1 %v1128_v29 }
 0x2cf   :  { %1176 = vadd.xlane.f32.xlu0 %v1121_v42 }
 0x2d3   :  { %1192 = vadd.xlane.f32.xlu0 %v1129_v6 }
 0x320   :  { %v1147_v32 = vpop.xlane.xlu1 %1146  ;;  %v1131_v56 = vpop.xlane.xlu0 %1130 }
 0x321   :  { %v1202_v4 = vadd.f32 %v1147_v32, %v1131_v56  ;;  %v1234_v32 = vld [vmem:[%s2888_s3] sm:$0xff] }
 0x324   :  { %v1163_v33 = vpop.xlane.xlu1 %1162  ;;  %v1149_v60 = vpop.xlane.xlu0 %1148 }
 0x325   :  { %v1210_v59 = vadd.f32 %v1202_v4, %v1163_v33 }
 0x328   :  { %v1179_v34 = vpop.xlane.xlu1 %1178  ;;  %v1165_v15 = vpop.xlane.xlu0 %1164 }
 0x329   :  { %v1218_v1 = vadd.f32 %v1210_v59, %v1179_v34 }
 0x32b   :  { %v1226_v37 = vmul.f32 0.0078125, %v1218_v1 }
 0x32c   :  { %v1133_v7 = vpop.xlane.xlu1 %1132  ;;  %v1181_v8 = vpop.xlane.xlu0 %1180 }
 0x32d   :  { %v1242_v9 = vadd.f32 1e-05, %v1226_v37  ;;  %v1203_v17 = vadd.f32 %v1149_v60, %v1133_v7 }
 0x32f   :  { %1666 = vrsqrt.f32 %v1242_v9  ;;  %v1211_v5 = vadd.f32 %v1203_v17, %v1165_v15  ;;  %v1235_v9 = vld [vmem:[%s2888_s3 + $0x8] sm:$0xff] }
 0x330   :  { %v1151_v18 = vpop.xlane.xlu1 %1150  ;;  %v1135_v52 = vpop.xlane.xlu0 %1134 }
 0x331   :  { %v1219_v23 = vadd.f32 %v1211_v5, %v1181_v8  ;;  %v1204_v30 = vadd.f32 %v1151_v18, %v1135_v52 }
 0x333   :  { %v1227_v29 = vmul.f32 0.0078125, %v1219_v23 }
 0x334   :  { %v1167_v54 = vpop.xlane.xlu1 %1166  ;;  %v1137_v44 = vpop.xlane.xlu0 %1136 }
 0x335   :  { %v1243_v42 = vadd.f32 1e-05, %v1227_v29  ;;  %v1212_v6 = vadd.f32 %v1204_v30, %v1167_v54 }
 0x337   :  { %1668 = vrsqrt.f32 %v1243_v42  ;;  %v1266_v42 = vld [vmem:[%s2889_s4] sm:$0xff] }
 0x338   :  { %v1183_v56 = vpop.xlane.xlu1 %1182  ;;  %v1153_v33 = vpop.xlane.xlu0 %1152 }
 0x339   :  { %v1667_v4 = vpop.eup %1666  ;;  %v1220_v60 = vadd.f32 %v1212_v6, %v1183_v56  ;;  %v1205_v7 = vadd.f32 %v1153_v33, %v1137_v44 }
 0x33a   :  { %v1258_v59 = vmul.f32 %v1667_v4, %v1234_v32  ;;  %v1236_v4 = vld [vmem:[%s2888_s3 + $0x10] sm:$0xff] }
 0x33b   :  { %v1228_v34 = vmul.f32 0.0078125, %v1220_v60 }
 0x33c   :  { %v1139_v15 = vpop.xlane.xlu1 %1138  ;;  %1292 = vperm.xlu1 %1665, %v1258_v59   ;;  %v1169_v1 = vpop.xlane.xlu0 %1168  ;;  %v1274_v29 = vmul.f32 %v1258_v59, %v2581_v21 }
 0x33d   :  { %v1244_v37 = vadd.f32 1e-05, %v1228_v34  ;;  %v1213_v8 = vadd.f32 %v1205_v7, %v1169_v1 }
 0x33e   :  { %v1282_v56 = vsub.f32 %v1266_v42, %v1274_v29 }
 0x33f   :  { %1670 = vrsqrt.f32 %v1244_v37 }
 0x340   :  { %v1155_v17 = vpop.xlane.xlu1 %1154  ;;  %v1185_v5 = vpop.xlane.xlu0 %1184 }
 0x341   :  { %v1669_v18 = vpop.eup %1668  ;;  %v1221_v52 = vadd.f32 %v1213_v8, %v1185_v5  ;;  %v1206_v6 = vadd.f32 %v1155_v17, %v1139_v15  ;;  %v1267_v15 = vld [vmem:[%s2889_s4 + $0x8] sm:$0xff]  ;;  %v1268_v8 = vld [vmem:[%s2889_s4 + $0x10] sm:$0xff] }
 0x342   :  { %v1259_v23 = vmul.f32 %v1669_v18, %v1235_v9 }
 0x343   :  { %v1229_v54 = vmul.f32 0.0078125, %v1221_v52 }
 0x344   :  { %v1171_v30 = vpop.xlane.xlu1 %1170  ;;  %1297 = vperm.xlu0 %1664, %v1259_v23   ;;  %v1141_v44 = vpop.xlane.xlu0 %1140  ;;  %v1275_v37 = vmul.f32 %v1259_v23, %v2584_v3  ;;  %v1237_v23 = vld [vmem:[%s2888_s3 + $0x18] sm:$0xff] }
 0x345   :  { %v1245_v32 = vadd.f32 1e-05, %v1229_v54  ;;  %v1214_v33 = vadd.f32 %v1206_v6, %v1171_v30 }
 0x346   :  { %v1283_v29 = vsub.f32 %v1267_v15, %v1275_v37  ;;  %v1238_v37 = vld [vmem:[%s2888_s3 + $0x20] sm:$0xff] }
 0x347   :  { %1672 = vrsqrt.f32 %v1245_v32 }
 0x348   :  { %v1187_v60 = vpop.xlane.xlu1 %1186  ;;  %1364 = vperm.xlu0 %1664, %v1282_v56   ;;  %v1157_v21 = vpop.xlane.xlu0 %1156 }
 0x349   :  { %v1671_v59 = vpop.eup %1670  ;;  %v1222_v34 = vadd.f32 %v1214_v33, %v1187_v60  ;;  %v1207_v52 = vadd.f32 %v1157_v21, %v1141_v44 }
 0x34a   :  { %v1260_v1 = vmul.f32 %v1671_v59, %v1236_v4 }
 0x34b   :  { %v1230_v7 = vmul.f32 0.0078125, %v1222_v34 }
 0x34c   :  { %v1143_v9 = vpop.xlane.xlu1 %1142  ;;  %1302 = vperm.xlu1 %1665, %v1260_v1   ;;  %v1173_v17 = vpop.xlane.xlu0 %1172  ;;  %v1276_v5 = vmul.f32 %v1260_v1, %v2587_v38  ;;  %v1269_v38 = vld [vmem:[%s2889_s4 + $0x18] sm:$0xff] }
 0x34d   :  { %v1246_v18 = vadd.f32 1e-05, %v1230_v7  ;;  %v1215_v3 = vadd.f32 %v1207_v52, %v1173_v17 }
 0x34e   :  { %v1284_v54 = vsub.f32 %v1268_v8, %v1276_v5 }
 0x34f   :  { %1674 = vrsqrt.f32 %v1246_v18 }
 0x350   :  { %v1159_v42 = vpop.xlane.xlu1 %1158  ;;  %1369 = vperm.xlu1 %1665, %v1283_v29   ;;  %1374 = vperm.xlu0 %1664, %v1284_v54   ;;  %v1189_v30 = vpop.xlane.xlu0 %1188 }
 0x351   :  { %v1673_v6 = vpop.eup %1672  ;;  %v1223_v32 = vadd.f32 %v1215_v3, %v1189_v30  ;;  %v1208_v21 = vadd.f32 %v1159_v42, %v1143_v9  ;;  %v1239_v42 = vld [vmem:[%s2888_s3 + $0x28] sm:$0xff] }
 0x352   :  { %v1261_v56 = vmul.f32 %v1673_v6, %v1237_v23 }
 0x353   :  { %v1231_v33 = vmul.f32 0.0078125, %v1223_v32 }
 0x354   :  { %v1175_v44 = vpop.xlane.xlu1 %1174  ;;  %1307 = vperm.xlu1 %1665, %v1261_v56   ;;  %v1145_v4 = vpop.xlane.xlu0 %1144  ;;  %v1277_v60 = vmul.f32 %v1261_v56, %v2590_v19  ;;  %v1270_v19 = vld [vmem:[%s2889_s4 + $0x20] sm:$0xff] }
 0x355   :  { %v1247_v59 = vadd.f32 1e-05, %v1231_v33  ;;  %v1216_v1 = vadd.f32 %v1208_v21, %v1175_v44 }
 0x356   :  { %v1285_v34 = vsub.f32 %v1269_v38, %v1277_v60  ;;  %v1271_v38 = vld [vmem:[%s2889_s4 + $0x28] sm:$0xff]  ;;  %v1240_v60 = vld [vmem:[%s2888_s3 + $0x30] sm:$0xff] }
 0x357   :  { %1676 = vrsqrt.f32 %v1247_v59 }
 0x358   :  { %v1191_v7 = vpop.xlane.xlu1 %1190  ;;  %1379 = vperm.xlu1 %1665, %v1285_v34   ;;  %v1161_v15 = vpop.xlane.xlu0 %1160  ;;  %v1272_v34 = vld [vmem:[%s2889_s4 + $0x30] sm:$0xff] }
 0x359   :  { %v1675_v8 = vpop.eup %1674  ;;  %v1224_v17 = vadd.f32 %v1216_v1, %v1191_v7  ;;  %v1209_v54 = vadd.f32 %v1161_v15, %v1145_v4 }
 0x35a   :  { %v1262_v5 = vmul.f32 %v1675_v8, %v1238_v37  ;;  %v1273_v8 = vld [vmem:[%s2889_s4 + $0x38] sm:$0xff] }
 0x35b   :  { %v1232_v18 = vmul.f32 0.0078125, %v1224_v17 }
 0x35c   :  { %1312 = vperm.xlu0 %1664, %v1262_v5   ;;  %v1177_v9 = vpop.xlane.xlu0 %1176  ;;  %v1278_v52 = vmul.f32 %v1262_v5, %v2593_v28 }
 0x35d   :  { %v1248_v29 = vadd.f32 1e-05, %v1232_v18  ;;  %v1217_v23 = vadd.f32 %v1209_v54, %v1177_v9 }
 0x35e   :  { %v1286_v3 = vsub.f32 %v1270_v19, %v1278_v52 }
 0x35f   :  { %1678 = vrsqrt.f32 %v1248_v29 }
 0x360   :  { %1384 = vperm.xlu0 %1664, %v1286_v3   ;;  %v1193_v30 = vpop.xlane.xlu0 %1192 }
 0x361   :  { %v1677_v6 = vpop.eup %1676  ;;  %v1225_v32 = vadd.f32 %v1217_v23, %v1193_v30 }
 0x362   :  { %v1263_v56 = vmul.f32 %v1677_v6, %v1239_v42 }
 0x363   :  { %v1233_v33 = vmul.f32 0.0078125, %v1225_v32 }
 0x364   :  { %1317 = vperm.xlu1 %1665, %v1263_v56   ;;  %v1279_v28 = vmul.f32 %v1263_v56, %v2596_v45  ;;  %v1241_v45 = vld [vmem:[%s2888_s3 + $0x38] sm:$0xff] }
 0x365   :  { %v1249_v44 = vadd.f32 1e-05, %v1233_v33 }
 0x366   :  { %v1287_v4 = vsub.f32 %v1271_v38, %v1279_v28 }
 0x367   :  { %1680 = vrsqrt.f32 %v1249_v44 }
 0x368   :  { %1389 = vperm.xlu1 %1665, %v1287_v4  }
 0x369   :  { %v1679_v21 = vpop.eup %1678 }
 0x36a   :  { %v1264_v59 = vmul.f32 %v1679_v21, %v1240_v60 }
 0x36c   :  { %1322 = vperm.xlu0 %1664, %v1264_v59   ;;  %v1280_v1 = vmul.f32 %v1264_v59, %v2599_v48 }
 0x36e   :  { %v1288_v37 = vsub.f32 %v1272_v34, %v1280_v1 }
 0x370   :  { %1394 = vperm.xlu0 %1664, %v1288_v37  }
 0x371   :  { %v1681_v7 = vpop.eup %1680 }
 0x372   :  { %v1265_v15 = vmul.f32 %v1681_v7, %v1241_v45 }
 0x374   :  { %1327 = vperm.xlu1 %1665, %v1265_v15   ;;  %v1281_v17 = vmul.f32 %v1265_v15, %v2602_v63 }
 0x376   :  { %v1289_v5 = vsub.f32 %v1273_v8, %v1281_v17 }
 0x378   :  { %1399 = vperm.xlu1 %1665, %v1289_v5  }
 0x3bb   :  { %v1293_v18 = vpop.permute.xlu1 %1292 }
 0x3bc   :  { %v1330_v48 = vmul.f32 %v1293_v18, %v2421_v11  ;;  %v1338_v9 = vmul.f32 %v1293_v18, %v2461_v13  ;;  %v1346_v52 = vmul.f32 %v1293_v18, %v2501_v25  ;;  %v1354_v29 = vmul.f32 %v1293_v18, %v2541_v51 }
 0x3c3   :  { %v1298_v19 = vpop.permute.xlu0 %1297 }
 0x3c4   :  { %v1331_v11 = vmul.f32 %v1298_v19, %v2426_v20  ;;  %v1339_v13 = vmul.f32 %v1298_v19, %v2466_v22  ;;  %v1347_v25 = vmul.f32 %v1298_v19, %v2506_v36  ;;  %v1355_v51 = vmul.f32 %v1298_v19, %v2546_v62 }
 0x3c7   :  { %v1365_v54 = vpop.permute.xlu0 %1364 }
 0x3c8   :  { %v1402_v3 = vadd.f32 %v1365_v54, %v1330_v48  ;;  %v1410_v23 = vadd.f32 %v1365_v54, %v1338_v9  ;;  %v1418_v42 = vadd.f32 %v1365_v54, %v1346_v52  ;;  %v1426_v30 = vadd.f32 %v1365_v54, %v1354_v29 }
 0x3ca   :  { %v1434_v6 = vmax.f32 %v1402_v3, 0.0  ;;  %v1442_v32 = vmax.f32 %v1410_v23, 0.0  ;;  %v1450_v63 = vmax.f32 %v1418_v42, 0.0  ;;  %v1458_v56 = vmax.f32 %v1426_v30, 0.0 }
 0x3cb   :  { %v1303_v33 = vpop.permute.xlu1 %1302 }
 0x3cc   :  { %1466 = vst [vmem:[%s2890_s5] sm:$0xff] %v1434_v6  ;;  %1474 = vst [vmem:[%s2890_s5 + $0x40] sm:$0xff] %v1442_v32  ;;  %v1332_v38 = vmul.f32 %v1303_v33, %v2431_v27  ;;  %v1340_v28 = vmul.f32 %v1303_v33, %v2471_v31  ;;  %v1348_v44 = vmul.f32 %v1303_v33, %v2511_v46 }
 0x3cd   :  { %1482 = vst [vmem:[%s2890_s5 + $0x80] sm:$0xff] %v1450_v63  ;;  %1490 = vst [vmem:[%s2890_s5 + $0xc0] sm:$0xff] %v1458_v56  ;;  %v1356_v4 = vmul.f32 %v1303_v33, %v2551_v12 }
 0x3cf   :  { %v1370_v60 = vpop.permute.xlu1 %1369  ;;  %v1375_v21 = vpop.permute.xlu0 %1374 }
 0x3d0   :  { %v1403_v59 = vadd.f32 %v1370_v60, %v1331_v11  ;;  %v1411_v34 = vadd.f32 %v1370_v60, %v1339_v13  ;;  %v1419_v1 = vadd.f32 %v1370_v60, %v1347_v25  ;;  %v1427_v20 = vadd.f32 %v1370_v60, %v1355_v51 }
 0x3d1   :  { %v1404_v37 = vadd.f32 %v1375_v21, %v1332_v38  ;;  %v1412_v22 = vadd.f32 %v1375_v21, %v1340_v28  ;;  %v1420_v45 = vadd.f32 %v1375_v21, %v1348_v44  ;;  %v1428_v36 = vadd.f32 %v1375_v21, %v1356_v4 }
 0x3d2   :  { %v1435_v7 = vmax.f32 %v1403_v59, 0.0  ;;  %v1443_v62 = vmax.f32 %v1411_v34, 0.0  ;;  %v1451_v15 = vmax.f32 %v1419_v1, 0.0  ;;  %v1459_v27 = vmax.f32 %v1427_v20, 0.0 }
 0x3d3   :  { %v1436_v8 = vmax.f32 %v1404_v37, 0.0  ;;  %v1444_v31 = vmax.f32 %v1412_v22, 0.0  ;;  %v1452_v17 = vmax.f32 %v1420_v45, 0.0  ;;  %v1460_v46 = vmax.f32 %v1428_v36, 0.0  ;;  %v1308_v5 = vpop.permute.xlu1 %1307 }
 0x3d4   :  { %1467 = vst [vmem:[%s2890_s5 + $0x8] sm:$0xff] %v1435_v7  ;;  %1475 = vst [vmem:[%s2890_s5 + $0x48] sm:$0xff] %v1443_v62  ;;  %v1333_v12 = vmul.f32 %v1308_v5, %v2436_v35  ;;  %v1341_v18 = vmul.f32 %v1308_v5, %v2476_v40  ;;  %v1349_v19 = vmul.f32 %v1308_v5, %v2516_v55 }
 0x3d5   :  { %1483 = vst [vmem:[%s2890_s5 + $0x88] sm:$0xff] %v1451_v15  ;;  %1491 = vst [vmem:[%s2890_s5 + $0xc8] sm:$0xff] %v1459_v27  ;;  %v1357_v48 = vmul.f32 %v1308_v5, %v2556_v26 }
 0x3d6   :  { %1468 = vst [vmem:[%s2890_s5 + $0x10] sm:$0xff] %v1436_v8  ;;  %1476 = vst [vmem:[%s2890_s5 + $0x50] sm:$0xff] %v1444_v31 }
 0x3d7   :  { %1484 = vst [vmem:[%s2890_s5 + $0x90] sm:$0xff] %v1452_v17  ;;  %1492 = vst [vmem:[%s2890_s5 + $0xd0] sm:$0xff] %v1460_v46  ;;  %v1380_v9 = vpop.permute.xlu1 %1379 }
 0x3d8   :  { %v1405_v52 = vadd.f32 %v1380_v9, %v1333_v12  ;;  %v1413_v29 = vadd.f32 %v1380_v9, %v1341_v18  ;;  %v1421_v54 = vadd.f32 %v1380_v9, %v1349_v19  ;;  %v1429_v3 = vadd.f32 %v1380_v9, %v1357_v48 }
 0x3da   :  { %v1437_v23 = vmax.f32 %v1405_v52, 0.0  ;;  %v1445_v42 = vmax.f32 %v1413_v29, 0.0  ;;  %v1453_v30 = vmax.f32 %v1421_v54, 0.0  ;;  %v1461_v6 = vmax.f32 %v1429_v3, 0.0 }
 0x3db   :  { %v1313_v32 = vpop.permute.xlu0 %1312 }
 0x3dc   :  { %1469 = vst [vmem:[%s2890_s5 + $0x18] sm:$0xff] %v1437_v23  ;;  %1477 = vst [vmem:[%s2890_s5 + $0x58] sm:$0xff] %v1445_v42  ;;  %v1334_v35 = vmul.f32 %v1313_v32, %v2441_v43  ;;  %v1342_v40 = vmul.f32 %v1313_v32, %v2481_v0  ;;  %v1350_v55 = vmul.f32 %v1313_v32, %v2521_v2 }
 0x3dd   :  { %1485 = vst [vmem:[%s2890_s5 + $0x98] sm:$0xff] %v1453_v30  ;;  %1493 = vst [vmem:[%s2890_s5 + $0xd8] sm:$0xff] %v1461_v6  ;;  %v1358_v26 = vmul.f32 %v1313_v32, %v2561_v41 }
 0x3df   :  { %v1385_v63 = vpop.permute.xlu0 %1384 }
 0x3e0   :  { %v1406_v56 = vadd.f32 %v1385_v63, %v1334_v35  ;;  %v1414_v33 = vadd.f32 %v1385_v63, %v1342_v40  ;;  %v1422_v11 = vadd.f32 %v1385_v63, %v1350_v55  ;;  %v1430_v13 = vadd.f32 %v1385_v63, %v1358_v26 }
 0x3e2   :  { %v1438_v25 = vmax.f32 %v1406_v56, 0.0  ;;  %v1446_v51 = vmax.f32 %v1414_v33, 0.0  ;;  %v1454_v38 = vmax.f32 %v1422_v11, 0.0  ;;  %v1462_v28 = vmax.f32 %v1430_v13, 0.0 }
 0x3e3   :  { %v1318_v44 = vpop.permute.xlu1 %1317 }
 0x3e4   :  { %1470 = vst [vmem:[%s2890_s5 + $0x20] sm:$0xff] %v1438_v25  ;;  %1478 = vst [vmem:[%s2890_s5 + $0x60] sm:$0xff] %v1446_v51  ;;  %v1335_v43 = vmul.f32 %v1318_v44, %v2446_v50  ;;  %v1343_v0 = vmul.f32 %v1318_v44, %v2486_v57  ;;  %v1351_v2 = vmul.f32 %v1318_v44, %v2526_v16 }
 0x3e5   :  { %1486 = vst [vmem:[%s2890_s5 + $0xa0] sm:$0xff] %v1454_v38  ;;  %1494 = vst [vmem:[%s2890_s5 + $0xe0] sm:$0xff] %v1462_v28  ;;  %v1359_v41 = vmul.f32 %v1318_v44, %v2915_v24 }
 0x3e7   :  { %v1390_v4 = vpop.permute.xlu1 %1389 }
 0x3e8   :  { %v1407_v60 = vadd.f32 %v1390_v4, %v1335_v43  ;;  %v1415_v21 = vadd.f32 %v1390_v4, %v1343_v0  ;;  %v1423_v59 = vadd.f32 %v1390_v4, %v1351_v2  ;;  %v1431_v34 = vadd.f32 %v1390_v4, %v1359_v41 }
 0x3ea   :  { %v1439_v1 = vmax.f32 %v1407_v60, 0.0  ;;  %v1447_v20 = vmax.f32 %v1415_v21, 0.0  ;;  %v1455_v37 = vmax.f32 %v1423_v59, 0.0  ;;  %v1463_v22 = vmax.f32 %v1431_v34, 0.0 }
 0x3eb   :  { %v1323_v45 = vpop.permute.xlu0 %1322 }
 0x3ec   :  { %1471 = vst [vmem:[%s2890_s5 + $0x28] sm:$0xff] %v1439_v1  ;;  %1479 = vst [vmem:[%s2890_s5 + $0x68] sm:$0xff] %v1447_v20  ;;  %v1336_v50 = vmul.f32 %v1323_v45, %v2451_v58  ;;  %v1344_v57 = vmul.f32 %v1323_v45, %v2916_v39  ;;  %v1352_v16 = vmul.f32 %v1323_v45, %v2917_v53 }
 0x3ed   :  { %1487 = vst [vmem:[%s2890_s5 + $0xa8] sm:$0xff] %v1455_v37  ;;  %1495 = vst [vmem:[%s2890_s5 + $0xe8] sm:$0xff] %v1463_v22  ;;  %v1360_v24 = vmul.f32 %v1323_v45, %v2919_v61 }
 0x3ef   :  { %v1395_v36 = vpop.permute.xlu0 %1394 }
 0x3f0   :  { %v1408_v7 = vadd.f32 %v1395_v36, %v1336_v50  ;;  %v1416_v62 = vadd.f32 %v1395_v36, %v1344_v57  ;;  %v1424_v15 = vadd.f32 %v1395_v36, %v1352_v16  ;;  %v1432_v27 = vadd.f32 %v1395_v36, %v1360_v24 }
 0x3f2   :  { %v1440_v8 = vmax.f32 %v1408_v7, 0.0  ;;  %v1448_v31 = vmax.f32 %v1416_v62, 0.0  ;;  %v1456_v17 = vmax.f32 %v1424_v15, 0.0  ;;  %v1464_v46 = vmax.f32 %v1432_v27, 0.0 }
 0x3f3   :  { %v1328_v5 = vpop.permute.xlu1 %1327 }
 0x3f4   :  { %1472 = vst [vmem:[%s2890_s5 + $0x30] sm:$0xff] %v1440_v8  ;;  %1480 = vst [vmem:[%s2890_s5 + $0x70] sm:$0xff] %v1448_v31  ;;  %v1337_v58 = vmul.f32 %v1328_v5, %v2918_v47  ;;  %v1345_v39 = vmul.f32 %v1328_v5, %v2920_v49  ;;  %v1353_v53 = vmul.f32 %v1328_v5, %v2921_v10 }
 0x3f5   :  { %1488 = vst [vmem:[%s2890_s5 + $0xb0] sm:$0xff] %v1456_v17  ;;  %1496 = vst [vmem:[%s2890_s5 + $0xf0] sm:$0xff] %v1464_v46  ;;  %v1361_v61 = vmul.f32 %v1328_v5, %v2922_v14 }
 0x3f7   :  { %v1400_v12 = vpop.permute.xlu1 %1399 }
 0x3f8   :  { %v1409_v18 = vadd.f32 %v1400_v12, %v1337_v58  ;;  %v1417_v19 = vadd.f32 %v1400_v12, %v1345_v39  ;;  %v1425_v48 = vadd.f32 %v1400_v12, %v1353_v53  ;;  %v1433_v9 = vadd.f32 %v1400_v12, %v1361_v61 }
 0x3fa   :  { %v1441_v52 = vmax.f32 %v1409_v18, 0.0  ;;  %v1449_v29 = vmax.f32 %v1417_v19, 0.0  ;;  %v1457_v54 = vmax.f32 %v1425_v48, 0.0  ;;  %v1465_v3 = vmax.f32 %v1433_v9, 0.0 }
 0x3fc   :  { %1473 = vst [vmem:[%s2890_s5 + $0x38] sm:$0xff] %v1441_v52  ;;  %1481 = vst [vmem:[%s2890_s5 + $0x78] sm:$0xff] %v1449_v29 }
 0x3fd   :  { %1489 = vst [vmem:[%s2890_s5 + $0xb8] sm:$0xff] %v1457_v54  ;;  %1497 = vst [vmem:[%s2890_s5 + $0xf8] sm:$0xff] %v1465_v3 }

// kernel: tile.23
= control target key start
LH: loop header
LB: loop body
LE: loop exit
PB: predicated region body
PF: predicated region fallthrough
CT: control target
= control target key end

     0   :  { %s22_s0 = inlined_call_operand.vmem [shape: f32[32], index: 0, kind: input, shape index: {}]   ;;  %s23_s1 = inlined_call_operand.vmem [shape: f32[4,32], index: 1, kind: output, shape index: {}]  }
   0x1   :  { %v4_v0 = vld [vmem:[%s22_s0] ss:$0 sm:$0xff] }
   0x2   :  { %5 = vst [vmem:[%s23_s1] sm:$0xf] %v4_v0 }

// kernel: tile.1
= control target key start
LH: loop header
LB: loop body
LE: loop exit
PB: predicated region body
PF: predicated region fallthrough
CT: control target
= control target key end

     0   :  { %s546_s8 = smov 125   ;;  %s547_s9 = smov 126   ;;  %vm7_vm0 = vcmask 7168   ;;  %s1101_s0 = inlined_call_operand.vmem [shape: f32[4,32], index: 0, kind: input, shape index: {}]   ;;  %s1102_s1 = inlined_call_operand.vmem [shape: f32[128,1], index: 1, kind: output, shape index: {}]  }
   0x1   :  { %v4_v0 = vld [vmem:[%s1101_s0] sm:$0xf]  ;;  %s545_s0 = smov 127   ;;  %s548_s10 = smov 124  }
   0x2   :  { %5 = vst [vmem:[#allocation0] sm:$0xf] %v4_v0  ;;  %s549_s11 = smov 123   ;;  %s550_s12 = smov 122  }
   0x3   :  { %s551_s13 = smov 121   ;;  %s552_s14 = smov 120  }
   0x4   :  { %s553_s15 = smov 119   ;;  %s554_s16 = smov 118  }
   0x5   :  { %s555_s17 = smov 117   ;;  %s556_s18 = smov 116  }
   0x6   :  { %s557_s19 = smov 115   ;;  %s558_s20 = smov 114  }
   0x7   :  { %s559_s21 = smov 113   ;;  %s560_s22 = smov 112  }
   0x8   :  { %s561_s23 = smov 111   ;;  %s562_s24 = smov 110  }
   0x9   :  { %v15_v1 = vld [vmem:[#allocation0] sm:$0xf]   ;;  %s563_s25 = smov 109   ;;  %s564_s26 = smov 108  }
   0xa   :  { %v39_v2 = vld [vmem:[#allocation0] sm:$0xf]   ;;  %16 = vrot.lane.b32.xlu0 %v15_v1, %s545_s0  ;;  %s565_s27 = smov 107   ;;  %s566_s28 = smov 106  }
   0xb   :  { %40 = vrot.lane.b32.xlu1 %v39_v2, %s546_s8  ;;  %v27_v3 = vld [vmem:[#allocation0] sm:$0xf]   ;;  %s567_s29 = smov 105   ;;  %s568_s30 = smov 104  }
   0xc   :  { %v51_v4 = vld [vmem:[#allocation0] sm:$0xf]  }
   0xd   :  { %v63_v5 = vld [vmem:[#allocation0] sm:$0xf]  }
   0xe   :  { %28 = vrot.lane.b32.xlu0 %v27_v3, %s547_s9  ;;  %v75_v6 = vld [vmem:[#allocation0] sm:$0xf]   ;;  %s569_s9 = smov 103  }
   0xf   :  { %52 = vrot.lane.b32.xlu1 %v51_v4, %s548_s10  ;;  %v87_v7 = vld [vmem:[#allocation0] sm:$0xf]   ;;  %s570_s10 = smov 102  }
  0x10   :  { %v99_v8 = vld [vmem:[#allocation0] sm:$0xf]  }
  0x11   :  { %v111_v9 = vld [vmem:[#allocation0] sm:$0xf]  }
  0x12   :  { %64 = vrot.lane.b32.xlu0 %v63_v5, %s549_s11  ;;  %v123_v10 = vld [vmem:[#allocation0] sm:$0xf]   ;;  %s571_s11 = smov 101  }
  0x13   :  { %76 = vrot.lane.b32.xlu1 %v75_v6, %s550_s12  ;;  %v135_v11 = vld [vmem:[#allocation0] sm:$0xf]   ;;  %s572_s12 = smov 100  }
  0x14   :  { %v147_v12 = vld [vmem:[#allocation0] sm:$0xf]  }
  0x15   :  { %v159_v13 = vld [vmem:[#allocation0] sm:$0xf]  }
  0x16   :  { %88 = vrot.lane.b32.xlu0 %v87_v7, %s551_s13  ;;  %v171_v14 = vld [vmem:[#allocation0] sm:$0xf]   ;;  %s573_s13 = smov 99  }
  0x17   :  { %100 = vrot.lane.b32.xlu1 %v99_v8, %s552_s14  ;;  %v183_v15 = vld [vmem:[#allocation0] sm:$0xf]   ;;  %s574_s14 = smov 98  }
  0x18   :  { %v195_v16 = vld [vmem:[#allocation0] sm:$0xf]  }
  0x19   :  { %v207_v17 = vld [vmem:[#allocation0] sm:$0xf]  }
  0x1a   :  { %112 = vrot.lane.b32.xlu0 %v111_v9, %s553_s15  ;;  %v219_v18 = vld [vmem:[#allocation0] sm:$0xf]   ;;  %s575_s15 = smov 97  }
  0x1b   :  { %124 = vrot.lane.b32.xlu1 %v123_v10, %s554_s16  ;;  %v231_v19 = vld [vmem:[#allocation0] sm:$0xf]  }
  0x1c   :  { %v243_v20 = vld [vmem:[#allocation0] sm:$0xf]  }
  0x1d   :  { %v255_v21 = vld [vmem:[#allocation0] sm:$0xf]  }
  0x1e   :  { %136 = vrot.lane.b32.xlu0 %v135_v11, %s555_s17  ;;  %v267_v22 = vld [vmem:[#allocation0] sm:$0xf]  }
  0x1f   :  { %148 = vrot.lane.b32.xlu1 %v147_v12, %s556_s18  ;;  %v279_v23 = vld [vmem:[#allocation0] sm:$0xf]  }
  0x20   :  { %v291_v24 = vld [vmem:[#allocation0] sm:$0xf]  }
  0x21   :  { %v303_v25 = vld [vmem:[#allocation0] sm:$0xf]  }
  0x22   :  { %160 = vrot.lane.b32.xlu0 %v159_v13, %s557_s19  ;;  %v315_v26 = vld [vmem:[#allocation0] sm:$0xf]  }
  0x23   :  { %172 = vrot.lane.b32.xlu1 %v171_v14, %s558_s20  ;;  %v6_v27 = vld [vmem:[#allocation0] sm:$0xf]  }
  0x24   :  { %8 = vst.msk [vmem:[%s1102_s1] sm:$0x1] %vm7_vm0, %v6_v27   ;;  %387 = vst.msk [vmem:[%s1102_s1 + $0x1f] sm:$0x2] %vm7_vm0, %v6_v27   ;;  %v327_v28 = vld [vmem:[#allocation0] sm:$0xf]  }
  0x25   :  { %388 = vst.msk [vmem:[%s1102_s1 + $0x3e] sm:$0x4] %vm7_vm0, %v6_v27   ;;  %389 = vst.msk [vmem:[%s1102_s1 + $0x5d] sm:$0x8] %vm7_vm0, %v6_v27   ;;  %v339_v29 = vld [vmem:[#allocation0] sm:$0xf]  }
  0x26   :  { %184 = vrot.lane.b32.xlu0 %v183_v15, %s559_s21  ;;  %v351_v30 = vld [vmem:[#allocation0] sm:$0xf]  }
  0x27   :  { %196 = vrot.lane.b32.xlu1 %v195_v16, %s560_s22  ;;  %v363_v31 = vld [vmem:[#allocation0] sm:$0xf]  }
  0x28   :  { %v375_v32 = vld [vmem:[#allocation0] sm:$0xf]  }
  0x2a   :  { %208 = vrot.lane.b32.xlu0 %v207_v17, %s561_s23 }
  0x2b   :  { %220 = vrot.lane.b32.xlu1 %v219_v18, %s562_s24 }
  0x2e   :  { %232 = vrot.lane.b32.xlu0 %v231_v19, %s563_s25 }
  0x2f   :  { %244 = vrot.lane.b32.xlu1 %v243_v20, %s564_s26 }
  0x32   :  { %256 = vrot.lane.b32.xlu0 %v255_v21, %s565_s27 }
  0x33   :  { %268 = vrot.lane.b32.xlu1 %v267_v22, %s566_s28 }
  0x36   :  { %280 = vrot.lane.b32.xlu0 %v279_v23, %s567_s29 }
  0x37   :  { %292 = vrot.lane.b32.xlu1 %v291_v24, %s568_s30 }
  0x3a   :  { %304 = vrot.lane.b32.xlu0 %v303_v25, %s569_s9 }
  0x3b   :  { %316 = vrot.lane.b32.xlu1 %v315_v26, %s570_s10 }
  0x3e   :  { %328 = vrot.lane.b32.xlu0 %v327_v28, %s571_s11 }
  0x3f   :  { %340 = vrot.lane.b32.xlu1 %v339_v29, %s572_s12 }
  0x42   :  { %352 = vrot.lane.b32.xlu0 %v351_v30, %s573_s13 }
  0x43   :  { %364 = vrot.lane.b32.xlu1 %v363_v31, %s574_s14 }
  0x46   :  { %376 = vrot.lane.b32.xlu0 %v375_v32, %s575_s15 }
  0x7c   :  { %v17_v33 = vpop.permute.xlu0 %16  }
  0x7d   :  { %v41_v34 = vpop.permute.xlu1 %40   ;;  %390 = vst.msk [vmem:[%s1102_s1 + $0x1] sm:$0x1] %vm7_vm0, %v17_v33   ;;  %391 = vst.msk [vmem:[%s1102_s1 + $0x20] sm:$0x2] %vm7_vm0, %v17_v33  }
  0x7e   :  { %392 = vst.msk [vmem:[%s1102_s1 + $0x3f] sm:$0x4] %vm7_vm0, %v17_v33   ;;  %393 = vst.msk [vmem:[%s1102_s1 + $0x5e] sm:$0x8] %vm7_vm0, %v17_v33  }
  0x7f   :  { %398 = vst.msk [vmem:[%s1102_s1 + $0x3] sm:$0x1] %vm7_vm0, %v41_v34   ;;  %399 = vst.msk [vmem:[%s1102_s1 + $0x22] sm:$0x2] %vm7_vm0, %v41_v34  }
  0x80   :  { %400 = vst.msk [vmem:[%s1102_s1 + $0x41] sm:$0x4] %vm7_vm0, %v41_v34   ;;  %401 = vst.msk [vmem:[%s1102_s1 + $0x60] sm:$0x8] %vm7_vm0, %v41_v34   ;;  %v29_v35 = vpop.permute.xlu0 %28  }
  0x81   :  { %v53_v36 = vpop.permute.xlu1 %52   ;;  %394 = vst.msk [vmem:[%s1102_s1 + $0x2] sm:$0x1] %vm7_vm0, %v29_v35   ;;  %395 = vst.msk [vmem:[%s1102_s1 + $0x21] sm:$0x2] %vm7_vm0, %v29_v35  }
  0x82   :  { %396 = vst.msk [vmem:[%s1102_s1 + $0x40] sm:$0x4] %vm7_vm0, %v29_v35   ;;  %397 = vst.msk [vmem:[%s1102_s1 + $0x5f] sm:$0x8] %vm7_vm0, %v29_v35  }
  0x83   :  { %402 = vst.msk [vmem:[%s1102_s1 + $0x4] sm:$0x1] %vm7_vm0, %v53_v36   ;;  %403 = vst.msk [vmem:[%s1102_s1 + $0x23] sm:$0x2] %vm7_vm0, %v53_v36  }
  0x84   :  { %404 = vst.msk [vmem:[%s1102_s1 + $0x42] sm:$0x4] %vm7_vm0, %v53_v36   ;;  %405 = vst.msk [vmem:[%s1102_s1 + $0x61] sm:$0x8] %vm7_vm0, %v53_v36   ;;  %v65_v37 = vpop.permute.xlu0 %64  }
  0x85   :  { %v77_v38 = vpop.permute.xlu1 %76   ;;  %406 = vst.msk [vmem:[%s1102_s1 + $0x5] sm:$0x1] %vm7_vm0, %v65_v37   ;;  %407 = vst.msk [vmem:[%s1102_s1 + $0x24] sm:$0x2] %vm7_vm0, %v65_v37  }
  0x86   :  { %408 = vst.msk [vmem:[%s1102_s1 + $0x43] sm:$0x4] %vm7_vm0, %v65_v37   ;;  %409 = vst.msk [vmem:[%s1102_s1 + $0x62] sm:$0x8] %vm7_vm0, %v65_v37  }
  0x87   :  { %410 = vst.msk [vmem:[%s1102_s1 + $0x6] sm:$0x1] %vm7_vm0, %v77_v38   ;;  %411 = vst.msk [vmem:[%s1102_s1 + $0x25] sm:$0x2] %vm7_vm0, %v77_v38  }
  0x88   :  { %412 = vst.msk [vmem:[%s1102_s1 + $0x44] sm:$0x4] %vm7_vm0, %v77_v38   ;;  %413 = vst.msk [vmem:[%s1102_s1 + $0x63] sm:$0x8] %vm7_vm0, %v77_v38   ;;  %v89_v39 = vpop.permute.xlu0 %88  }
  0x89   :  { %v101_v40 = vpop.permute.xlu1 %100   ;;  %414 = vst.msk [vmem:[%s1102_s1 + $0x7] sm:$0x1] %vm7_vm0, %v89_v39   ;;  %415 = vst.msk [vmem:[%s1102_s1 + $0x26] sm:$0x2] %vm7_vm0, %v89_v39  }
  0x8a   :  { %416 = vst.msk [vmem:[%s1102_s1 + $0x45] sm:$0x4] %vm7_vm0, %v89_v39   ;;  %417 = vst.msk [vmem:[%s1102_s1 + $0x64] sm:$0x8] %vm7_vm0, %v89_v39  }
  0x8b   :  { %418 = vst.msk [vmem:[%s1102_s1 + $0x8] sm:$0x1] %vm7_vm0, %v101_v40   ;;  %419 = vst.msk [vmem:[%s1102_s1 + $0x27] sm:$0x2] %vm7_vm0, %v101_v40  }
  0x8c   :  { %420 = vst.msk [vmem:[%s1102_s1 + $0x46] sm:$0x4] %vm7_vm0, %v101_v40   ;;  %421 = vst.msk [vmem:[%s1102_s1 + $0x65] sm:$0x8] %vm7_vm0, %v101_v40   ;;  %v113_v41 = vpop.permute.xlu0 %112  }
  0x8d   :  { %v125_v42 = vpop.permute.xlu1 %124   ;;  %422 = vst.msk [vmem:[%s1102_s1 + $0x9] sm:$0x1] %vm7_vm0, %v113_v41   ;;  %423 = vst.msk [vmem:[%s1102_s1 + $0x28] sm:$0x2] %vm7_vm0, %v113_v41  }
  0x8e   :  { %424 = vst.msk [vmem:[%s1102_s1 + $0x47] sm:$0x4] %vm7_vm0, %v113_v41   ;;  %425 = vst.msk [vmem:[%s1102_s1 + $0x66] sm:$0x8] %vm7_vm0, %v113_v41  }
  0x8f   :  { %426 = vst.msk [vmem:[%s1102_s1 + $0xa] sm:$0x1] %vm7_vm0, %v125_v42   ;;  %427 = vst.msk [vmem:[%s1102_s1 + $0x29] sm:$0x2] %vm7_vm0, %v125_v42  }
  0x90   :  { %428 = vst.msk [vmem:[%s1102_s1 + $0x48] sm:$0x4] %vm7_vm0, %v125_v42   ;;  %429 = vst.msk [vmem:[%s1102_s1 + $0x67] sm:$0x8] %vm7_vm0, %v125_v42   ;;  %v137_v43 = vpop.permute.xlu0 %136  }
  0x91   :  { %v149_v44 = vpop.permute.xlu1 %148   ;;  %430 = vst.msk [vmem:[%s1102_s1 + $0xb] sm:$0x1] %vm7_vm0, %v137_v43   ;;  %431 = vst.msk [vmem:[%s1102_s1 + $0x2a] sm:$0x2] %vm7_vm0, %v137_v43  }
  0x92   :  { %432 = vst.msk [vmem:[%s1102_s1 + $0x49] sm:$0x4] %vm7_vm0, %v137_v43   ;;  %433 = vst.msk [vmem:[%s1102_s1 + $0x68] sm:$0x8] %vm7_vm0, %v137_v43  }
  0x93   :  { %434 = vst.msk [vmem:[%s1102_s1 + $0xc] sm:$0x1] %vm7_vm0, %v149_v44   ;;  %435 = vst.msk [vmem:[%s1102_s1 + $0x2b] sm:$0x2] %vm7_vm0, %v149_v44  }
  0x94   :  { %436 = vst.msk [vmem:[%s1102_s1 + $0x4a] sm:$0x4] %vm7_vm0, %v149_v44   ;;  %437 = vst.msk [vmem:[%s1102_s1 + $0x69] sm:$0x8] %vm7_vm0, %v149_v44   ;;  %v161_v45 = vpop.permute.xlu0 %160  }
  0x95   :  { %v173_v46 = vpop.permute.xlu1 %172   ;;  %438 = vst.msk [vmem:[%s1102_s1 + $0xd] sm:$0x1] %vm7_vm0, %v161_v45   ;;  %439 = vst.msk [vmem:[%s1102_s1 + $0x2c] sm:$0x2] %vm7_vm0, %v161_v45  }
  0x96   :  { %440 = vst.msk [vmem:[%s1102_s1 + $0x4b] sm:$0x4] %vm7_vm0, %v161_v45   ;;  %441 = vst.msk [vmem:[%s1102_s1 + $0x6a] sm:$0x8] %vm7_vm0, %v161_v45  }
  0x97   :  { %442 = vst.msk [vmem:[%s1102_s1 + $0xe] sm:$0x1] %vm7_vm0, %v173_v46   ;;  %443 = vst.msk [vmem:[%s1102_s1 + $0x2d] sm:$0x2] %vm7_vm0, %v173_v46  }
  0x98   :  { %444 = vst.msk [vmem:[%s1102_s1 + $0x4c] sm:$0x4] %vm7_vm0, %v173_v46   ;;  %445 = vst.msk [vmem:[%s1102_s1 + $0x6b] sm:$0x8] %vm7_vm0, %v173_v46   ;;  %v185_v47 = vpop.permute.xlu0 %184  }
  0x99   :  { %v197_v48 = vpop.permute.xlu1 %196   ;;  %446 = vst.msk [vmem:[%s1102_s1 + $0xf] sm:$0x1] %vm7_vm0, %v185_v47   ;;  %447 = vst.msk [vmem:[%s1102_s1 + $0x2e] sm:$0x2] %vm7_vm0, %v185_v47  }
  0x9a   :  { %448 = vst.msk [vmem:[%s1102_s1 + $0x4d] sm:$0x4] %vm7_vm0, %v185_v47   ;;  %449 = vst.msk [vmem:[%s1102_s1 + $0x6c] sm:$0x8] %vm7_vm0, %v185_v47  }
  0x9b   :  { %450 = vst.msk [vmem:[%s1102_s1 + $0x10] sm:$0x1] %vm7_vm0, %v197_v48   ;;  %451 = vst.msk [vmem:[%s1102_s1 + $0x2f] sm:$0x2] %vm7_vm0, %v197_v48  }
  0x9c   :  { %452 = vst.msk [vmem:[%s1102_s1 + $0x4e] sm:$0x4] %vm7_vm0, %v197_v48   ;;  %453 = vst.msk [vmem:[%s1102_s1 + $0x6d] sm:$0x8] %vm7_vm0, %v197_v48   ;;  %v209_v49 = vpop.permute.xlu0 %208  }
  0x9d   :  { %v221_v50 = vpop.permute.xlu1 %220   ;;  %454 = vst.msk [vmem:[%s1102_s1 + $0x11] sm:$0x1] %vm7_vm0, %v209_v49   ;;  %455 = vst.msk [vmem:[%s1102_s1 + $0x30] sm:$0x2] %vm7_vm0, %v209_v49  }
  0x9e   :  { %456 = vst.msk [vmem:[%s1102_s1 + $0x4f] sm:$0x4] %vm7_vm0, %v209_v49   ;;  %457 = vst.msk [vmem:[%s1102_s1 + $0x6e] sm:$0x8] %vm7_vm0, %v209_v49  }
  0x9f   :  { %458 = vst.msk [vmem:[%s1102_s1 + $0x12] sm:$0x1] %vm7_vm0, %v221_v50   ;;  %459 = vst.msk [vmem:[%s1102_s1 + $0x31] sm:$0x2] %vm7_vm0, %v221_v50  }
  0xa0   :  { %460 = vst.msk [vmem:[%s1102_s1 + $0x50] sm:$0x4] %vm7_vm0, %v221_v50   ;;  %461 = vst.msk [vmem:[%s1102_s1 + $0x6f] sm:$0x8] %vm7_vm0, %v221_v50   ;;  %v233_v51 = vpop.permute.xlu0 %232  }
  0xa1   :  { %v245_v52 = vpop.permute.xlu1 %244   ;;  %462 = vst.msk [vmem:[%s1102_s1 + $0x13] sm:$0x1] %vm7_vm0, %v233_v51   ;;  %463 = vst.msk [vmem:[%s1102_s1 + $0x32] sm:$0x2] %vm7_vm0, %v233_v51  }
  0xa2   :  { %464 = vst.msk [vmem:[%s1102_s1 + $0x51] sm:$0x4] %vm7_vm0, %v233_v51   ;;  %465 = vst.msk [vmem:[%s1102_s1 + $0x70] sm:$0x8] %vm7_vm0, %v233_v51  }
  0xa3   :  { %466 = vst.msk [vmem:[%s1102_s1 + $0x14] sm:$0x1] %vm7_vm0, %v245_v52   ;;  %467 = vst.msk [vmem:[%s1102_s1 + $0x33] sm:$0x2] %vm7_vm0, %v245_v52  }
  0xa4   :  { %468 = vst.msk [vmem:[%s1102_s1 + $0x52] sm:$0x4] %vm7_vm0, %v245_v52   ;;  %469 = vst.msk [vmem:[%s1102_s1 + $0x71] sm:$0x8] %vm7_vm0, %v245_v52   ;;  %v257_v53 = vpop.permute.xlu0 %256  }
  0xa5   :  { %v269_v54 = vpop.permute.xlu1 %268   ;;  %470 = vst.msk [vmem:[%s1102_s1 + $0x15] sm:$0x1] %vm7_vm0, %v257_v53   ;;  %471 = vst.msk [vmem:[%s1102_s1 + $0x34] sm:$0x2] %vm7_vm0, %v257_v53  }
  0xa6   :  { %472 = vst.msk [vmem:[%s1102_s1 + $0x53] sm:$0x4] %vm7_vm0, %v257_v53   ;;  %473 = vst.msk [vmem:[%s1102_s1 + $0x72] sm:$0x8] %vm7_vm0, %v257_v53  }
  0xa7   :  { %474 = vst.msk [vmem:[%s1102_s1 + $0x16] sm:$0x1] %vm7_vm0, %v269_v54   ;;  %475 = vst.msk [vmem:[%s1102_s1 + $0x35] sm:$0x2] %vm7_vm0, %v269_v54  }
  0xa8   :  { %476 = vst.msk [vmem:[%s1102_s1 + $0x54] sm:$0x4] %vm7_vm0, %v269_v54   ;;  %477 = vst.msk [vmem:[%s1102_s1 + $0x73] sm:$0x8] %vm7_vm0, %v269_v54   ;;  %v281_v55 = vpop.permute.xlu0 %280  }
  0xa9   :  { %v293_v56 = vpop.permute.xlu1 %292   ;;  %478 = vst.msk [vmem:[%s1102_s1 + $0x17] sm:$0x1] %vm7_vm0, %v281_v55   ;;  %479 = vst.msk [vmem:[%s1102_s1 + $0x36] sm:$0x2] %vm7_vm0, %v281_v55  }
  0xaa   :  { %480 = vst.msk [vmem:[%s1102_s1 + $0x55] sm:$0x4] %vm7_vm0, %v281_v55   ;;  %481 = vst.msk [vmem:[%s1102_s1 + $0x74] sm:$0x8] %vm7_vm0, %v281_v55  }
  0xab   :  { %482 = vst.msk [vmem:[%s1102_s1 + $0x18] sm:$0x1] %vm7_vm0, %v293_v56   ;;  %483 = vst.msk [vmem:[%s1102_s1 + $0x37] sm:$0x2] %vm7_vm0, %v293_v56  }
  0xac   :  { %484 = vst.msk [vmem:[%s1102_s1 + $0x56] sm:$0x4] %vm7_vm0, %v293_v56   ;;  %485 = vst.msk [vmem:[%s1102_s1 + $0x75] sm:$0x8] %vm7_vm0, %v293_v56   ;;  %v305_v57 = vpop.permute.xlu0 %304  }
  0xad   :  { %v317_v58 = vpop.permute.xlu1 %316   ;;  %486 = vst.msk [vmem:[%s1102_s1 + $0x19] sm:$0x1] %vm7_vm0, %v305_v57   ;;  %487 = vst.msk [vmem:[%s1102_s1 + $0x38] sm:$0x2] %vm7_vm0, %v305_v57  }
  0xae   :  { %488 = vst.msk [vmem:[%s1102_s1 + $0x57] sm:$0x4] %vm7_vm0, %v305_v57   ;;  %489 = vst.msk [vmem:[%s1102_s1 + $0x76] sm:$0x8] %vm7_vm0, %v305_v57  }
  0xaf   :  { %490 = vst.msk [vmem:[%s1102_s1 + $0x1a] sm:$0x1] %vm7_vm0, %v317_v58   ;;  %491 = vst.msk [vmem:[%s1102_s1 + $0x39] sm:$0x2] %vm7_vm0, %v317_v58  }
  0xb0   :  { %492 = vst.msk [vmem:[%s1102_s1 + $0x58] sm:$0x4] %vm7_vm0, %v317_v58   ;;  %493 = vst.msk [vmem:[%s1102_s1 + $0x77] sm:$0x8] %vm7_vm0, %v317_v58   ;;  %v329_v59 = vpop.permute.xlu0 %328  }
  0xb1   :  { %v341_v60 = vpop.permute.xlu1 %340   ;;  %494 = vst.msk [vmem:[%s1102_s1 + $0x1b] sm:$0x1] %vm7_vm0, %v329_v59   ;;  %495 = vst.msk [vmem:[%s1102_s1 + $0x3a] sm:$0x2] %vm7_vm0, %v329_v59  }
  0xb2   :  { %496 = vst.msk [vmem:[%s1102_s1 + $0x59] sm:$0x4] %vm7_vm0, %v329_v59   ;;  %497 = vst.msk [vmem:[%s1102_s1 + $0x78] sm:$0x8] %vm7_vm0, %v329_v59  }
  0xb3   :  { %498 = vst.msk [vmem:[%s1102_s1 + $0x1c] sm:$0x1] %vm7_vm0, %v341_v60   ;;  %499 = vst.msk [vmem:[%s1102_s1 + $0x3b] sm:$0x2] %vm7_vm0, %v341_v60  }
  0xb4   :  { %500 = vst.msk [vmem:[%s1102_s1 + $0x5a] sm:$0x4] %vm7_vm0, %v341_v60   ;;  %501 = vst.msk [vmem:[%s1102_s1 + $0x79] sm:$0x8] %vm7_vm0, %v341_v60   ;;  %v353_v61 = vpop.permute.xlu0 %352  }
  0xb5   :  { %v365_v62 = vpop.permute.xlu1 %364   ;;  %502 = vst.msk [vmem:[%s1102_s1 + $0x1d] sm:$0x1] %vm7_vm0, %v353_v61   ;;  %503 = vst.msk [vmem:[%s1102_s1 + $0x3c] sm:$0x2] %vm7_vm0, %v353_v61  }
  0xb6   :  { %504 = vst.msk [vmem:[%s1102_s1 + $0x5b] sm:$0x4] %vm7_vm0, %v353_v61   ;;  %505 = vst.msk [vmem:[%s1102_s1 + $0x7a] sm:$0x8] %vm7_vm0, %v353_v61  }
  0xb7   :  { %506 = vst.msk [vmem:[%s1102_s1 + $0x1e] sm:$0x1] %vm7_vm0, %v365_v62   ;;  %507 = vst.msk [vmem:[%s1102_s1 + $0x3d] sm:$0x2] %vm7_vm0, %v365_v62  }
  0xb8   :  { %508 = vst.msk [vmem:[%s1102_s1 + $0x5c] sm:$0x4] %vm7_vm0, %v365_v62   ;;  %509 = vst.msk [vmem:[%s1102_s1 + $0x7b] sm:$0x8] %vm7_vm0, %v365_v62   ;;  %v377_v63 = vpop.permute.xlu0 %376  }
  0xb9   :  { %510 = vst.msk [vmem:[%s1102_s1 + $0x1f] sm:$0x1] %vm7_vm0, %v377_v63   ;;  %511 = vst.msk [vmem:[%s1102_s1 + $0x3e] sm:$0x2] %vm7_vm0, %v377_v63  }
  0xba   :  { %512 = vst.msk [vmem:[%s1102_s1 + $0x5d] sm:$0x4] %vm7_vm0, %v377_v63   ;;  %513 = vst.msk [vmem:[%s1102_s1 + $0x7c] sm:$0x8] %vm7_vm0, %v377_v63  }

// kernel: encoder_decoder_forward.13
= control target key start
LH: loop header
LB: loop body
LE: loop exit
PB: predicated region body
PF: predicated region fallthrough
CT: control target
= control target key end

     0   :  { %v970_v3 = vmov 0   ;;  %s1716_s1 = inlined_call_operand.vmem [shape: f32[256,256], index: 1, kind: input, shape index: {}]   ;;  %s1717_s0 = inlined_call_operand.vmem [shape: f32[128,256], index: 0, kind: input, shape index: {}]   ;;  %s1718_s2 = inlined_call_operand.vmem [shape: f32[128,1], index: 2, kind: input, shape index: {}]   ;;  %s1719_s3 = inlined_call_operand.vmem [shape: f32[32,1], index: 3, kind: input, shape index: {}]   ;;  %s1720_s4 = inlined_call_operand.vmem [shape: f32[32,1], index: 4, kind: input, shape index: {}]   ;;  %s1721_s5 = inlined_call_operand.vmem [shape: f32[128,256], index: 5, kind: output, shape index: {}]  }
   0x1   :  { %v53_v0 = vld [vmem:[%s1716_s1 + $0x8] sm:$0xff]  ;;  %v55_v1 = vld [vmem:[%s1716_s1 + $0x18] sm:$0xff]  ;;  %v52_v2 = vld [vmem:[%s1716_s1] sm:$0xff]  ;;  %961 = vset.pattern.permute.xlu1 %v970_v3  ;;  %960 = vset.pattern.permute.xlu0 %v970_v3 }
   0x2   :  { %v863_v4 = vpack.c.bf16 %v55_v1, %v53_v0  ;;  %v54_v5 = vld [vmem:[%s1716_s1 + $0x10] sm:$0xff]  ;;  %v57_v6 = vld [vmem:[%s1716_s1 + $0x28] sm:$0xff]  ;;  %v59_v7 = vld [vmem:[%s1716_s1 + $0x38] sm:$0xff] }
   0x3   :  { %v865_v8 = vpack.c.bf16 %v54_v5, %v52_v2  ;;  %v867_v9 = vpack.c.bf16 %v59_v7, %v57_v6  ;;  %v56_v10 = vld [vmem:[%s1716_s1 + $0x20] sm:$0xff]  ;;  %v58_v11 = vld [vmem:[%s1716_s1 + $0x30] sm:$0xff]  ;;  %v61_v12 = vld [vmem:[%s1716_s1 + $0x48] sm:$0xff] }
   0x4   :  { %864 = vmatprep.subr.bf16.mxu0 %v863_v4  ;;  %927 = vmatprep.subr.bf16.mxu1 %v863_v4  ;;  %v63_v13 = vld [vmem:[%s1716_s1 + $0x58] sm:$0xff]  ;;  %v869_v14 = vpack.c.bf16 %v58_v11, %v56_v10  ;;  %v60_v16 = vld [vmem:[%s1716_s1 + $0x40] sm:$0xff]  ;;  %v62_v17 = vld [vmem:[%s1716_s1 + $0x50] sm:$0xff] }
   0x5   :  { %866 = vmatpush1.bf16.msra.mxu0 %v865_v8  ;;  %943 = vmatpush1.bf16.msra.mxu1 %v865_v8  ;;  %v871_v15 = vpack.c.bf16 %v63_v13, %v61_v12  ;;  %v65_v18 = vld [vmem:[%s1716_s1 + $0x68] sm:$0xff]  ;;  %v67_v19 = vld [vmem:[%s1716_s1 + $0x78] sm:$0xff]  ;;  %v873_v20 = vpack.c.bf16 %v62_v17, %v60_v16  ;;  %v64_v22 = vld [vmem:[%s1716_s1 + $0x60] sm:$0xff] }
   0x6   :  { %868 = vmatprep.subr.bf16.mxu0 %v867_v9  ;;  %928 = vmatprep.subr.bf16.mxu1 %v867_v9  ;;  %v875_v21 = vpack.c.bf16 %v67_v19, %v65_v18  ;;  %v66_v23 = vld [vmem:[%s1716_s1 + $0x70] sm:$0xff]  ;;  %v69_v24 = vld [vmem:[%s1716_s1 + $0x88] sm:$0xff]  ;;  %v71_v25 = vld [vmem:[%s1716_s1 + $0x98] sm:$0xff] }
   0x7   :  { %v877_v26 = vpack.c.bf16 %v66_v23, %v64_v22  ;;  %v879_v27 = vpack.c.bf16 %v71_v25, %v69_v24  ;;  %v68_v28 = vld [vmem:[%s1716_s1 + $0x80] sm:$0xff]  ;;  %v70_v29 = vld [vmem:[%s1716_s1 + $0x90] sm:$0xff]  ;;  %v73_v30 = vld [vmem:[%s1716_s1 + $0xa8] sm:$0xff] }
   0x8   :  { %v75_v31 = vld [vmem:[%s1716_s1 + $0xb8] sm:$0xff]  ;;  %v881_v32 = vpack.c.bf16 %v70_v29, %v68_v28  ;;  %v72_v34 = vld [vmem:[%s1716_s1 + $0xa0] sm:$0xff]  ;;  %v74_v35 = vld [vmem:[%s1716_s1 + $0xb0] sm:$0xff] }
   0x9   :  { %870 = vmatpush1.bf16.msra.mxu0 %v869_v14  ;;  %944 = vmatpush1.bf16.msra.mxu1 %v869_v14  ;;  %v883_v33 = vpack.c.bf16 %v75_v31, %v73_v30  ;;  %v77_v36 = vld [vmem:[%s1716_s1 + $0xc8] sm:$0xff]  ;;  %v79_v37 = vld [vmem:[%s1716_s1 + $0xd8] sm:$0xff]  ;;  %v885_v38 = vpack.c.bf16 %v74_v35, %v72_v34  ;;  %v76_v39 = vld [vmem:[%s1716_s1 + $0xc0] sm:$0xff] }
   0xa   :  { %872 = vmatprep.subr.bf16.mxu0 %v871_v15  ;;  %929 = vmatprep.subr.bf16.mxu1 %v871_v15  ;;  %v887_v40 = vpack.c.bf16 %v79_v37, %v77_v36  ;;  %v78_v41 = vld [vmem:[%s1716_s1 + $0xd0] sm:$0xff]  ;;  %v21_v42 = vld [vmem:[%s1717_s0 + $0x8] sm:$0xff]  ;;  %v83_v45 = vld [vmem:[%s1716_s1 + $0xf8] sm:$0xff] }
   0xb   :  { %v37_v43 = vld [vmem:[%s1717_s0 + $0x88] sm:$0xff]  ;;  %276 = vmatprep.mubr.f32.mxu0 %v21_v42  ;;  %v889_v46 = vpack.c.bf16 %v78_v41, %v76_v39  ;;  %v80_v48 = vld [vmem:[%s1716_s1 + $0xe0] sm:$0xff]  ;;  %v82_v49 = vld [vmem:[%s1716_s1 + $0xf0] sm:$0xff] }
   0xc   :  { %v81_v44 = vld [vmem:[%s1716_s1 + $0xe8] sm:$0xff]  ;;  %324 = vmatprep.mubr.f32.mxu1 %v37_v43  ;;  %v87_v51 = vld [vmem:[%s1716_s1 + $0x118] sm:$0xff]  ;;  %v893_v52 = vpack.c.bf16 %v82_v49, %v80_v48  ;;  %v84_v54 = vld [vmem:[%s1716_s1 + $0x100] sm:$0xff] }
   0xd   :  { %874 = vmatpush1.bf16.msra.mxu0 %v873_v20  ;;  %945 = vmatpush1.bf16.msra.mxu1 %v873_v20  ;;  %v891_v47 = vpack.c.bf16 %v83_v45, %v81_v44  ;;  %v85_v50 = vld [vmem:[%s1716_s1 + $0x108] sm:$0xff]  ;;  %v86_v55 = vld [vmem:[%s1716_s1 + $0x110] sm:$0xff]  ;;  %v91_v57 = vld [vmem:[%s1716_s1 + $0x138] sm:$0xff] }
   0xe   :  { %876 = vmatprep.subr.bf16.mxu0 %v875_v21  ;;  %930 = vmatprep.subr.bf16.mxu1 %v875_v21  ;;  %v895_v53 = vpack.c.bf16 %v87_v51, %v85_v50  ;;  %v89_v56 = vld [vmem:[%s1716_s1 + $0x128] sm:$0xff]  ;;  %v897_v58 = vpack.c.bf16 %v86_v55, %v84_v54  ;;  %v118_v59 = vld [vmem:[%s1718_s2 + $0x10] sm:$0xff]  ;;  %v116_v60 = vld [vmem:[%s1718_s2] sm:$0xff] }
   0xf   :  { %v899_v61 = vpack.c.bf16 %v91_v57, %v89_v56  ;;  %v88_v62 = vld [vmem:[%s1716_s1 + $0x120] sm:$0xff]  ;;  %v90_v63 = vld [vmem:[%s1716_s1 + $0x130] sm:$0xff]  ;;  %v93_v0 = vld [vmem:[%s1716_s1 + $0x148] sm:$0xff]  ;;  %144 = vperm.xlu1 %961, %v118_v59   ;;  %134 = vperm.xlu0 %960, %v116_v60  }
  0x10   :  { %v95_v1 = vld [vmem:[%s1716_s1 + $0x158] sm:$0xff]  ;;  %v117_v3 = vld [vmem:[%s1718_s2 + $0x8] sm:$0xff]  ;;  %v901_v4 = vpack.c.bf16 %v90_v63, %v88_v62  ;;  %v92_v6 = vld [vmem:[%s1716_s1 + $0x140] sm:$0xff] }
  0x11   :  { %878 = vmatpush1.bf16.msra.mxu0 %v877_v26  ;;  %946 = vmatpush1.bf16.msra.mxu1 %v877_v26  ;;  %v119_v2 = vld [vmem:[%s1718_s2 + $0x18] sm:$0xff]  ;;  %v903_v5 = vpack.c.bf16 %v95_v1, %v93_v0  ;;  %v94_v7 = vld [vmem:[%s1716_s1 + $0x150] sm:$0xff]  ;;  %v97_v8 = vld [vmem:[%s1716_s1 + $0x168] sm:$0xff] }
  0x12   :  { %880 = vmatprep.subr.bf16.mxu0 %v879_v27  ;;  %931 = vmatprep.subr.bf16.mxu1 %v879_v27  ;;  %v99_v9 = vld [vmem:[%s1716_s1 + $0x178] sm:$0xff]  ;;  %v121_v10 = vld [vmem:[%s1718_s2 + $0x28] sm:$0xff]  ;;  %v120_v11 = vld [vmem:[%s1718_s2 + $0x20] sm:$0xff]  ;;  %v905_v12 = vpack.c.bf16 %v94_v7, %v92_v6 }
  0x13   :  { %149 = vperm.xlu1 %961, %v119_v2   ;;  %139 = vperm.xlu0 %960, %v117_v3   ;;  %v907_v13 = vpack.c.bf16 %v99_v9, %v97_v8  ;;  %v96_v14 = vld [vmem:[%s1716_s1 + $0x160] sm:$0xff]  ;;  %v98_v15 = vld [vmem:[%s1716_s1 + $0x170] sm:$0xff]  ;;  %v101_v16 = vld [vmem:[%s1716_s1 + $0x188] sm:$0xff] }
  0x14   :  { %v103_v17 = vld [vmem:[%s1716_s1 + $0x198] sm:$0xff]  ;;  %v122_v19 = vld [vmem:[%s1718_s2 + $0x30] sm:$0xff]  ;;  %v909_v20 = vpack.c.bf16 %v98_v15, %v96_v14  ;;  %v100_v22 = vld [vmem:[%s1716_s1 + $0x180] sm:$0xff] }
  0x15   :  { %882 = vmatpush1.bf16.msra.mxu0 %v881_v32  ;;  %947 = vmatpush1.bf16.msra.mxu1 %v881_v32  ;;  %v123_v18 = vld [vmem:[%s1718_s2 + $0x38] sm:$0xff]  ;;  %v911_v21 = vpack.c.bf16 %v103_v17, %v101_v16  ;;  %v102_v23 = vld [vmem:[%s1716_s1 + $0x190] sm:$0xff]  ;;  %v105_v24 = vld [vmem:[%s1716_s1 + $0x1a8] sm:$0xff] }
  0x16   :  { %884 = vmatprep.subr.bf16.mxu0 %v883_v33  ;;  %932 = vmatprep.subr.bf16.mxu1 %v883_v33  ;;  %v107_v25 = vld [vmem:[%s1716_s1 + $0x1b8] sm:$0xff]  ;;  %v125_v26 = vld [vmem:[%s1718_s2 + $0x48] sm:$0xff]  ;;  %v124_v27 = vld [vmem:[%s1718_s2 + $0x40] sm:$0xff]  ;;  %v913_v28 = vpack.c.bf16 %v102_v23, %v100_v22  ;;  %v373_v22 = vlaneseq }
  0x17   :  { %159 = vperm.xlu1 %961, %v121_v10   ;;  %154 = vperm.xlu0 %960, %v120_v11   ;;  %v915_v29 = vpack.c.bf16 %v107_v25, %v105_v24  ;;  %v104_v30 = vld [vmem:[%s1716_s1 + $0x1a0] sm:$0xff]  ;;  %v106_v31 = vld [vmem:[%s1716_s1 + $0x1b0] sm:$0xff]  ;;  %v109_v32 = vld [vmem:[%s1716_s1 + $0x1c8] sm:$0xff] }
  0x18   :  { %v111_v33 = vld [vmem:[%s1716_s1 + $0x1d8] sm:$0xff]  ;;  %v126_v35 = vld [vmem:[%s1718_s2 + $0x50] sm:$0xff]  ;;  %v917_v36 = vpack.c.bf16 %v106_v31, %v104_v30  ;;  %v129_v42 = vld [vmem:[%s1718_s2 + $0x68] sm:$0xff]  ;;  %v374_v25 = vand.u32 127, %v373_v22 }
  0x19   :  { %886 = vmatpush1.bf16.msra.mxu0 %v885_v38  ;;  %948 = vmatpush1.bf16.msra.mxu1 %v885_v38  ;;  %v127_v34 = vld [vmem:[%s1718_s2 + $0x58] sm:$0xff]  ;;  %v919_v37 = vpack.c.bf16 %v111_v33, %v109_v32  ;;  %v108_v38 = vld [vmem:[%s1716_s1 + $0x1c0] sm:$0xff]  ;;  %v110_v39 = vld [vmem:[%s1716_s1 + $0x1d0] sm:$0xff] }
  0x1a   :  { %888 = vmatprep.subr.bf16.mxu0 %v887_v40  ;;  %933 = vmatprep.subr.bf16.mxu1 %v887_v40  ;;  %v113_v40 = vld [vmem:[%s1716_s1 + $0x1e8] sm:$0xff]  ;;  %v115_v41 = vld [vmem:[%s1716_s1 + $0x1f8] sm:$0xff]  ;;  %v128_v43 = vld [vmem:[%s1718_s2 + $0x60] sm:$0xff]  ;;  %v921_v44 = vpack.c.bf16 %v110_v39, %v108_v38 }
  0x1b   :  { %169 = vperm.xlu1 %961, %v123_v18   ;;  %164 = vperm.xlu0 %960, %v122_v19   ;;  %v923_v45 = vpack.c.bf16 %v115_v41, %v113_v40  ;;  %v131_v48 = vld [vmem:[%s1718_s2 + $0x78] sm:$0xff]  ;;  %v130_v49 = vld [vmem:[%s1718_s2 + $0x70] sm:$0xff]  ;;  %v20_v51 = vld [vmem:[%s1717_s0] sm:$0xff] }
  0x1c   :  { %v39_v54 = vld [vmem:[%s1717_s0 + $0x98] sm:$0xff]  ;;  %v22_v55 = vld [vmem:[%s1717_s0 + $0x10] sm:$0xff]  ;;  %v25_v57 = vld [vmem:[%s1717_s0 + $0x28] sm:$0xff] }
  0x1d   :  { %890 = vmatpush1.bf16.msra.mxu0 %v889_v46  ;;  %949 = vmatpush1.bf16.msra.mxu1 %v889_v46  ;;  %v112_v46 = vld [vmem:[%s1716_s1 + $0x1e0] sm:$0xff]  ;;  %v38_v56 = vld [vmem:[%s1717_s0 + $0x90] sm:$0xff]  ;;  %v43_v62 = vld [vmem:[%s1717_s0 + $0xb8] sm:$0xff] }
  0x1e   :  { %892 = vmatprep.subr.bf16.mxu0 %v891_v47  ;;  %934 = vmatprep.subr.bf16.mxu1 %v891_v47  ;;  %v114_v47 = vld [vmem:[%s1716_s1 + $0x1f0] sm:$0xff]  ;;  %v24_v59 = vld [vmem:[%s1717_s0 + $0x20] sm:$0xff]  ;;  %v29_v1 = vld [vmem:[%s1717_s0 + $0x48] sm:$0xff] }
  0x1f   :  { %179 = vperm.xlu1 %961, %v125_v26   ;;  %174 = vperm.xlu0 %960, %v124_v27   ;;  %v925_v50 = vpack.c.bf16 %v114_v47, %v112_v46  ;;  %v40_v60 = vld [vmem:[%s1717_s0 + $0xa0] sm:$0xff]  ;;  %v26_v63 = vld [vmem:[%s1717_s0 + $0x30] sm:$0xff]  ;;  %v45_v2 = vld [vmem:[%s1717_s0 + $0xc8] sm:$0xff]  ;;  %v1345_v27 = vadd.s32 128, %v374_v25 }
  0x20   :  { %v42_v0 = vld [vmem:[%s1717_s0 + $0xb0] sm:$0xff]  ;;  %v28_v3 = vld [vmem:[%s1717_s0 + $0x40] sm:$0xff]  ;;  %v47_v6 = vld [vmem:[%s1717_s0 + $0xd8] sm:$0xff] }
  0x21   :  { %894 = vmatpush1.bf16.msra.mxu0 %v893_v52  ;;  %950 = vmatpush1.bf16.msra.mxu1 %v893_v52  ;;  %v36_v52 = vld [vmem:[%s1717_s0 + $0x80] sm:$0xff]  ;;  %v30_v7 = vld [vmem:[%s1717_s0 + $0x50] sm:$0xff]  ;;  %v33_v9 = vld [vmem:[%s1717_s0 + $0x68] sm:$0xff]  ;;  %vm377_vm0 = vcmp.lt.s32.totalorder %v1345_v27, 162 }
  0x22   :  { %896 = vmatprep.subr.bf16.mxu0 %v895_v53  ;;  %935 = vmatprep.subr.bf16.mxu1 %v895_v53  ;;  %v23_v53 = vld [vmem:[%s1717_s0 + $0x18] sm:$0xff]  ;;  %v46_v8 = vld [vmem:[%s1717_s0 + $0xd0] sm:$0xff]  ;;  %v49_v10 = vld [vmem:[%s1717_s0 + $0xe8] sm:$0xff] }
  0x23   :  { %189 = vperm.xlu1 %961, %v127_v34   ;;  %184 = vperm.xlu0 %960, %v126_v35   ;;  %v32_v11 = vld [vmem:[%s1717_s0 + $0x60] sm:$0xff]  ;;  %v51_v14 = vld [vmem:[%s1717_s0 + $0xf8] sm:$0xff]  ;;  %v34_v15 = vld [vmem:[%s1717_s0 + $0x70] sm:$0xff] }
  0x24   :  { %v50_v16 = vld [vmem:[%s1717_s0 + $0xf0] sm:$0xff] }
  0x25   :  { %898 = vmatpush1.bf16.msra.mxu0 %v897_v58  ;;  %951 = vmatpush1.bf16.msra.mxu1 %v897_v58  ;;  %v41_v58 = vld [vmem:[%s1717_s0 + $0xa8] sm:$0xff] }
  0x26   :  { %900 = vmatprep.subr.bf16.mxu0 %v899_v61  ;;  %936 = vmatprep.subr.bf16.mxu1 %v899_v61  ;;  %v27_v61 = vld [vmem:[%s1717_s0 + $0x38] sm:$0xff] }
  0x27   :  { %199 = vperm.xlu1 %961, %v129_v42   ;;  %194 = vperm.xlu0 %960, %v128_v43  }
  0x29   :  { %902 = vmatpush1.bf16.msra.mxu0 %v901_v4  ;;  %952 = vmatpush1.bf16.msra.mxu1 %v901_v4  ;;  %v44_v4 = vld [vmem:[%s1717_s0 + $0xc0] sm:$0xff] }
  0x2a   :  { %904 = vmatprep.subr.bf16.mxu0 %v903_v5  ;;  %937 = vmatprep.subr.bf16.mxu1 %v903_v5  ;;  %v31_v5 = vld [vmem:[%s1717_s0 + $0x58] sm:$0xff] }
  0x2b   :  { %209 = vperm.xlu1 %961, %v131_v48   ;;  %204 = vperm.xlu0 %960, %v130_v49  }
  0x2d   :  { %906 = vmatpush1.bf16.msra.mxu0 %v905_v12  ;;  %953 = vmatpush1.bf16.msra.mxu1 %v905_v12  ;;  %v48_v12 = vld [vmem:[%s1717_s0 + $0xe0] sm:$0xff] }
  0x2e   :  { %908 = vmatprep.subr.bf16.mxu0 %v907_v13  ;;  %938 = vmatprep.subr.bf16.mxu1 %v907_v13  ;;  %v35_v13 = vld [vmem:[%s1717_s0 + $0x78] sm:$0xff] }
  0x31   :  { %910 = vmatpush1.bf16.msra.mxu0 %v909_v20  ;;  %954 = vmatpush1.bf16.msra.mxu1 %v909_v20 }
  0x32   :  { %912 = vmatprep.subr.bf16.mxu0 %v911_v21  ;;  %939 = vmatprep.subr.bf16.mxu1 %v911_v21 }
  0x35   :  { %914 = vmatpush1.bf16.msra.mxu0 %v913_v28  ;;  %955 = vmatpush1.bf16.msra.mxu1 %v913_v28 }
  0x36   :  { %916 = vmatprep.subr.bf16.mxu0 %v915_v29  ;;  %940 = vmatprep.subr.bf16.mxu1 %v915_v29 }
  0x39   :  { %918 = vmatpush1.bf16.msra.mxu0 %v917_v36  ;;  %956 = vmatpush1.bf16.msra.mxu1 %v917_v36 }
  0x3a   :  { %920 = vmatprep.subr.bf16.mxu0 %v919_v37  ;;  %941 = vmatprep.subr.bf16.mxu1 %v919_v37 }
  0x3d   :  { %922 = vmatpush1.bf16.msra.mxu0 %v921_v44  ;;  %957 = vmatpush1.bf16.msra.mxu1 %v921_v44 }
  0x3e   :  { %924 = vmatprep.subr.bf16.mxu0 %v923_v45  ;;  %942 = vmatprep.subr.bf16.mxu1 %v923_v45 }
  0x41   :  { %926 = vmatpush1.bf16.msra.mxu0 %v925_v50  ;;  %958 = vmatpush1.bf16.msra.mxu1 %v925_v50 }
  0x44   :  { %277 = vmatmul.mubr.f32.vlgmr.msra.gmra.mrb[0].mxu0 %v20_v51  ;;  %325 = vmatmul.mubr.f32.vlgmr.msra.gmra.mrb[0].mxu1 %v36_v52 }
  0x45   :  { %282 = vmatprep.mubr.f32.mxu0 %v23_v53  ;;  %330 = vmatprep.mubr.f32.mxu1 %v39_v54 }
  0x48   :  { %283 = vmatmul.mubr.f32.gmra.mrb[2].mxu0 %v22_v55  ;;  %331 = vmatmul.mubr.f32.gmra.mrb[2].mxu1 %v38_v56 }
  0x49   :  { %288 = vmatprep.mubr.f32.mxu0 %v25_v57  ;;  %336 = vmatprep.mubr.f32.mxu1 %v41_v58 }
  0x4c   :  { %289 = vmatmul.mubr.f32.gmra.mrb[4].mxu0 %v24_v59  ;;  %337 = vmatmul.mubr.f32.gmra.mrb[4].mxu1 %v40_v60 }
  0x4d   :  { %294 = vmatprep.mubr.f32.mxu0 %v27_v61  ;;  %342 = vmatprep.mubr.f32.mxu1 %v43_v62 }
  0x50   :  { %295 = vmatmul.mubr.f32.gmra.mrb[6].mxu0 %v26_v63  ;;  %343 = vmatmul.mubr.f32.gmra.mrb[6].mxu1 %v42_v0 }
  0x51   :  { %300 = vmatprep.mubr.f32.mxu0 %v29_v1  ;;  %348 = vmatprep.mubr.f32.mxu1 %v45_v2 }
  0x54   :  { %301 = vmatmul.mubr.f32.gmra.mrb[8].mxu0 %v28_v3  ;;  %349 = vmatmul.mubr.f32.gmra.mrb[8].mxu1 %v44_v4 }
  0x55   :  { %306 = vmatprep.mubr.f32.mxu0 %v31_v5  ;;  %354 = vmatprep.mubr.f32.mxu1 %v47_v6 }
  0x58   :  { %307 = vmatmul.mubr.f32.gmra.mrb[10].mxu0 %v30_v7  ;;  %355 = vmatmul.mubr.f32.gmra.mrb[10].mxu1 %v46_v8 }
  0x59   :  { %312 = vmatprep.mubr.f32.mxu0 %v33_v9  ;;  %360 = vmatprep.mubr.f32.mxu1 %v49_v10 }
  0x5c   :  { %313 = vmatmul.mubr.f32.gmra.mrb[12].mxu0 %v32_v11  ;;  %361 = vmatmul.mubr.f32.gmra.mrb[12].mxu1 %v48_v12 }
  0x5d   :  { %318 = vmatprep.mubr.f32.mxu0 %v35_v13  ;;  %366 = vmatprep.mubr.f32.mxu1 %v51_v14 }
  0x60   :  { %319 = vmatmul.mubr.f32.gmra.mrb[14].mxu0 %v34_v15  ;;  %367 = vmatmul.mubr.f32.gmra.mrb[14].mxu1 %v50_v16 }
  0x8e   :  { %v135_v17 = vpop.permute.xlu0 %134  ;;  %v145_v18 = vpop.permute.xlu1 %144 }
  0x92   :  { %v140_v19 = vpop.permute.xlu0 %139  ;;  %v150_v20 = vpop.permute.xlu1 %149 }
  0x96   :  { %v1337_v21 = vpop.permute.xlu0 %154  ;;  %v1339_v23 = vpop.permute.xlu1 %159 }
  0x9a   :  { %v1341_v24 = vpop.permute.xlu0 %164  ;;  %v1343_v26 = vpop.permute.xlu1 %169 }
  0x9e   :  { %v175_v28 = vpop.permute.xlu0 %174  ;;  %v180_v35 = vpop.permute.xlu1 %179 }
  0xa2   :  { %v185_v48 = vpop.permute.xlu0 %184  ;;  %v190_v61 = vpop.permute.xlu1 %189 }
  0xa6   :  { %v195_v10 = vpop.permute.xlu0 %194  ;;  %v200_v22 = vpop.permute.xlu1 %199 }
 0x117   :  { %v278_v29 = vpop.f32.mrb[0].mxu0  ;;  %v326_v30 = vpop.f32.mrb[0].mxu1 }
 0x118   :  { %v280_v31 = vpop.f32.mrb[1].mxu0  ;;  %v328_v32 = vpop.f32.mrb[1].mxu1  ;;  %v1352_v36 = vadd.f32 %v278_v29, %v135_v17  ;;  %v1354_v37 = vadd.f32 %v326_v30, %v175_v28 }
 0x119   :  { %v1348_v33 = vadd.f32 %v280_v31, %v135_v17  ;;  %v1350_v34 = vadd.f32 %v328_v32, %v175_v28 }
 0x11b   :  { %v284_v38 = vpop.f32.mrb[2].mxu0  ;;  %v332_v39 = vpop.f32.mrb[2].mxu1  ;;  %v395_v40 = vsel %vm377_vm0, %v1350_v34, 0.0  ;;  %v379_v41 = vsel %vm377_vm0, %v1348_v33, 0.0 }
 0x11c   :  { %v286_v42 = vpop.f32.mrb[3].mxu0  ;;  %v334_v43 = vpop.f32.mrb[3].mxu1  ;;  %v434_v44 = vadd.f32 %v395_v40, %v1354_v37  ;;  %v410_v45 = vadd.f32 %v379_v41, %v1352_v36  ;;  %v1368_v49 = vadd.f32 %v284_v38, %v140_v19  ;;  %v1370_v50 = vadd.f32 %v332_v39, %v180_v35 }
 0x11d   :  { %v1364_v46 = vadd.f32 %v286_v42, %v140_v19  ;;  %v1366_v47 = vadd.f32 %v334_v43, %v180_v35  ;;  %v205_v42 = vpop.permute.xlu0 %204 }
 0x11e   :  { %435 = vadd.xlane.f32.xlu1 %v434_v44  ;;  %411 = vadd.xlane.f32.xlu0 %v410_v45 }
 0x11f   :  { %v290_v51 = vpop.f32.mrb[4].mxu0  ;;  %v338_v52 = vpop.f32.mrb[4].mxu1  ;;  %v381_v53 = vsel %vm377_vm0, %v1364_v46, 0.0  ;;  %v397_v54 = vsel %vm377_vm0, %v1366_v47, 0.0 }
 0x120   :  { %v292_v55 = vpop.f32.mrb[5].mxu0  ;;  %v340_v56 = vpop.f32.mrb[5].mxu1  ;;  %v413_v57 = vadd.f32 %v381_v53, %v1368_v49  ;;  %v437_v58 = vadd.f32 %v397_v54, %v1370_v50  ;;  %v1384_v62 = vadd.f32 %v290_v51, %v145_v18  ;;  %v1386_v63 = vadd.f32 %v338_v52, %v185_v48 }
 0x121   :  { %v1380_v59 = vadd.f32 %v292_v55, %v145_v18  ;;  %v1382_v60 = vadd.f32 %v340_v56, %v185_v48 }
 0x122   :  { %414 = vadd.xlane.f32.xlu1 %v413_v57  ;;  %438 = vadd.xlane.f32.xlu0 %v437_v58  ;;  %v210_v58 = vpop.permute.xlu1 %209 }
 0x123   :  { %v296_v0 = vpop.f32.mrb[6].mxu0  ;;  %v344_v1 = vpop.f32.mrb[6].mxu1  ;;  %v399_v2 = vsel %vm377_vm0, %v1382_v60, 0.0  ;;  %v383_v3 = vsel %vm377_vm0, %v1380_v59, 0.0 }
 0x124   :  { %v298_v4 = vpop.f32.mrb[7].mxu0  ;;  %v346_v5 = vpop.f32.mrb[7].mxu1  ;;  %v440_v6 = vadd.f32 %v399_v2, %v1386_v63  ;;  %v416_v7 = vadd.f32 %v383_v3, %v1384_v62  ;;  %v1400_v11 = vadd.f32 %v296_v0, %v150_v20  ;;  %v1414_v25 = vadd.f32 %v344_v1, %v190_v61 }
 0x125   :  { %v1396_v8 = vadd.f32 %v298_v4, %v150_v20  ;;  %v1398_v9 = vadd.f32 %v346_v5, %v190_v61 }
 0x126   :  { %441 = vadd.xlane.f32.xlu1 %v440_v6  ;;  %417 = vadd.xlane.f32.xlu0 %v416_v7 }
 0x127   :  { %v302_v12 = vpop.f32.mrb[8].mxu0  ;;  %v350_v13 = vpop.f32.mrb[8].mxu1  ;;  %v385_v14 = vsel %vm377_vm0, %v1396_v8, 0.0  ;;  %v401_v20 = vsel %vm377_vm0, %v1398_v9, 0.0 }
 0x128   :  { %v304_v15 = vpop.f32.mrb[9].mxu0  ;;  %v352_v16 = vpop.f32.mrb[9].mxu1  ;;  %v419_v17 = vadd.f32 %v385_v14, %v1400_v11  ;;  %v1417_v28 = vadd.f32 %v302_v12, %v1337_v21  ;;  %v443_v39 = vadd.f32 %v401_v20, %v1414_v25  ;;  %v1432_v43 = vadd.f32 %v350_v13, %v195_v10 }
 0x129   :  { %v1407_v18 = vadd.f32 %v304_v15, %v1337_v21  ;;  %v1409_v19 = vadd.f32 %v352_v16, %v195_v10 }
 0x12a   :  { %420 = vadd.xlane.f32.xlu0 %v419_v17 }
 0x12b   :  { %v308_v29 = vpop.f32.mrb[10].mxu0  ;;  %v356_v30 = vpop.f32.mrb[10].mxu1  ;;  %v387_v31 = vsel %vm377_vm0, %v1407_v18, 0.0  ;;  %v403_v21 = vsel %vm377_vm0, %v1409_v19, 0.0 }
 0x12c   :  { %v310_v32 = vpop.f32.mrb[11].mxu0  ;;  %v358_v35 = vpop.f32.mrb[11].mxu1  ;;  %v422_v38 = vadd.f32 %v387_v31, %v1417_v28  ;;  %v1435_v44 = vadd.f32 %v308_v29, %v1339_v23  ;;  %v446_v54 = vadd.f32 %v403_v21, %v1432_v43  ;;  %v1450_v61 = vadd.f32 %v356_v30, %v200_v22 }
 0x12d   :  { %v1425_v40 = vadd.f32 %v310_v32, %v1339_v23  ;;  %v1427_v41 = vadd.f32 %v358_v35, %v200_v22 }
 0x12e   :  { %423 = vadd.xlane.f32.xlu1 %v422_v38  ;;  %444 = vadd.xlane.f32.xlu0 %v443_v39 }
 0x12f   :  { %v314_v45 = vpop.f32.mrb[12].mxu0  ;;  %v362_v48 = vpop.f32.mrb[12].mxu1  ;;  %v389_v51 = vsel %vm377_vm0, %v1425_v40, 0.0  ;;  %v405_v23 = vsel %vm377_vm0, %v1427_v41, 0.0 }
 0x130   :  { %v316_v52 = vpop.f32.mrb[13].mxu0  ;;  %v364_v53 = vpop.f32.mrb[13].mxu1  ;;  %v425_v55 = vadd.f32 %v389_v51, %v1435_v44  ;;  %v1453_v0 = vadd.f32 %v314_v45, %v1341_v24  ;;  %v449_v7 = vadd.f32 %v405_v23, %v1450_v61  ;;  %v1468_v13 = vadd.f32 %v362_v48, %v205_v42 }
 0x131   :  { %v1443_v56 = vadd.f32 %v316_v52, %v1341_v24  ;;  %v1445_v57 = vadd.f32 %v364_v53, %v205_v42 }
 0x132   :  { %447 = vadd.xlane.f32.xlu1 %v446_v54  ;;  %426 = vadd.xlane.f32.xlu0 %v425_v55 }
 0x133   :  { %v320_v1 = vpop.f32.mrb[14].mxu0  ;;  %v368_v2 = vpop.f32.mrb[14].mxu1  ;;  %v391_v3 = vsel %vm377_vm0, %v1443_v56, 0.0  ;;  %v407_v24 = vsel %vm377_vm0, %v1445_v57, 0.0 }
 0x134   :  { %v322_v4 = vpop.f32.mrb[15].mxu0  ;;  %v370_v5 = vpop.f32.mrb[15].mxu1  ;;  %v428_v6 = vadd.f32 %v391_v3, %v1453_v0  ;;  %v1471_v14 = vadd.f32 %v320_v1, %v1343_v26  ;;  %v452_v16 = vadd.f32 %v407_v24, %v1468_v13  ;;  %v1481_v22 = vadd.f32 %v368_v2, %v210_v58 }
 0x135   :  { %v1461_v10 = vadd.f32 %v322_v4, %v1343_v26  ;;  %v1463_v12 = vadd.f32 %v370_v5, %v210_v58 }
 0x136   :  { %429 = vadd.xlane.f32.xlu1 %v428_v6  ;;  %450 = vadd.xlane.f32.xlu0 %v449_v7 }
 0x137   :  { %v393_v15 = vsel %vm377_vm0, %v1461_v10, 0.0  ;;  %v409_v20 = vsel %vm377_vm0, %v1463_v12, 0.0 }
 0x138   :  { %v431_v17 = vadd.f32 %v393_v15, %v1471_v14  ;;  %v455_v26 = vadd.f32 %v409_v20, %v1481_v22 }
 0x13a   :  { %453 = vadd.xlane.f32.xlu1 %v452_v16  ;;  %432 = vadd.xlane.f32.xlu0 %v431_v17 }
 0x13e   :  { %456 = vadd.xlane.f32.xlu0 %v455_v26 }
 0x1ab   :  { %v436_v29 = vpop.xlane.xlu1 %435  ;;  %v412_v30 = vpop.xlane.xlu0 %411 }
 0x1af   :  { %v439_v31 = vpop.xlane.xlu0 %438  ;;  %v415_v32 = vpop.xlane.xlu1 %414 }
 0x1b3   :  { %v418_v35 = vpop.xlane.xlu0 %417  ;;  %v442_v38 = vpop.xlane.xlu1 %441 }
 0x1b7   :  { %v421_v39 = vpop.xlane.xlu0 %420 }
 0x1bb   :  { %v424_v21 = vpop.xlane.xlu1 %423  ;;  %v445_v42 = vpop.xlane.xlu0 %444 }
 0x1bc   :  { %v462_v45 = vadd.f32 %v424_v21, %v412_v30 }
 0x1be   :  { %v466_v48 = vadd.f32 %v462_v45, %v436_v29 }
 0x1bf   :  { %v448_v51 = vpop.xlane.xlu1 %447  ;;  %v427_v52 = vpop.xlane.xlu0 %426 }
 0x1c0   :  { %v470_v53 = vadd.f32 %v466_v48, %v448_v51  ;;  %v463_v54 = vadd.f32 %v427_v52, %v415_v32 }
 0x1c2   :  { %v1484_v55 = vmul.f32 0.0015432099, %v470_v53  ;;  %v467_v23 = vadd.f32 %v463_v54, %v439_v31 }
 0x1c3   :  { %v430_v58 = vpop.xlane.xlu1 %429  ;;  %v451_v1 = vpop.xlane.xlu0 %450 }
 0x1c4   :  { %v464_v2 = vadd.f32 %v430_v58, %v418_v35  ;;  %v471_v3 = vadd.f32 %v467_v23, %v451_v1  ;;  %481 = vperm.xlu1 %961, %v1484_v55  }
 0x1c6   :  { %v1487_v4 = vmul.f32 0.0015432099, %v471_v3  ;;  %v468_v5 = vadd.f32 %v464_v2, %v442_v38 }
 0x1c7   :  { %v454_v6 = vpop.xlane.xlu1 %453  ;;  %v433_v7 = vpop.xlane.xlu0 %432 }
 0x1c8   :  { %v472_v24 = vadd.f32 %v468_v5, %v454_v6  ;;  %v465_v15 = vadd.f32 %v433_v7, %v421_v39  ;;  %486 = vperm.xlu0 %960, %v1487_v4  }
 0x1ca   :  { %v1490_v16 = vmul.f32 0.0015432099, %v472_v24  ;;  %v469_v17 = vadd.f32 %v465_v15, %v445_v42 }
 0x1cb   :  { %v457_v20 = vpop.xlane.xlu0 %456 }
 0x1cc   :  { %v473_v26 = vadd.f32 %v469_v17, %v457_v20  ;;  %491 = vperm.xlu1 %961, %v1490_v16  }
 0x1ce   :  { %v1493_v29 = vmul.f32 0.0015432099, %v473_v26 }
 0x1d0   :  { %496 = vperm.xlu1 %961, %v1493_v29  }
 0x243   :  { %v482_v30 = vpop.permute.xlu1 %481 }
 0x244   :  { %v499_v31 = vsub.f32 %v1352_v36, %v482_v30  ;;  %v500_v32 = vsub.f32 %v1348_v33, %v482_v30  ;;  %v507_v35 = vsub.f32 %v1417_v28, %v482_v30  ;;  %v508_v38 = vsub.f32 %v1407_v18, %v482_v30 }
 0x245   :  { %v515_v39 = vsub.f32 %v1354_v37, %v482_v30  ;;  %v516_v21 = vsub.f32 %v1350_v34, %v482_v30  ;;  %v523_v42 = vsub.f32 %v1432_v43, %v482_v30  ;;  %v524_v45 = vsub.f32 %v1409_v19, %v482_v30 }
 0x246   :  { %v532_v48 = vsel %vm377_vm0, %v500_v32, 0.0  ;;  %v563_v51 = vmul.f32 %v499_v31, %v499_v31  ;;  %v540_v52 = vsel %vm377_vm0, %v508_v38, 0.0  ;;  %v571_v53 = vmul.f32 %v507_v35, %v507_v35 }
 0x247   :  { %v487_v54 = vpop.permute.xlu0 %486  ;;  %v564_v23 = vmul.f32 %v532_v48, %v532_v48  ;;  %v572_v58 = vmul.f32 %v540_v52, %v540_v52  ;;  %v548_v1 = vsel %vm377_vm0, %v516_v21, 0.0  ;;  %v579_v2 = vmul.f32 %v515_v39, %v515_v39 }
 0x248   :  { %v580_v3 = vmul.f32 %v548_v1, %v548_v1  ;;  %v509_v5 = vsub.f32 %v1435_v44, %v487_v54  ;;  %v510_v6 = vsub.f32 %v1425_v40, %v487_v54  ;;  %v556_v7 = vsel %vm377_vm0, %v524_v45, 0.0 }
 0x249   :  { %v595_v24 = vadd.f32 %v564_v23, %v563_v51  ;;  %v607_v15 = vadd.f32 %v572_v58, %v571_v53  ;;  %v587_v26 = vmul.f32 %v523_v42, %v523_v42  ;;  %v517_v30 = vsub.f32 %v1370_v50, %v487_v54 }
 0x24a   :  { %v542_v17 = vsel %vm377_vm0, %v510_v6, 0.0  ;;  %v573_v20 = vmul.f32 %v509_v5, %v509_v5  ;;  %v588_v35 = vmul.f32 %v556_v7, %v556_v7  ;;  %v518_v38 = vsub.f32 %v1366_v47, %v487_v54 }
 0x24b   :  { %v492_v31 = vpop.permute.xlu1 %491  ;;  %596 = vadd.xlane.f32.xlu0 %v595_v24  ;;  %608 = vadd.xlane.f32.xlu1 %v607_v15  ;;  %v574_v32 = vmul.f32 %v542_v17, %v542_v17  ;;  %v619_v39 = vadd.f32 %v580_v3, %v579_v2  ;;  %v525_v21 = vsub.f32 %v1450_v61, %v487_v54 }
 0x24c   :  { %v526_v45 = vsub.f32 %v1427_v41, %v487_v54  ;;  %v501_v48 = vsub.f32 %v1368_v49, %v487_v54  ;;  %v550_v42 = vsel %vm377_vm0, %v518_v38, 0.0  ;;  %v581_v52 = vmul.f32 %v517_v30, %v517_v30 }
 0x24d   :  { %v610_v51 = vadd.f32 %v574_v32, %v573_v20  ;;  %v502_v53 = vsub.f32 %v1364_v46, %v487_v54  ;;  %v582_v23 = vmul.f32 %v550_v42, %v550_v42  ;;  %v503_v1 = vsub.f32 %v1384_v62, %v492_v31 }
 0x24e   :  { %v558_v58 = vsel %vm377_vm0, %v526_v45, 0.0  ;;  %v589_v3 = vmul.f32 %v525_v21, %v525_v21  ;;  %v504_v7 = vsub.f32 %v1380_v59, %v492_v31  ;;  %v631_v24 = vadd.f32 %v588_v35, %v587_v26 }
 0x24f   :  { %620 = vadd.xlane.f32.xlu1 %v619_v39  ;;  %v497_v2 = vpop.permute.xlu1 %496  ;;  %611 = vadd.xlane.f32.xlu0 %v610_v51  ;;  %v590_v5 = vmul.f32 %v558_v58, %v558_v58  ;;  %v534_v6 = vsel %vm377_vm0, %v502_v53, 0.0  ;;  %v565_v15 = vmul.f32 %v501_v48, %v501_v48  ;;  %v512_v54 = vsub.f32 %v1443_v56, %v492_v31 }
 0x250   :  { %v566_v17 = vmul.f32 %v534_v6, %v534_v6  ;;  %v622_v20 = vadd.f32 %v582_v23, %v581_v52  ;;  %v536_v30 = vsel %vm377_vm0, %v504_v7, 0.0  ;;  %v511_v32 = vsub.f32 %v1453_v0, %v492_v31 }
 0x251   :  { %v506_v38 = vsub.f32 %v1396_v8, %v497_v2  ;;  %v544_v39 = vsel %vm377_vm0, %v512_v54, 0.0  ;;  %v634_v21 = vadd.f32 %v590_v5, %v589_v3  ;;  %v567_v45 = vmul.f32 %v503_v1, %v503_v1 }
 0x252   :  { %v598_v26 = vadd.f32 %v566_v17, %v565_v15  ;;  %v568_v35 = vmul.f32 %v536_v30, %v536_v30  ;;  %v505_v48 = vsub.f32 %v1400_v11, %v497_v2  ;;  %v520_v51 = vsub.f32 %v1382_v60, %v492_v31 }
 0x253   :  { %632 = vadd.xlane.f32.xlu1 %v631_v24  ;;  %623 = vadd.xlane.f32.xlu0 %v622_v20  ;;  %v575_v42 = vmul.f32 %v511_v32, %v511_v32  ;;  %v576_v52 = vmul.f32 %v544_v39, %v544_v39  ;;  %v538_v53 = vsel %vm377_vm0, %v506_v38, 0.0  ;;  %v519_v23 = vsub.f32 %v1386_v63, %v492_v31 }
 0x254   :  { %v552_v58 = vsel %vm377_vm0, %v520_v51, 0.0  ;;  %v514_v6 = vsub.f32 %v1461_v10, %v497_v2  ;;  %v528_v1 = vsub.f32 %v1445_v57, %v492_v31  ;;  %v569_v3 = vmul.f32 %v505_v48, %v505_v48 }
 0x255   :  { %v570_v5 = vmul.f32 %v538_v53, %v538_v53  ;;  %v513_v7 = vsub.f32 %v1471_v14, %v497_v2  ;;  %v527_v24 = vsub.f32 %v1468_v13, %v492_v31  ;;  %v601_v15 = vadd.f32 %v568_v35, %v567_v45 }
 0x256   :  { %v613_v17 = vadd.f32 %v576_v52, %v575_v42  ;;  %v583_v54 = vmul.f32 %v519_v23, %v519_v23  ;;  %v584_v20 = vmul.f32 %v552_v58, %v552_v58  ;;  %v546_v30 = vsel %vm377_vm0, %v514_v6, 0.0 }
 0x257   :  { %635 = vadd.xlane.f32.xlu0 %v634_v21  ;;  %599 = vadd.xlane.f32.xlu1 %v598_v26  ;;  %v560_v32 = vsel %vm377_vm0, %v528_v1, 0.0  ;;  %v522_v38 = vsub.f32 %v1398_v9, %v497_v2  ;;  %v604_v39 = vadd.f32 %v570_v5, %v569_v3  ;;  %v577_v21 = vmul.f32 %v513_v7, %v513_v7 }
 0x258   :  { %v591_v26 = vmul.f32 %v527_v24, %v527_v24  ;;  %v625_v48 = vadd.f32 %v584_v20, %v583_v54  ;;  %v578_v51 = vmul.f32 %v546_v30, %v546_v30  ;;  %v592_v31 = vmul.f32 %v560_v32, %v560_v32 }
 0x259   :  { %v521_v45 = vsub.f32 %v1414_v25, %v497_v2  ;;  %v554_v35 = vsel %vm377_vm0, %v522_v38, 0.0  ;;  %v530_v42 = vsub.f32 %v1463_v12, %v497_v2  ;;  %v529_v52 = vsub.f32 %v1481_v22, %v497_v2 }
 0x25a   :  { %v616_v53 = vadd.f32 %v578_v51, %v577_v21  ;;  %v637_v23 = vadd.f32 %v592_v31, %v591_v26  ;;  %v586_v6 = vmul.f32 %v554_v35, %v554_v35 }
 0x25b   :  { %602 = vadd.xlane.f32.xlu0 %v601_v15  ;;  %614 = vadd.xlane.f32.xlu1 %v613_v17  ;;  %v585_v58 = vmul.f32 %v521_v45, %v521_v45  ;;  %v562_v1 = vsel %vm377_vm0, %v530_v42, 0.0  ;;  %v593_v5 = vmul.f32 %v529_v52, %v529_v52 }
 0x25c   :  { %v594_v7 = vmul.f32 %v562_v1, %v562_v1 }
 0x25d   :  { %v628_v3 = vadd.f32 %v586_v6, %v585_v58 }
 0x25e   :  { %v640_v24 = vadd.f32 %v594_v7, %v593_v5 }
 0x25f   :  { %605 = vadd.xlane.f32.xlu0 %v604_v39  ;;  %626 = vadd.xlane.f32.xlu1 %v625_v48 }
 0x263   :  { %617 = vadd.xlane.f32.xlu0 %v616_v53  ;;  %638 = vadd.xlane.f32.xlu1 %v637_v23 }
 0x267   :  { %629 = vadd.xlane.f32.xlu0 %v628_v3  ;;  %v663_v3 = vld [vmem:[%s1719_s3] sm:$0xff] }
 0x26b   :  { %641 = vadd.xlane.f32.xlu0 %v640_v24 }
 0x2d8   :  { %v609_v15 = vpop.xlane.xlu1 %608  ;;  %v597_v17 = vpop.xlane.xlu0 %596 }
 0x2d9   :  { %v647_v2 = vadd.f32 %v609_v15, %v597_v17 }
 0x2dc   :  { %v621_v54 = vpop.xlane.xlu1 %620  ;;  %v612_v20 = vpop.xlane.xlu0 %611 }
 0x2dd   :  { %v651_v30 = vadd.f32 %v647_v2, %v621_v54 }
 0x2e0   :  { %v633_v32 = vpop.xlane.xlu1 %632  ;;  %v624_v38 = vpop.xlane.xlu0 %623 }
 0x2e1   :  { %v655_v39 = vadd.f32 %v651_v30, %v633_v32 }
 0x2e3   :  { %v659_v21 = vmul.f32 0.0015432099, %v655_v39 }
 0x2e4   :  { %v600_v27 = vpop.xlane.xlu1 %599  ;;  %v636_v26 = vpop.xlane.xlu0 %635 }
 0x2e5   :  { %v667_v48 = vadd.f32 1e-05, %v659_v21  ;;  %v648_v51 = vadd.f32 %v612_v20, %v600_v27 }
 0x2e7   :  { %962 = vrsqrt.f32 %v667_v48  ;;  %v652_v31 = vadd.f32 %v648_v51, %v624_v38  ;;  %v664_v38 = vld [vmem:[%s1719_s3 + $0x8] sm:$0xff] }
 0x2e8   :  { %v615_v45 = vpop.xlane.xlu1 %614  ;;  %v603_v35 = vpop.xlane.xlu0 %602 }
 0x2e9   :  { %v656_v42 = vadd.f32 %v652_v31, %v636_v26  ;;  %v649_v6 = vadd.f32 %v615_v45, %v603_v35  ;;  %v679_v31 = vld [vmem:[%s1720_s4] sm:$0xff] }
 0x2eb   :  { %v660_v52 = vmul.f32 0.0015432099, %v656_v42  ;;  %v665_v42 = vld [vmem:[%s1719_s3 + $0x10] sm:$0xff] }
 0x2ec   :  { %v627_v53 = vpop.xlane.xlu1 %626  ;;  %v606_v23 = vpop.xlane.xlu0 %605 }
 0x2ed   :  { %v668_v58 = vadd.f32 1e-05, %v660_v52  ;;  %v653_v1 = vadd.f32 %v649_v6, %v627_v53 }
 0x2ef   :  { %964 = vrsqrt.f32 %v668_v58  ;;  %v681_v58 = vld [vmem:[%s1720_s4 + $0x10] sm:$0xff] }
 0x2f0   :  { %v639_v5 = vpop.xlane.xlu1 %638  ;;  %v618_v7 = vpop.xlane.xlu0 %617 }
 0x2f1   :  { %v963_v24 = vpop.eup %962  ;;  %v657_v15 = vadd.f32 %v653_v1, %v639_v5  ;;  %v650_v30 = vadd.f32 %v618_v7, %v606_v23  ;;  %v666_v5 = vld [vmem:[%s1719_s3 + $0x18] sm:$0xff] }
 0x2f2   :  { %v675_v17 = vmul.f32 %v963_v24, %v663_v3  ;;  %v682_v24 = vld [vmem:[%s1720_s4 + $0x18] sm:$0xff] }
 0x2f3   :  { %v661_v54 = vmul.f32 0.0015432099, %v657_v15 }
 0x2f4   :  { %693 = vperm.xlu1 %961, %v675_v17   ;;  %v630_v20 = vpop.xlane.xlu0 %629  ;;  %v683_v48 = vmul.f32 %v675_v17, %v1484_v55  ;;  %v680_v55 = vld [vmem:[%s1720_s4 + $0x8] sm:$0xff] }
 0x2f5   :  { %v669_v2 = vadd.f32 1e-05, %v661_v54  ;;  %v654_v32 = vadd.f32 %v650_v30, %v630_v20 }
 0x2f6   :  { %v687_v35 = vsub.f32 %v679_v31, %v683_v48 }
 0x2f7   :  { %966 = vrsqrt.f32 %v669_v2 }
 0x2f8   :  { %v642_v39 = vpop.xlane.xlu0 %641 }
 0x2f9   :  { %v965_v21 = vpop.eup %964  ;;  %v658_v27 = vadd.f32 %v654_v32, %v642_v39 }
 0x2fa   :  { %v676_v26 = vmul.f32 %v965_v21, %v664_v38 }
 0x2fb   :  { %v662_v51 = vmul.f32 0.0015432099, %v658_v27 }
 0x2fc   :  { %698 = vperm.xlu0 %960, %v676_v26   ;;  %v684_v23 = vmul.f32 %v676_v26, %v1487_v4 }
 0x2fd   :  { %v670_v45 = vadd.f32 1e-05, %v662_v51 }
 0x2fe   :  { %v688_v1 = vsub.f32 %v680_v55, %v684_v23 }
 0x2ff   :  { %968 = vrsqrt.f32 %v670_v45 }
 0x300   :  { %745 = vperm.xlu0 %960, %v687_v35  }
 0x301   :  { %v967_v52 = vpop.eup %966 }
 0x302   :  { %v677_v53 = vmul.f32 %v967_v52, %v665_v42 }
 0x304   :  { %703 = vperm.xlu1 %961, %v677_v53   ;;  %v685_v6 = vmul.f32 %v677_v53, %v1490_v16 }
 0x306   :  { %v689_v3 = vsub.f32 %v681_v58, %v685_v6 }
 0x308   :  { %750 = vperm.xlu1 %961, %v688_v1   ;;  %755 = vperm.xlu0 %960, %v689_v3  }
 0x309   :  { %v969_v4 = vpop.eup %968 }
 0x30a   :  { %v678_v7 = vmul.f32 %v969_v4, %v666_v5 }
 0x30c   :  { %708 = vperm.xlu1 %961, %v678_v7   ;;  %v686_v15 = vmul.f32 %v678_v7, %v1493_v29 }
 0x30e   :  { %v690_v17 = vsub.f32 %v682_v24, %v686_v15 }
 0x310   :  { %760 = vperm.xlu1 %961, %v690_v17  }
 0x373   :  { %v694_v16 = vpop.permute.xlu1 %693 }
 0x374   :  { %v711_v20 = vmul.f32 %v694_v16, %v1352_v36  ;;  %v712_v2 = vmul.f32 %v694_v16, %v1348_v33  ;;  %v719_v30 = vmul.f32 %v694_v16, %v1417_v28  ;;  %v720_v32 = vmul.f32 %v694_v16, %v1407_v18 }
 0x375   :  { %v727_v38 = vmul.f32 %v694_v16, %v1354_v37  ;;  %v728_v39 = vmul.f32 %v694_v16, %v1350_v34  ;;  %v735_v21 = vmul.f32 %v694_v16, %v1432_v43  ;;  %v736_v29 = vmul.f32 %v694_v16, %v1409_v19 }
 0x37b   :  { %v699_v54 = vpop.permute.xlu0 %698 }
 0x37c   :  { %v713_v19 = vmul.f32 %v699_v54, %v1368_v49  ;;  %v714_v55 = vmul.f32 %v699_v54, %v1364_v46  ;;  %v721_v58 = vmul.f32 %v699_v54, %v1435_v44  ;;  %v722_v6 = vmul.f32 %v699_v54, %v1425_v40 }
 0x37d   :  { %v729_v46 = vmul.f32 %v699_v54, %v1370_v50  ;;  %v730_v49 = vmul.f32 %v699_v54, %v1366_v47  ;;  %v737_v40 = vmul.f32 %v699_v54, %v1450_v61  ;;  %v738_v44 = vmul.f32 %v699_v54, %v1427_v41 }
 0x37f   :  { %v746_v27 = vpop.permute.xlu0 %745 }
 0x380   :  { %v763_v26 = vadd.f32 %v746_v27, %v711_v20  ;;  %v764_v48 = vadd.f32 %v746_v27, %v712_v2  ;;  %v771_v51 = vadd.f32 %v746_v27, %v719_v30  ;;  %v772_v31 = vadd.f32 %v746_v27, %v720_v32 }
 0x381   :  { %v779_v36 = vadd.f32 %v746_v27, %v727_v38  ;;  %v780_v45 = vadd.f32 %v746_v27, %v728_v39  ;;  %v787_v33 = vadd.f32 %v746_v27, %v735_v21  ;;  %v788_v35 = vadd.f32 %v746_v27, %v736_v29 }
 0x382   :  { %v795_v28 = vmax.f32 %v763_v26, 0.0  ;;  %v796_v42 = vmax.f32 %v764_v48, 0.0  ;;  %v803_v18 = vmax.f32 %v771_v51, 0.0  ;;  %v804_v52 = vmax.f32 %v772_v31, 0.0 }
 0x383   :  { %v811_v37 = vmax.f32 %v779_v36, 0.0  ;;  %v812_v53 = vmax.f32 %v780_v45, 0.0  ;;  %v819_v34 = vmax.f32 %v787_v33, 0.0  ;;  %v820_v23 = vmax.f32 %v788_v35, 0.0  ;;  %v704_v43 = vpop.permute.xlu1 %703 }
 0x384   :  { %827 = vst [vmem:[%s1721_s5] sm:$0xff] %v795_v28  ;;  %828 = vst [vmem:[%s1721_s5 + $0x8] sm:$0xff] %v796_v42  ;;  %v715_v47 = vmul.f32 %v704_v43, %v1384_v62  ;;  %v716_v50 = vmul.f32 %v704_v43, %v1380_v59  ;;  %v723_v41 = vmul.f32 %v704_v43, %v1453_v0 }
 0x385   :  { %835 = vst [vmem:[%s1721_s5 + $0x40] sm:$0xff] %v803_v18  ;;  %836 = vst [vmem:[%s1721_s5 + $0x48] sm:$0xff] %v804_v52  ;;  %v724_v61 = vmul.f32 %v704_v43, %v1443_v56  ;;  %v731_v3 = vmul.f32 %v704_v43, %v1386_v63  ;;  %v732_v5 = vmul.f32 %v704_v43, %v1382_v60 }
 0x386   :  { %843 = vst [vmem:[%s1721_s5 + $0x80] sm:$0xff] %v811_v37  ;;  %844 = vst [vmem:[%s1721_s5 + $0x88] sm:$0xff] %v812_v53  ;;  %v739_v4 = vmul.f32 %v704_v43, %v1468_v13  ;;  %v740_v7 = vmul.f32 %v704_v43, %v1445_v57 }
 0x387   :  { %851 = vst [vmem:[%s1721_s5 + $0xc0] sm:$0xff] %v819_v34  ;;  %852 = vst [vmem:[%s1721_s5 + $0xc8] sm:$0xff] %v820_v23  ;;  %v751_v1 = vpop.permute.xlu1 %750  ;;  %v756_v0 = vpop.permute.xlu0 %755 }
 0x388   :  { %v765_v24 = vadd.f32 %v751_v1, %v713_v19  ;;  %v766_v15 = vadd.f32 %v751_v1, %v714_v55  ;;  %v773_v17 = vadd.f32 %v751_v1, %v721_v58  ;;  %v774_v16 = vadd.f32 %v751_v1, %v722_v6 }
 0x389   :  { %v781_v62 = vadd.f32 %v751_v1, %v729_v46  ;;  %v782_v54 = vadd.f32 %v751_v1, %v730_v49  ;;  %v789_v59 = vadd.f32 %v751_v1, %v737_v40  ;;  %v790_v20 = vadd.f32 %v751_v1, %v738_v44 }
 0x38a   :  { %v797_v2 = vmax.f32 %v765_v24, 0.0  ;;  %v798_v56 = vmax.f32 %v766_v15, 0.0  ;;  %v805_v30 = vmax.f32 %v773_v17, 0.0  ;;  %v806_v32 = vmax.f32 %v774_v16, 0.0 }
 0x38b   :  { %v813_v63 = vmax.f32 %v781_v62, 0.0  ;;  %v814_v38 = vmax.f32 %v782_v54, 0.0  ;;  %v821_v60 = vmax.f32 %v789_v59, 0.0  ;;  %v822_v39 = vmax.f32 %v790_v20, 0.0  ;;  %v709_v13 = vpop.permute.xlu1 %708 }
 0x38c   :  { %829 = vst [vmem:[%s1721_s5 + $0x10] sm:$0xff] %v797_v2  ;;  %830 = vst [vmem:[%s1721_s5 + $0x18] sm:$0xff] %v798_v56  ;;  %v767_v57 = vadd.f32 %v756_v0, %v715_v47  ;;  %v768_v21 = vadd.f32 %v756_v0, %v716_v50  ;;  %v775_v29 = vadd.f32 %v756_v0, %v723_v41 }
 0x38d   :  { %837 = vst [vmem:[%s1721_s5 + $0x50] sm:$0xff] %v805_v30  ;;  %838 = vst [vmem:[%s1721_s5 + $0x58] sm:$0xff] %v806_v32  ;;  %v776_v27 = vadd.f32 %v756_v0, %v724_v61  ;;  %v783_v26 = vadd.f32 %v756_v0, %v731_v3  ;;  %v784_v48 = vadd.f32 %v756_v0, %v732_v5 }
 0x38e   :  { %845 = vst [vmem:[%s1721_s5 + $0x90] sm:$0xff] %v813_v63  ;;  %846 = vst [vmem:[%s1721_s5 + $0x98] sm:$0xff] %v814_v38  ;;  %v791_v51 = vadd.f32 %v756_v0, %v739_v4  ;;  %v792_v31 = vadd.f32 %v756_v0, %v740_v7  ;;  %v799_v36 = vmax.f32 %v767_v57, 0.0  ;;  %v800_v45 = vmax.f32 %v768_v21, 0.0 }
 0x38f   :  { %853 = vst [vmem:[%s1721_s5 + $0xd0] sm:$0xff] %v821_v60  ;;  %854 = vst [vmem:[%s1721_s5 + $0xd8] sm:$0xff] %v822_v39  ;;  %v807_v33 = vmax.f32 %v775_v29, 0.0  ;;  %v808_v35 = vmax.f32 %v776_v27, 0.0  ;;  %v815_v28 = vmax.f32 %v783_v26, 0.0  ;;  %v816_v42 = vmax.f32 %v784_v48, 0.0  ;;  %v761_v37 = vpop.permute.xlu1 %760 }
 0x390   :  { %v823_v18 = vmax.f32 %v791_v51, 0.0  ;;  %v824_v52 = vmax.f32 %v792_v31, 0.0  ;;  %831 = vst [vmem:[%s1721_s5 + $0x20] sm:$0xff] %v799_v36  ;;  %832 = vst [vmem:[%s1721_s5 + $0x28] sm:$0xff] %v800_v45  ;;  %v717_v53 = vmul.f32 %v709_v13, %v1400_v11  ;;  %v718_v34 = vmul.f32 %v709_v13, %v1396_v8 }
 0x391   :  { %839 = vst [vmem:[%s1721_s5 + $0x60] sm:$0xff] %v807_v33  ;;  %840 = vst [vmem:[%s1721_s5 + $0x68] sm:$0xff] %v808_v35  ;;  %v725_v23 = vmul.f32 %v709_v13, %v1471_v14  ;;  %v726_v43 = vmul.f32 %v709_v13, %v1461_v10  ;;  %v733_v8 = vmul.f32 %v709_v13, %v1414_v25 }
 0x392   :  { %847 = vst [vmem:[%s1721_s5 + $0xa0] sm:$0xff] %v815_v28  ;;  %848 = vst [vmem:[%s1721_s5 + $0xa8] sm:$0xff] %v816_v42  ;;  %v734_v11 = vmul.f32 %v709_v13, %v1398_v9  ;;  %v741_v10 = vmul.f32 %v709_v13, %v1481_v22  ;;  %v742_v14 = vmul.f32 %v709_v13, %v1463_v12 }
 0x393   :  { %855 = vst [vmem:[%s1721_s5 + $0xe0] sm:$0xff] %v823_v18  ;;  %856 = vst [vmem:[%s1721_s5 + $0xe8] sm:$0xff] %v824_v52  ;;  %v769_v19 = vadd.f32 %v761_v37, %v717_v53  ;;  %v770_v55 = vadd.f32 %v761_v37, %v718_v34  ;;  %v777_v58 = vadd.f32 %v761_v37, %v725_v23 }
 0x394   :  { %v778_v6 = vadd.f32 %v761_v37, %v726_v43  ;;  %v785_v46 = vadd.f32 %v761_v37, %v733_v8  ;;  %v786_v49 = vadd.f32 %v761_v37, %v734_v11  ;;  %v793_v40 = vadd.f32 %v761_v37, %v741_v10 }
 0x395   :  { %v794_v44 = vadd.f32 %v761_v37, %v742_v14  ;;  %v801_v47 = vmax.f32 %v769_v19, 0.0  ;;  %v802_v50 = vmax.f32 %v770_v55, 0.0  ;;  %v809_v41 = vmax.f32 %v777_v58, 0.0 }
 0x396   :  { %v810_v61 = vmax.f32 %v778_v6, 0.0  ;;  %v817_v1 = vmax.f32 %v785_v46, 0.0  ;;  %v818_v25 = vmax.f32 %v786_v49, 0.0  ;;  %v825_v3 = vmax.f32 %v793_v40, 0.0 }
 0x397   :  { %v826_v9 = vmax.f32 %v794_v44, 0.0  ;;  %833 = vst [vmem:[%s1721_s5 + $0x30] sm:$0xff] %v801_v47  ;;  %834 = vst [vmem:[%s1721_s5 + $0x38] sm:$0xff] %v802_v50 }
 0x398   :  { %841 = vst [vmem:[%s1721_s5 + $0x70] sm:$0xff] %v809_v41  ;;  %842 = vst [vmem:[%s1721_s5 + $0x78] sm:$0xff] %v810_v61 }
 0x399   :  { %849 = vst [vmem:[%s1721_s5 + $0xb0] sm:$0xff] %v817_v1  ;;  %850 = vst [vmem:[%s1721_s5 + $0xb8] sm:$0xff] %v818_v25 }
 0x39a   :  { %857 = vst [vmem:[%s1721_s5 + $0xf0] sm:$0xff] %v825_v3  ;;  %858 = vst [vmem:[%s1721_s5 + $0xf8] sm:$0xff] %v826_v9 }

// kernel: tile.28
= control target key start
LH: loop header
LB: loop body
LE: loop exit
PB: predicated region body
PF: predicated region fallthrough
CT: control target
= control target key end

     0   :  { %s22_s0 = inlined_call_operand.vmem [shape: f32[2], index: 0, kind: input, shape index: {}]   ;;  %s23_s1 = inlined_call_operand.vmem [shape: f32[4,2], index: 1, kind: output, shape index: {}]  }
   0x1   :  { %v4_v0 = vld [vmem:[%s22_s0] ss:$0 sm:$0xff] }
   0x2   :  { %5 = vst [vmem:[%s23_s1] sm:$0xf] %v4_v0 }

// kernel: tile.2
= control target key start
LH: loop header
LB: loop body
LE: loop exit
PB: predicated region body
PF: predicated region fallthrough
CT: control target
= control target key end

     0   :  { %vm7_vm0 = vcmask 7168   ;;  %s37_s0 = inlined_call_operand.vmem [shape: f32[4,2], index: 0, kind: input, shape index: {}]   ;;  %s38_s1 = inlined_call_operand.vmem [shape: f32[8,1], index: 1, kind: output, shape index: {}]  }
   0x1   :  { %v4_v0 = vld [vmem:[%s37_s0] sm:$0xf]  ;;  %s17_s0 = smov 127  }
   0x2   :  { %5 = vst [vmem:[#allocation0] sm:$0xf] %v4_v0 }
   0x9   :  { %v9_v1 = vld [vmem:[#allocation0] sm:$0xf]  }
   0xa   :  { %v6_v2 = vld [vmem:[#allocation0] sm:$0xf]   ;;  %10 = vrot.lane.b32.xlu0 %v9_v1, %s17_s0 }
   0xb   :  { %8 = vst.msk [vmem:[%s38_s1] ss:$2 sm:$0xf] %vm7_vm0, %v6_v2  }
  0x7c   :  { %v11_v3 = vpop.permute.xlu0 %10  }
  0x7d   :  { %15 = vst.msk [vmem:[%s38_s1 + $0x1] ss:$2 sm:$0xf] %vm7_vm0, %v11_v3  }

// kernel: encoder_decoder_forward.14
= control target key start
LH: loop header
LB: loop body
LE: loop exit
PB: predicated region body
PF: predicated region fallthrough
CT: control target
= control target key end

     0   :  { %v597_v3 = vmov 0.0   ;;  %v598_v8 = vmov 0   ;;  %vm382_vm1 = vcmask 1041408   ;;  %vm384_vm2 = vcmask 1043456   ;;  %s996_s1 = inlined_call_operand.vmem [shape: f32[128,768], index: 1, kind: input, shape index: {}]   ;;  %s997_s0 = inlined_call_operand.vmem [shape: f32[8,128], index: 0, kind: input, shape index: {}]   ;;  %s998_s2 = inlined_call_operand.vmem [shape: f32[8,1], index: 2, kind: input, shape index: {}]   ;;  %s999_s3 = inlined_call_operand.vmem [shape: f32[2,1], index: 3, kind: input, shape index: {}]   ;;  %s1000_s4 = inlined_call_operand.vmem [shape: f32[2,1], index: 4, kind: input, shape index: {}]   ;;  %s1001_s5 = inlined_call_operand.vmem [shape: f32[8,768], index: 5, kind: output, shape index: {}]  }
   0x1   :  { %v22_v0 = vld [vmem:[%s996_s1 + $0x8] sm:$0xff]  ;;  %v28_v1 = vld [vmem:[%s996_s1 + $0x38] sm:$0xff]  ;;  %v21_v2 = vld [vmem:[%s996_s1] sm:$0xff]  ;;  %187 = vmatprep.mubr.f32.mxu0 %v597_v3  ;;  %258 = vmatprep.mubr.f32.mxu1 %v597_v3  ;;  %vm386_vm3 = vcmask 1045504  }
   0x2   :  { %v495_v4 = vpack.c.bf16 %v28_v1, %v22_v0  ;;  %v27_v5 = vld [vmem:[%s996_s1 + $0x30] sm:$0xff]  ;;  %v24_v6 = vld [vmem:[%s996_s1 + $0x18] sm:$0xff]  ;;  %v30_v7 = vld [vmem:[%s996_s1 + $0x48] sm:$0xff]  ;;  %593 = vset.pattern.permute.xlu0 %v598_v8  ;;  %594 = vset.pattern.permute.xlu1 %v598_v8 }
   0x3   :  { %v497_v9 = vpack.c.bf16 %v27_v5, %v21_v2  ;;  %v527_v10 = vpack.c.bf16 %v30_v7, %v24_v6  ;;  %v34_v11 = vld [vmem:[%s996_s1 + $0x68] sm:$0xff]  ;;  %v40_v12 = vld [vmem:[%s996_s1 + $0x98] sm:$0xff]  ;;  %v23_v13 = vld [vmem:[%s996_s1 + $0x10] sm:$0xff] }
   0x4   :  { %496 = vmatprep.subr.bf16.mxu0 %v495_v4  ;;  %v499_v14 = vpack.c.bf16 %v40_v12, %v34_v11  ;;  %v29_v15 = vld [vmem:[%s996_s1 + $0x40] sm:$0xff]  ;;  %v39_v17 = vld [vmem:[%s996_s1 + $0x90] sm:$0xff]  ;;  %v36_v20 = vld [vmem:[%s996_s1 + $0x78] sm:$0xff] }
   0x5   :  { %v33_v16 = vld [vmem:[%s996_s1 + $0x60] sm:$0xff]  ;;  %498 = vmatpush1.bf16.msra.mxu0 %v497_v9  ;;  %528 = vmatprep.subr.bf16.mxu1 %v527_v10  ;;  %v529_v18 = vpack.c.bf16 %v29_v15, %v23_v13  ;;  %v42_v21 = vld [vmem:[%s996_s1 + $0xa8] sm:$0xff]  ;;  %v52_v24 = vld [vmem:[%s996_s1 + $0xf8] sm:$0xff] }
   0x6   :  { %v501_v19 = vpack.c.bf16 %v39_v17, %v33_v16  ;;  %v46_v22 = vld [vmem:[%s996_s1 + $0xc8] sm:$0xff]  ;;  %500 = vmatprep.subr.bf16.mxu0 %v499_v14  ;;  %v531_v23 = vpack.c.bf16 %v42_v21, %v36_v20  ;;  %v35_v25 = vld [vmem:[%s996_s1 + $0x70] sm:$0xff]  ;;  %v41_v26 = vld [vmem:[%s996_s1 + $0xa0] sm:$0xff] }
   0x7   :  { %530 = vmatpush1.bf16.msra.mxu1 %v529_v18  ;;  %v503_v27 = vpack.c.bf16 %v52_v24, %v46_v22  ;;  %v533_v28 = vpack.c.bf16 %v41_v26, %v35_v25  ;;  %v45_v29 = vld [vmem:[%s996_s1 + $0xc0] sm:$0xff]  ;;  %v51_v30 = vld [vmem:[%s996_s1 + $0xf0] sm:$0xff]  ;;  %v48_v31 = vld [vmem:[%s996_s1 + $0xd8] sm:$0xff] }
   0x8   :  { %532 = vmatprep.subr.bf16.mxu1 %v531_v23  ;;  %v54_v32 = vld [vmem:[%s996_s1 + $0x108] sm:$0xff]  ;;  %v64_v34 = vld [vmem:[%s996_s1 + $0x158] sm:$0xff]  ;;  %v505_v35 = vpack.c.bf16 %v51_v30, %v45_v29  ;;  %v47_v37 = vld [vmem:[%s996_s1 + $0xd0] sm:$0xff] }
   0x9   :  { %v58_v33 = vld [vmem:[%s996_s1 + $0x128] sm:$0xff]  ;;  %502 = vmatpush1.bf16.msra.mxu0 %v501_v19  ;;  %v535_v36 = vpack.c.bf16 %v54_v32, %v48_v31  ;;  %v53_v38 = vld [vmem:[%s996_s1 + $0x100] sm:$0xff]  ;;  %v63_v41 = vld [vmem:[%s996_s1 + $0x150] sm:$0xff] }
   0xa   :  { %v57_v39 = vld [vmem:[%s996_s1 + $0x120] sm:$0xff]  ;;  %504 = vmatprep.subr.bf16.mxu0 %v503_v27  ;;  %v507_v40 = vpack.c.bf16 %v64_v34, %v58_v33  ;;  %v60_v42 = vld [vmem:[%s996_s1 + $0x138] sm:$0xff]  ;;  %v66_v43 = vld [vmem:[%s996_s1 + $0x168] sm:$0xff]  ;;  %v537_v44 = vpack.c.bf16 %v53_v38, %v47_v37 }
   0xb   :  { %534 = vmatpush1.bf16.msra.mxu1 %v533_v28  ;;  %v70_v45 = vld [vmem:[%s996_s1 + $0x188] sm:$0xff]  ;;  %v76_v46 = vld [vmem:[%s996_s1 + $0x1b8] sm:$0xff]  ;;  %v539_v47 = vpack.c.bf16 %v66_v43, %v60_v42  ;;  %v59_v48 = vld [vmem:[%s996_s1 + $0x130] sm:$0xff]  ;;  %v509_v50 = vpack.c.bf16 %v63_v41, %v57_v39 }
   0xc   :  { %536 = vmatprep.subr.bf16.mxu1 %v535_v36  ;;  %v65_v49 = vld [vmem:[%s996_s1 + $0x160] sm:$0xff]  ;;  %v72_v51 = vld [vmem:[%s996_s1 + $0x198] sm:$0xff]  ;;  %v78_v52 = vld [vmem:[%s996_s1 + $0x1c8] sm:$0xff]  ;;  %v511_v53 = vpack.c.bf16 %v76_v46, %v70_v45 }
   0xd   :  { %506 = vmatpush1.bf16.msra.mxu0 %v505_v35  ;;  %v69_v54 = vld [vmem:[%s996_s1 + $0x180] sm:$0xff]  ;;  %v75_v55 = vld [vmem:[%s996_s1 + $0x1b0] sm:$0xff]  ;;  %v541_v56 = vpack.c.bf16 %v65_v49, %v59_v48  ;;  %v82_v57 = vld [vmem:[%s996_s1 + $0x1e8] sm:$0xff]  ;;  %v543_v59 = vpack.c.bf16 %v78_v52, %v72_v51 }
   0xe   :  { %508 = vmatprep.subr.bf16.mxu0 %v507_v40  ;;  %v88_v58 = vld [vmem:[%s996_s1 + $0x218] sm:$0xff]  ;;  %v71_v60 = vld [vmem:[%s996_s1 + $0x190] sm:$0xff]  ;;  %v77_v61 = vld [vmem:[%s996_s1 + $0x1c0] sm:$0xff]  ;;  %v513_v62 = vpack.c.bf16 %v75_v55, %v69_v54 }
   0xf   :  { %538 = vmatpush1.bf16.msra.mxu1 %v537_v44  ;;  %v84_v63 = vld [vmem:[%s996_s1 + $0x1f8] sm:$0xff]  ;;  %v90_v0 = vld [vmem:[%s996_s1 + $0x228] sm:$0xff]  ;;  %v515_v1 = vpack.c.bf16 %v88_v58, %v82_v57  ;;  %v81_v2 = vld [vmem:[%s996_s1 + $0x1e0] sm:$0xff]  ;;  %v545_v5 = vpack.c.bf16 %v77_v61, %v71_v60 }
  0x10   :  { %540 = vmatprep.subr.bf16.mxu1 %v539_v47  ;;  %v87_v4 = vld [vmem:[%s996_s1 + $0x210] sm:$0xff]  ;;  %v94_v6 = vld [vmem:[%s996_s1 + $0x248] sm:$0xff]  ;;  %v100_v7 = vld [vmem:[%s996_s1 + $0x278] sm:$0xff]  ;;  %v547_v8 = vpack.c.bf16 %v90_v0, %v84_v63 }
  0x11   :  { %510 = vmatpush1.bf16.msra.mxu0 %v509_v50  ;;  %v83_v9 = vld [vmem:[%s996_s1 + $0x1f0] sm:$0xff]  ;;  %v89_v10 = vld [vmem:[%s996_s1 + $0x220] sm:$0xff]  ;;  %v517_v11 = vpack.c.bf16 %v87_v4, %v81_v2  ;;  %v96_v12 = vld [vmem:[%s996_s1 + $0x258] sm:$0xff]  ;;  %v519_v14 = vpack.c.bf16 %v100_v7, %v94_v6 }
  0x12   :  { %512 = vmatprep.subr.bf16.mxu0 %v511_v53  ;;  %v102_v13 = vld [vmem:[%s996_s1 + $0x288] sm:$0xff]  ;;  %v93_v15 = vld [vmem:[%s996_s1 + $0x240] sm:$0xff]  ;;  %v99_v16 = vld [vmem:[%s996_s1 + $0x270] sm:$0xff]  ;;  %v549_v17 = vpack.c.bf16 %v89_v10, %v83_v9 }
  0x13   :  { %542 = vmatpush1.bf16.msra.mxu1 %v541_v56  ;;  %v106_v18 = vld [vmem:[%s996_s1 + $0x2a8] sm:$0xff]  ;;  %v112_v19 = vld [vmem:[%s996_s1 + $0x2d8] sm:$0xff]  ;;  %v551_v20 = vpack.c.bf16 %v102_v13, %v96_v12  ;;  %v95_v21 = vld [vmem:[%s996_s1 + $0x250] sm:$0xff]  ;;  %v521_v23 = vpack.c.bf16 %v99_v16, %v93_v15 }
  0x14   :  { %544 = vmatprep.subr.bf16.mxu1 %v543_v59  ;;  %v101_v22 = vld [vmem:[%s996_s1 + $0x280] sm:$0xff]  ;;  %v108_v24 = vld [vmem:[%s996_s1 + $0x2b8] sm:$0xff]  ;;  %v114_v25 = vld [vmem:[%s996_s1 + $0x2e8] sm:$0xff]  ;;  %v523_v26 = vpack.c.bf16 %v112_v19, %v106_v18 }
  0x15   :  { %514 = vmatpush1.bf16.msra.mxu0 %v513_v62  ;;  %v105_v27 = vld [vmem:[%s996_s1 + $0x2a0] sm:$0xff]  ;;  %v111_v28 = vld [vmem:[%s996_s1 + $0x2d0] sm:$0xff]  ;;  %v553_v29 = vpack.c.bf16 %v101_v22, %v95_v21  ;;  %v26_v30 = vld [vmem:[%s996_s1 + $0x28] sm:$0xff]  ;;  %v555_v32 = vpack.c.bf16 %v114_v25, %v108_v24 }
  0x16   :  { %516 = vmatprep.subr.bf16.mxu0 %v515_v1  ;;  %v32_v31 = vld [vmem:[%s996_s1 + $0x58] sm:$0xff]  ;;  %v107_v33 = vld [vmem:[%s996_s1 + $0x2b0] sm:$0xff]  ;;  %v113_v34 = vld [vmem:[%s996_s1 + $0x2e0] sm:$0xff]  ;;  %v525_v35 = vpack.c.bf16 %v111_v28, %v105_v27  ;;  %v336_v28 = vlaneseq }
  0x17   :  { %546 = vmatpush1.bf16.msra.mxu1 %v545_v5  ;;  %v559_v36 = vpack.c.bf16 %v32_v31, %v26_v30  ;;  %v25_v37 = vld [vmem:[%s996_s1 + $0x20] sm:$0xff]  ;;  %v31_v38 = vld [vmem:[%s996_s1 + $0x50] sm:$0xff]  ;;  %v557_v39 = vpack.c.bf16 %v113_v34, %v107_v33  ;;  %v38_v40 = vld [vmem:[%s996_s1 + $0x88] sm:$0xff] }
  0x18   :  { %548 = vmatprep.subr.bf16.mxu1 %v547_v8  ;;  %v44_v41 = vld [vmem:[%s996_s1 + $0xb8] sm:$0xff]  ;;  %v844_v42 = vld [vmem:[%s997_s0] sm:$0xff]  ;;  %v561_v43 = vpack.c.bf16 %v31_v38, %v25_v37  ;;  %v43_v47 = vld [vmem:[%s996_s1 + $0xb0] sm:$0xff]  ;;  %v337_v31 = vand.u32 127, %v336_v28 }
  0x19   :  { %518 = vmatpush1.bf16.msra.mxu0 %v517_v11  ;;  %v117_v44 = vld [vmem:[%s998_s2] sm:$0xff]  ;;  %v563_v45 = vpack.c.bf16 %v44_v41, %v38_v40  ;;  %v50_v48 = vld [vmem:[%s996_s1 + $0xe8] sm:$0xff]  ;;  %v56_v49 = vld [vmem:[%s996_s1 + $0x118] sm:$0xff] }
  0x1a   :  { %520 = vmatprep.subr.bf16.mxu0 %v519_v14  ;;  %v37_v46 = vld [vmem:[%s996_s1 + $0x80] sm:$0xff]  ;;  %120 = vperm.xlu0 %593, %v117_v44   ;;  %v567_v51 = vpack.c.bf16 %v56_v49, %v50_v48  ;;  %v55_v53 = vld [vmem:[%s996_s1 + $0x110] sm:$0xff]  ;;  %v62_v54 = vld [vmem:[%s996_s1 + $0x148] sm:$0xff]  ;;  %v342_v34 = vadd.s32 640, %v337_v31 }
  0x1b   :  { %550 = vmatpush1.bf16.msra.mxu1 %v549_v17  ;;  %v565_v50 = vpack.c.bf16 %v43_v47, %v37_v46  ;;  %v49_v52 = vld [vmem:[%s996_s1 + $0xe0] sm:$0xff]  ;;  %v67_v58 = vld [vmem:[%s996_s1 + $0x170] sm:$0xff]  ;;  %v74_v59 = vld [vmem:[%s996_s1 + $0x1a8] sm:$0xff] }
  0x1c   :  { %552 = vmatprep.subr.bf16.mxu1 %v551_v20  ;;  %v569_v55 = vpack.c.bf16 %v55_v53, %v49_v52  ;;  %v61_v57 = vld [vmem:[%s996_s1 + $0x140] sm:$0xff]  ;;  %v80_v60 = vld [vmem:[%s996_s1 + $0x1d8] sm:$0xff]  ;;  %v79_v0 = vld [vmem:[%s996_s1 + $0x1d0] sm:$0xff]  ;;  %vm348_vm0 = vcmp.lt.s32.totalorder %v342_v34, 722 }
  0x1d   :  { %522 = vmatpush1.bf16.msra.mxu0 %v521_v23  ;;  %v573_v61 = vpack.c.bf16 %v67_v58, %v61_v57  ;;  %v575_v62 = vpack.c.bf16 %v80_v60, %v74_v59  ;;  %v73_v63 = vld [vmem:[%s996_s1 + $0x1a0] sm:$0xff]  ;;  %v86_v1 = vld [vmem:[%s996_s1 + $0x208] sm:$0xff]  ;;  %v92_v2 = vld [vmem:[%s996_s1 + $0x238] sm:$0xff] }
  0x1e   :  { %524 = vmatprep.subr.bf16.mxu0 %v523_v26  ;;  %v577_v4 = vpack.c.bf16 %v79_v0, %v73_v63  ;;  %v579_v5 = vpack.c.bf16 %v92_v2, %v86_v1  ;;  %v85_v6 = vld [vmem:[%s996_s1 + $0x200] sm:$0xff]  ;;  %v91_v7 = vld [vmem:[%s996_s1 + $0x230] sm:$0xff]  ;;  %v98_v8 = vld [vmem:[%s996_s1 + $0x268] sm:$0xff] }
  0x1f   :  { %554 = vmatpush1.bf16.msra.mxu1 %v553_v29  ;;  %v104_v9 = vld [vmem:[%s996_s1 + $0x298] sm:$0xff]  ;;  %v581_v10 = vpack.c.bf16 %v91_v7, %v85_v6  ;;  %v97_v12 = vld [vmem:[%s996_s1 + $0x260] sm:$0xff]  ;;  %v103_v13 = vld [vmem:[%s996_s1 + $0x290] sm:$0xff] }
  0x20   :  { %556 = vmatprep.subr.bf16.mxu1 %v555_v32  ;;  %v583_v11 = vpack.c.bf16 %v104_v9, %v98_v8  ;;  %v110_v14 = vld [vmem:[%s996_s1 + $0x2c8] sm:$0xff]  ;;  %v116_v15 = vld [vmem:[%s996_s1 + $0x2f8] sm:$0xff]  ;;  %v585_v16 = vpack.c.bf16 %v103_v13, %v97_v12  ;;  %v109_v18 = vld [vmem:[%s996_s1 + $0x2c0] sm:$0xff] }
  0x21   :  { %526 = vmatpush1.bf16.msra.mxu0 %v525_v35  ;;  %v587_v17 = vpack.c.bf16 %v116_v15, %v110_v14  ;;  %v115_v19 = vld [vmem:[%s996_s1 + $0x2f0] sm:$0xff] }
  0x22   :  { %560 = vmatprep.subr.bf16.mxu0 %v559_v36  ;;  %v589_v20 = vpack.c.bf16 %v115_v19, %v109_v18 }
  0x23   :  { %558 = vmatpush1.bf16.msra.mxu1 %v557_v39 }
  0x24   :  { %188 = vmatmul.mubr.f32.vlgmr.msra.gmra.mrb[0].mxu0 %v844_v42 }
  0x25   :  { %562 = vmatpush1.bf16.msra.mxu0 %v561_v43  ;;  %329 = vmatprep.mubr.f32.mxu0 %v597_v3  ;;  %v68_v3 = vld [vmem:[%s996_s1 + $0x178] sm:$0xff] }
  0x26   :  { %259 = vmatmul.mubr.f32.vlgmr.msra.gmra.mrb[0].mxu1 %v844_v42  ;;  %564 = vmatprep.subr.bf16.mxu0 %v563_v45  ;;  %v571_v56 = vpack.c.bf16 %v68_v3, %v62_v54 }
  0x29   :  { %566 = vmatpush1.bf16.msra.mxu0 %v565_v50 }
  0x2a   :  { %568 = vmatprep.subr.bf16.mxu0 %v567_v51 }
  0x2d   :  { %570 = vmatpush1.bf16.msra.mxu0 %v569_v55 }
  0x2e   :  { %572 = vmatprep.subr.bf16.mxu0 %v571_v56 }
  0x31   :  { %574 = vmatpush1.bf16.msra.mxu0 %v573_v61 }
  0x32   :  { %576 = vmatprep.subr.bf16.mxu0 %v575_v62 }
  0x35   :  { %578 = vmatpush1.bf16.msra.mxu0 %v577_v4 }
  0x36   :  { %580 = vmatprep.subr.bf16.mxu0 %v579_v5 }
  0x39   :  { %582 = vmatpush1.bf16.msra.mxu0 %v581_v10 }
  0x3a   :  { %584 = vmatprep.subr.bf16.mxu0 %v583_v11 }
  0x3d   :  { %586 = vmatpush1.bf16.msra.mxu0 %v585_v16 }
  0x3e   :  { %588 = vmatprep.subr.bf16.mxu0 %v587_v17 }
  0x41   :  { %590 = vmatpush1.bf16.msra.mxu0 %v589_v20 }
  0x44   :  { %330 = vmatmul.mubr.f32.vlgmr.msra.gmra.mrb[2].mxu0 %v844_v42 }
  0x99   :  { %v121_v25 = vpop.permute.xlu0 %120 }
  0xf7   :  { %v189_v21 = vpop.f32.mrb[0].mxu0 }
  0xf8   :  { %v191_v22 = vpop.f32.mrb[1].mxu0  ;;  %v931_v26 = vadd.f32 %v189_v21, %v121_v25  ;;  %v430_v21 = vld [vmem:[%s999_s3] sm:$0x3] }
  0xf9   :  { %v260_v23 = vpop.f32.mrb[0].mxu1  ;;  %v933_v27 = vadd.f32 %v191_v22, %v121_v25 }
  0xfa   :  { %v262_v24 = vpop.f32.mrb[1].mxu1  ;;  %v937_v30 = vadd.f32 %v260_v23, %v121_v25 }
  0xfb   :  { %v355_v29 = vadd.f32 %v933_v27, %v931_v26  ;;  %v940_v33 = vadd.f32 %v262_v24, %v121_v25  ;;  %v434_v24 = vld [vmem:[%s1000_s4] sm:$0x3] }
  0xfd   :  { %v356_v32 = vadd.f32 %v355_v29, %v937_v30 }
  0xff   :  { %v357_v36 = vadd.f32 %v356_v32, %v940_v33 }
 0x117   :  { %v331_v35 = vpop.f32.mrb[2].mxu0 }
 0x118   :  { %v943_v37 = vadd.f32 %v331_v35, %v121_v25  ;;  %v333_v38 = vpop.f32.mrb[3].mxu0 }
 0x119   :  { %v945_v39 = vadd.f32 %v333_v38, %v121_v25 }
 0x11a   :  { %v358_v40 = vadd.f32 %v357_v36, %v943_v37 }
 0x11b   :  { %v354_v41 = vsel %vm348_vm0, %v945_v39, 0.0 }
 0x11c   :  { %v359_v42 = vadd.f32 %v358_v40, %v354_v41 }
 0x11e   :  { %360 = vadd.xlane.f32.xlu0 %v359_v42 }
 0x1ab   :  { %v361_v43 = vpop.xlane.xlu0 %360 }
 0x1ac   :  { %v364_v44 = vrot.slane %v361_v43, 2  ;;  %v367_v46 = vrot.slane %v361_v43, 4  ;;  %v370_v48 = vrot.slane %v361_v43, 6 }
 0x1ae   :  { %v366_v45 = vadd.f32 %v364_v44, %v361_v43 }
 0x1b0   :  { %v369_v47 = vadd.f32 %v367_v46, %v366_v45 }
 0x1b2   :  { %v372_v49 = vadd.f32 %v370_v48, %v369_v47 }
 0x1b4   :  { %v374_v50 = vmul.f32 0.00034626038, %v372_v49 }
 0x1b6   :  { %v376_v51 = vrot.slane %v374_v50, 6  ;;  %v378_v52 = vrot.slane %v374_v50, 4  ;;  %v380_v53 = vrot.slane %v374_v50, 2 }
 0x1b8   :  { %v383_v54 = vsel %vm382_vm1, %v374_v50, %v376_v51 }
 0x1b9   :  { %v385_v3 = vsel %vm384_vm2, %v383_v54, %v378_v52 }
 0x1ba   :  { %v387_v55 = vsel %vm386_vm3, %v385_v3, %v380_v53 }
 0x1bb   :  { %390 = vperm.xlu1 %594, %v387_v55  }
 0x23a   :  { %v391_v56 = vpop.permute.xlu1 %390 }
 0x23b   :  { %v393_v57 = vsub.f32 %v931_v26, %v391_v56  ;;  %v394_v58 = vsub.f32 %v933_v27, %v391_v56  ;;  %v395_v59 = vsub.f32 %v937_v30, %v391_v56  ;;  %v396_v60 = vsub.f32 %v940_v33, %v391_v56 }
 0x23c   :  { %v398_v63 = vsub.f32 %v945_v39, %v391_v56  ;;  %v397_v0 = vsub.f32 %v943_v37, %v391_v56 }
 0x23d   :  { %v405_v61 = vmul.f32 %v393_v57, %v393_v57  ;;  %v406_v62 = vmul.f32 %v394_v58, %v394_v58  ;;  %v407_v1 = vmul.f32 %v395_v59, %v395_v59  ;;  %v408_v4 = vmul.f32 %v396_v60, %v396_v60 }
 0x23e   :  { %v404_v6 = vsel %vm348_vm0, %v398_v63, 0.0  ;;  %v409_v7 = vmul.f32 %v397_v0, %v397_v0 }
 0x23f   :  { %v411_v2 = vadd.f32 %v406_v62, %v405_v61  ;;  %v410_v9 = vmul.f32 %v404_v6, %v404_v6 }
 0x241   :  { %v412_v5 = vadd.f32 %v411_v2, %v407_v1 }
 0x243   :  { %v413_v8 = vadd.f32 %v412_v5, %v408_v4 }
 0x245   :  { %v414_v10 = vadd.f32 %v413_v8, %v409_v7 }
 0x247   :  { %v415_v11 = vadd.f32 %v414_v10, %v410_v9 }
 0x249   :  { %416 = vadd.xlane.f32.xlu1 %v415_v11 }
 0x2d6   :  { %v417_v12 = vpop.xlane.xlu1 %416 }
 0x2d7   :  { %v420_v13 = vrot.slane %v417_v12, 2  ;;  %v423_v15 = vrot.slane %v417_v12, 4  ;;  %v426_v17 = vrot.slane %v417_v12, 6 }
 0x2d9   :  { %v422_v14 = vadd.f32 %v420_v13, %v417_v12 }
 0x2db   :  { %v425_v16 = vadd.f32 %v423_v15, %v422_v14 }
 0x2dd   :  { %v428_v18 = vadd.f32 %v426_v17, %v425_v16 }
 0x2df   :  { %v429_v19 = vmul.f32 0.00034626038, %v428_v18 }
 0x2e1   :  { %v431_v20 = vadd.f32 1e-05, %v429_v19 }
 0x2e3   :  { %595 = vrsqrt.f32 %v431_v20 }
 0x2ed   :  { %v596_v22 = vpop.eup %595 }
 0x2ee   :  { %v433_v23 = vmul.f32 %v596_v22, %v430_v21 }
 0x2f0   :  { %v438_v25 = vrot.slane %v433_v23, 6  ;;  %v440_v28 = vrot.slane %v433_v23, 4  ;;  %v435_v29 = vmul.f32 %v433_v23, %v374_v50  ;;  %v442_v31 = vrot.slane %v433_v23, 2 }
 0x2f2   :  { %v444_v32 = vsel %vm382_vm1, %v433_v23, %v438_v25  ;;  %v436_v34 = vsub.f32 %v434_v24, %v435_v29 }
 0x2f3   :  { %v445_v35 = vsel %vm384_vm2, %v444_v32, %v440_v28 }
 0x2f4   :  { %v446_v36 = vsel %vm386_vm3, %v445_v35, %v442_v31  ;;  %v448_v38 = vrot.slane %v436_v34, 6  ;;  %v450_v40 = vrot.slane %v436_v34, 4  ;;  %v452_v41 = vrot.slane %v436_v34, 2 }
 0x2f5   :  { %459 = vperm.xlu0 %593, %v446_v36  }
 0x2f6   :  { %v454_v42 = vsel %vm382_vm1, %v436_v34, %v448_v38 }
 0x2f7   :  { %v455_v43 = vsel %vm384_vm2, %v454_v42, %v450_v40 }
 0x2f8   :  { %v456_v44 = vsel %vm386_vm3, %v455_v43, %v452_v41 }
 0x2f9   :  { %470 = vperm.xlu1 %594, %v456_v44  }
 0x374   :  { %v460_v45 = vpop.permute.xlu0 %459 }
 0x375   :  { %v462_v46 = vmul.f32 %v460_v45, %v931_v26  ;;  %v463_v47 = vmul.f32 %v460_v45, %v933_v27  ;;  %v464_v48 = vmul.f32 %v460_v45, %v937_v30  ;;  %v465_v49 = vmul.f32 %v460_v45, %v940_v33 }
 0x376   :  { %v466_v50 = vmul.f32 %v460_v45, %v943_v37  ;;  %v467_v51 = vmul.f32 %v460_v45, %v945_v39 }
 0x378   :  { %v471_v52 = vpop.permute.xlu1 %470 }
 0x379   :  { %v473_v53 = vadd.f32 %v471_v52, %v462_v46  ;;  %v474_v54 = vadd.f32 %v471_v52, %v463_v47  ;;  %v475_v3 = vadd.f32 %v471_v52, %v464_v48  ;;  %v476_v55 = vadd.f32 %v471_v52, %v465_v49 }
 0x37a   :  { %v477_v56 = vadd.f32 %v471_v52, %v466_v50  ;;  %v478_v57 = vadd.f32 %v471_v52, %v467_v51 }
 0x37b   :  { %v479_v58 = vmax.f32 %v473_v53, 0.0  ;;  %v480_v59 = vmax.f32 %v474_v54, 0.0  ;;  %v481_v26 = vmax.f32 %v475_v3, 0.0  ;;  %v482_v60 = vmax.f32 %v476_v55, 0.0 }
 0x37c   :  { %v483_v27 = vmax.f32 %v477_v56, 0.0  ;;  %v484_v61 = vmax.f32 %v478_v57, 0.0 }
 0x37d   :  { %485 = vst [vmem:[%s1001_s5] sm:$0xff] %v479_v58  ;;  %486 = vst [vmem:[%s1001_s5 + $0x8] sm:$0xff] %v480_v59 }
 0x37e   :  { %487 = vst [vmem:[%s1001_s5 + $0x10] sm:$0xff] %v481_v26  ;;  %488 = vst [vmem:[%s1001_s5 + $0x18] sm:$0xff] %v482_v60 }
 0x37f   :  { %489 = vst [vmem:[%s1001_s5 + $0x20] sm:$0xff] %v483_v27  ;;  %490 = vst [vmem:[%s1001_s5 + $0x28] sm:$0xff] %v484_v61 }

// kernel: encoder_decoder_forward.15
= control target key start
LH: loop header
LB: loop body
LE: loop exit
PB: predicated region body
PF: predicated region fallthrough
CT: control target
= control target key end

     0   :  { %v1291_v3 = vmov 0.0   ;;  %v1292_v9 = vmov 0   ;;  %vm107_vm0 = vcmask 261120   ;;  %s1646_s1 = inlined_call_operand.vmem [shape: f32[32,2560], index: 1, kind: input, shape index: {}]   ;;  %s1647_s2 = inlined_call_operand.<no memory space> [shape: f32[1,1], index: 2, kind: input, shape index: {}]   ;;  %s1648_s0 = inlined_call_operand.vmem [shape: f32[1,32], index: 0, kind: input, shape index: {}]   ;;  %s1649_s3 = inlined_call_operand.vmem [shape: f32[1,2560], index: 3, kind: output, shape index: {}]  }
   0x1   :  { %v18_v0 = vld [vmem:[%s1646_s1 + $0x8] sm:$0xff]  ;;  %v20_v2 = vld [vmem:[%s1646_s1 + $0x18] sm:$0xff]  ;;  %175 = vmatprep.mubr.f32.mxu0 %v1291_v3  ;;  %246 = vmatprep.mubr.f32.mxu1 %v1291_v3  ;;  %v8_v4 = vstv %s1647_s2  ;;  %v17_v7 = vld [vmem:[%s1646_s1] sm:$0xff] }
   0x2   :  { %v38_v1 = vld [vmem:[%s1646_s1 + $0xa8] sm:$0xff]  ;;  %v40_v6 = vld [vmem:[%s1646_s1 + $0xb8] sm:$0xff]  ;;  %v37_v8 = vld [vmem:[%s1646_s1 + $0xa0] sm:$0xff]  ;;  %1210 = vset.pattern.permute.xlu0 %v1292_v9  ;;  %9 = vst [vmem:[#allocation2] sm:$0x1] %v8_v4 }
   0x3   :  { %v1127_v5 = vpack.c.bf16 %v38_v1, %v18_v0  ;;  %v1135_v10 = vpack.c.bf16 %v40_v6, %v20_v2  ;;  %v1129_v11 = vpack.c.bf16 %v37_v8, %v17_v7  ;;  %v19_v12 = vld [vmem:[%s1646_s1 + $0x10] sm:$0xff]  ;;  %v58_v14 = vld [vmem:[%s1646_s1 + $0x148] sm:$0xff]  ;;  %v60_v17 = vld [vmem:[%s1646_s1 + $0x158] sm:$0xff] }
   0x4   :  { %v39_v13 = vld [vmem:[%s1646_s1 + $0xb0] sm:$0xff]  ;;  %v78_v16 = vld [vmem:[%s1646_s1 + $0x1e8] sm:$0xff]  ;;  %v80_v18 = vld [vmem:[%s1646_s1 + $0x1f8] sm:$0xff] }
   0x5   :  { %1128 = vmatprep.subr.bf16.mxu0 %v1127_v5  ;;  %v1137_v15 = vpack.c.bf16 %v39_v13, %v19_v12  ;;  %1136 = vmatprep.subr.bf16.mxu1 %v1135_v10  ;;  %v1131_v19 = vpack.c.bf16 %v78_v16, %v58_v14  ;;  %v1139_v20 = vpack.c.bf16 %v80_v18, %v60_v17  ;;  %v57_v21 = vld [vmem:[%s1646_s1 + $0x140] sm:$0xff]  ;;  %v59_v23 = vld [vmem:[%s1646_s1 + $0x150] sm:$0xff]  ;;  %v22_v26 = vld [vmem:[%s1646_s1 + $0x28] sm:$0xff] }
   0x6   :  { %1130 = vmatpush1.bf16.msra.mxu0 %v1129_v11  ;;  %v77_v22 = vld [vmem:[%s1646_s1 + $0x1e0] sm:$0xff]  ;;  %v79_v25 = vld [vmem:[%s1646_s1 + $0x1f0] sm:$0xff]  ;;  %v42_v29 = vld [vmem:[%s1646_s1 + $0xc8] sm:$0xff] }
   0x7   :  { %1138 = vmatpush1.bf16.msra.mxu1 %v1137_v15  ;;  %v1133_v24 = vpack.c.bf16 %v77_v22, %v57_v21  ;;  %1132 = vmatprep.subr.bf16.mxu0 %v1131_v19  ;;  %v1141_v27 = vpack.c.bf16 %v79_v25, %v59_v23  ;;  %v1373_v28 = vld [vmem:[%s1648_s0] sm:$0x1]  ;;  %v24_v30 = vld [vmem:[%s1646_s1 + $0x38] sm:$0xff]  ;;  %v1143_v32 = vpack.c.bf16 %v42_v29, %v22_v26  ;;  %v23_v36 = vld [vmem:[%s1646_s1 + $0x30] sm:$0xff] }
   0x8   :  { %1140 = vmatprep.subr.bf16.mxu1 %v1139_v20  ;;  %v44_v31 = vld [vmem:[%s1646_s1 + $0xd8] sm:$0xff]  ;;  %v21_v34 = vld [vmem:[%s1646_s1 + $0x20] sm:$0xff]  ;;  %v43_v38 = vld [vmem:[%s1646_s1 + $0xd0] sm:$0xff] }
   0x9   :  { %v1151_v33 = vpack.c.bf16 %v44_v31, %v24_v30  ;;  %v41_v35 = vld [vmem:[%s1646_s1 + $0xc0] sm:$0xff]  ;;  %v62_v39 = vld [vmem:[%s1646_s1 + $0x168] sm:$0xff]  ;;  %v1153_v41 = vpack.c.bf16 %v43_v38, %v23_v36  ;;  %v64_v43 = vld [vmem:[%s1646_s1 + $0x178] sm:$0xff] }
   0xa   :  { %1134 = vmatpush1.bf16.msra.mxu0 %v1133_v24  ;;  %v1145_v37 = vpack.c.bf16 %v41_v35, %v21_v34  ;;  %v82_v40 = vld [vmem:[%s1646_s1 + $0x208] sm:$0xff]  ;;  %v84_v44 = vld [vmem:[%s1646_s1 + $0x218] sm:$0xff]  ;;  %v61_v45 = vld [vmem:[%s1646_s1 + $0x160] sm:$0xff] }
   0xb   :  { %1142 = vmatpush1.bf16.msra.mxu1 %v1141_v27  ;;  %1144 = vmatprep.subr.bf16.mxu0 %v1143_v32  ;;  %v1147_v42 = vpack.c.bf16 %v82_v40, %v62_v39  ;;  %v1155_v46 = vpack.c.bf16 %v84_v44, %v64_v43  ;;  %v81_v47 = vld [vmem:[%s1646_s1 + $0x200] sm:$0xff]  ;;  %v63_v48 = vld [vmem:[%s1646_s1 + $0x170] sm:$0xff]  ;;  %v26_v50 = vld [vmem:[%s1646_s1 + $0x48] sm:$0xff] }
   0xc   :  { %1152 = vmatprep.subr.bf16.mxu1 %v1151_v33  ;;  %v83_v49 = vld [vmem:[%s1646_s1 + $0x210] sm:$0xff]  ;;  %v46_v51 = vld [vmem:[%s1646_s1 + $0xe8] sm:$0xff]  ;;  %v28_v52 = vld [vmem:[%s1646_s1 + $0x58] sm:$0xff]  ;;  %v1149_v53 = vpack.c.bf16 %v81_v47, %v61_v45 }
   0xd   :  { %1117 = vmatmul.mubr.msk.f32.vlgmr.msra.gmra.mrb[0].mxu0 %vm107_vm0, %v1373_v28  ;;  %v48_v54 = vld [vmem:[%s1646_s1 + $0xf8] sm:$0xff]  ;;  %v1157_v55 = vpack.c.bf16 %v83_v49, %v63_v48  ;;  %v1159_v56 = vpack.c.bf16 %v46_v51, %v26_v50  ;;  %v25_v57 = vld [vmem:[%s1646_s1 + $0x40] sm:$0xff]  ;;  %v27_v59 = vld [vmem:[%s1646_s1 + $0x50] sm:$0xff] }
   0xe   :  { %1118 = vmatmul.mubr.msk.f32.vlgmr.msra.gmra.mrb[0].mxu1 %vm107_vm0, %v1373_v28  ;;  %1146 = vmatpush1.bf16.msra.mxu0 %v1145_v37  ;;  %v45_v58 = vld [vmem:[%s1646_s1 + $0xe0] sm:$0xff]  ;;  %v1167_v60 = vpack.c.bf16 %v48_v54, %v28_v52  ;;  %v47_v61 = vld [vmem:[%s1646_s1 + $0xf0] sm:$0xff]  ;;  %v66_v62 = vld [vmem:[%s1646_s1 + $0x188] sm:$0xff] }
   0xf   :  { %1154 = vmatpush1.bf16.msra.mxu1 %v1153_v41  ;;  %1148 = vmatprep.subr.bf16.mxu0 %v1147_v42  ;;  %v86_v63 = vld [vmem:[%s1646_s1 + $0x228] sm:$0xff]  ;;  %v68_v0 = vld [vmem:[%s1646_s1 + $0x198] sm:$0xff]  ;;  %v1161_v2 = vpack.c.bf16 %v45_v58, %v25_v57  ;;  %v1169_v4 = vpack.c.bf16 %v47_v61, %v27_v59  ;;  %v65_v6 = vld [vmem:[%s1646_s1 + $0x180] sm:$0xff] }
  0x10   :  { %1156 = vmatprep.subr.bf16.mxu1 %v1155_v46  ;;  %317 = vmatprep.mubr.f32.mxu0 %v1291_v3  ;;  %v88_v1 = vld [vmem:[%s1646_s1 + $0x238] sm:$0xff]  ;;  %v1163_v5 = vpack.c.bf16 %v86_v63, %v66_v62  ;;  %v85_v7 = vld [vmem:[%s1646_s1 + $0x220] sm:$0xff]  ;;  %v67_v8 = vld [vmem:[%s1646_s1 + $0x190] sm:$0xff]  ;;  %v103_v63 = vlaneseq }
  0x11   :  { %388 = vmatprep.mubr.f32.mxu1 %v1291_v3  ;;  %v1171_v9 = vpack.c.bf16 %v88_v1, %v68_v0  ;;  %v87_v10 = vld [vmem:[%s1646_s1 + $0x230] sm:$0xff]  ;;  %v30_v11 = vld [vmem:[%s1646_s1 + $0x68] sm:$0xff]  ;;  %v32_v13 = vld [vmem:[%s1646_s1 + $0x78] sm:$0xff]  ;;  %v1165_v15 = vpack.c.bf16 %v85_v7, %v65_v6 }
  0x12   :  { %1150 = vmatpush1.bf16.msra.mxu0 %v1149_v53  ;;  %v50_v12 = vld [vmem:[%s1646_s1 + $0x108] sm:$0xff]  ;;  %v52_v14 = vld [vmem:[%s1646_s1 + $0x118] sm:$0xff]  ;;  %v1173_v16 = vpack.c.bf16 %v87_v10, %v67_v8  ;;  %v29_v18 = vld [vmem:[%s1646_s1 + $0x60] sm:$0xff]  ;;  %v1593_v0 = vshrl.u32 %v103_v63, 7  ;;  %vm1110_vm1 = vcmp.lt.s32.totalorder %v103_v63, 512 }
  0x13   :  { %1158 = vmatpush1.bf16.msra.mxu1 %v1157_v55  ;;  %1160 = vmatprep.subr.bf16.mxu0 %v1159_v56  ;;  %v1175_v17 = vpack.c.bf16 %v50_v12, %v30_v11  ;;  %v49_v19 = vld [vmem:[%s1646_s1 + $0x100] sm:$0xff]  ;;  %v31_v20 = vld [vmem:[%s1646_s1 + $0x70] sm:$0xff]  ;;  %v1183_v21 = vpack.c.bf16 %v52_v14, %v32_v13  ;;  %v70_v23 = vld [vmem:[%s1646_s1 + $0x1a8] sm:$0xff] }
  0x14   :  { %1168 = vmatprep.subr.bf16.mxu1 %v1167_v60  ;;  %v51_v22 = vld [vmem:[%s1646_s1 + $0x110] sm:$0xff]  ;;  %v90_v24 = vld [vmem:[%s1646_s1 + $0x248] sm:$0xff]  ;;  %v72_v25 = vld [vmem:[%s1646_s1 + $0x1b8] sm:$0xff]  ;;  %v1177_v27 = vpack.c.bf16 %v49_v19, %v29_v18  ;;  %v105_v1 = vsub.s32 0, %v1593_v0 }
  0x15   :  { %1119 = vmatmul.mubr.msk.f32.vlgmr.msra.gmra.mrb[2].mxu0 %vm107_vm0, %v1373_v28  ;;  %v92_v26 = vld [vmem:[%s1646_s1 + $0x258] sm:$0xff]  ;;  %v1185_v29 = vpack.c.bf16 %v51_v22, %v31_v20  ;;  %v1179_v30 = vpack.c.bf16 %v90_v24, %v70_v23  ;;  %v69_v31 = vld [vmem:[%s1646_s1 + $0x1a0] sm:$0xff]  ;;  %v71_v33 = vld [vmem:[%s1646_s1 + $0x1b0] sm:$0xff] }
  0x16   :  { %1120 = vmatmul.mubr.msk.f32.vlgmr.msra.gmra.mrb[2].mxu1 %vm107_vm0, %v1373_v28  ;;  %1162 = vmatpush1.bf16.msra.mxu0 %v1161_v2  ;;  %v89_v32 = vld [vmem:[%s1646_s1 + $0x240] sm:$0xff]  ;;  %v1187_v34 = vpack.c.bf16 %v92_v26, %v72_v25  ;;  %v91_v35 = vld [vmem:[%s1646_s1 + $0x250] sm:$0xff]  ;;  %v34_v36 = vld [vmem:[%s1646_s1 + $0x88] sm:$0xff] }
  0x17   :  { %1170 = vmatpush1.bf16.msra.mxu1 %v1169_v4  ;;  %1164 = vmatprep.subr.bf16.mxu0 %v1163_v5  ;;  %v54_v37 = vld [vmem:[%s1646_s1 + $0x128] sm:$0xff]  ;;  %v36_v38 = vld [vmem:[%s1646_s1 + $0x98] sm:$0xff]  ;;  %v1181_v40 = vpack.c.bf16 %v89_v32, %v69_v31  ;;  %v97_v41 = vld [vmem:[#allocation2] sm:$0x1]  ;;  %v1189_v42 = vpack.c.bf16 %v91_v35, %v71_v33 }
  0x18   :  { %1172 = vmatprep.subr.bf16.mxu1 %v1171_v9  ;;  %459 = vmatprep.mubr.f32.mxu0 %v1291_v3  ;;  %v56_v39 = vld [vmem:[%s1646_s1 + $0x138] sm:$0xff]  ;;  %v1191_v43 = vpack.c.bf16 %v54_v37, %v34_v36  ;;  %v33_v44 = vld [vmem:[%s1646_s1 + $0x80] sm:$0xff]  ;;  %v35_v46 = vld [vmem:[%s1646_s1 + $0x90] sm:$0xff] }
  0x19   :  { %530 = vmatprep.mubr.f32.mxu1 %v1291_v3  ;;  %v53_v45 = vld [vmem:[%s1646_s1 + $0x120] sm:$0xff]  ;;  %v1199_v47 = vpack.c.bf16 %v56_v39, %v36_v38  ;;  %v55_v48 = vld [vmem:[%s1646_s1 + $0x130] sm:$0xff]  ;;  %v74_v49 = vld [vmem:[%s1646_s1 + $0x1c8] sm:$0xff]  ;;  %100 = vperm.xlu0 %1210, %v97_v41  }
  0x1a   :  { %1166 = vmatpush1.bf16.msra.mxu0 %v1165_v15  ;;  %v94_v50 = vld [vmem:[%s1646_s1 + $0x268] sm:$0xff]  ;;  %v76_v51 = vld [vmem:[%s1646_s1 + $0x1d8] sm:$0xff]  ;;  %v1193_v53 = vpack.c.bf16 %v53_v45, %v33_v44  ;;  %v1201_v54 = vpack.c.bf16 %v55_v48, %v35_v46  ;;  %v73_v56 = vld [vmem:[%s1646_s1 + $0x1c0] sm:$0xff] }
  0x1b   :  { %1174 = vmatpush1.bf16.msra.mxu1 %v1173_v16  ;;  %1176 = vmatprep.subr.bf16.mxu0 %v1175_v17  ;;  %v96_v52 = vld [vmem:[%s1646_s1 + $0x278] sm:$0xff]  ;;  %v1195_v55 = vpack.c.bf16 %v94_v50, %v74_v49  ;;  %v93_v57 = vld [vmem:[%s1646_s1 + $0x260] sm:$0xff]  ;;  %v75_v59 = vld [vmem:[%s1646_s1 + $0x1d0] sm:$0xff] }
  0x1c   :  { %1184 = vmatprep.subr.bf16.mxu1 %v1183_v21  ;;  %v1203_v58 = vpack.c.bf16 %v96_v52, %v76_v51  ;;  %v95_v60 = vld [vmem:[%s1646_s1 + $0x270] sm:$0xff]  ;;  %v1197_v61 = vpack.c.bf16 %v93_v57, %v73_v56 }
  0x1d   :  { %1121 = vmatmul.mubr.msk.f32.vlgmr.msra.gmra.mrb[4].mxu0 %vm107_vm0, %v1373_v28  ;;  %v1205_v62 = vpack.c.bf16 %v95_v60, %v75_v59 }
  0x1e   :  { %1122 = vmatmul.mubr.msk.f32.vlgmr.msra.gmra.mrb[4].mxu1 %vm107_vm0, %v1373_v28  ;;  %1178 = vmatpush1.bf16.msra.mxu0 %v1177_v27 }
  0x1f   :  { %1186 = vmatpush1.bf16.msra.mxu1 %v1185_v29  ;;  %1180 = vmatprep.subr.bf16.mxu0 %v1179_v30 }
  0x20   :  { %1188 = vmatprep.subr.bf16.mxu1 %v1187_v34  ;;  %601 = vmatprep.mubr.f32.mxu0 %v1291_v3 }
  0x21   :  { %672 = vmatprep.mubr.f32.mxu1 %v1291_v3 }
  0x22   :  { %1182 = vmatpush1.bf16.msra.mxu0 %v1181_v40 }
  0x23   :  { %1190 = vmatpush1.bf16.msra.mxu1 %v1189_v42  ;;  %1192 = vmatprep.subr.bf16.mxu0 %v1191_v43 }
  0x24   :  { %1200 = vmatprep.subr.bf16.mxu1 %v1199_v47  ;;  %v1293_v47 = vmov 1966171168  }
  0x25   :  { %1123 = vmatmul.mubr.msk.f32.vlgmr.msra.gmra.mrb[6].mxu0 %vm107_vm0, %v1373_v28  ;;  %v986_v48 = vunpack.c.l.s4 %v1293_v47 }
  0x26   :  { %1124 = vmatmul.mubr.msk.f32.vlgmr.msra.gmra.mrb[6].mxu1 %vm107_vm0, %v1373_v28  ;;  %1194 = vmatpush1.bf16.msra.mxu0 %v1193_v53 }
  0x27   :  { %1202 = vmatpush1.bf16.msra.mxu1 %v1201_v54  ;;  %1196 = vmatprep.subr.bf16.mxu0 %v1195_v55 }
  0x28   :  { %1204 = vmatprep.subr.bf16.mxu1 %v1203_v58  ;;  %743 = vmatprep.mubr.f32.mxu0 %v1291_v3 }
  0x29   :  { %814 = vmatprep.mubr.f32.mxu1 %v1291_v3 }
  0x2a   :  { %1198 = vmatpush1.bf16.msra.mxu0 %v1197_v61 }
  0x2b   :  { %1206 = vmatpush1.bf16.msra.mxu1 %v1205_v62 }
  0x2d   :  { %1125 = vmatmul.mubr.msk.f32.vlgmr.msra.gmra.mrb[8].mxu0 %vm107_vm0, %v1373_v28 }
  0x2e   :  { %1126 = vmatmul.mubr.msk.f32.vlgmr.msra.gmra.mrb[8].mxu1 %vm107_vm0, %v1373_v28 }
  0x98   :  { %v101_v2 = vpop.permute.xlu0 %100 }
  0x99   :  { %v1596_v4 = vrot.slane %v101_v2, %v105_v1  ;;  %v987_v2 = vunpack.c.0.s8 %v986_v48 }
  0xe0   :  { %v177_v5 = vpop.f32.mrb[0].mxu0 }
  0xe1   :  { %v178_v3 = vadd.f32 %v177_v5, %v1596_v4  ;;  %v248_v6 = vpop.f32.mrb[0].mxu1  ;;  %v179_v7 = vpop.f32.mrb[1].mxu0 }
  0xe2   :  { %v249_v8 = vadd.f32 %v248_v6, %v1596_v4  ;;  %v180_v9 = vadd.f32 %v179_v7, %v1596_v4  ;;  %v250_v10 = vpop.f32.mrb[1].mxu1 }
  0xe3   :  { %v821_v28 = vsub.f32 0.0, %v178_v3  ;;  %v251_v11 = vadd.f32 %v250_v10, %v1596_v4 }
  0xe4   :  { %v823_v12 = vsub.f32 0.0, %v249_v8  ;;  %v822_v13 = vsub.f32 0.0, %v180_v9 }
  0xe5   :  { %v841_v14 = vmul.f32 1.442695, %v821_v28  ;;  %v824_v15 = vsub.f32 0.0, %v251_v11 }
  0xe6   :  { %v845_v16 = vmul.f32 1.442695, %v823_v12  ;;  %v843_v17 = vmul.f32 1.442695, %v822_v13 }
  0xe7   :  { %1211 = vpow2.f32 %v841_v14  ;;  %v847_v18 = vmul.f32 1.442695, %v824_v15 }
  0xe8   :  { %1213 = vpow2.f32 %v845_v16  ;;  %v319_v19 = vpop.f32.mrb[2].mxu0 }
  0xe9   :  { %1215 = vpow2.f32 %v843_v17  ;;  %v320_v20 = vadd.f32 %v319_v19, %v1596_v4  ;;  %v390_v21 = vpop.f32.mrb[2].mxu1  ;;  %v321_v22 = vpop.f32.mrb[3].mxu0 }
  0xea   :  { %1217 = vpow2.f32 %v847_v18  ;;  %v391_v23 = vadd.f32 %v390_v21, %v1596_v4  ;;  %v322_v24 = vadd.f32 %v321_v22, %v1596_v4  ;;  %v392_v25 = vpop.f32.mrb[3].mxu1 }
  0xeb   :  { %v825_v26 = vsub.f32 0.0, %v320_v20  ;;  %v393_v27 = vadd.f32 %v392_v25, %v1596_v4 }
  0xec   :  { %v827_v29 = vsub.f32 0.0, %v391_v23  ;;  %v826_v30 = vsub.f32 0.0, %v322_v24 }
  0xed   :  { %v849_v31 = vmul.f32 1.442695, %v825_v26  ;;  %v828_v32 = vsub.f32 0.0, %v393_v27 }
  0xee   :  { %v853_v33 = vmul.f32 1.442695, %v827_v29  ;;  %v851_v34 = vmul.f32 1.442695, %v826_v30  ;;  %v1615_v30 = vsub.s32 %v987_v2, %v1593_v0 }
  0xef   :  { %1219 = vpow2.f32 %v849_v31  ;;  %v855_v35 = vmul.f32 1.442695, %v828_v32 }
  0xf0   :  { %1221 = vpow2.f32 %v853_v33  ;;  %v461_v36 = vpop.f32.mrb[4].mxu0 }
  0xf1   :  { %v1212_v37 = vpop.eup %1211  ;;  %1223 = vpow2.f32 %v851_v34  ;;  %v462_v38 = vadd.f32 %v461_v36, %v1596_v4  ;;  %v532_v39 = vpop.f32.mrb[4].mxu1 }
  0xf2   :  { %v463_v40 = vpop.f32.mrb[5].mxu0  ;;  %v1214_v41 = vpop.eup %1213  ;;  %v881_v42 = vadd.f32 1.0, %v1212_v37  ;;  %1225 = vpow2.f32 %v855_v35  ;;  %v533_v43 = vadd.f32 %v532_v39, %v1596_v4 }
  0xf3   :  { %v464_v44 = vadd.f32 %v463_v40, %v1596_v4  ;;  %v534_v45 = vpop.f32.mrb[5].mxu1  ;;  %v1216_v46 = vpop.eup %1215  ;;  %v883_v49 = vadd.f32 1.0, %v1214_v41  ;;  %v829_v50 = vsub.f32 0.0, %v462_v38 }
  0xf4   :  { %v535_v51 = vadd.f32 %v534_v45, %v1596_v4  ;;  %v1218_v52 = vpop.eup %1217  ;;  %1227 = vrcp.f32 %v881_v42  ;;  %v882_v53 = vadd.f32 1.0, %v1216_v46  ;;  %v831_v54 = vsub.f32 0.0, %v533_v43 }
  0xf5   :  { %v830_v55 = vsub.f32 0.0, %v464_v44  ;;  %1229 = vrcp.f32 %v883_v49  ;;  %v884_v56 = vadd.f32 1.0, %v1218_v52  ;;  %v857_v57 = vmul.f32 1.442695, %v829_v50 }
  0xf6   :  { %v832_v58 = vsub.f32 0.0, %v535_v51  ;;  %1231 = vrcp.f32 %v882_v53  ;;  %v861_v59 = vmul.f32 1.442695, %v831_v54 }
  0xf7   :  { %v859_v60 = vmul.f32 1.442695, %v830_v55  ;;  %1233 = vrcp.f32 %v884_v56 }
  0xf8   :  { %v863_v61 = vmul.f32 1.442695, %v832_v58  ;;  %1235 = vpow2.f32 %v857_v57  ;;  %v603_v62 = vpop.f32.mrb[6].mxu0 }
  0xf9   :  { %v1220_v1 = vpop.eup %1219  ;;  %1237 = vpow2.f32 %v861_v59  ;;  %v604_v5 = vadd.f32 %v603_v62, %v1596_v4  ;;  %v674_v3 = vpop.f32.mrb[6].mxu1 }
  0xfa   :  { %v605_v6 = vpop.f32.mrb[7].mxu0  ;;  %v1222_v7 = vpop.eup %1221  ;;  %v885_v8 = vadd.f32 1.0, %v1220_v1  ;;  %1239 = vpow2.f32 %v859_v60  ;;  %v675_v9 = vadd.f32 %v674_v3, %v1596_v4 }
  0xfb   :  { %v606_v10 = vadd.f32 %v605_v6, %v1596_v4  ;;  %v676_v28 = vpop.f32.mrb[7].mxu1  ;;  %v1224_v11 = vpop.eup %1223  ;;  %v887_v12 = vadd.f32 1.0, %v1222_v7  ;;  %1241 = vpow2.f32 %v863_v61  ;;  %v833_v13 = vsub.f32 0.0, %v604_v5 }
  0xfc   :  { %v677_v14 = vadd.f32 %v676_v28, %v1596_v4  ;;  %v1226_v15 = vpop.eup %1225  ;;  %1243 = vrcp.f32 %v885_v8  ;;  %v886_v16 = vadd.f32 1.0, %v1224_v11  ;;  %v835_v17 = vsub.f32 0.0, %v675_v9 }
  0xfd   :  { %v834_v18 = vsub.f32 0.0, %v606_v10  ;;  %1245 = vrcp.f32 %v887_v12  ;;  %v888_v19 = vadd.f32 1.0, %v1226_v15  ;;  %v865_v20 = vmul.f32 1.442695, %v833_v13 }
  0xfe   :  { %v836_v21 = vsub.f32 0.0, %v677_v14  ;;  %v1228_v22 = vpop.eup %1227  ;;  %1247 = vrcp.f32 %v886_v16  ;;  %v869_v23 = vmul.f32 1.442695, %v835_v17 }
  0xff   :  { %v867_v24 = vmul.f32 1.442695, %v834_v18  ;;  %v1230_v25 = vpop.eup %1229  ;;  %v921_v26 = vmax.f32 %v1228_v22, 0.0  ;;  %1249 = vrcp.f32 %v888_v19 }
 0x100   :  { %v871_v27 = vmul.f32 1.442695, %v836_v21  ;;  %v1232_v29 = vpop.eup %1231  ;;  %v923_v31 = vmax.f32 %v1230_v25, 0.0  ;;  %1251 = vpow2.f32 %v865_v20  ;;  %v745_v32 = vpop.f32.mrb[8].mxu0 }
 0x101   :  { %v1234_v33 = vpop.eup %1233  ;;  %v941_v34 = vmin.f32 %v921_v26, 1.0  ;;  %v922_v35 = vmax.f32 %v1232_v29, 0.0  ;;  %1253 = vpow2.f32 %v869_v23  ;;  %v746_v36 = vadd.f32 %v745_v32, %v1596_v4  ;;  %v816_v37 = vpop.f32.mrb[8].mxu1 }
 0x102   :  { %v747_v38 = vpop.f32.mrb[9].mxu0  ;;  %v1236_v39 = vpop.eup %1235  ;;  %v943_v40 = vmin.f32 %v923_v31, 1.0  ;;  %v924_v41 = vmax.f32 %v1234_v33, 0.0  ;;  %1255 = vpow2.f32 %v867_v24  ;;  %v817_v42 = vadd.f32 %v816_v37, %v1596_v4 }
 0x103   :  { %v818_v43 = vpop.f32.mrb[9].mxu1  ;;  %v1238_v0 = vpop.eup %1237  ;;  %v942_v44 = vmin.f32 %v922_v35, 1.0  ;;  %v889_v45 = vadd.f32 1.0, %v1236_v39  ;;  %1257 = vpow2.f32 %v871_v27  ;;  %v837_v46 = vsub.f32 0.0, %v746_v36 }
 0x104   :  { %v1240_v47 = vpop.eup %1239  ;;  %v944_v48 = vmin.f32 %v924_v41, 1.0  ;;  %v891_v49 = vadd.f32 1.0, %v1238_v0  ;;  %v839_v50 = vsub.f32 0.0, %v817_v42  ;;  %v748_v51 = vadd.f32 %v747_v38, %v1596_v4 }
 0x105   :  { %v1242_v52 = vpop.eup %1241  ;;  %v981_v53 = vcombine.low %v941_v34, %v942_v44  ;;  %1259 = vrcp.f32 %v889_v45  ;;  %v890_v54 = vadd.f32 1.0, %v1240_v47  ;;  %v873_v55 = vmul.f32 1.442695, %v837_v46 }
 0x106   :  { %v1244_v56 = vpop.eup %1243  ;;  %v982_v57 = vcombine.low %v943_v40, %v944_v48  ;;  %1261 = vrcp.f32 %v891_v49  ;;  %v892_v58 = vadd.f32 1.0, %v1242_v52  ;;  %v877_v59 = vmul.f32 1.442695, %v839_v50 }
 0x107   :  { %v1246_v60 = vpop.eup %1245  ;;  %v991_v61 = vrot.slane %v981_v53, %v1615_v30  ;;  %v925_v62 = vmax.f32 %v1244_v56, 0.0  ;;  %1263 = vrcp.f32 %v890_v54  ;;  %v838_v1 = vsub.f32 0.0, %v748_v51 }
 0x108   :  { %v1248_v2 = vpop.eup %1247  ;;  %v998_v5 = vrot.slane %v982_v57, %v1615_v30  ;;  %v927_v3 = vmax.f32 %v1246_v60, 0.0  ;;  %1265 = vrcp.f32 %v892_v58  ;;  %v819_v6 = vadd.f32 %v818_v43, %v1596_v4 }
 0x109   :  { %v1250_v7 = vpop.eup %1249  ;;  %v945_v8 = vmin.f32 %v925_v62, 1.0  ;;  %v926_v9 = vmax.f32 %v1248_v2, 0.0  ;;  %1267 = vpow2.f32 %v873_v55  ;;  %v875_v10 = vmul.f32 1.442695, %v838_v1 }
 0x10a   :  { %v1252_v28 = vpop.eup %1251  ;;  %v1013_v11 = vcombine.low %v991_v61, %v998_v5  ;;  %v947_v12 = vmin.f32 %v927_v3, 1.0  ;;  %v928_v13 = vmax.f32 %v1250_v7, 0.0  ;;  %1269 = vpow2.f32 %v877_v59 }
 0x10b   :  { %v1254_v14 = vpop.eup %1253  ;;  %v946_v15 = vmin.f32 %v926_v9, 1.0  ;;  %v893_v16 = vadd.f32 1.0, %v1252_v28  ;;  %1271 = vpow2.f32 %v875_v10  ;;  %v840_v17 = vsub.f32 0.0, %v819_v6 }
 0x10c   :  { %v1256_v18 = vpop.eup %1255  ;;  %v948_v19 = vmin.f32 %v928_v13, 1.0  ;;  %v895_v20 = vadd.f32 1.0, %v1254_v14  ;;  %v1021_v43 = vrot.slane %v1013_v11, %v1615_v30 }
 0x10d   :  { %v1258_v21 = vpop.eup %1257  ;;  %v983_v4 = vcombine.low %v945_v8, %v946_v15  ;;  %1273 = vrcp.f32 %v893_v16  ;;  %v894_v22 = vadd.f32 1.0, %v1256_v18  ;;  %v879_v23 = vmul.f32 1.442695, %v840_v17 }
 0x10e   :  { %v984_v24 = vcombine.low %v947_v12, %v948_v19  ;;  %1275 = vrcp.f32 %v895_v20  ;;  %v896_v25 = vadd.f32 1.0, %v1258_v21 }
 0x10f   :  { %v1260_v26 = vpop.eup %1259  ;;  %v1005_v27 = vrot.slane %v983_v4, %v1615_v30  ;;  %1277 = vrcp.f32 %v894_v22 }
 0x110   :  { %v1262_v29 = vpop.eup %1261  ;;  %v1012_v31 = vrot.slane %v984_v24, %v1615_v30  ;;  %v929_v32 = vmax.f32 %v1260_v26, 0.0  ;;  %1279 = vrcp.f32 %v896_v25 }
 0x111   :  { %v1264_v33 = vpop.eup %1263  ;;  %v931_v34 = vmax.f32 %v1262_v29, 0.0  ;;  %1281 = vpow2.f32 %v879_v23 }
 0x112   :  { %v1266_v35 = vpop.eup %1265  ;;  %v1014_v36 = vcombine.low %v1005_v27, %v1012_v31  ;;  %v949_v37 = vmin.f32 %v929_v32, 1.0  ;;  %v930_v38 = vmax.f32 %v1264_v33, 0.0 }
 0x113   :  { %v1268_v39 = vpop.eup %1267  ;;  %v951_v40 = vmin.f32 %v931_v34, 1.0  ;;  %v932_v41 = vmax.f32 %v1266_v35, 0.0 }
 0x114   :  { %v1270_v42 = vpop.eup %1269  ;;  %v1028_v0 = vrot.slane %v1014_v36, %v1615_v30  ;;  %v950_v44 = vmin.f32 %v930_v38, 1.0  ;;  %v897_v45 = vadd.f32 1.0, %v1268_v39 }
 0x115   :  { %v1272_v46 = vpop.eup %1271  ;;  %v952_v47 = vmin.f32 %v932_v41, 1.0  ;;  %v899_v48 = vadd.f32 1.0, %v1270_v42 }
 0x116   :  { %v1029_v49 = vcombine.low %v1021_v43, %v1028_v0  ;;  %v1030_v50 = vcombine.low %v949_v37, %v950_v44  ;;  %1283 = vrcp.f32 %v897_v45  ;;  %v898_v51 = vadd.f32 1.0, %v1272_v46 }
 0x117   :  { %v1274_v52 = vpop.eup %1273  ;;  %v1031_v53 = vcombine.low %v951_v40, %v952_v47  ;;  %1285 = vrcp.f32 %v899_v48 }
 0x118   :  { %v1276_v54 = vpop.eup %1275  ;;  %1106 = vst [vmem:[%s1649_s3] sm:$0xff] %v1029_v49  ;;  %v1040_v55 = vrot.slane %v1030_v50, %v1615_v30  ;;  %v933_v56 = vmax.f32 %v1274_v52, 0.0  ;;  %1287 = vrcp.f32 %v898_v51 }
 0x119   :  { %v1278_v57 = vpop.eup %1277  ;;  %v1047_v58 = vrot.slane %v1031_v53, %v1615_v30  ;;  %v935_v59 = vmax.f32 %v1276_v54, 0.0 }
 0x11a   :  { %v1280_v60 = vpop.eup %1279  ;;  %v953_v61 = vmin.f32 %v933_v56, 1.0  ;;  %v934_v62 = vmax.f32 %v1278_v57, 0.0 }
 0x11b   :  { %v1282_v1 = vpop.eup %1281  ;;  %v1062_v2 = vcombine.low %v1040_v55, %v1047_v58  ;;  %v955_v5 = vmin.f32 %v935_v59, 1.0  ;;  %v936_v3 = vmax.f32 %v1280_v60, 0.0 }
 0x11c   :  { %v954_v6 = vmin.f32 %v934_v62, 1.0  ;;  %v900_v7 = vadd.f32 1.0, %v1282_v1 }
 0x11d   :  { %v956_v8 = vmin.f32 %v936_v3, 1.0  ;;  %v1070_v19 = vrot.slane %v1062_v2, %v1615_v30 }
 0x11e   :  { %v1032_v9 = vcombine.low %v953_v61, %v954_v6  ;;  %1289 = vrcp.f32 %v900_v7 }
 0x11f   :  { %v1033_v10 = vcombine.low %v955_v5, %v956_v8 }
 0x120   :  { %v1284_v28 = vpop.eup %1283  ;;  %v1054_v11 = vrot.slane %v1032_v9, %v1615_v30 }
 0x121   :  { %v1286_v12 = vpop.eup %1285  ;;  %v1061_v13 = vrot.slane %v1033_v10, %v1615_v30  ;;  %v937_v14 = vmax.f32 %v1284_v28, 0.0 }
 0x122   :  { %v1288_v15 = vpop.eup %1287  ;;  %v939_v21 = vmax.f32 %v1286_v12, 0.0 }
 0x123   :  { %v1063_v16 = vcombine.low %v1054_v11, %v1061_v13  ;;  %v957_v17 = vmin.f32 %v937_v14, 1.0  ;;  %v938_v18 = vmax.f32 %v1288_v15, 0.0 }
 0x124   :  { %v959_v25 = vmin.f32 %v939_v21, 1.0 }
 0x125   :  { %v1077_v20 = vrot.slane %v1063_v16, %v1615_v30  ;;  %v958_v4 = vmin.f32 %v938_v18, 1.0 }
 0x127   :  { %v1078_v22 = vcombine.low %v1070_v19, %v1077_v20  ;;  %v1079_v23 = vcombine.low %v957_v17, %v958_v4 }
 0x128   :  { %v1290_v24 = vpop.eup %1289 }
 0x129   :  { %1107 = vst [vmem:[%s1649_s3 + $0x8] sm:$0xff] %v1078_v22  ;;  %v940_v26 = vmax.f32 %v1290_v24, 0.0  ;;  %v1087_v29 = vrot.slane %v1079_v23, %v1615_v30 }
 0x12b   :  { %v960_v27 = vmin.f32 %v940_v26, 1.0 }
 0x12d   :  { %v1080_v31 = vcombine.low %v959_v25, %v960_v27 }
 0x12f   :  { %v1094_v32 = vrot.slane %v1080_v31, %v1615_v30 }
 0x131   :  { %v1095_v33 = vcombine.low %v1087_v29, %v1094_v32 }
 0x133   :  { %v1102_v34 = vrot.slane %v1095_v33, %v1615_v30 }
 0x135   :  { %1112 = vst.msk [vmem:[%s1649_s3 + $0x10] sm:$0xf] %vm1110_vm1, %v1102_v34 }

</bundles_post_ra>
